<compile_context>
chip_gen: v7x
topology: tpu7x:2x2x1
jax: 0.10.0
libtpu: 0.0.40
codegen_flags: <defaults>
</compile_context>

<pallas_src>
import jax
import jax.numpy as jnp
from jax import lax
from jax.experimental import pallas as pl
from jax.experimental.pallas import tpu as pltpu

N_EMBD = 384
N_HEAD = 6
HEAD_SIZE = N_EMBD // N_HEAD   # 64
BLOCK_SIZE = 256               # max context (we only need T <= BLOCK_SIZE)
LN_EPS = 1e-5


def _layer_norm(h, gamma, beta):
    mu = jnp.mean(h, axis=-1, keepdims=True)
    var = jnp.mean((h - mu) ** 2, axis=-1, keepdims=True)
    return (h - mu) * lax.rsqrt(var + LN_EPS) * gamma + beta


def _const_index_map(ndim):
    # Grid-invariant block (weights / biases): always block (0, 0, ...).
    return lambda i: (0,) * ndim


def _make_block_kernel(T, b_blk):
    """Kernel over one tile of M = b_blk * T flattened (batch*seq) rows."""

    def kernel(x_ref,
               ln1g_ref, ln1b_ref,
               wq_ref, wk_ref, wv_ref, wp_ref, bp_ref,
               ln2g_ref, ln2b_ref,
               w1_ref, b1_ref, w2_ref, b2_ref,
               o_ref):
        x = x_ref[...]                                        # (M, C) f32

        # ---------------- x + sa(ln1(x)) --------------------------------
        h1 = _layer_norm(x, ln1g_ref[0], ln1b_ref[0])         # f32
        h1b = h1.astype(jnp.bfloat16)

        def head_proj(w_ref):
            # w_ref: (H, C, D) bf16 (pre-split per head on the host).
            # Returns head-major activations (H, M, D) in f32 (full K=C=384
            # contraction per head, no lane-offset slicing of activations).
            return jnp.stack(
                [jnp.dot(h1b, w_ref[h], preferred_element_type=jnp.float32)
                 for h in range(N_HEAD)], axis=0)

        # NOTE: the PyTorch Head scales by C**-0.5 where C = n_embd (=384),
        # not head_size — we reproduce that exactly.
        scale = float(N_EMBD) ** (-0.5)
        q_heads = (head_proj(wq_ref) * scale).astype(jnp.bfloat16)  # (H,M,D)
        k_heads = head_proj(wk_ref).astype(jnp.bfloat16)            # (H,M,D)
        v_heads = head_proj(wv_ref).astype(jnp.bfloat16)            # (H,M,D)
        wp_h = wp_ref[...]                                          # (H,D,C) bf16

        # Additive causal mask (T, T), shared by every head / batch row.
        row = lax.broadcasted_iota(jnp.int32, (T, T), 0)
        col = lax.broadcasted_iota(jnp.int32, (T, T), 1)
        mask_add = jnp.where(col <= row, jnp.float32(0.0),
                             jnp.float32(-1e9))

        sa_rows = []
        for b in range(b_blk):                    # small static loop (<=8)
            r = slice(b * T, (b + 1) * T)         # static sublane-dir slice
            qh = q_heads[:, r, :]                 # (H, T, D) bf16
            kh = k_heads[:, r, :]
            vh = v_heads[:, r, :]

            # scores: head-batched matmul, f32 accumulation
            s = jnp.einsum('htd,hsd->hts', qh, kh,
                           preferred_element_type=jnp.float32)   # (H,T,T)
            s = s + mask_add                                     # additive mask

            # manual softmax in f32; divide via EUP approx reciprocal
            m = jnp.max(s, axis=-1, keepdims=True)
            p = jnp.exp(s - m)
            denom = jnp.sum(p, axis=-1, keepdims=True)
            p = p * pl.reciprocal(denom, approx=True)

            attn = jnp.einsum('hts,hsd->htd', p.astype(jnp.bfloat16), vh,
                              preferred_element_type=jnp.float32)  # (H,T,D)

            # Output projection folded per head and accumulated over the
            # leading head axis -> no concat / cross-lane relayout.
            proj = jnp.einsum('htd,hdc->htc', attn.astype(jnp.bfloat16), wp_h,
                              preferred_element_type=jnp.float32)  # (H,T,C)
            sa_rows.append(jnp.sum(proj, axis=0))                  # (T, C) f32

        sa = jnp.concatenate(sa_rows, axis=0) if b_blk > 1 else sa_rows[0]
        x1 = x + sa + bp_ref[0]                                    # f32 residual

        # ---------------- x + ffwd(ln2(x)) -------------------------------
        h2 = _layer_norm(x1, ln2g_ref[0], ln2b_ref[0])             # f32
        hid = jnp.dot(h2.astype(jnp.bfloat16), w1_ref[...],
                      preferred_element_type=jnp.float32) + b1_ref[0]
        hid = jnp.maximum(hid, 0.0)                                # ReLU, f32
        ff = jnp.dot(hid.astype(jnp.bfloat16), w2_ref[...],
                     preferred_element_type=jnp.float32) + b2_ref[0]

        o_ref[...] = (x1 + ff).astype(o_ref.dtype)

    return kernel


def _prepare_kernel_params(params):
    """Host-side prep: per-head split of QKV/proj weights + bf16 cast."""
    (ln1g, ln1b, wq, wk, wv, wp, bp, ln2g, ln2b, w1, b1, w2, b2) = params
    C, H, D = N_EMBD, N_HEAD, HEAD_SIZE
    bf = jnp.bfloat16
    # head h's query/key/value weight = columns [h*D, (h+1)*D) of wq/wk/wv
    wq_h = wq.reshape(C, H, D).transpose(1, 0, 2).astype(bf)   # (H, C, D)
    wk_h = wk.reshape(C, H, D).transpose(1, 0, 2).astype(bf)   # (H, C, D)
    wv_h = wv.reshape(C, H, D).transpose(1, 0, 2).astype(bf)   # (H, C, D)
    # head h's slice of the output projection = rows [h*D, (h+1)*D) of wp
    wp_h = wp.reshape(H, D, C).astype(bf)                      # (H, D, C)
    return [ln1g, ln1b, wq_h, wk_h, wv_h, wp_h, bp, ln2g, ln2b,
            w1.astype(bf), b1, w2.astype(bf), b2]


def transformer_block(x, params, *, b_blk=None):
    """x: (B, T, C) float32.  params: the 13 f32 arrays from init_params."""
    B, T, C = x.shape
    assert C == N_EMBD and T <= BLOCK_SIZE
    if b_blk is None:
        b_blk = 2 if (B % 2 == 0 and B >= 2) else 1
    if B % b_blk != 0:
        b_blk = 1
    M = b_blk * T

    kparams = _prepare_kernel_params(params)
    kernel = _make_block_kernel(T, b_blk)

    x2d = x.reshape(B * T, C)        # flatten batch*seq on the host (free)
    x_spec = pl.BlockSpec((M, C), lambda i: (i, 0))
    w_specs = [pl.BlockSpec(p.shape, _const_index_map(p.ndim))
               for p in kparams]

    out2d = pl.pallas_call(
        kernel,
        out_shape=jax.ShapeDtypeStruct((B * T, C), x.dtype),
        grid=(B // b_blk,),
        in_specs=[x_spec] + w_specs,
        out_specs=pl.BlockSpec((M, C), lambda i: (i, 0)),
        compiler_params=pltpu.CompilerParams(
            dimension_semantics=("parallel",),
            vmem_limit_bytes=32 * 1024 * 1024),
    )(x2d, *kparams)
    return out2d.reshape(B, T, C)


# ---------------- pure-JAX reference (for correctness check) ----------------
def reference_block(x, params):
    (ln1g, ln1b, wq, wk, wv, wp, bp, ln2g, ln2b, w1, b1, w2, b2) = params
    B, T, C = x.shape
    h1 = _layer_norm(x, ln1g[0], ln1b[0])
    q = h1 @ wq
    k = h1 @ wk
    v = h1 @ wv
    scale = float(C) ** (-0.5)
    mask = jnp.tril(jnp.ones((T, T), dtype=bool))
    outs = []
    for h in range(N_HEAD):
        sl = slice(h * HEAD_SIZE, (h + 1) * HEAD_SIZE)
        wei = jnp.einsum("btd,bsd->bts", q[..., sl], k[..., sl]) * scale
        wei = jnp.where(mask, wei, -jnp.inf)
        wei = jax.nn.softmax(wei, axis=-1)
        outs.append(jnp.einsum("bts,bsd->btd", wei, v[..., sl]))
    att = jnp.concatenate(outs, axis=-1)
    x1 = x + att @ wp + bp[0]
    h2 = _layer_norm(x1, ln2g[0], ln2b[0])
    ff = jnp.maximum(h2 @ w1 + b1[0], 0.0) @ w2 + b2[0]
    return x1 + ff


def init_params(key):
    ks = jax.random.split(key, 8)
    s = 0.02
    C, Hd = N_EMBD, 4 * N_EMBD
    ln1g = jnp.ones((1, C), jnp.float32)
    ln1b = jnp.zeros((1, C), jnp.float32)
    # Linear(n_embd, head_size, bias=False) per head; stacked so that the
    # h-th head occupies columns [h*HEAD_SIZE, (h+1)*HEAD_SIZE).
    wq = s * jax.random.normal(ks[0], (C, C), jnp.float32)
    wk = s * jax.random.normal(ks[1], (C, C), jnp.float32)
    wv = s * jax.random.normal(ks[2], (C, C), jnp.float32)
    wp = s * jax.random.normal(ks[3], (C, C), jnp.float32)
    bp = s * jax.random.normal(ks[4], (1, C), jnp.float32)
    ln2g = jnp.ones((1, C), jnp.float32)
    ln2b = jnp.zeros((1, C), jnp.float32)
    w1 = s * jax.random.normal(ks[5], (C, Hd), jnp.float32)
    b1 = s * jax.random.normal(ks[6], (1, Hd), jnp.float32)
    w2 = s * jax.random.normal(ks[7], (Hd, C), jnp.float32)
    b2 = jnp.zeros((1, C), jnp.float32)
    return [ln1g, ln1b, wq, wk, wv, wp, bp, ln2g, ln2b, w1, b1, w2, b2]


if __name__ == "__main__":
    key = jax.random.PRNGKey(0)
    k_x, k_p = jax.random.split(key)

    B, T = 4, 32                       # T <= block_size (256)
    x = jax.random.normal(k_x, (B, T, N_EMBD), jnp.float32)
    params = init_params(k_p)

    out = transformer_block(x, params, b_blk=2)   # grid=(2,): both v7x cores busy
    out = jax.block_until_ready(out)

    ref = reference_block(x, params)              # f32 reference
    assert out.shape == (B, T, N_EMBD)
    err = float(jnp.max(jnp.abs(out - ref)))
    # bf16 MXU operands + approx-reciprocal softmax => looser tolerance than f32
    assert err < 5e-2, f"max abs err {err}"

    print("KERNEL_OK")
</pallas_src>

<mosaic_0001>
module attributes {stable_mosaic.version = 11 : i64} {
  func.func @kernel(%arg0: i32, %arg1: memref<64x384xf32, #tpu.memory_space<vmem>>, %arg2: memref<1x384xf32, #tpu.memory_space<vmem>>, %arg3: memref<1x384xf32, #tpu.memory_space<vmem>>, %arg4: memref<6x384x64xbf16, #tpu.memory_space<vmem>>, %arg5: memref<6x384x64xbf16, #tpu.memory_space<vmem>>, %arg6: memref<6x384x64xbf16, #tpu.memory_space<vmem>>, %arg7: memref<6x64x384xbf16, #tpu.memory_space<vmem>>, %arg8: memref<1x384xf32, #tpu.memory_space<vmem>>, %arg9: memref<1x384xf32, #tpu.memory_space<vmem>>, %arg10: memref<1x384xf32, #tpu.memory_space<vmem>>, %arg11: memref<384x1536xbf16, #tpu.memory_space<vmem>>, %arg12: memref<1x1536xf32, #tpu.memory_space<vmem>>, %arg13: memref<1536x384xbf16, #tpu.memory_space<vmem>>, %arg14: memref<1x384xf32, #tpu.memory_space<vmem>>, %arg15: memref<64x384xf32, #tpu.memory_space<vmem>>) attributes {dimension_semantics = [#tpu.dimension_semantics<parallel>], iteration_bounds = array<i64: 2>, scalar_prefetch = 0 : i64, scratch_operands = 0 : i64, tpu.core_type = #tpu.core_type<tc>, window_params = [{transform_indices = @transform_0, window_bounds = array<i64: 64, 384>}, {pipeline_mode = #tpu.pipeline_mode<synchronous>, transform_indices = @transform_1, window_bounds = array<i64: 1, 384>}, {pipeline_mode = #tpu.pipeline_mode<synchronous>, transform_indices = @transform_2, window_bounds = array<i64: 1, 384>}, {pipeline_mode = #tpu.pipeline_mode<synchronous>, transform_indices = @transform_3, window_bounds = array<i64: 6, 384, 64>}, {pipeline_mode = #tpu.pipeline_mode<synchronous>, transform_indices = @transform_4, window_bounds = array<i64: 6, 384, 64>}, {pipeline_mode = #tpu.pipeline_mode<synchronous>, transform_indices = @transform_5, window_bounds = array<i64: 6, 384, 64>}, {pipeline_mode = #tpu.pipeline_mode<synchronous>, transform_indices = @transform_6, window_bounds = array<i64: 6, 64, 384>}, {pipeline_mode = #tpu.pipeline_mode<synchronous>, transform_indices = @transform_7, window_bounds = array<i64: 1, 384>}, {pipeline_mode = #tpu.pipeline_mode<synchronous>, transform_indices = @transform_8, window_bounds = array<i64: 1, 384>}, {pipeline_mode = #tpu.pipeline_mode<synchronous>, transform_indices = @transform_9, window_bounds = array<i64: 1, 384>}, {pipeline_mode = #tpu.pipeline_mode<synchronous>, transform_indices = @transform_10, window_bounds = array<i64: 384, 1536>}, {pipeline_mode = #tpu.pipeline_mode<synchronous>, transform_indices = @transform_11, window_bounds = array<i64: 1, 1536>}, {pipeline_mode = #tpu.pipeline_mode<synchronous>, transform_indices = @transform_12, window_bounds = array<i64: 1536, 384>}, {pipeline_mode = #tpu.pipeline_mode<synchronous>, transform_indices = @transform_13, window_bounds = array<i64: 1, 384>}, {transform_indices = @transform_14, window_bounds = array<i64: 64, 384>}]} {
    %c0 = arith.constant 0 : index
    %c0_0 = arith.constant 0 : index
    %0 = vector.load %arg1[%c0, %c0_0] : memref<64x384xf32, #tpu.memory_space<vmem>>, vector<64x384xf32>
    %c0_1 = arith.constant 0 : index
    %c0_2 = arith.constant 0 : index
    %1 = vector.load %arg2[%c0_1, %c0_2] : memref<1x384xf32, #tpu.memory_space<vmem>>, vector<1x384xf32>
    %2 = vector.shape_cast %1 : vector<1x384xf32> to vector<384xf32>
    %c0_3 = arith.constant 0 : index
    %c0_4 = arith.constant 0 : index
    %3 = vector.load %arg3[%c0_3, %c0_4] : memref<1x384xf32, #tpu.memory_space<vmem>>, vector<1x384xf32>
    %4 = vector.shape_cast %3 : vector<1x384xf32> to vector<384xf32>
    %cst = arith.constant dense<0.000000e+00> : vector<64xf32>
    %5 = vector.multi_reduction <add>, %0, %cst [1] : vector<64x384xf32> to vector<64xf32>
    %6 = vector.shape_cast %5 : vector<64xf32> to vector<64x1xf32>
    %cst_5 = arith.constant 3.840000e+02 : f32
    %7 = vector.broadcast %cst_5 : f32 to vector<64x1xf32>
    %8 = arith.divf %6, %7 : vector<64x1xf32>
    %9 = vector.broadcast %8 : vector<64x1xf32> to vector<64x384xf32>
    %10 = arith.subf %0, %9 : vector<64x384xf32>
    %11 = arith.mulf %10, %10 : vector<64x384xf32>
    %cst_6 = arith.constant dense<0.000000e+00> : vector<64xf32>
    %12 = vector.multi_reduction <add>, %11, %cst_6 [1] : vector<64x384xf32> to vector<64xf32>
    %13 = vector.shape_cast %12 : vector<64xf32> to vector<64x1xf32>
    %cst_7 = arith.constant 3.840000e+02 : f32
    %14 = vector.broadcast %cst_7 : f32 to vector<64x1xf32>
    %15 = arith.divf %13, %14 : vector<64x1xf32>
    %16 = vector.broadcast %8 : vector<64x1xf32> to vector<64x384xf32>
    %17 = arith.subf %0, %16 : vector<64x384xf32>
    %cst_8 = arith.constant 9.99999974E-6 : f32
    %18 = vector.broadcast %cst_8 : f32 to vector<64x1xf32>
    %19 = arith.addf %15, %18 : vector<64x1xf32>
    %20 = math.rsqrt %19 : vector<64x1xf32>
    %21 = vector.broadcast %20 : vector<64x1xf32> to vector<64x384xf32>
    %22 = arith.mulf %17, %21 : vector<64x384xf32>
    %23 = vector.shape_cast %2 : vector<384xf32> to vector<1x384xf32>
    %24 = vector.broadcast %23 : vector<1x384xf32> to vector<64x384xf32>
    %25 = arith.mulf %22, %24 : vector<64x384xf32>
    %26 = vector.shape_cast %4 : vector<384xf32> to vector<1x384xf32>
    %27 = vector.broadcast %26 : vector<1x384xf32> to vector<64x384xf32>
    %28 = arith.addf %25, %27 : vector<64x384xf32>
    %29 = arith.truncf %28 : vector<64x384xf32> to vector<64x384xbf16>
    %c0_9 = arith.constant 0 : index
    %c0_10 = arith.constant 0 : index
    %c0_11 = arith.constant 0 : index
    %30 = vector.load %arg4[%c0_9, %c0_10, %c0_11] : memref<6x384x64xbf16, #tpu.memory_space<vmem>>, vector<1x384x64xbf16>
    %31 = vector.shape_cast %30 : vector<1x384x64xbf16> to vector<384x64xbf16>
    %cst_12 = arith.constant dense<0.000000e+00> : vector<64x64xf32>
    %32 = tpu.matmul %29, %31, %cst_12 {dimension_numbers = #tpu.dot_dimension_numbers<[1], [0], [0], [1], [0, 0, 1, 1], [], []>} : vector<64x384xbf16>, vector<384x64xbf16>, vector<64x64xf32> -> vector<64x64xf32>
    %c1 = arith.constant 1 : index
    %c0_13 = arith.constant 0 : index
    %c0_14 = arith.constant 0 : index
    %33 = vector.load %arg4[%c1, %c0_13, %c0_14] : memref<6x384x64xbf16, #tpu.memory_space<vmem>>, vector<1x384x64xbf16>
    %34 = vector.shape_cast %33 : vector<1x384x64xbf16> to vector<384x64xbf16>
    %cst_15 = arith.constant dense<0.000000e+00> : vector<64x64xf32>
    %35 = tpu.matmul %29, %34, %cst_15 {dimension_numbers = #tpu.dot_dimension_numbers<[1], [0], [0], [1], [0, 0, 1, 1], [], []>} : vector<64x384xbf16>, vector<384x64xbf16>, vector<64x64xf32> -> vector<64x64xf32>
    %c2 = arith.constant 2 : index
    %c0_16 = arith.constant 0 : index
    %c0_17 = arith.constant 0 : index
    %36 = vector.load %arg4[%c2, %c0_16, %c0_17] : memref<6x384x64xbf16, #tpu.memory_space<vmem>>, vector<1x384x64xbf16>
    %37 = vector.shape_cast %36 : vector<1x384x64xbf16> to vector<384x64xbf16>
    %cst_18 = arith.constant dense<0.000000e+00> : vector<64x64xf32>
    %38 = tpu.matmul %29, %37, %cst_18 {dimension_numbers = #tpu.dot_dimension_numbers<[1], [0], [0], [1], [0, 0, 1, 1], [], []>} : vector<64x384xbf16>, vector<384x64xbf16>, vector<64x64xf32> -> vector<64x64xf32>
    %c3 = arith.constant 3 : index
    %c0_19 = arith.constant 0 : index
    %c0_20 = arith.constant 0 : index
    %39 = vector.load %arg4[%c3, %c0_19, %c0_20] : memref<6x384x64xbf16, #tpu.memory_space<vmem>>, vector<1x384x64xbf16>
    %40 = vector.shape_cast %39 : vector<1x384x64xbf16> to vector<384x64xbf16>
    %cst_21 = arith.constant dense<0.000000e+00> : vector<64x64xf32>
    %41 = tpu.matmul %29, %40, %cst_21 {dimension_numbers = #tpu.dot_dimension_numbers<[1], [0], [0], [1], [0, 0, 1, 1], [], []>} : vector<64x384xbf16>, vector<384x64xbf16>, vector<64x64xf32> -> vector<64x64xf32>
    %c4 = arith.constant 4 : index
    %c0_22 = arith.constant 0 : index
    %c0_23 = arith.constant 0 : index
    %42 = vector.load %arg4[%c4, %c0_22, %c0_23] : memref<6x384x64xbf16, #tpu.memory_space<vmem>>, vector<1x384x64xbf16>
    %43 = vector.shape_cast %42 : vector<1x384x64xbf16> to vector<384x64xbf16>
    %cst_24 = arith.constant dense<0.000000e+00> : vector<64x64xf32>
    %44 = tpu.matmul %29, %43, %cst_24 {dimension_numbers = #tpu.dot_dimension_numbers<[1], [0], [0], [1], [0, 0, 1, 1], [], []>} : vector<64x384xbf16>, vector<384x64xbf16>, vector<64x64xf32> -> vector<64x64xf32>
    %c5 = arith.constant 5 : index
    %c0_25 = arith.constant 0 : index
    %c0_26 = arith.constant 0 : index
    %45 = vector.load %arg4[%c5, %c0_25, %c0_26] : memref<6x384x64xbf16, #tpu.memory_space<vmem>>, vector<1x384x64xbf16>
    %46 = vector.shape_cast %45 : vector<1x384x64xbf16> to vector<384x64xbf16>
    %cst_27 = arith.constant dense<0.000000e+00> : vector<64x64xf32>
    %47 = tpu.matmul %29, %46, %cst_27 {dimension_numbers = #tpu.dot_dimension_numbers<[1], [0], [0], [1], [0, 0, 1, 1], [], []>} : vector<64x384xbf16>, vector<384x64xbf16>, vector<64x64xf32> -> vector<64x64xf32>
    %48 = vector.shape_cast %32 : vector<64x64xf32> to vector<1x64x64xf32>
    %49 = vector.shape_cast %35 : vector<64x64xf32> to vector<1x64x64xf32>
    %50 = vector.shape_cast %38 : vector<64x64xf32> to vector<1x64x64xf32>
    %51 = vector.shape_cast %41 : vector<64x64xf32> to vector<1x64x64xf32>
    %52 = vector.shape_cast %44 : vector<64x64xf32> to vector<1x64x64xf32>
    %53 = vector.shape_cast %47 : vector<64x64xf32> to vector<1x64x64xf32>
    %54 = tpu.concatenate %48, %49, %50, %51, %52, %53 in 0 : vector<1x64x64xf32>, vector<1x64x64xf32>, vector<1x64x64xf32>, vector<1x64x64xf32>, vector<1x64x64xf32>, vector<1x64x64xf32> -> vector<6x64x64xf32>
    %cst_28 = arith.constant 0.0510310382 : f32
    %55 = vector.broadcast %cst_28 : f32 to vector<6x64x64xf32>
    %56 = arith.mulf %54, %55 : vector<6x64x64xf32>
    %57 = arith.truncf %56 : vector<6x64x64xf32> to vector<6x64x64xbf16>
    %c0_29 = arith.constant 0 : index
    %c0_30 = arith.constant 0 : index
    %c0_31 = arith.constant 0 : index
    %58 = vector.load %arg5[%c0_29, %c0_30, %c0_31] : memref<6x384x64xbf16, #tpu.memory_space<vmem>>, vector<1x384x64xbf16>
    %59 = vector.shape_cast %58 : vector<1x384x64xbf16> to vector<384x64xbf16>
    %cst_32 = arith.constant dense<0.000000e+00> : vector<64x64xf32>
    %60 = tpu.matmul %29, %59, %cst_32 {dimension_numbers = #tpu.dot_dimension_numbers<[1], [0], [0], [1], [0, 0, 1, 1], [], []>} : vector<64x384xbf16>, vector<384x64xbf16>, vector<64x64xf32> -> vector<64x64xf32>
    %c1_33 = arith.constant 1 : index
    %c0_34 = arith.constant 0 : index
    %c0_35 = arith.constant 0 : index
    %61 = vector.load %arg5[%c1_33, %c0_34, %c0_35] : memref<6x384x64xbf16, #tpu.memory_space<vmem>>, vector<1x384x64xbf16>
    %62 = vector.shape_cast %61 : vector<1x384x64xbf16> to vector<384x64xbf16>
    %cst_36 = arith.constant dense<0.000000e+00> : vector<64x64xf32>
    %63 = tpu.matmul %29, %62, %cst_36 {dimension_numbers = #tpu.dot_dimension_numbers<[1], [0], [0], [1], [0, 0, 1, 1], [], []>} : vector<64x384xbf16>, vector<384x64xbf16>, vector<64x64xf32> -> vector<64x64xf32>
    %c2_37 = arith.constant 2 : index
    %c0_38 = arith.constant 0 : index
    %c0_39 = arith.constant 0 : index
    %64 = vector.load %arg5[%c2_37, %c0_38, %c0_39] : memref<6x384x64xbf16, #tpu.memory_space<vmem>>, vector<1x384x64xbf16>
    %65 = vector.shape_cast %64 : vector<1x384x64xbf16> to vector<384x64xbf16>
    %cst_40 = arith.constant dense<0.000000e+00> : vector<64x64xf32>
    %66 = tpu.matmul %29, %65, %cst_40 {dimension_numbers = #tpu.dot_dimension_numbers<[1], [0], [0], [1], [0, 0, 1, 1], [], []>} : vector<64x384xbf16>, vector<384x64xbf16>, vector<64x64xf32> -> vector<64x64xf32>
    %c3_41 = arith.constant 3 : index
    %c0_42 = arith.constant 0 : index
    %c0_43 = arith.constant 0 : index
    %67 = vector.load %arg5[%c3_41, %c0_42, %c0_43] : memref<6x384x64xbf16, #tpu.memory_space<vmem>>, vector<1x384x64xbf16>
    %68 = vector.shape_cast %67 : vector<1x384x64xbf16> to vector<384x64xbf16>
    %cst_44 = arith.constant dense<0.000000e+00> : vector<64x64xf32>
    %69 = tpu.matmul %29, %68, %cst_44 {dimension_numbers = #tpu.dot_dimension_numbers<[1], [0], [0], [1], [0, 0, 1, 1], [], []>} : vector<64x384xbf16>, vector<384x64xbf16>, vector<64x64xf32> -> vector<64x64xf32>
    %c4_45 = arith.constant 4 : index
    %c0_46 = arith.constant 0 : index
    %c0_47 = arith.constant 0 : index
    %70 = vector.load %arg5[%c4_45, %c0_46, %c0_47] : memref<6x384x64xbf16, #tpu.memory_space<vmem>>, vector<1x384x64xbf16>
    %71 = vector.shape_cast %70 : vector<1x384x64xbf16> to vector<384x64xbf16>
    %cst_48 = arith.constant dense<0.000000e+00> : vector<64x64xf32>
    %72 = tpu.matmul %29, %71, %cst_48 {dimension_numbers = #tpu.dot_dimension_numbers<[1], [0], [0], [1], [0, 0, 1, 1], [], []>} : vector<64x384xbf16>, vector<384x64xbf16>, vector<64x64xf32> -> vector<64x64xf32>
    %c5_49 = arith.constant 5 : index
    %c0_50 = arith.constant 0 : index
    %c0_51 = arith.constant 0 : index
    %73 = vector.load %arg5[%c5_49, %c0_50, %c0_51] : memref<6x384x64xbf16, #tpu.memory_space<vmem>>, vector<1x384x64xbf16>
    %74 = vector.shape_cast %73 : vector<1x384x64xbf16> to vector<384x64xbf16>
    %cst_52 = arith.constant dense<0.000000e+00> : vector<64x64xf32>
    %75 = tpu.matmul %29, %74, %cst_52 {dimension_numbers = #tpu.dot_dimension_numbers<[1], [0], [0], [1], [0, 0, 1, 1], [], []>} : vector<64x384xbf16>, vector<384x64xbf16>, vector<64x64xf32> -> vector<64x64xf32>
    %76 = vector.shape_cast %60 : vector<64x64xf32> to vector<1x64x64xf32>
    %77 = vector.shape_cast %63 : vector<64x64xf32> to vector<1x64x64xf32>
    %78 = vector.shape_cast %66 : vector<64x64xf32> to vector<1x64x64xf32>
    %79 = vector.shape_cast %69 : vector<64x64xf32> to vector<1x64x64xf32>
    %80 = vector.shape_cast %72 : vector<64x64xf32> to vector<1x64x64xf32>
    %81 = vector.shape_cast %75 : vector<64x64xf32> to vector<1x64x64xf32>
    %82 = tpu.concatenate %76, %77, %78, %79, %80, %81 in 0 : vector<1x64x64xf32>, vector<1x64x64xf32>, vector<1x64x64xf32>, vector<1x64x64xf32>, vector<1x64x64xf32>, vector<1x64x64xf32> -> vector<6x64x64xf32>
    %83 = arith.truncf %82 : vector<6x64x64xf32> to vector<6x64x64xbf16>
    %c0_53 = arith.constant 0 : index
    %c0_54 = arith.constant 0 : index
    %c0_55 = arith.constant 0 : index
    %84 = vector.load %arg6[%c0_53, %c0_54, %c0_55] : memref<6x384x64xbf16, #tpu.memory_space<vmem>>, vector<1x384x64xbf16>
    %85 = vector.shape_cast %84 : vector<1x384x64xbf16> to vector<384x64xbf16>
    %cst_56 = arith.constant dense<0.000000e+00> : vector<64x64xf32>
    %86 = tpu.matmul %29, %85, %cst_56 {dimension_numbers = #tpu.dot_dimension_numbers<[1], [0], [0], [1], [0, 0, 1, 1], [], []>} : vector<64x384xbf16>, vector<384x64xbf16>, vector<64x64xf32> -> vector<64x64xf32>
    %c1_57 = arith.constant 1 : index
    %c0_58 = arith.constant 0 : index
    %c0_59 = arith.constant 0 : index
    %87 = vector.load %arg6[%c1_57, %c0_58, %c0_59] : memref<6x384x64xbf16, #tpu.memory_space<vmem>>, vector<1x384x64xbf16>
    %88 = vector.shape_cast %87 : vector<1x384x64xbf16> to vector<384x64xbf16>
    %cst_60 = arith.constant dense<0.000000e+00> : vector<64x64xf32>
    %89 = tpu.matmul %29, %88, %cst_60 {dimension_numbers = #tpu.dot_dimension_numbers<[1], [0], [0], [1], [0, 0, 1, 1], [], []>} : vector<64x384xbf16>, vector<384x64xbf16>, vector<64x64xf32> -> vector<64x64xf32>
    %c2_61 = arith.constant 2 : index
    %c0_62 = arith.constant 0 : index
    %c0_63 = arith.constant 0 : index
    %90 = vector.load %arg6[%c2_61, %c0_62, %c0_63] : memref<6x384x64xbf16, #tpu.memory_space<vmem>>, vector<1x384x64xbf16>
    %91 = vector.shape_cast %90 : vector<1x384x64xbf16> to vector<384x64xbf16>
    %cst_64 = arith.constant dense<0.000000e+00> : vector<64x64xf32>
    %92 = tpu.matmul %29, %91, %cst_64 {dimension_numbers = #tpu.dot_dimension_numbers<[1], [0], [0], [1], [0, 0, 1, 1], [], []>} : vector<64x384xbf16>, vector<384x64xbf16>, vector<64x64xf32> -> vector<64x64xf32>
    %c3_65 = arith.constant 3 : index
    %c0_66 = arith.constant 0 : index
    %c0_67 = arith.constant 0 : index
    %93 = vector.load %arg6[%c3_65, %c0_66, %c0_67] : memref<6x384x64xbf16, #tpu.memory_space<vmem>>, vector<1x384x64xbf16>
    %94 = vector.shape_cast %93 : vector<1x384x64xbf16> to vector<384x64xbf16>
    %cst_68 = arith.constant dense<0.000000e+00> : vector<64x64xf32>
    %95 = tpu.matmul %29, %94, %cst_68 {dimension_numbers = #tpu.dot_dimension_numbers<[1], [0], [0], [1], [0, 0, 1, 1], [], []>} : vector<64x384xbf16>, vector<384x64xbf16>, vector<64x64xf32> -> vector<64x64xf32>
    %c4_69 = arith.constant 4 : index
    %c0_70 = arith.constant 0 : index
    %c0_71 = arith.constant 0 : index
    %96 = vector.load %arg6[%c4_69, %c0_70, %c0_71] : memref<6x384x64xbf16, #tpu.memory_space<vmem>>, vector<1x384x64xbf16>
    %97 = vector.shape_cast %96 : vector<1x384x64xbf16> to vector<384x64xbf16>
    %cst_72 = arith.constant dense<0.000000e+00> : vector<64x64xf32>
    %98 = tpu.matmul %29, %97, %cst_72 {dimension_numbers = #tpu.dot_dimension_numbers<[1], [0], [0], [1], [0, 0, 1, 1], [], []>} : vector<64x384xbf16>, vector<384x64xbf16>, vector<64x64xf32> -> vector<64x64xf32>
    %c5_73 = arith.constant 5 : index
    %c0_74 = arith.constant 0 : index
    %c0_75 = arith.constant 0 : index
    %99 = vector.load %arg6[%c5_73, %c0_74, %c0_75] : memref<6x384x64xbf16, #tpu.memory_space<vmem>>, vector<1x384x64xbf16>
    %100 = vector.shape_cast %99 : vector<1x384x64xbf16> to vector<384x64xbf16>
    %cst_76 = arith.constant dense<0.000000e+00> : vector<64x64xf32>
    %101 = tpu.matmul %29, %100, %cst_76 {dimension_numbers = #tpu.dot_dimension_numbers<[1], [0], [0], [1], [0, 0, 1, 1], [], []>} : vector<64x384xbf16>, vector<384x64xbf16>, vector<64x64xf32> -> vector<64x64xf32>
    %102 = vector.shape_cast %86 : vector<64x64xf32> to vector<1x64x64xf32>
    %103 = vector.shape_cast %89 : vector<64x64xf32> to vector<1x64x64xf32>
    %104 = vector.shape_cast %92 : vector<64x64xf32> to vector<1x64x64xf32>
    %105 = vector.shape_cast %95 : vector<64x64xf32> to vector<1x64x64xf32>
    %106 = vector.shape_cast %98 : vector<64x64xf32> to vector<1x64x64xf32>
    %107 = vector.shape_cast %101 : vector<64x64xf32> to vector<1x64x64xf32>
    %108 = tpu.concatenate %102, %103, %104, %105, %106, %107 in 0 : vector<1x64x64xf32>, vector<1x64x64xf32>, vector<1x64x64xf32>, vector<1x64x64xf32>, vector<1x64x64xf32>, vector<1x64x64xf32> -> vector<6x64x64xf32>
    %109 = arith.truncf %108 : vector<6x64x64xf32> to vector<6x64x64xbf16>
    %c0_77 = arith.constant 0 : index
    %c0_78 = arith.constant 0 : index
    %c0_79 = arith.constant 0 : index
    %110 = vector.load %arg7[%c0_77, %c0_78, %c0_79] : memref<6x64x384xbf16, #tpu.memory_space<vmem>>, vector<6x64x384xbf16>
    %111 = tpu.iota {dimensions = array<i32: 0>} : vector<32x32xi32>
    %112 = tpu.iota {dimensions = array<i32: 1>} : vector<32x32xi32>
    %113 = arith.cmpi sle, %112, %111 : vector<32x32xi32>
    %cst_80 = arith.constant 0.000000e+00 : f32
    %cst_81 = arith.constant -1.000000e+09 : f32
    %114 = vector.broadcast %cst_80 : f32 to vector<32x32xf32>
    %115 = vector.broadcast %cst_81 : f32 to vector<32x32xf32>
    %116 = arith.select %113, %114, %115 : vector<32x32xi1>, vector<32x32xf32>
    %117 = vector.extract_strided_slice %57 {offsets = [0, 0, 0], sizes = [6, 32, 64], strides = [1, 1, 1]} : vector<6x64x64xbf16> to vector<6x32x64xbf16>
    %118 = vector.extract_strided_slice %83 {offsets = [0, 0, 0], sizes = [6, 32, 64], strides = [1, 1, 1]} : vector<6x64x64xbf16> to vector<6x32x64xbf16>
    %119 = vector.extract_strided_slice %109 {offsets = [0, 0, 0], sizes = [6, 32, 64], strides = [1, 1, 1]} : vector<6x64x64xbf16> to vector<6x32x64xbf16>
    "tpu.trace_start"() <{level = 10 : i32, message = "htd,hsd->hts"}> : () -> ()
    %cst_82 = arith.constant dense<0.000000e+00> : vector<6x32x32xf32>
    %120 = tpu.matmul %117, %118, %cst_82 {dimension_numbers = #tpu.dot_dimension_numbers<[2], [2], [1], [1], [0, 0, 0, 1, 1, 1], [0], [0]>} : vector<6x32x64xbf16>, vector<6x32x64xbf16>, vector<6x32x32xf32> -> vector<6x32x32xf32>
    "tpu.trace_stop"() : () -> ()
    %121 = vector.shape_cast %116 : vector<32x32xf32> to vector<1x32x32xf32>
    %122 = vector.broadcast %121 : vector<1x32x32xf32> to vector<6x32x32xf32>
    %123 = arith.addf %120, %122 : vector<6x32x32xf32>
    %cst_83 = arith.constant dense<0xFF800000> : vector<6x32xf32>
    %124 = vector.multi_reduction <maximumf>, %123, %cst_83 [2] : vector<6x32x32xf32> to vector<6x32xf32>
    %125 = vector.shape_cast %124 : vector<6x32xf32> to vector<6x32x1xf32>
    %126 = vector.broadcast %125 : vector<6x32x1xf32> to vector<6x32x32xf32>
    %127 = arith.subf %123, %126 : vector<6x32x32xf32>
    %128 = math.exp %127 : vector<6x32x32xf32>
    %cst_84 = arith.constant dense<0.000000e+00> : vector<6x32xf32>
    %129 = vector.multi_reduction <add>, %128, %cst_84 [2] : vector<6x32x32xf32> to vector<6x32xf32>
    %130 = vector.shape_cast %129 : vector<6x32xf32> to vector<6x32x1xf32>
    %131 = tpu.reciprocal %130 {approx = true} : vector<6x32x1xf32> -> vector<6x32x1xf32>
    %132 = vector.broadcast %131 : vector<6x32x1xf32> to vector<6x32x32xf32>
    %133 = arith.mulf %128, %132 : vector<6x32x32xf32>
    %134 = arith.truncf %133 : vector<6x32x32xf32> to vector<6x32x32xbf16>
    "tpu.trace_start"() <{level = 10 : i32, message = "hts,hsd->htd"}> : () -> ()
    %cst_85 = arith.constant dense<0.000000e+00> : vector<6x32x64xf32>
    %135 = tpu.matmul %134, %119, %cst_85 {dimension_numbers = #tpu.dot_dimension_numbers<[2], [1], [1], [2], [0, 0, 0, 1, 1, 2], [0], [0]>} : vector<6x32x32xbf16>, vector<6x32x64xbf16>, vector<6x32x64xf32> -> vector<6x32x64xf32>
    "tpu.trace_stop"() : () -> ()
    %136 = arith.truncf %135 : vector<6x32x64xf32> to vector<6x32x64xbf16>
    "tpu.trace_start"() <{level = 10 : i32, message = "htd,hdc->htc"}> : () -> ()
    %cst_86 = arith.constant dense<0.000000e+00> : vector<6x32x384xf32>
    %137 = tpu.matmul %136, %110, %cst_86 {dimension_numbers = #tpu.dot_dimension_numbers<[2], [1], [1], [2], [0, 0, 0, 1, 1, 2], [0], [0]>} : vector<6x32x64xbf16>, vector<6x64x384xbf16>, vector<6x32x384xf32> -> vector<6x32x384xf32>
    "tpu.trace_stop"() : () -> ()
    %cst_87 = arith.constant dense<0.000000e+00> : vector<32x384xf32>
    %138 = vector.multi_reduction <add>, %137, %cst_87 [0] : vector<6x32x384xf32> to vector<32x384xf32>
    %139 = vector.extract_strided_slice %57 {offsets = [0, 32, 0], sizes = [6, 32, 64], strides = [1, 1, 1]} : vector<6x64x64xbf16> to vector<6x32x64xbf16>
    %140 = vector.extract_strided_slice %83 {offsets = [0, 32, 0], sizes = [6, 32, 64], strides = [1, 1, 1]} : vector<6x64x64xbf16> to vector<6x32x64xbf16>
    %141 = vector.extract_strided_slice %109 {offsets = [0, 32, 0], sizes = [6, 32, 64], strides = [1, 1, 1]} : vector<6x64x64xbf16> to vector<6x32x64xbf16>
    "tpu.trace_start"() <{level = 10 : i32, message = "htd,hsd->hts"}> : () -> ()
    %cst_88 = arith.constant dense<0.000000e+00> : vector<6x32x32xf32>
    %142 = tpu.matmul %139, %140, %cst_88 {dimension_numbers = #tpu.dot_dimension_numbers<[2], [2], [1], [1], [0, 0, 0, 1, 1, 1], [0], [0]>} : vector<6x32x64xbf16>, vector<6x32x64xbf16>, vector<6x32x32xf32> -> vector<6x32x32xf32>
    "tpu.trace_stop"() : () -> ()
    %143 = vector.shape_cast %116 : vector<32x32xf32> to vector<1x32x32xf32>
    %144 = vector.broadcast %143 : vector<1x32x32xf32> to vector<6x32x32xf32>
    %145 = arith.addf %142, %144 : vector<6x32x32xf32>
    %cst_89 = arith.constant dense<0xFF800000> : vector<6x32xf32>
    %146 = vector.multi_reduction <maximumf>, %145, %cst_89 [2] : vector<6x32x32xf32> to vector<6x32xf32>
    %147 = vector.shape_cast %146 : vector<6x32xf32> to vector<6x32x1xf32>
    %148 = vector.broadcast %147 : vector<6x32x1xf32> to vector<6x32x32xf32>
    %149 = arith.subf %145, %148 : vector<6x32x32xf32>
    %150 = math.exp %149 : vector<6x32x32xf32>
    %cst_90 = arith.constant dense<0.000000e+00> : vector<6x32xf32>
    %151 = vector.multi_reduction <add>, %150, %cst_90 [2] : vector<6x32x32xf32> to vector<6x32xf32>
    %152 = vector.shape_cast %151 : vector<6x32xf32> to vector<6x32x1xf32>
    %153 = tpu.reciprocal %152 {approx = true} : vector<6x32x1xf32> -> vector<6x32x1xf32>
    %154 = vector.broadcast %153 : vector<6x32x1xf32> to vector<6x32x32xf32>
    %155 = arith.mulf %150, %154 : vector<6x32x32xf32>
    %156 = arith.truncf %155 : vector<6x32x32xf32> to vector<6x32x32xbf16>
    "tpu.trace_start"() <{level = 10 : i32, message = "hts,hsd->htd"}> : () -> ()
    %cst_91 = arith.constant dense<0.000000e+00> : vector<6x32x64xf32>
    %157 = tpu.matmul %156, %141, %cst_91 {dimension_numbers = #tpu.dot_dimension_numbers<[2], [1], [1], [2], [0, 0, 0, 1, 1, 2], [0], [0]>} : vector<6x32x32xbf16>, vector<6x32x64xbf16>, vector<6x32x64xf32> -> vector<6x32x64xf32>
    "tpu.trace_stop"() : () -> ()
    %158 = arith.truncf %157 : vector<6x32x64xf32> to vector<6x32x64xbf16>
    "tpu.trace_start"() <{level = 10 : i32, message = "htd,hdc->htc"}> : () -> ()
    %cst_92 = arith.constant dense<0.000000e+00> : vector<6x32x384xf32>
    %159 = tpu.matmul %158, %110, %cst_92 {dimension_numbers = #tpu.dot_dimension_numbers<[2], [1], [1], [2], [0, 0, 0, 1, 1, 2], [0], [0]>} : vector<6x32x64xbf16>, vector<6x64x384xbf16>, vector<6x32x384xf32> -> vector<6x32x384xf32>
    "tpu.trace_stop"() : () -> ()
    %cst_93 = arith.constant dense<0.000000e+00> : vector<32x384xf32>
    %160 = vector.multi_reduction <add>, %159, %cst_93 [0] : vector<6x32x384xf32> to vector<32x384xf32>
    %161 = tpu.concatenate %138, %160 in 0 : vector<32x384xf32>, vector<32x384xf32> -> vector<64x384xf32>
    %162 = arith.addf %0, %161 : vector<64x384xf32>
    %c0_94 = arith.constant 0 : index
    %c0_95 = arith.constant 0 : index
    %163 = vector.load %arg8[%c0_94, %c0_95] : memref<1x384xf32, #tpu.memory_space<vmem>>, vector<1x384xf32>
    %164 = vector.shape_cast %163 : vector<1x384xf32> to vector<384xf32>
    %165 = vector.shape_cast %164 : vector<384xf32> to vector<1x384xf32>
    %166 = vector.broadcast %165 : vector<1x384xf32> to vector<64x384xf32>
    %167 = arith.addf %162, %166 : vector<64x384xf32>
    %c0_96 = arith.constant 0 : index
    %c0_97 = arith.constant 0 : index
    %168 = vector.load %arg9[%c0_96, %c0_97] : memref<1x384xf32, #tpu.memory_space<vmem>>, vector<1x384xf32>
    %169 = vector.shape_cast %168 : vector<1x384xf32> to vector<384xf32>
    %c0_98 = arith.constant 0 : index
    %c0_99 = arith.constant 0 : index
    %170 = vector.load %arg10[%c0_98, %c0_99] : memref<1x384xf32, #tpu.memory_space<vmem>>, vector<1x384xf32>
    %171 = vector.shape_cast %170 : vector<1x384xf32> to vector<384xf32>
    %cst_100 = arith.constant dense<0.000000e+00> : vector<64xf32>
    %172 = vector.multi_reduction <add>, %167, %cst_100 [1] : vector<64x384xf32> to vector<64xf32>
    %173 = vector.shape_cast %172 : vector<64xf32> to vector<64x1xf32>
    %cst_101 = arith.constant 3.840000e+02 : f32
    %174 = vector.broadcast %cst_101 : f32 to vector<64x1xf32>
    %175 = arith.divf %173, %174 : vector<64x1xf32>
    %176 = vector.broadcast %175 : vector<64x1xf32> to vector<64x384xf32>
    %177 = arith.subf %167, %176 : vector<64x384xf32>
    %178 = arith.mulf %177, %177 : vector<64x384xf32>
    %cst_102 = arith.constant dense<0.000000e+00> : vector<64xf32>
    %179 = vector.multi_reduction <add>, %178, %cst_102 [1] : vector<64x384xf32> to vector<64xf32>
    %180 = vector.shape_cast %179 : vector<64xf32> to vector<64x1xf32>
    %cst_103 = arith.constant 3.840000e+02 : f32
    %181 = vector.broadcast %cst_103 : f32 to vector<64x1xf32>
    %182 = arith.divf %180, %181 : vector<64x1xf32>
    %183 = vector.broadcast %175 : vector<64x1xf32> to vector<64x384xf32>
    %184 = arith.subf %167, %183 : vector<64x384xf32>
    %cst_104 = arith.constant 9.99999974E-6 : f32
    %185 = vector.broadcast %cst_104 : f32 to vector<64x1xf32>
    %186 = arith.addf %182, %185 : vector<64x1xf32>
    %187 = math.rsqrt %186 : vector<64x1xf32>
    %188 = vector.broadcast %187 : vector<64x1xf32> to vector<64x384xf32>
    %189 = arith.mulf %184, %188 : vector<64x384xf32>
    %190 = vector.shape_cast %169 : vector<384xf32> to vector<1x384xf32>
    %191 = vector.broadcast %190 : vector<1x384xf32> to vector<64x384xf32>
    %192 = arith.mulf %189, %191 : vector<64x384xf32>
    %193 = vector.shape_cast %171 : vector<384xf32> to vector<1x384xf32>
    %194 = vector.broadcast %193 : vector<1x384xf32> to vector<64x384xf32>
    %195 = arith.addf %192, %194 : vector<64x384xf32>
    %196 = arith.truncf %195 : vector<64x384xf32> to vector<64x384xbf16>
    %c0_105 = arith.constant 0 : index
    %c0_106 = arith.constant 0 : index
    %197 = vector.load %arg11[%c0_105, %c0_106] : memref<384x1536xbf16, #tpu.memory_space<vmem>>, vector<384x1536xbf16>
    %cst_107 = arith.constant dense<0.000000e+00> : vector<64x1536xf32>
    %198 = tpu.matmul %196, %197, %cst_107 {dimension_numbers = #tpu.dot_dimension_numbers<[1], [0], [0], [1], [0, 0, 1, 1], [], []>} : vector<64x384xbf16>, vector<384x1536xbf16>, vector<64x1536xf32> -> vector<64x1536xf32>
    %c0_108 = arith.constant 0 : index
    %c0_109 = arith.constant 0 : index
    %199 = vector.load %arg12[%c0_108, %c0_109] : memref<1x1536xf32, #tpu.memory_space<vmem>>, vector<1x1536xf32>
    %200 = vector.shape_cast %199 : vector<1x1536xf32> to vector<1536xf32>
    %201 = vector.shape_cast %200 : vector<1536xf32> to vector<1x1536xf32>
    %202 = vector.broadcast %201 : vector<1x1536xf32> to vector<64x1536xf32>
    %203 = arith.addf %198, %202 : vector<64x1536xf32>
    %cst_110 = arith.constant 0.000000e+00 : f32
    %204 = vector.broadcast %cst_110 : f32 to vector<64x1536xf32>
    %205 = arith.maximumf %203, %204 : vector<64x1536xf32>
    %206 = arith.truncf %205 : vector<64x1536xf32> to vector<64x1536xbf16>
    %c0_111 = arith.constant 0 : index
    %c0_112 = arith.constant 0 : index
    %207 = vector.load %arg13[%c0_111, %c0_112] : memref<1536x384xbf16, #tpu.memory_space<vmem>>, vector<1536x384xbf16>
    %cst_113 = arith.constant dense<0.000000e+00> : vector<64x384xf32>
    %208 = tpu.matmul %206, %207, %cst_113 {dimension_numbers = #tpu.dot_dimension_numbers<[1], [0], [0], [1], [0, 0, 1, 1], [], []>} : vector<64x1536xbf16>, vector<1536x384xbf16>, vector<64x384xf32> -> vector<64x384xf32>
    %c0_114 = arith.constant 0 : index
    %c0_115 = arith.constant 0 : index
    %209 = vector.load %arg14[%c0_114, %c0_115] : memref<1x384xf32, #tpu.memory_space<vmem>>, vector<1x384xf32>
    %210 = vector.shape_cast %209 : vector<1x384xf32> to vector<384xf32>
    %211 = vector.shape_cast %210 : vector<384xf32> to vector<1x384xf32>
    %212 = vector.broadcast %211 : vector<1x384xf32> to vector<64x384xf32>
    %213 = arith.addf %208, %212 : vector<64x384xf32>
    %214 = arith.addf %167, %213 : vector<64x384xf32>
    %c0_116 = arith.constant 0 : index
    %c0_117 = arith.constant 0 : index
    %215 = vector.load %arg15[%c0_116, %c0_117] : memref<64x384xf32, #tpu.memory_space<vmem>>, vector<64x384xf32>
    tpu.vector_store %arg15[%c0_116, %c0_117], %214 {strides = array<i32>} : memref<64x384xf32, #tpu.memory_space<vmem>>, vector<64x384xf32>,
    return
  }
  func.func @transform_0(%arg0: i32) -> (i32, i32) {
    %c0_i32 = arith.constant 0 : i32
    %c0_i32_0 = arith.constant 0 : i32
    return %arg0, %c0_i32 : i32, i32
  }
  func.func @transform_1(%arg0: i32) -> (i32, i32) {
    %c0_i32 = arith.constant 0 : i32
    %c0_i32_0 = arith.constant 0 : i32
    %c0_i32_1 = arith.constant 0 : i32
    return %c0_i32, %c0_i32_0 : i32, i32
  }
  func.func @transform_2(%arg0: i32) -> (i32, i32) {
    %c0_i32 = arith.constant 0 : i32
    %c0_i32_0 = arith.constant 0 : i32
    %c0_i32_1 = arith.constant 0 : i32
    return %c0_i32, %c0_i32_0 : i32, i32
  }
  func.func @transform_3(%arg0: i32) -> (i32, i32, i32) {
    %c0_i32 = arith.constant 0 : i32
    %c0_i32_0 = arith.constant 0 : i32
    %c0_i32_1 = arith.constant 0 : i32
    %c0_i32_2 = arith.constant 0 : i32
    return %c0_i32, %c0_i32_0, %c0_i32_1 : i32, i32, i32
  }
  func.func @transform_4(%arg0: i32) -> (i32, i32, i32) {
    %c0_i32 = arith.constant 0 : i32
    %c0_i32_0 = arith.constant 0 : i32
    %c0_i32_1 = arith.constant 0 : i32
    %c0_i32_2 = arith.constant 0 : i32
    return %c0_i32, %c0_i32_0, %c0_i32_1 : i32, i32, i32
  }
  func.func @transform_5(%arg0: i32) -> (i32, i32, i32) {
    %c0_i32 = arith.constant 0 : i32
    %c0_i32_0 = arith.constant 0 : i32
    %c0_i32_1 = arith.constant 0 : i32
    %c0_i32_2 = arith.constant 0 : i32
    return %c0_i32, %c0_i32_0, %c0_i32_1 : i32, i32, i32
  }
  func.func @transform_6(%arg0: i32) -> (i32, i32, i32) {
    %c0_i32 = arith.constant 0 : i32
    %c0_i32_0 = arith.constant 0 : i32
    %c0_i32_1 = arith.constant 0 : i32
    %c0_i32_2 = arith.constant 0 : i32
    return %c0_i32, %c0_i32_0, %c0_i32_1 : i32, i32, i32
  }
  func.func @transform_7(%arg0: i32) -> (i32, i32) {
    %c0_i32 = arith.constant 0 : i32
    %c0_i32_0 = arith.constant 0 : i32
    %c0_i32_1 = arith.constant 0 : i32
    return %c0_i32, %c0_i32_0 : i32, i32
  }
  func.func @transform_8(%arg0: i32) -> (i32, i32) {
    %c0_i32 = arith.constant 0 : i32
    %c0_i32_0 = arith.constant 0 : i32
    %c0_i32_1 = arith.constant 0 : i32
    return %c0_i32, %c0_i32_0 : i32, i32
  }
  func.func @transform_9(%arg0: i32) -> (i32, i32) {
    %c0_i32 = arith.constant 0 : i32
    %c0_i32_0 = arith.constant 0 : i32
    %c0_i32_1 = arith.constant 0 : i32
    return %c0_i32, %c0_i32_0 : i32, i32
  }
  func.func @transform_10(%arg0: i32) -> (i32, i32) {
    %c0_i32 = arith.constant 0 : i32
    %c0_i32_0 = arith.constant 0 : i32
    %c0_i32_1 = arith.constant 0 : i32
    return %c0_i32, %c0_i32_0 : i32, i32
  }
  func.func @transform_11(%arg0: i32) -> (i32, i32) {
    %c0_i32 = arith.constant 0 : i32
    %c0_i32_0 = arith.constant 0 : i32
    %c0_i32_1 = arith.constant 0 : i32
    return %c0_i32, %c0_i32_0 : i32, i32
  }
  func.func @transform_12(%arg0: i32) -> (i32, i32) {
    %c0_i32 = arith.constant 0 : i32
    %c0_i32_0 = arith.constant 0 : i32
    %c0_i32_1 = arith.constant 0 : i32
    return %c0_i32, %c0_i32_0 : i32, i32
  }
  func.func @transform_13(%arg0: i32) -> (i32, i32) {
    %c0_i32 = arith.constant 0 : i32
    %c0_i32_0 = arith.constant 0 : i32
    %c0_i32_1 = arith.constant 0 : i32
    return %c0_i32, %c0_i32_0 : i32, i32
  }
  func.func @transform_14(%arg0: i32) -> (i32, i32) {
    %c0_i32 = arith.constant 0 : i32
    %c0_i32_0 = arith.constant 0 : i32
    return %arg0, %c0_i32 : i32, i32
  }
}

</mosaic_0001>

<bundles_post_ra>
// kernel: tpu_custom_call.1
= control target key start
LH: loop header
LB: loop body
LE: loop exit
PB: predicated region body
PF: predicated region fallthrough
CT: control target
= control target key end

     0   :  { %s30218_s0 = inlined_call_operand.hbm [shape: f32[128,384], index: 0, kind: input, shape index: {}]   ;;  %s30219_s1 = inlined_call_operand.vmem [shape: f32[1,384], index: 1, kind: input, shape index: {}]   ;;  %s30220_s2 = inlined_call_operand.hbm [shape: f32[1,384], index: 2, kind: input, shape index: {}]   ;;  %s30221_s3 = inlined_call_operand.vmem [shape: bf16[6,384,64], index: 3, kind: input, shape index: {}]   ;;  %s30222_s4 = inlined_call_operand.vmem [shape: bf16[6,384,64], index: 4, kind: input, shape index: {}]   ;;  %s30223_s5 = inlined_call_operand.vmem [shape: bf16[6,384,64], index: 5, kind: input, shape index: {}]   ;;  %s30224_s6 = inlined_call_operand.vmem [shape: bf16[6,64,384], index: 6, kind: input, shape index: {}]   ;;  %s30225_s7 = inlined_call_operand.hbm [shape: f32[1,384], index: 7, kind: input, shape index: {}]   ;;  %s30226_s8 = inlined_call_operand.hbm [shape: f32[1,384], index: 8, kind: input, shape index: {}]   ;;  %s30227_s9 = inlined_call_operand.hbm [shape: f32[1,384], index: 9, kind: input, shape index: {}]   ;;  %s30228_s10 = inlined_call_operand.vmem [shape: bf16[384,1536], index: 10, kind: input, shape index: {}]   ;;  %s30229_s11 = inlined_call_operand.hbm [shape: f32[1,1536], index: 11, kind: input, shape index: {}]   ;;  %s30230_s12 = inlined_call_operand.vmem [shape: bf16[1536,384], index: 12, kind: input, shape index: {}]   ;;  %s30231_s13 = inlined_call_operand.hbm [shape: f32[1,384], index: 13, kind: input, shape index: {}]   ;;  %s30232_s14 = inlined_call_operand.hbm [shape: f32[128,384], index: 14, kind: output, shape index: {}]  }
   0x1   :  { %30305 = sst [smem:[#allocation59_spill]] %s30218_s0 }
   0x2   :  { %30306 = sst [smem:[#allocation60_spill]] %s30220_s2 }
   0x3   :  { %30307 = sst [smem:[#allocation61_spill]] %s30223_s5 }
   0x4   :  { %30308 = sst [smem:[#allocation62_spill]] %s30224_s6 }
   0x5   :  { %30309 = sst [smem:[#allocation63_spill]] %s30225_s7 }
   0x6   :  { %30310 = sst [smem:[#allocation64_spill]] %s30226_s8 }
   0x7   :  { %30311 = sst [smem:[#allocation65_spill]] %s30228_s10 }
   0x8   :  { %30312 = sst [smem:[#allocation66_spill]] %s30230_s12 }
   0x9   :  { %30313 = sst [smem:[#allocation67_spill]] %s30232_s14 }
   0xa   :  { %19 = vsyncpa [#allocation3], 0 }
   0xb   :  { %21 = vsyncpa [#allocation3 + $0x1], 0 }
   0xc   :  { %22 = vsyncpa [#allocation6], 0 }
   0xd   :  { %23 = vsyncpa [#allocation9], 0 }
   0xe   :  { %24 = vsyncpa [#allocation12], 0 }
   0xf   :  { %25 = vsyncpa [#allocation4], 0 }
  0x10   :  { %27 = vsyncpa [#allocation4 + $0x1], 0  ;;  %s23386_s29 = smov 0   ;;  %s23388_s30 = smov 0  }
  0x11   :  { %s23390_s15 = smov 0   ;;  %s23392_s16 = smov 0  }
  0x12 LB: > { %s23297_s17 = smov [#allocation5]   ;;  %s23407_s19 = sadd.s32 4294967295, %s23295_s16   ;;  %s23295_s16 = sphi %s23392_s16, %s30481_s16   ;;  %s23291_s15 = sphi %s23390_s15, %s30480_s15   ;;  %s23287_s30 = sphi %s23388_s30, %s30479_s30   ;;  %s23283_s29 = sphi %s23386_s29, %s30478_s29  }
  0x13   : > { %s379_s18 = sshll.u32 %s23297_s17, 4  ;;  %p16762_p0 = scmp.ge.s32.totalorder %s23295_s16, 1  ;;  %s23412_s18 = int_to_ptr.vmem [resolvable:$true] %s379_s18 }
  0x14   : > { %p30238_p1 = scmp.eq.s32.totalorder %s23407_s19, 0  ;;  %p363_p2 = scmp.lt.s32.totalorder %s23295_s16, 3 }
  0x15   : > { %s23298_s21 = smov [#allocation8]   ;;  %s23299_s23 = smov [#allocation11]  }
  0x16   : > { %p23414_p3 = pnand %p16762_p0, %p363_p2  ;;  %s413_s22 = sshll.u32 %s23298_s21, 4  ;;  %s23421_s22 = int_to_ptr.vmem [resolvable:$true] %s413_s22 }
  0x17   : > { %s438_s24 = sshll.u32 %s23299_s23, 4  ;;  %s23300_s26 = smov [#allocation7]   ;;  %s23429_s24 = int_to_ptr.vmem [resolvable:$true] %s438_s24 }
  0x18   : > { %s30314_s20 = scalar_select %p23414_p3, 1, 0 }
  0x19   : > { %p21257_p5 = pneg %p23414_p3  ;;  %s23431_s27 = sshll.u32 %s23300_s26, 4  ;;  %s403_s27 = int_to_ptr.vmem [resolvable:$true] %s23431_s27 }
  0x1a   : > { %s30316_s2 = sld [smem:[#allocation60_spill]] }
  0x1b   : > { %p23425_p6 = pnand %p21257_p5, %p30238_p1 }
  0x1d   : > { %p23441_p8 = pneg %p23425_p6 }
  0x20   : > { %s23019_s14 = scalar_lea.hbm %s30316_s2, 48 }
  0x21   : > { %p23020_p7 = scmp.ne.s32.totalorder %s30316_s2, %s23019_s14  ;;  %p23026_p11 = scmp.lt.u32.totalorder %s23019_s14, %s30316_s2 }
  0x23   : > { %p23022_p9 = pnand %p23441_p8, %p23020_p7 }
  0x25   : > { %p23023_p10 = pneg %p23022_p9 }
  0x27   : > { %p23028_p12 = pnand %p23026_p11, %p23023_p10 }
  0x29   : > { %23031 = shalt.err (!%p23028_p12)
}
  0x2a   : > { %s23032_s12 = scalar_lea.vmem %s23412_s18, 48  ;;  %s23039_s28 = scalar_lea.vmem %s23412_s18, 64 }
  0x2b   : > { %p23033_p13 = scmp.ne.s32.totalorder %s23412_s18, %s23032_s12  ;;  %p23040_p5 = scmp.lt.s32.totalorder %s23412_s18, %s23412_s18 }
  0x2c   : > { %p23041_p7 = scmp.lt.s32.totalorder %s23039_s28, %s23032_s12 }
  0x2d   : > { %p23035_p0 = pnand %p23033_p13, %p23441_p8 }
  0x2e   : > { %p23042_p9 = por %p23041_p7, %p23040_p5 }
  0x2f   : > { %p23036_p2 = pneg %p23035_p0 }
  0x31   : > { %p23043_p4 = pnand %p23042_p9, %p23036_p2 }
  0x33   : > { %23046 = shalt.err (!%p23043_p4)
}
  0x34   : > { %21260 = dma.hbm_to_vmem [thread:$0]  (!%p23425_p6), %s30316_s2, 48, %s23412_s18, [#allocation6]  }
  0x35   : > { %s30318_s8 = sld [smem:[#allocation64_spill]] }
  0x3b   : > { %s23047_s26 = scalar_lea.hbm %s30318_s8, 48 }
  0x3c   : > { %p23048_p10 = scmp.ne.s32.totalorder %s30318_s8, %s23047_s26  ;;  %p23054_p4 = scmp.lt.u32.totalorder %s23047_s26, %s30318_s8 }
  0x3e   : > { %p23050_p11 = pnand %p23048_p10, %p23441_p8 }
  0x40   : > { %p23051_p12 = pneg %p23050_p11 }
  0x42   : > { %p23056_p13 = pnand %p23054_p4, %p23051_p12 }
  0x44   : > { %23059 = shalt.err (!%p23056_p13)
}
  0x45   : > { %s23060_s18 = scalar_lea.vmem %s23421_s22, 48  ;;  %s23067_s5 = scalar_lea.vmem %s23421_s22, 64 }
  0x46   : > { %p23061_p0 = scmp.ne.s32.totalorder %s23421_s22, %s23060_s18  ;;  %p23068_p7 = scmp.lt.s32.totalorder %s23421_s22, %s23421_s22 }
  0x47   : > { %p23069_p9 = scmp.lt.s32.totalorder %s23067_s5, %s23060_s18 }
  0x48   : > { %p23063_p2 = pnand %p23061_p0, %p23441_p8 }
  0x49   : > { %p23070_p10 = por %p23069_p9, %p23068_p7 }
  0x4a   : > { %p23064_p5 = pneg %p23063_p2 }
  0x4c   : > { %p23071_p11 = pnand %p23070_p10, %p23064_p5 }
  0x4e   : > { %23074 = shalt.err (!%p23071_p11)
}
  0x4f   : > { %21266 = dma.hbm_to_vmem [thread:$0]  (!%p23425_p6), %s30318_s8, 48, %s23421_s22, [#allocation9]  }
  0x50   : > { %s23075_s21 = scalar_lea.hbm %s30229_s11, 192 }
  0x51   : > { %p23076_p12 = scmp.ne.s32.totalorder %s30229_s11, %s23075_s21  ;;  %p23082_p0 = scmp.lt.u32.totalorder %s23075_s21, %s30229_s11 }
  0x53   : > { %p23078_p4 = pnand %p23076_p12, %p23441_p8 }
  0x55   : > { %p23079_p13 = pneg %p23078_p4 }
  0x57   : > { %p23084_p2 = pnand %p23082_p0, %p23079_p13 }
  0x59   : > { %23087 = shalt.err (!%p23084_p2)
}
  0x5a   : > { %s23088_s22 = scalar_lea.vmem %s23429_s24, 192  ;;  %p23096_p10 = scmp.lt.s32.totalorder %s23429_s24, %s23429_s24 }
  0x5b   : > { %p23089_p5 = scmp.ne.s32.totalorder %s23429_s24, %s23088_s22  ;;  %p23097_p11 = scmp.lt.s32.totalorder %s23088_s22, %s23088_s22 }
  0x5d   : > { %p23091_p7 = pnand %p23089_p5, %p23441_p8  ;;  %p23098_p12 = por %p23097_p11, %p23096_p10 }
  0x5f   : > { %p23092_p9 = pneg %p23091_p7 }
  0x61   : > { %p23099_p4 = pnand %p23098_p12, %p23092_p9 }
  0x63   : > { %23102 = shalt.err (!%p23099_p4)
}
  0x64   : > { %21272 = dma.hbm_to_vmem [thread:$0]  (!%p23425_p6), %s30229_s11, 192, %s23429_s24, [#allocation12]  }
  0x65   : > { %s23301_s10 = smov [#allocation10]   ;;  %s30319_s7 = sld [smem:[#allocation63_spill]] }
  0x66   : > { %s424_s14 = sshll.u32 %s23301_s10, 4  ;;  %s425_s14 = int_to_ptr.vmem [resolvable:$true] %s424_s14 }
  0x6b   : > { %s23103_s26 = scalar_lea.hbm %s30319_s7, 48 }
  0x6c   : > { %p23104_p13 = scmp.ne.s32.totalorder %s30319_s7, %s23103_s26  ;;  %p23110_p5 = scmp.lt.u32.totalorder %s23103_s26, %s30319_s7 }
  0x6e   : > { %p23106_p0 = pnand %p23104_p13, %p23441_p8 }
  0x70   : > { %p23107_p2 = pneg %p23106_p0 }
  0x72   : > { %p23112_p7 = pnand %p23110_p5, %p23107_p2 }
  0x74   : > { %23115 = shalt.err (!%p23112_p7)
}
  0x75   : > { %s23116_s24 = scalar_lea.vmem %s403_s27, 48  ;;  %s23123_s5 = scalar_lea.vmem %s403_s27, 64 }
  0x76   : > { %p23117_p9 = scmp.ne.s32.totalorder %s403_s27, %s23116_s24  ;;  %p23124_p12 = scmp.lt.s32.totalorder %s403_s27, %s403_s27 }
  0x77   : > { %p23125_p4 = scmp.lt.s32.totalorder %s23123_s5, %s23116_s24 }
  0x78   : > { %p23119_p10 = pnand %p23117_p9, %p23441_p8 }
  0x79   : > { %p23126_p1 = por %p23125_p4, %p23124_p12 }
  0x7a   : > { %p23120_p11 = pneg %p23119_p10 }
  0x7c   : > { %p23127_p3 = pnand %p23126_p1, %p23120_p11 }
  0x7e   : > { %23130 = shalt.err (!%p23127_p3)
}
  0x7f   : > { %21263 = dma.hbm_to_vmem [thread:$0]  (!%p23425_p6), %s30319_s7, 48, %s403_s27, [#allocation6]  }
  0x80   : > { %s23131_s26 = scalar_lea.hbm %s30227_s9, 48 }
  0x81   : > { %p23132_p13 = scmp.ne.s32.totalorder %s30227_s9, %s23131_s26  ;;  %p23138_p3 = scmp.lt.u32.totalorder %s23131_s26, %s30227_s9 }
  0x83   : > { %p23134_p0 = pnand %p23132_p13, %p23441_p8 }
  0x85   : > { %p23135_p1 = pneg %p23134_p0 }
  0x87   : > { %p23140_p2 = pnand %p23138_p3, %p23135_p1 }
  0x89   : > { %23143 = shalt.err (!%p23140_p2)
}
  0x8a   : > { %s23144_s24 = scalar_lea.vmem %s425_s14, 48  ;;  %s23151_s27 = scalar_lea.vmem %s425_s14, 64 }
  0x8b   : > { %p23145_p5 = scmp.ne.s32.totalorder %s425_s14, %s23144_s24  ;;  %p23152_p10 = scmp.lt.s32.totalorder %s425_s14, %s425_s14 }
  0x8c   : > { %p23153_p11 = scmp.lt.s32.totalorder %s23151_s27, %s23144_s24 }
  0x8d   : > { %p23147_p7 = pnand %p23145_p5, %p23441_p8 }
  0x8e   : > { %p23154_p12 = por %p23153_p11, %p23152_p10 }
  0x8f   : > { %p23148_p9 = pneg %p23147_p7 }
  0x91   : > { %p23155_p4 = pnand %p23154_p12, %p23148_p9 }
  0x93   : > { %23158 = shalt.err (!%p23155_p4)
}
  0x94   : > { %21269 = dma.hbm_to_vmem [thread:$0]  (!%p23425_p6), %s30227_s9, 48, %s425_s14, [#allocation9]  }
  0x95   : > { %s23302_s10 = smov [#allocation13]   ;;  %s23159_s12 = scalar_lea.hbm %s30231_s13, 48 }
  0x96   : > { %s452_s17 = sshll.u32 %s23302_s10, 4  ;;  %p23160_p13 = scmp.ne.s32.totalorder %s30231_s13, %s23159_s12  ;;  %s453_s17 = int_to_ptr.vmem [resolvable:$true] %s452_s17 }
  0x97   : > { %p23166_p3 = scmp.lt.u32.totalorder %s23159_s12, %s30231_s13 }
  0x98   : > { %p23162_p0 = pnand %p23160_p13, %p23441_p8 }
  0x9a   : > { %p23163_p1 = pneg %p23162_p0 }
  0x9c   : > { %p23168_p2 = pnand %p23166_p3, %p23163_p1 }
  0x9e   : > { %23171 = shalt.err (!%p23168_p2)
}
  0x9f   : > { %s23172_s14 = scalar_lea.vmem %s453_s17, 48  ;;  %s23179_s27 = scalar_lea.vmem %s453_s17, 64 }
  0xa0   : > { %p23173_p5 = scmp.ne.s32.totalorder %s453_s17, %s23172_s14  ;;  %p23180_p10 = scmp.lt.s32.totalorder %s453_s17, %s453_s17 }
  0xa1   : > { %p23181_p11 = scmp.lt.s32.totalorder %s23179_s27, %s23172_s14 }
  0xa2   : > { %p23175_p7 = pnand %p23173_p5, %p23441_p8 }
  0xa3   : > { %p23182_p12 = por %p23181_p11, %p23180_p10 }
  0xa4   : > { %p23176_p9 = pneg %p23175_p7 }
  0xa6   : > { %p23183_p4 = pnand %p23182_p12, %p23176_p9 }
  0xa8   : > { %23186 = shalt.err (!%p23183_p4)
}
  0xa9   : > { %21275 = dma.hbm_to_vmem [thread:$0]  (!%p23425_p6), %s30231_s13, 48, %s453_s17, [#allocation12]  }
  0xaa   : > { %s16761_s23 = sadd.s32 4294967294, %s23295_s16   ;;  %s23567_s25 = sadd.s32 1, %s23295_s16  }
  0xab   : > { %s37_s10 = ssub.s32 %s23295_s16, %s23567_s25  ;;  %s40_s21 = sadd.s32 1, %s23291_s15 }
  0xac   : > { %p38_p8 = scmp.eq.s32.totalorder %s37_s10, 0  ;;  %p47_p13 = scmp.ne.s32.totalorder %s23291_s15, %s23287_s30 }
  0xad   : > { %p48_p0 = scmp.eq.s32.totalorder %s23295_s16, 0  ;;  %p53_p1 = scmp.ne.s32.totalorder %s23287_s30, %s23283_s29 }
  0xae   : > { %s23578_s26 = scalar_select %p38_p8, %s23291_s15, %s40_s21  }
  0xaf   : > { %p49_p3 = por %p48_p0, %p47_p13  ;;  %p30320_p2 = scmp.eq.s32.totalorder %s23407_s19, 0 }
  0xb0   : > { %p350_p6 = scmp.eq.s32.totalorder %s23407_s19, 1  ;;  %p356_p7 = scmp.eq.s32.totalorder %s16761_s23, 1 }
  0xb1   : > { %p23582_p5 = por %p30320_p2, %p53_p1  ;;  %p21290_p9 = scmp.lt.s32.totalorder %s23295_s16, 2 }
  0xb2   : > { %s463_s17 = sand.u32 1, %s23291_s15   ;;  %p23589_p10 = por %p350_p6, %p47_p13 }
  0xb3   : > { %p23593_p11 = por %p356_p7, %p53_p1  ;;  %s21225_s22 = smul.u32 192, %s463_s17 }
  0xb4   : > { %s30322_s28 = scalar_select %p23589_p10, 1, 0 }
  0xb5   : > { %s30323_s18 = scalar_select %p23593_p11, 1, 0 }
  0xb6   : > { %s21226_s24 = smul.u32 3072, %s23295_s16  ;;  %p23598_p12 = pnand %p21290_p9, %p49_p3 }
  0xb7   : > { %s30325_s0 = sld [smem:[#allocation59_spill]]  ;;  %s467_s23 = scalar_lea.vmem [#allocation2], %s21225_s22 }
  0xb8   : > { %s475_s10 = sshll.u32 %s467_s23, 4  ;;  %s23609_s21 = scalar_lea.sflag [#allocation3], %s463_s17  ;;  %s23607_s10 = int_to_ptr.vmem [resolvable:$true] %s475_s10 }
  0xb9   : > { %p23189_p8 = pneg %p23598_p12 }
  0xbd   : > { %s23605_s6 = scalar_lea.hbm %s30325_s0, %s21226_s24  ;;  %s23192_s5 = scalar_lea.hbm %s30325_s0, 6144 }
  0xbe   : > { %s23187_s2 = scalar_lea.hbm %s23605_s6, 3072  ;;  %p23193_p1 = scmp.lt.u32.totalorder %s23605_s6, %s30325_s0 }
  0xbf   : > { %p23188_p4 = scmp.ne.s32.totalorder %s23605_s6, %s23187_s2  ;;  %p23194_p3 = scmp.lt.u32.totalorder %s23192_s5, %s23187_s2 }
  0xc0   : > { %p23196_p6 = scmp.lt.u32.totalorder %s23187_s2, %s23605_s6 }
  0xc1   : > { %p23190_p13 = pnand %p23189_p8, %p23188_p4  ;;  %p23195_p2 = por %p23194_p3, %p23193_p1 }
  0xc3   : > { %p23191_p0 = pneg %p23190_p13  ;;  %p23197_p7 = por %p23196_p6, %p23195_p2 }
  0xc5   : > { %p23198_p9 = pnand %p23197_p7, %p23191_p0 }
  0xc7   : > { %23201 = shalt.err (!%p23198_p9)
}
  0xc8   : > { %s23202_s17 = scalar_lea.vmem %s23607_s10, 3072  ;;  %s23303_s22 = smov [#allocation2]  }
  0xc9   : > { %p23203_p4 = scmp.ne.s32.totalorder %s23607_s10, %s23202_s17  ;;  %s23207_s23 = sshll.u32 %s23303_s22, 4  ;;  %s23208_s23 = int_to_ptr.vmem [resolvable:$false] %s23207_s23 }
  0xca   : > { %s23209_s7 = scalar_lea.vmem %s23208_s23, 6144  ;;  %p23210_p10 = scmp.lt.s32.totalorder %s23607_s10, %s23208_s23 }
  0xcb   : > { %p23205_p13 = pnand %p23203_p4, %p23189_p8  ;;  %p23211_p1 = scmp.lt.s32.totalorder %s23209_s7, %s23202_s17 }
  0xcd   : > { %p23206_p11 = pneg %p23205_p13  ;;  %p23212_p3 = por %p23211_p1, %p23210_p10 }
  0xcf   : > { %p23213_p2 = pnand %p23212_p3, %p23206_p11 }
  0xd1   : > { %23216 = shalt.err (!%p23213_p2)
}
  0xd2   : > { %s23304_s2 = smov 384   ;;  %s23305_s8 = smov 24  }
  0xd3   : > { %21279 = dma.hbm_to_vmem [thread:$0]  (!%p23598_p12), %s23605_s6, 3072, %s23607_s10, %s23609_s21, %s23304_s2, %s23304_s2, %s23305_s8  }
  0xd4   : > { %p30326_p8 = scmp.ne.s32.totalorder %s30314_s20, 0 }
  0xd6   : > { %487 = sbr.rel (%p30326_p8) target bundleno = 4180 (0x1054), region = 76 }
  0xdd   : > { %s23640_s24 = sand.u32 1, %s23287_s30  }
  0xde   : > { %s30294_s27 = smul.u32 192, %s23640_s24  ;;  %s490_s5 = scalar_lea.sflag [#allocation3], %s23640_s24 }
  0xe0   : > { %s23646_s17 = scalar_lea.vmem [#allocation2], %s30294_s27 }
  0xe1   : > { %23262 = dma.done.wait (%p23582_p5), %s490_s5, 3072  }
  0xe2   : > { %23264 = vsyncadd (%p23582_p5), %s490_s5, 4294964224  ;;  %p30327_p10 = scmp.eq.s32.totalorder %s23407_s19, 0 }
  0xe4   : > { %23266 = dma.done.wait (%p30327_p10), [#allocation6], 96   ;;  %p30328_p11 = pmov %p30327_p10 }
  0xe5   : > { %p30329_p12 = pmov %p30327_p10 }
  0xe6   : > { %23268 = vsyncadd (%p30328_p11), [#allocation6], 4294967200 }
  0xe7   : > { %23270 = dma.done.wait (%p30329_p12), [#allocation9], 96   ;;  %p30330_p0 = pmov %p30327_p10 }
  0xe9   : > { %23272 = vsyncadd (%p30330_p0), [#allocation9], 4294967200  ;;  %p30331_p6 = pmov %p30330_p0 }
  0xea   : > { %p30332_p7 = pmov %p30330_p0 }
  0xeb   : > { %23274 = dma.done.wait (%p30331_p6), [#allocation12], 240  }
  0xec   : > { %23276 = vsyncadd (%p30332_p7), [#allocation12], 4294967056  ;;  %v23665_v0 = vld [vmem:[%s23646_s17] sm:$0xff]  ;;  %v23668_v1 = vld [vmem:[%s23646_s17 + $0x8] sm:$0xff]  ;;  %s30346_s8 = sld [smem:[#allocation61_spill]]  ;;  %vm6894_vm0 = vcmask 523264  }
  0xed   : > { %v23671_v2 = vld [vmem:[%s23646_s17 + $0x10] sm:$0xff]  ;;  %v591_v3 = vadd.f32 %v23668_v1, %v23665_v0  ;;  %v23679_v5 = vld [vmem:[%s23646_s17 + $0x38] sm:$0xff]  ;;  %v23682_v6 = vld [vmem:[%s23646_s17 + $0x40] sm:$0xff]  ;;  %vm7261_vm5 = vcmask 261120   ;;  %s30401_s2 = sld [smem:[#allocation62_spill]]  ;;  %s30452_s23 = sld [smem:[#allocation65_spill]] }
  0xee   : > { %v23676_v4 = vld [vmem:[%s23646_s17 + $0x30] sm:$0xff]  ;;  %v23687_v8 = vld [vmem:[%s23646_s17 + $0x18] sm:$0xff]  ;;  %v23690_v9 = vld [vmem:[%s23646_s17 + $0x20] sm:$0xff]  ;;  %s30462_s21 = sld [smem:[#allocation66_spill]]  ;;  %s30464_s22 = smul.u32 192, %s23640_s24 }
  0xef   : > { %v599_v7 = vadd.f32 %v23679_v5, %v23676_v4  ;;  %v23693_v10 = vld [vmem:[%s23646_s17 + $0x28] sm:$0xff]  ;;  %v592_v11 = vadd.f32 %v591_v3, %v23671_v2  ;;  %v595_v12 = vadd.f32 %v23690_v9, %v23687_v8  ;;  %v23702_v14 = vld [vmem:[%s23646_s17 + $0x50] sm:$0xff]  ;;  %v23705_v15 = vld [vmem:[%s23646_s17 + $0x58] sm:$0xff]  ;;  %s21228_s5 = smul.u32 3072, %s23407_s19  ;;  %s30472_s6 = sld [smem:[#allocation67_spill]] }
  0xf0   : > { %v23699_v13 = vld [vmem:[%s23646_s17 + $0x48] sm:$0xff]  ;;  %v577_v18 = vld [vmem:[%s23646_s17 + $0x60] sm:$0xff]  ;;  %v580_v22 = vld [vmem:[%s23646_s17 + $0x78] sm:$0xff]  ;;  %s30114_s7 = scalar_lea.vmem [#allocation14], %s30464_s22  ;;  %p30474_p9 = scmp.ne.s32.totalorder %s30322_s28, 0 }
  0xf1   : > { %v600_v16 = vadd.f32 %v599_v7, %v23682_v6  ;;  %v603_v17 = vadd.f32 %v23702_v14, %v23699_v13  ;;  %v578_v19 = vld [vmem:[%s23646_s17 + $0x68] sm:$0xff]  ;;  %593 = vadd.xlane.f32.xlu0 %v592_v11  ;;  %v596_v20 = vadd.f32 %v595_v12, %v23693_v10  ;;  %v581_v23 = vld [vmem:[%s23646_s17 + $0x80] sm:$0xff]  ;;  %v579_v25 = vld [vmem:[%s23646_s17 + $0x70] sm:$0xff]  ;;  %s16631_s20 = sshll.u32 %s30114_s7, 4  ;;  %s23308_s10 = smov [#allocation14]   ;;  %s30170_s20 = int_to_ptr.vmem [resolvable:$true] %s16631_s20 }
  0xf2   : > { %v607_v21 = vadd.f32 %v578_v19, %v577_v18  ;;  %v611_v26 = vadd.f32 %v581_v23, %v580_v22  ;;  %v583_v27 = vld [vmem:[%s23646_s17 + $0x90] sm:$0xff]  ;;  %v584_v28 = vld [vmem:[%s23646_s17 + $0x98] sm:$0xff]  ;;  %v582_v29 = vld [vmem:[%s23646_s17 + $0x88] sm:$0xff]  ;;  %s23217_s27 = scalar_lea.vmem %s30170_s20, 3072  ;;  %s23221_s22 = sshll.u32 %s23308_s10, 4  ;;  %s23222_s22 = int_to_ptr.vmem [resolvable:$false] %s23221_s22 }
  0xf3   : > { %601 = vadd.xlane.f32.xlu1 %v600_v16  ;;  %v604_v24 = vadd.f32 %v603_v17, %v23705_v15  ;;  %v586_v30 = vld [vmem:[%s23646_s17 + $0xa8] sm:$0xff]  ;;  %v587_v31 = vld [vmem:[%s23646_s17 + $0xb0] sm:$0xff]  ;;  %v585_v32 = vld [vmem:[%s23646_s17 + $0xa0] sm:$0xff]  ;;  %v615_v34 = vadd.f32 %v584_v28, %v583_v27  ;;  %p23218_p5 = scmp.ne.s32.totalorder %s30170_s20, %s23217_s27  ;;  %p23224_p1 = scmp.lt.s32.totalorder %s30170_s20, %s23222_s22 }
  0xf4   : > { %v608_v33 = vadd.f32 %v607_v21, %v579_v25  ;;  %v588_v35 = vld [vmem:[%s23646_s17 + $0xb8] sm:$0xff]  ;;  %v612_v36 = vadd.f32 %v611_v26, %v582_v29  ;;  %v619_v37 = vadd.f32 %v587_v31, %v586_v30  ;;  %v21342_v40 = vld [vmem:[%s30221_s3 + $0x40] sm:$0xff]   ;;  %v21346_v44 = vld [vmem:[%s30221_s3 + $0x48] sm:$0xff]  }
  0xf5   : > { %597 = vadd.xlane.f32.xlu0 %v596_v20  ;;  %v616_v38 = vadd.f32 %v615_v34, %v585_v32  ;;  %v21343_v41 = vld [vmem:[%s30221_s3 + $0x100] sm:$0xff]   ;;  %v21347_v45 = vld [vmem:[%s30221_s3 + $0x108] sm:$0xff]   ;;  %18681 = vmatprep.subr.bf16.mxu1 %v21342_v40  ;;  %v22912_v26 = vld [vmem:[%s23646_s17 + $0x78] sm:$0xff]  ;;  %s30168_s19 = scalar_lea.hbm %s30472_s6, %s21228_s5  ;;  %p23219_p4 = pnand %p23218_p5, %p30474_p9 }
  0xf6   : > { %v620_v39 = vadd.f32 %v619_v37, %v588_v35  ;;  %v21344_v42 = vld [vmem:[%s30221_s3] sm:$0xff]   ;;  %18733 = vmatprep.subr.bf16.mxu0 %v21343_v41  ;;  %v22911_v22 = vld [vmem:[%s23646_s17 + $0x68] sm:$0xff]  ;;  %v22914_v32 = vld [vmem:[%s23646_s17 + $0x70] sm:$0xff]  ;;  %s23223_s5 = scalar_lea.vmem %s23222_s22, 6144 }
  0xf7   : > { %605 = vadd.xlane.f32.xlu1 %v604_v24  ;;  %v21345_v43 = vld [vmem:[%s30221_s3 + $0xc0] sm:$0xff]   ;;  %18682 = vmatpush3.bf16.msra.mxu1 %v21344_v42  ;;  %v22915_v42 = vld [vmem:[%s23646_s17 + $0x88] sm:$0xff]  ;;  %p23220_p13 = pneg %p23219_p4  ;;  %p23225_p3 = scmp.lt.s32.totalorder %s23223_s5, %s23217_s27 }
  0xf8   : > { %18734 = vmatpush3.bf16.msra.mxu0 %v21345_v43  ;;  %18683 = vmatprep.subr.bf16.mxu1 %v21346_v44  ;;  %v22910_v20 = vld [vmem:[%s23646_s17 + $0x60] sm:$0xff]  ;;  %v22916_v44 = vld [vmem:[%s23646_s17 + $0x90] sm:$0xff] }
  0xf9   : > { %609 = vadd.xlane.f32.xlu0 %v608_v33  ;;  %18735 = vmatprep.subr.bf16.mxu0 %v21347_v45  ;;  %v22913_v28 = vld [vmem:[%s23646_s17 + $0x80] sm:$0xff]  ;;  %p23226_p2 = por %p23225_p3, %p23224_p1 }
  0xfb   : > { %613 = vadd.xlane.f32.xlu1 %v612_v36  ;;  %p23227_p8 = pnand %p23226_p2, %p23220_p13 }
  0xfd   : > { %617 = vadd.xlane.f32.xlu0 %v616_v38 }
  0xff   : > { %621 = vadd.xlane.f32.xlu1 %v620_v39 }
 0x17e   : > { %v594_v46 = vpop.xlane.xlu0 %593 }
 0x17f   : > { %v624_v47 = vmul.f32 0.0026041667, %v594_v46  ;;  %v22917_v46 = vld [vmem:[%s23646_s17 + $0x98] sm:$0xff] }
 0x180   : > { %v602_v48 = vpop.xlane.xlu1 %601 }
 0x181   : > { %v626_v49 = vmul.f32 0.0026041667, %v602_v48  ;;  %v23743_v50 = vsub.f32 %v23665_v0, %v624_v47  ;;  %v23746_v51 = vsub.f32 %v23668_v1, %v624_v47  ;;  %v23749_v52 = vsub.f32 %v23671_v2, %v624_v47 }
 0x182   : > { %v598_v55 = vpop.xlane.xlu0 %597 }
 0x183   : > { %v23752_v53 = vsub.f32 %v23676_v4, %v626_v49  ;;  %v23755_v54 = vsub.f32 %v23679_v5, %v626_v49  ;;  %v23758_v56 = vsub.f32 %v23682_v6, %v626_v49  ;;  %v625_v57 = vmul.f32 0.0026041667, %v598_v55  ;;  %v22918_v49 = vld [vmem:[%s23646_s17 + $0xa8] sm:$0xff] }
 0x184   : > { %v606_v58 = vpop.xlane.xlu1 %605  ;;  %v656_v59 = vmul.f32 %v23743_v50, %v23743_v50  ;;  %v657_v60 = vmul.f32 %v23746_v51, %v23746_v51  ;;  %v658_v61 = vmul.f32 %v23749_v52, %v23749_v52 }
 0x185   : > { %v627_v62 = vmul.f32 0.0026041667, %v606_v58  ;;  %v662_v63 = vmul.f32 %v23752_v53, %v23752_v53  ;;  %v663_v0 = vmul.f32 %v23755_v54, %v23755_v54  ;;  %v664_v1 = vmul.f32 %v23758_v56, %v23758_v56 }
 0x186   : > { %v23773_v2 = vsub.f32 %v23687_v8, %v625_v57  ;;  %v23776_v3 = vsub.f32 %v23690_v9, %v625_v57  ;;  %v680_v4 = vadd.f32 %v657_v60, %v656_v59  ;;  %v23779_v5 = vsub.f32 %v23693_v10, %v625_v57  ;;  %v610_v11 = vpop.xlane.xlu0 %609  ;;  %v22919_v57 = vld [vmem:[%s23646_s17 + $0xb0] sm:$0xff] }
 0x187   : > { %v23782_v6 = vsub.f32 %v23699_v13, %v627_v62  ;;  %v23785_v7 = vsub.f32 %v23702_v14, %v627_v62  ;;  %v688_v12 = vadd.f32 %v663_v0, %v662_v63  ;;  %v23788_v8 = vsub.f32 %v23705_v15, %v627_v62  ;;  %v22920_v63 = vld [vmem:[%s23646_s17 + $0xa0] sm:$0xff] }
 0x188   : > { %v628_v16 = vmul.f32 0.0026041667, %v610_v11  ;;  %v681_v9 = vadd.f32 %v680_v4, %v658_v61  ;;  %v614_v17 = vpop.xlane.xlu1 %613  ;;  %v659_v10 = vmul.f32 %v23773_v2, %v23773_v2  ;;  %v660_v13 = vmul.f32 %v23776_v3, %v23776_v3 }
 0x189   : > { %v629_v18 = vmul.f32 0.0026041667, %v614_v17  ;;  %v689_v19 = vadd.f32 %v688_v12, %v664_v1  ;;  %v661_v14 = vmul.f32 %v23779_v5, %v23779_v5  ;;  %v665_v15 = vmul.f32 %v23782_v6, %v23782_v6  ;;  %v22921_v12 = vld [vmem:[%s23646_s17 + $0xb8] sm:$0xff] }
 0x18a   : > { %v23799_v21 = vsub.f32 %v22910_v20, %v628_v16  ;;  %v23802_v23 = vsub.f32 %v22911_v22, %v628_v16  ;;  %682 = vadd.xlane.f32.xlu0 %v681_v9  ;;  %v684_v24 = vadd.f32 %v660_v13, %v659_v10  ;;  %v666_v25 = vmul.f32 %v23785_v7, %v23785_v7  ;;  %v618_v30 = vpop.xlane.xlu0 %617 }
 0x18b   : > { %v23807_v27 = vsub.f32 %v22912_v26, %v629_v18  ;;  %v23810_v29 = vsub.f32 %v22913_v28, %v629_v18  ;;  %v667_v31 = vmul.f32 %v23788_v8, %v23788_v8  ;;  %v23815_v33 = vsub.f32 %v22914_v32, %v628_v16  ;;  %v21350_v26 = vld [vmem:[%s30221_s3 + $0x50] sm:$0xff]   ;;  %v21354_v32 = vld [vmem:[%s30221_s3 + $0x58] sm:$0xff]  }
 0x18c   : > { %v630_v34 = vmul.f32 0.0026041667, %v618_v30  ;;  %v685_v35 = vadd.f32 %v684_v24, %v661_v14  ;;  %v622_v36 = vpop.xlane.xlu1 %621  ;;  %v692_v37 = vadd.f32 %v666_v25, %v665_v15  ;;  %v668_v38 = vmul.f32 %v23799_v21, %v23799_v21  ;;  %v21348_v24 = vld [vmem:[%s30221_s3 + $0x8] sm:$0xff]   ;;  %v21351_v28 = vld [vmem:[%s30221_s3 + $0x110] sm:$0xff]  }
 0x18d   : > { %v631_v39 = vmul.f32 0.0026041667, %v622_v36  ;;  %v669_v40 = vmul.f32 %v23802_v23, %v23802_v23  ;;  %v670_v41 = vmul.f32 %v23815_v33, %v23815_v33  ;;  %v23824_v43 = vsub.f32 %v22915_v42, %v629_v18  ;;  %v21349_v25 = vld [vmem:[%s30221_s3 + $0xc8] sm:$0xff]   ;;  %18684 = vmatpush3.bf16.msra.mxu1 %v21348_v24  ;;  %v21352_v30 = vld [vmem:[%s30221_s3 + $0x10] sm:$0xff]   ;;  %v21357_v36 = vld [vmem:[%s30221_s3 + $0xd8] sm:$0xff]  }
 0x18e   : > { %v23827_v45 = vsub.f32 %v22916_v44, %v630_v34  ;;  %v23830_v47 = vsub.f32 %v22917_v46, %v630_v34  ;;  %690 = vadd.xlane.f32.xlu0 %v689_v19  ;;  %686 = vadd.xlane.f32.xlu1 %v685_v35  ;;  %v693_v48 = vadd.f32 %v692_v37, %v667_v31  ;;  %v21353_v31 = vld [vmem:[%s30221_s3 + $0xd0] sm:$0xff]   ;;  %v21356_v35 = vld [vmem:[%s30221_s3 + $0x18] sm:$0xff]   ;;  %v21358_v37 = vld [vmem:[%s30221_s3 + $0x60] sm:$0xff]  }
 0x18f   : > { %v23833_v55 = vsub.f32 %v22918_v49, %v631_v39  ;;  %v23836_v58 = vsub.f32 %v22919_v57, %v631_v39  ;;  %v696_v59 = vadd.f32 %v669_v40, %v668_v38  ;;  %v671_v60 = vmul.f32 %v23807_v27, %v23807_v27  ;;  %18736 = vmatpush3.bf16.msra.mxu0 %v21349_v25  ;;  %v21359_v38 = vld [vmem:[%s30221_s3 + $0x120] sm:$0xff]   ;;  %v21363_v42 = vld [vmem:[%s30221_s3 + $0x128] sm:$0xff]   ;;  %v21367_v49 = vld [vmem:[%s30221_s3 + $0x130] sm:$0xff]  }
 0x190   : > { %v672_v61 = vmul.f32 %v23810_v29, %v23810_v29  ;;  %v673_v62 = vmul.f32 %v23824_v43, %v23824_v43  ;;  %v23845_v0 = vsub.f32 %v22920_v63, %v630_v34  ;;  %v674_v1 = vmul.f32 %v23827_v45, %v23827_v45  ;;  %18685 = vmatprep.subr.bf16.mxu1 %v21350_v26  ;;  %v21355_v34 = vld [vmem:[%s30221_s3 + $0x118] sm:$0xff]   ;;  %v21361_v40 = vld [vmem:[%s30221_s3 + $0xe0] sm:$0xff]   ;;  %v21364_v44 = vld [vmem:[%s30221_s3 + $0x28] sm:$0xff]  }
 0x191   : > { %v697_v4 = vadd.f32 %v696_v59, %v670_v41  ;;  %v675_v11 = vmul.f32 %v23830_v47, %v23830_v47  ;;  %v23852_v16 = vsub.f32 %v22921_v12, %v631_v39  ;;  %v677_v9 = vmul.f32 %v23833_v55, %v23833_v55  ;;  %18737 = vmatprep.subr.bf16.mxu0 %v21351_v28  ;;  %v21360_v39 = vld [vmem:[%s30221_s3 + $0x20] sm:$0xff]   ;;  %v21362_v41 = vld [vmem:[%s30221_s3 + $0x68] sm:$0xff]   ;;  %v21368_v57 = vld [vmem:[%s30221_s3 + $0x30] sm:$0xff]  }
 0x192   : > { %694 = vadd.xlane.f32.xlu1 %v693_v48  ;;  %v700_v17 = vadd.f32 %v672_v61, %v671_v60  ;;  %v676_v10 = vmul.f32 %v23845_v0, %v23845_v0  ;;  %v678_v13 = vmul.f32 %v23836_v58, %v23836_v58  ;;  %18686 = vmatpush3.bf16.msra.mxu1 %v21352_v30  ;;  %v21365_v46 = vld [vmem:[%s30221_s3 + $0xe8] sm:$0xff]   ;;  %v21366_v48 = vld [vmem:[%s30221_s3 + $0x70] sm:$0xff]   ;;  %v21370_v60 = vld [vmem:[%s30221_s3 + $0x78] sm:$0xff]  }
 0x193   : > { %698 = vadd.xlane.f32.xlu0 %v697_v4  ;;  %v704_v18 = vadd.f32 %v675_v11, %v674_v1  ;;  %v679_v19 = vmul.f32 %v23852_v16, %v23852_v16  ;;  %18738 = vmatpush3.bf16.msra.mxu0 %v21353_v31  ;;  %v21369_v59 = vld [vmem:[%s30221_s3 + $0xf0] sm:$0xff]   ;;  %v21371_v61 = vld [vmem:[%s30221_s3 + $0x138] sm:$0xff]   ;;  %v23943_v1 = vld [vmem:[%s30221_s3 + $0x80] sm:$0xff]  }
 0x194   : > { %v701_v14 = vadd.f32 %v700_v17, %v673_v62  ;;  %v708_v15 = vadd.f32 %v678_v13, %v677_v9  ;;  %18687 = vmatprep.subr.bf16.mxu1 %v21354_v32  ;;  %18739 = vmatprep.subr.bf16.mxu0 %v21355_v34  ;;  %v21372_v62 = vld [vmem:[%s30221_s3 + $0x38] sm:$0xff]   ;;  %v21375_v4 = vld [vmem:[%s30221_s3 + $0x1c0] sm:$0xff]   ;;  %v30241_v9 = vlaneseq }
 0x195   : > { %v705_v20 = vadd.f32 %v704_v18, %v676_v10  ;;  %v21373_v63 = vld [vmem:[%s30221_s3 + $0xf8] sm:$0xff]   ;;  %v23955_v28 = vld [vmem:[%s30219_s1] sm:$0x7] }
 0x196   : > { %702 = vadd.xlane.f32.xlu1 %v701_v14  ;;  %v709_v22 = vadd.f32 %v708_v15, %v679_v19  ;;  %18688 = vmatpush3.bf16.msra.mxu1 %v21356_v35  ;;  %v23950_v14 = vshrl.u32 %v30241_v9, 7 }
 0x197   : > { %706 = vadd.xlane.f32.xlu0 %v705_v20  ;;  %18740 = vmatpush3.bf16.msra.mxu0 %v21357_v36 }
 0x198   : > { %18689 = vmatprep.subr.bf16.mxu1 %v21358_v37  ;;  %18741 = vmatprep.subr.bf16.mxu0 %v21359_v38  ;;  %30333 = vst [vmem:[#allocation20_spill] sm:$0xff] %v23950_v14  ;;  %v23958_v31 = vsub.s32 0, %v23950_v14  ;;  %v23961_v32 = vsub.s32 1, %v23950_v14 }
 0x19a   : > { %710 = vadd.xlane.f32.xlu1 %v709_v22  ;;  %18690 = vmatpush3.bf16.msra.mxu1 %v21360_v39  ;;  %30334 = vst [vmem:[#allocation21_spill] sm:$0xff] %v23958_v31  ;;  %30335 = vst [vmem:[#allocation22_spill] sm:$0xff] %v23961_v32 }
 0x19b   : > { %18742 = vmatpush3.bf16.msra.mxu0 %v21361_v40  ;;  %18691 = vmatprep.subr.bf16.mxu1 %v21362_v41  ;;  %v23965_v40 = vld [vmem:[#allocation5] sm:$0x7]  ;;  %v23969_v41 = vrot.slane %v23955_v28, %v23958_v31 }
 0x19c   : > { %18743 = vmatprep.subr.bf16.mxu0 %v21363_v42  ;;  %v23973_v42 = vrot.slane %v23955_v28, %v23961_v32 }
 0x19e   : > { %18692 = vmatpush3.bf16.msra.mxu1 %v21364_v44 }
 0x19f   : > { %18744 = vmatpush3.bf16.msra.mxu0 %v21365_v46  ;;  %18693 = vmatprep.subr.bf16.mxu1 %v21366_v48 }
 0x1a0   : > { %18745 = vmatprep.subr.bf16.mxu0 %v21367_v49 }
 0x1a2   : > { %18694 = vmatpush3.bf16.msra.mxu1 %v21368_v57 }
 0x1a3   : > { %18746 = vmatpush3.bf16.msra.mxu0 %v21369_v59  ;;  %18695 = vmatprep.subr.bf16.mxu1 %v21370_v60 }
 0x1a4   : > { %18747 = vmatprep.subr.bf16.mxu0 %v21371_v61 }
 0x1a6   : > { %18696 = vmatpush3.bf16.msra.mxu1 %v21372_v62  ;;  %v23985_v62 = vrot.slane %v23965_v40, %v23958_v31 }
 0x1a7   : > { %18748 = vmatpush3.bf16.msra.mxu0 %v21373_v63  ;;  %20025 = vmatprep.subr.bf16.mxu1 %v23943_v1  ;;  %v23989_v63 = vrot.slane %v23965_v40, %v23961_v32 }
 0x1a8   : > { %18785 = vmatprep.subr.bf16.mxu0 %v21375_v4 }
 0x217   : > { %v683_v11 = vpop.xlane.xlu0 %682 }
 0x218   : > { %v712_v12 = vmul.f32 0.0026041667, %v683_v11 }
 0x21a   : > { %v720_v17 = vadd.f32 1e-05, %v712_v12 }
 0x21b   : > { %v687_v10 = vpop.xlane.xlu1 %686  ;;  %v691_v13 = vpop.xlane.xlu0 %690 }
 0x21c   : > { %22686 = vrsqrt.f32 %v720_v17  ;;  %v713_v18 = vmul.f32 0.0026041667, %v687_v10  ;;  %v714_v19 = vmul.f32 0.0026041667, %v691_v13 }
 0x21e   : > { %v721_v15 = vadd.f32 1e-05, %v713_v18  ;;  %v722_v20 = vadd.f32 1e-05, %v714_v19 }
 0x21f   : > { %v695_v22 = vpop.xlane.xlu1 %694 }
 0x220   : > { %22688 = vrsqrt.f32 %v721_v15  ;;  %v715_v24 = vmul.f32 0.0026041667, %v695_v22  ;;  %v699_v25 = vpop.xlane.xlu0 %698 }
 0x221   : > { %22690 = vrsqrt.f32 %v722_v20  ;;  %v716_v26 = vmul.f32 0.0026041667, %v699_v25 }
 0x222   : > { %v723_v30 = vadd.f32 1e-05, %v715_v24 }
 0x223   : > { %v724_v34 = vadd.f32 1e-05, %v716_v26  ;;  %v703_v35 = vpop.xlane.xlu1 %702 }
 0x224   : > { %22692 = vrsqrt.f32 %v723_v30  ;;  %v717_v36 = vmul.f32 0.0026041667, %v703_v35  ;;  %v707_v37 = vpop.xlane.xlu0 %706  ;;  %v21376_v35 = vld [vmem:[%s30221_s3 + $0x180] sm:$0xff]  }
 0x225   : > { %22694 = vrsqrt.f32 %v724_v34  ;;  %v718_v44 = vmul.f32 0.0026041667, %v707_v37 }
 0x226   : > { %v23963_v38 = vpop.eup %22686  ;;  %v725_v39 = vadd.f32 1e-05, %v717_v36 }
 0x227   : > { %v711_v46 = vpop.xlane.xlu1 %710  ;;  %v736_v48 = vmul.f32 %v23963_v38, %v23743_v50  ;;  %v737_v49 = vmul.f32 %v23963_v38, %v23746_v51  ;;  %v726_v4 = vadd.f32 1e-05, %v718_v44 }
 0x228   : > { %22696 = vrsqrt.f32 %v725_v39  ;;  %v719_v57 = vmul.f32 0.0026041667, %v711_v46 }
 0x229   : > { %v776_v51 = vmul.f32 %v23969_v41, %v736_v48  ;;  %v777_v11 = vmul.f32 %v23973_v42, %v737_v49 }
 0x22a   : > { %v23979_v59 = vpop.eup %22688  ;;  %v727_v60 = vadd.f32 1e-05, %v719_v57  ;;  %v21378_v57 = vld [vmem:[%s30221_s3 + $0x1c8] sm:$0xff]  }
 0x22b   : > { %v23981_v61 = vpop.eup %22690  ;;  %v739_v50 = vmul.f32 %v23979_v59, %v23773_v2  ;;  %v740_v12 = vmul.f32 %v23979_v59, %v23776_v3  ;;  %v816_v15 = vadd.f32 %v23985_v62, %v776_v51  ;;  %v817_v3 = vadd.f32 %v23989_v63, %v777_v11 }
 0x22c   : > { %v743_v17 = vmul.f32 %v23981_v61, %v23755_v54  ;;  %22698 = vrsqrt.f32 %v727_v60  ;;  %v742_v34 = vmul.f32 %v23981_v61, %v23752_v53  ;;  %v21377_v53 = vld [vmem:[%s30221_s3 + $0x88] sm:$0xff]  }
 0x22d   : > { %v779_v10 = vmul.f32 %v23969_v41, %v739_v50  ;;  %v780_v18 = vmul.f32 %v23973_v42, %v740_v12  ;;  %22700 = vrsqrt.f32 %v726_v4  ;;  %v21379_v60 = vld [vmem:[%s30221_s3 + $0x188] sm:$0xff]  }
 0x22e   : > { %v24000_v13 = vpop.eup %22692  ;;  %v783_v54 = vmul.f32 %v23973_v42, %v743_v17 }
 0x22f   : > { %v819_v2 = vadd.f32 %v23985_v62, %v779_v10  ;;  %v746_v19 = vmul.f32 %v24000_v13, %v23785_v7  ;;  %v820_v20 = vadd.f32 %v23989_v63, %v780_v18  ;;  %v24010_v22 = vpop.eup %22694  ;;  %v745_v24 = vmul.f32 %v24000_v13, %v23782_v6 }
 0x230   : > { %v823_v36 = vadd.f32 %v23989_v63, %v783_v54  ;;  %v749_v6 = vmul.f32 %v24010_v22, %v23802_v23  ;;  %v782_v23 = vmul.f32 %v23969_v41, %v742_v34  ;;  %v748_v10 = vmul.f32 %v24010_v22, %v23799_v21  ;;  %v21383_v21 = vld [vmem:[%s30221_s3 + $0x98] sm:$0xff]  }
 0x231   : > { %v24016_v26 = vpack.c.bf16 %v819_v2, %v816_v15  ;;  %v24018_v30 = vpack.c.bf16 %v820_v20, %v817_v3  ;;  %v786_v7 = vmul.f32 %v23973_v42, %v746_v19  ;;  %v785_v44 = vmul.f32 %v23969_v41, %v745_v24  ;;  %v21385_v34 = vld [vmem:[%s30221_s3 + $0x198] sm:$0xff]  }
 0x232   : > { %v24014_v25 = vpop.eup %22696  ;;  %v789_v49 = vmul.f32 %v23973_v42, %v749_v6  ;;  %v822_v17 = vadd.f32 %v23985_v62, %v782_v23  ;;  %v788_v54 = vmul.f32 %v23969_v41, %v748_v10  ;;  %v24094_v24 = vsub.s32 2, %v23950_v14  ;;  %v21388_v23 = vld [vmem:[%s30221_s3 + $0x1a0] sm:$0xff]  }
 0x233   : > { %v826_v37 = vadd.f32 %v23989_v63, %v786_v7  ;;  %v752_v39 = vmul.f32 %v24014_v25, %v23810_v29  ;;  %1076 = vmatprep.mubr.bf16.mxu1 %v24018_v30  ;;  %1399 = vmatprep.mubr.bf16.mxu0 %v24018_v30  ;;  %v825_v4 = vadd.f32 %v23985_v62, %v785_v44 }
 0x234   : > { %1077 = vmatmul.mubr.bf16.vlgmr.msra.gmra.mrb[0].mxu1 %v24016_v26  ;;  %1400 = vmatmul.mubr.bf16.vlgmr.msra.gmra.mrb[0].mxu0 %v24016_v26  ;;  %v751_v51 = vmul.f32 %v24014_v25, %v23807_v27  ;;  %v21381_v27 = vld [vmem:[%s30221_s3 + $0x1d0] sm:$0xff]   ;;  %v829_v18 = vadd.f32 %v23989_v63, %v789_v49  ;;  %30336 = vst [vmem:[#allocation23_spill] sm:$0xff] %v24094_v24  ;;  %v21389_v49 = vld [vmem:[%s30221_s3 + $0xa8] sm:$0xff]  }
 0x235   : > { %v24038_v46 = vpack.c.bf16 %v826_v37, %v823_v36  ;;  %v792_v29 = vmul.f32 %v23973_v42, %v752_v39  ;;  %20026 = vmatpush3.bf16.msra.mxu1 %v23943_v1  ;;  %18786 = vmatpush3.bf16.msra.mxu0 %v21376_v35  ;;  %v21380_v1 = vld [vmem:[%s30221_s3 + $0x90] sm:$0xff]   ;;  %v24082_v19 = vpack.c.bf16 %v825_v4, %v822_v17 }
 0x236   : > { %v24041_v48 = vpop.eup %22698  ;;  %20027 = vmatprep.subr.bf16.mxu1 %v21377_v53  ;;  %v791_v15 = vmul.f32 %v23969_v41, %v751_v51  ;;  %18787 = vmatprep.subr.bf16.mxu0 %v21378_v57  ;;  %v741_v37 = vmul.f32 %v23979_v59, %v23779_v5  ;;  %v828_v39 = vadd.f32 %v23985_v62, %v788_v54 }
 0x237   : > { %v24054_v50 = vpop.eup %22700  ;;  %v832_v11 = vadd.f32 %v23989_v63, %v792_v29  ;;  %v758_v12 = vmul.f32 %v24041_v48, %v23836_v58  ;;  %1084 = vmatprep.mubr.bf16.mxu1 %v24038_v46  ;;  %1407 = vmatprep.mubr.bf16.mxu0 %v24038_v46  ;;  %v21382_v58 = vld [vmem:[%s30221_s3 + $0x190] sm:$0xff]   ;;  %v757_v36 = vmul.f32 %v24041_v48, %v23833_v55  ;;  %v21387_v55 = vld [vmem:[%s30221_s3 + $0x1e0] sm:$0xff]  }
 0x238   : > { %v755_v2 = vmul.f32 %v24054_v50, %v23830_v47  ;;  %v21384_v47 = vld [vmem:[%s30221_s3 + $0x1d8] sm:$0xff]   ;;  %v831_v35 = vadd.f32 %v23985_v62, %v791_v15  ;;  %v754_v44 = vmul.f32 %v24054_v50, %v23827_v45  ;;  %v738_v5 = vmul.f32 %v23963_v38, %v23749_v52  ;;  %v21390_v38 = vld [vmem:[%s30221_s3 + $0x1e8] sm:$0xff]  }
 0x239   : > { %20028 = vmatpush3.bf16.msra.mxu1 %v21377_v53  ;;  %v24088_v3 = vpack.c.bf16 %v832_v11, %v829_v18  ;;  %v798_v20 = vmul.f32 %v23973_v42, %v758_v12  ;;  %18788 = vmatpush3.bf16.msra.mxu0 %v21379_v60  ;;  %v24120_v53 = vrot.slane %v23955_v28, %v24094_v24  ;;  %v21393_v12 = vld [vmem:[%s30221_s3 + $0x1f0] sm:$0xff]  }
 0x23a   : > { %20029 = vmatprep.subr.bf16.mxu1 %v21380_v1  ;;  %18789 = vmatprep.subr.bf16.mxu0 %v21381_v27  ;;  %v795_v7 = vmul.f32 %v23973_v42, %v755_v2  ;;  %v21386_v42 = vld [vmem:[%s30221_s3 + $0xa0] sm:$0xff]   ;;  %v24128_v29 = vpack.c.bf16 %v831_v35, %v828_v39  ;;  %v797_v45 = vmul.f32 %v23969_v41, %v757_v36 }
 0x23b   : > { %v838_v6 = vadd.f32 %v23989_v63, %v798_v20  ;;  %v781_v28 = vmul.f32 %v24120_v53, %v741_v37  ;;  %v794_v52 = vmul.f32 %v23969_v41, %v754_v44  ;;  %v778_v60 = vmul.f32 %v24120_v53, %v738_v5  ;;  %v21391_v41 = vld [vmem:[%s30221_s3 + $0x1a8] sm:$0xff]   ;;  %v21405_v44 = vld [vmem:[%s30221_s3 + $0x290] sm:$0xff]   ;;  %v21407_v5 = vld [vmem:[%s30221_s3 + $0x158] sm:$0xff]  }
 0x23c   : > { %1085 = vmatmul.mubr.bf16.gmra.mrb[4].mxu1 %v24082_v19  ;;  %1408 = vmatmul.mubr.bf16.gmra.mrb[4].mxu0 %v24082_v19  ;;  %v835_v59 = vadd.f32 %v23989_v63, %v795_v7  ;;  %v24144_v63 = vrot.slane %v23965_v40, %v24094_v24  ;;  %v837_v4 = vadd.f32 %v23985_v62, %v797_v45  ;;  %v21392_v40 = vld [vmem:[%s30221_s3 + $0xb0] sm:$0xff]   ;;  %v21403_v37 = vld [vmem:[%s30221_s3 + $0x248] sm:$0xff]   ;;  %v21409_v45 = vld [vmem:[%s30221_s3 + $0x258] sm:$0xff]  }
 0x23d   : > { %1092 = vmatprep.mubr.bf16.mxu1 %v24088_v3  ;;  %20030 = vmatpush3.bf16.msra.mxu1 %v21380_v1  ;;  %v747_v1 = vmul.f32 %v24000_v13, %v23788_v8  ;;  %v834_v11 = vadd.f32 %v23985_v62, %v794_v52  ;;  %v744_v10 = vmul.f32 %v23981_v61, %v23758_v56  ;;  %v21394_v8 = vld [vmem:[%s30221_s3 + $0x1b0] sm:$0xff]   ;;  %v21395_v62 = vld [vmem:[%s30221_s3 + $0xb8] sm:$0xff]   ;;  %v21412_v52 = vld [vmem:[%s30221_s3 + $0x260] sm:$0xff]  }
 0x23e   : > { %1415 = vmatprep.mubr.bf16.mxu0 %v24088_v3  ;;  %18790 = vmatpush3.bf16.msra.mxu0 %v21382_v58  ;;  %v24135_v57 = vpack.c.bf16 %v838_v6, %v835_v59  ;;  %v821_v51 = vadd.f32 %v24144_v63, %v781_v28  ;;  %v818_v17 = vadd.f32 %v24144_v63, %v778_v60  ;;  %v21404_v6 = vld [vmem:[%s30221_s3 + $0x150] sm:$0xff]   ;;  %v21411_v28 = vld [vmem:[%s30221_s3 + $0x2a0] sm:$0xff]   ;;  %v21415_v60 = vld [vmem:[%s30221_s3 + $0x268] sm:$0xff]  }
 0x23f   : > { %20031 = vmatprep.subr.bf16.mxu1 %v21383_v21  ;;  %18791 = vmatprep.subr.bf16.mxu0 %v21384_v47  ;;  %v753_v27 = vmul.f32 %v24014_v25, %v23824_v43  ;;  %v24172_v13 = vpack.c.bf16 %v837_v4, %v834_v11  ;;  %v787_v2 = vmul.f32 %v24120_v53, %v747_v1  ;;  %v21396_v43 = vld [vmem:[%s30221_s3 + $0x1f8] sm:$0xff]   ;;  %v21399_v47 = vld [vmem:[%s30221_s3 + $0x280] sm:$0xff]   ;;  %v21417_v4 = vld [vmem:[%s30221_s3 + $0x2b0] sm:$0xff]  }
 0x240   : > { %v24177_v18 = vpack.c.bf16 %v821_v51, %v818_v17  ;;  %v750_v56 = vmul.f32 %v24010_v22, %v23815_v33  ;;  %v784_v61 = vmul.f32 %v24120_v53, %v744_v10  ;;  %v21397_v33 = vld [vmem:[%s30221_s3 + $0x1b8] sm:$0xff]   ;;  %v21398_v22 = vld [vmem:[%s30221_s3 + $0x140] sm:$0xff]   ;;  %v759_v15 = vmul.f32 %v24041_v48, %v23852_v16  ;;  %v21401_v16 = vld [vmem:[%s30221_s3 + $0x148] sm:$0xff]  }
 0x241   : > { %20032 = vmatpush3.bf16.msra.mxu1 %v21383_v21  ;;  %v793_v25 = vmul.f32 %v24120_v53, %v753_v27  ;;  %v827_v58 = vadd.f32 %v24144_v63, %v787_v2  ;;  %v756_v7 = vmul.f32 %v24054_v50, %v23845_v0  ;;  %v21402_v50 = vld [vmem:[%s30221_s3 + $0x288] sm:$0xff]   ;;  %v21419_v51 = vld [vmem:[%s30221_s3 + $0x178] sm:$0xff]   ;;  %v21423_v17 = vld [vmem:[%s30221_s3 + $0x340] sm:$0xff]  }
 0x242   : > { %18792 = vmatpush3.bf16.msra.mxu0 %v21385_v34  ;;  %20033 = vmatprep.subr.bf16.mxu1 %v21386_v42  ;;  %v790_v21 = vmul.f32 %v24120_v53, %v750_v56  ;;  %v824_v20 = vadd.f32 %v24144_v63, %v784_v61  ;;  %v21400_v34 = vld [vmem:[%s30221_s3 + $0x240] sm:$0xff]   ;;  %v799_v36 = vmul.f32 %v24120_v53, %v759_v15  ;;  %v21420_v1 = vld [vmem:[%s30221_s3 + $0x2b8] sm:$0xff]   ;;  %v21425_v27 = vld [vmem:[%s30221_s3 + $0x208] sm:$0xff]  }
 0x243   : > { %18793 = vmatprep.subr.bf16.mxu0 %v21387_v55  ;;  %v833_v54 = vadd.f32 %v24144_v63, %v793_v25  ;;  %v796_v0 = vmul.f32 %v24120_v53, %v756_v7  ;;  %v21406_v53 = vld [vmem:[%s30221_s3 + $0x250] sm:$0xff]   ;;  %v21421_v11 = vld [vmem:[%s30221_s3 + $0x278] sm:$0xff]   ;;  %v21424_v10 = vld [vmem:[%s30221_s3 + $0x300] sm:$0xff]  }
 0x244   : > { %1093 = vmatmul.mubr.bf16.gmra.mrb[8].mxu1 %v24128_v29  ;;  %1416 = vmatmul.mubr.bf16.gmra.mrb[8].mxu0 %v24128_v29  ;;  %v24214_v48 = vpack.c.bf16 %v827_v58, %v824_v20  ;;  %v830_v35 = vadd.f32 %v24144_v63, %v790_v21  ;;  %v839_v39 = vadd.f32 %v24144_v63, %v799_v36  ;;  %v21427_v2 = vld [vmem:[%s30221_s3 + $0x308] sm:$0xff]   ;;  %v21429_v56 = vld [vmem:[%s30221_s3 + $0x350] sm:$0xff]   ;;  %v21431_v61 = vld [vmem:[%s30221_s3 + $0x218] sm:$0xff]  }
 0x245   : > { %1100 = vmatprep.mubr.bf16.mxu1 %v24135_v57  ;;  %20034 = vmatpush3.bf16.msra.mxu1 %v21386_v42  ;;  %v836_v55 = vadd.f32 %v24144_v63, %v796_v0  ;;  %v21414_v63 = vld [vmem:[%s30221_s3 + $0x2a8] sm:$0xff]   ;;  %v21432_v25 = vld [vmem:[%s30221_s3 + $0x358] sm:$0xff]   ;;  %v21435_v58 = vld [vmem:[%s30221_s3 + $0x360] sm:$0xff]  }
 0x246   : > { %1423 = vmatprep.mubr.bf16.mxu0 %v24135_v57  ;;  %18794 = vmatpush3.bf16.msra.mxu0 %v21388_v23  ;;  %v24218_v42 = vpack.c.bf16 %v833_v54, %v830_v35  ;;  %v21408_v23 = vld [vmem:[%s30221_s3 + $0x298] sm:$0xff]   ;;  %v21437_v21 = vld [vmem:[%s30221_s3 + $0x228] sm:$0xff]   ;;  %v21436_v15 = vld [vmem:[%s30221_s3 + $0x320] sm:$0xff]  }
 0x247   : > { %20035 = vmatprep.subr.bf16.mxu1 %v21389_v49  ;;  %18795 = vmatprep.subr.bf16.mxu0 %v21390_v38  ;;  %v24245_v59 = vpack.c.bf16 %v839_v39, %v836_v55  ;;  %v21413_v38 = vld [vmem:[%s30221_s3 + $0x168] sm:$0xff]   ;;  %v21440_v20 = vld [vmem:[%s30221_s3 + $0x230] sm:$0xff]   ;;  %v21444_v35 = vld [vmem:[%s30221_s3 + $0x378] sm:$0xff]  }
 0x248   : > { %v21439_v54 = vld [vmem:[%s30221_s3 + $0x328] sm:$0xff]   ;;  %v21441_v7 = vld [vmem:[%s30221_s3 + $0x370] sm:$0xff]   ;;  %v21446_v36 = vld [vmem:[%s30221_s3 + $0x2c0] sm:$0xff]  }
 0x249   : > { %20036 = vmatpush3.bf16.msra.mxu1 %v21389_v49  ;;  %v21410_v49 = vld [vmem:[%s30221_s3 + $0x160] sm:$0xff]   ;;  %v21445_v0 = vld [vmem:[%s30221_s3 + $0x338] sm:$0xff]   ;;  %v21450_v39 = vld [vmem:[%s30221_s3 + $0x408] sm:$0xff]  }
 0x24a   : > { %18796 = vmatpush3.bf16.msra.mxu0 %v21391_v41  ;;  %20037 = vmatprep.subr.bf16.mxu1 %v21392_v40  ;;  %v21416_v41 = vld [vmem:[%s30221_s3 + $0x170] sm:$0xff]   ;;  %v21451_v55 = vld [vmem:[%s30221_s3 + $0x3c8] sm:$0xff]  }
 0x24b   : > { %18797 = vmatprep.subr.bf16.mxu0 %v21393_v12  ;;  %v21422_v12 = vld [vmem:[%s30221_s3 + $0x200] sm:$0xff]  }
 0x24c   : > { %1101 = vmatmul.mubr.bf16.gmra.mrb[12].mxu1 %v24172_v13  ;;  %1424 = vmatmul.mubr.bf16.gmra.mrb[12].mxu0 %v24172_v13 }
 0x24d   : > { %20041 = vmatprep.mubr.bf16.mxu1 %v24177_v18  ;;  %20038 = vmatpush3.bf16.msra.mxu1 %v21392_v40  ;;  %v21418_v40 = vld [vmem:[%s30221_s3 + $0x270] sm:$0xff]  }
 0x24e   : > { %1722 = vmatprep.mubr.bf16.mxu0 %v24018_v30  ;;  %18798 = vmatpush3.bf16.msra.mxu0 %v21394_v8  ;;  %v21426_v8 = vld [vmem:[%s30221_s3 + $0x348] sm:$0xff]  }
 0x24f   : > { %20039 = vmatprep.subr.bf16.mxu1 %v21395_v62  ;;  %18799 = vmatprep.subr.bf16.mxu0 %v21396_v43  ;;  %v21430_v43 = vld [vmem:[%s30221_s3 + $0x310] sm:$0xff]  }
 0x251   : > { %20040 = vmatpush3.bf16.msra.mxu1 %v21395_v62  ;;  %v21428_v62 = vld [vmem:[%s30221_s3 + $0x210] sm:$0xff]  }
 0x252   : > { %18800 = vmatpush3.bf16.msra.mxu0 %v21397_v33  ;;  %20049 = vmatprep.subr.bf16.mxu1 %v21398_v22  ;;  %v21434_v33 = vld [vmem:[%s30221_s3 + $0x220] sm:$0xff]  }
 0x253   : > { %18837 = vmatprep.subr.bf16.mxu0 %v21399_v47  ;;  %v21438_v47 = vld [vmem:[%s30221_s3 + $0x368] sm:$0xff]  }
 0x254   : > { %20042 = vmatmul.mubr.bf16.vlgmr.msra.gmra.mrb[16].mxu1 %v24214_v48 }
 0x255   : > { %20050 = vmatpush3.bf16.msra.mxu1 %v21398_v22  ;;  %1723 = vmatmul.mubr.bf16.vlgmr.msra.gmra.mrb[16].mxu0 %v24016_v26  ;;  %v21433_v22 = vld [vmem:[%s30221_s3 + $0x318] sm:$0xff]  }
 0x256   : > { %18838 = vmatpush3.bf16.msra.mxu0 %v21400_v34  ;;  %20045 = vmatprep.mubr.bf16.mxu1 %v24218_v42  ;;  %v21443_v34 = vld [vmem:[%s30221_s3 + $0x238] sm:$0xff]  }
 0x257   : > { %1730 = vmatprep.mubr.bf16.mxu0 %v24038_v46  ;;  %20051 = vmatprep.subr.bf16.mxu1 %v21401_v16 }
 0x258   : > { %18839 = vmatprep.subr.bf16.mxu0 %v21402_v50  ;;  %v21447_v50 = vld [vmem:[%s30221_s3 + $0x400] sm:$0xff]  }
 0x259   : > { %20052 = vmatpush3.bf16.msra.mxu1 %v21401_v16  ;;  %v21442_v16 = vld [vmem:[%s30221_s3 + $0x330] sm:$0xff]  }
 0x25a   : > { %18840 = vmatpush3.bf16.msra.mxu0 %v21403_v37  ;;  %20053 = vmatprep.subr.bf16.mxu1 %v21404_v6  ;;  %v21448_v37 = vld [vmem:[%s30221_s3 + $0x3c0] sm:$0xff]  }
 0x25b   : > { %18841 = vmatprep.subr.bf16.mxu0 %v21405_v44  ;;  %v21452_v44 = vld [vmem:[%s30221_s3 + $0x2d0] sm:$0xff]  }
 0x25c   : > { %20046 = vmatmul.mubr.bf16.gmra.mrb[20].mxu1 %v24245_v59 }
 0x25d   : > { %20054 = vmatpush3.bf16.msra.mxu1 %v21404_v6  ;;  %1731 = vmatmul.mubr.bf16.gmra.mrb[20].mxu0 %v24082_v19  ;;  %v21449_v6 = vld [vmem:[%s30221_s3 + $0x2c8] sm:$0xff]  }
 0x25e   : > { %18842 = vmatpush3.bf16.msra.mxu0 %v21406_v53  ;;  %20065 = vmatprep.mubr.bf16.mxu1 %v24177_v18  ;;  %v21453_v53 = vld [vmem:[%s30221_s3 + $0x410] sm:$0xff]  }
 0x25f   : > { %1738 = vmatprep.mubr.bf16.mxu0 %v24088_v3  ;;  %20055 = vmatprep.subr.bf16.mxu1 %v21407_v5 }
 0x260   : > { %18843 = vmatprep.subr.bf16.mxu0 %v21408_v23  ;;  %v21455_v23 = vld [vmem:[%s30221_s3 + $0x2d8] sm:$0xff]  }
 0x261   : > { %20056 = vmatpush3.bf16.msra.mxu1 %v21407_v5  ;;  %v21454_v5 = vld [vmem:[%s30221_s3 + $0x3d0] sm:$0xff]  }
 0x262   : > { %18844 = vmatpush3.bf16.msra.mxu0 %v21409_v45  ;;  %20057 = vmatprep.subr.bf16.mxu1 %v21410_v49  ;;  %v21456_v45 = vld [vmem:[%s30221_s3 + $0x418] sm:$0xff]  }
 0x263   : > { %18845 = vmatprep.subr.bf16.mxu0 %v21411_v28  ;;  %v21457_v28 = vld [vmem:[%s30221_s3 + $0x3d8] sm:$0xff]  }
 0x265   : > { %20058 = vmatpush3.bf16.msra.mxu1 %v21410_v49  ;;  %1739 = vmatmul.mubr.bf16.gmra.mrb[24].mxu0 %v24128_v29  ;;  %v21458_v49 = vld [vmem:[%s30221_s3 + $0x2e0] sm:$0xff]  }
 0x266   : > { %18846 = vmatpush3.bf16.msra.mxu0 %v21412_v52  ;;  %1746 = vmatprep.mubr.bf16.mxu0 %v24135_v57  ;;  %v21459_v52 = vld [vmem:[%s30221_s3 + $0x420] sm:$0xff]  }
 0x267   : > { %20059 = vmatprep.subr.bf16.mxu1 %v21413_v38  ;;  %18847 = vmatprep.subr.bf16.mxu0 %v21414_v63  ;;  %v21460_v63 = vld [vmem:[%s30221_s3 + $0x3e0] sm:$0xff]  }
 0x269   : > { %20060 = vmatpush3.bf16.msra.mxu1 %v21413_v38  ;;  %v21461_v38 = vld [vmem:[%s30221_s3 + $0x2e8] sm:$0xff]  }
 0x26a   : > { %18848 = vmatpush3.bf16.msra.mxu0 %v21415_v60  ;;  %20061 = vmatprep.subr.bf16.mxu1 %v21416_v41  ;;  %v21462_v60 = vld [vmem:[%s30221_s3 + $0x428] sm:$0xff]  }
 0x26b   : > { %18849 = vmatprep.subr.bf16.mxu0 %v21417_v4  ;;  %v21464_v4 = vld [vmem:[%s30221_s3 + $0x2f0] sm:$0xff]  }
 0x26d   : > { %20062 = vmatpush3.bf16.msra.mxu1 %v21416_v41  ;;  %1747 = vmatmul.mubr.bf16.gmra.mrb[28].mxu0 %v24172_v13  ;;  %v21463_v41 = vld [vmem:[%s30221_s3 + $0x3e8] sm:$0xff]  }
 0x26e   : > { %18850 = vmatpush3.bf16.msra.mxu0 %v21418_v40  ;;  %2045 = vmatprep.mubr.bf16.mxu0 %v24018_v30  ;;  %v21465_v40 = vld [vmem:[%s30221_s3 + $0x430] sm:$0xff]  }
 0x26f   : > { %20063 = vmatprep.subr.bf16.mxu1 %v21419_v51  ;;  %18851 = vmatprep.subr.bf16.mxu0 %v21420_v1  ;;  %v21467_v1 = vld [vmem:[%s30221_s3 + $0x2f8] sm:$0xff]  }
 0x271   : > { %20064 = vmatpush3.bf16.msra.mxu1 %v21419_v51  ;;  %v21466_v51 = vld [vmem:[%s30221_s3 + $0x3f0] sm:$0xff]  }
 0x272   : > { %18852 = vmatpush3.bf16.msra.mxu0 %v21421_v11  ;;  %20073 = vmatprep.subr.bf16.mxu1 %v21422_v12  ;;  %v21468_v11 = vld [vmem:[%s30221_s3 + $0x438] sm:$0xff]  }
 0x273   : > { %18889 = vmatprep.subr.bf16.mxu0 %v21423_v17  ;;  %v21470_v17 = vld [vmem:[%s30221_s3 + $0x380] sm:$0xff]  }
 0x274   : > { %20066 = vmatmul.mubr.bf16.vlgmr.msra.gmra.mrb[24].mxu1 %v24214_v48 }
 0x275   : > { %20069 = vmatprep.mubr.bf16.mxu1 %v24218_v42  ;;  %20074 = vmatpush3.bf16.msra.mxu1 %v21422_v12  ;;  %v21469_v12 = vld [vmem:[%s30221_s3 + $0x3f8] sm:$0xff]  }
 0x276   : > { %2046 = vmatmul.mubr.bf16.vlgmr.msra.gmra.mrb[32].mxu0 %v24016_v26  ;;  %20075 = vmatprep.subr.bf16.mxu1 %v21425_v27 }
 0x277   : > { %18890 = vmatpush3.bf16.msra.mxu0 %v21424_v10  ;;  %2053 = vmatprep.mubr.bf16.mxu0 %v24038_v46  ;;  %v21471_v10 = vld [vmem:[%s30222_s4 + $0x40] sm:$0xff]  }
 0x278   : > { %18891 = vmatprep.subr.bf16.mxu0 %v21426_v8  ;;  %v21473_v8 = vld [vmem:[%s30221_s3 + $0x388] sm:$0xff]  }
 0x279   : > { %20076 = vmatpush3.bf16.msra.mxu1 %v21425_v27  ;;  %v21472_v27 = vld [vmem:[%s30222_s4] sm:$0xff]  }
 0x27a   : > { %20077 = vmatprep.subr.bf16.mxu1 %v21428_v62 }
 0x27b   : > { %18892 = vmatpush3.bf16.msra.mxu0 %v21427_v2  ;;  %v21475_v2 = vld [vmem:[%s30222_s4 + $0x8] sm:$0xff]  }
 0x27c   : > { %20070 = vmatmul.mubr.bf16.gmra.mrb[28].mxu1 %v24245_v59  ;;  %18893 = vmatprep.subr.bf16.mxu0 %v21429_v56  ;;  %v21476_v56 = vld [vmem:[%s30221_s3 + $0x390] sm:$0xff]  }
 0x27d   : > { %20078 = vmatpush3.bf16.msra.mxu1 %v21428_v62  ;;  %20089 = vmatprep.mubr.bf16.mxu1 %v24177_v18  ;;  %v21474_v62 = vld [vmem:[%s30222_s4 + $0x48] sm:$0xff]  }
 0x27e   : > { %2054 = vmatmul.mubr.bf16.gmra.mrb[36].mxu0 %v24082_v19  ;;  %20079 = vmatprep.subr.bf16.mxu1 %v21431_v61 }
 0x27f   : > { %18894 = vmatpush3.bf16.msra.mxu0 %v21430_v43  ;;  %2061 = vmatprep.mubr.bf16.mxu0 %v24088_v3  ;;  %v21477_v43 = vld [vmem:[%s30222_s4 + $0x50] sm:$0xff]  }
 0x280   : > { %18895 = vmatprep.subr.bf16.mxu0 %v21432_v25  ;;  %v21479_v25 = vld [vmem:[%s30221_s3 + $0x398] sm:$0xff]  }
 0x281   : > { %20080 = vmatpush3.bf16.msra.mxu1 %v21431_v61  ;;  %v21478_v61 = vld [vmem:[%s30222_s4 + $0x10] sm:$0xff]  }
 0x282   : > { %20081 = vmatprep.subr.bf16.mxu1 %v21434_v33 }
 0x283   : > { %18896 = vmatpush3.bf16.msra.mxu0 %v21433_v22  ;;  %v21481_v22 = vld [vmem:[%s30222_s4 + $0x18] sm:$0xff]  }
 0x284   : > { %18897 = vmatprep.subr.bf16.mxu0 %v21435_v58  ;;  %v21482_v58 = vld [vmem:[%s30221_s3 + $0x3a0] sm:$0xff]  }
 0x285   : > { %20082 = vmatpush3.bf16.msra.mxu1 %v21434_v33  ;;  %v21480_v33 = vld [vmem:[%s30222_s4 + $0x58] sm:$0xff]  }
 0x286   : > { %2062 = vmatmul.mubr.bf16.gmra.mrb[40].mxu0 %v24128_v29  ;;  %20083 = vmatprep.subr.bf16.mxu1 %v21437_v21 }
 0x287   : > { %18898 = vmatpush3.bf16.msra.mxu0 %v21436_v15  ;;  %2069 = vmatprep.mubr.bf16.mxu0 %v24135_v57  ;;  %v21484_v15 = vld [vmem:[%s30222_s4 + $0x20] sm:$0xff]  }
 0x288   : > { %18899 = vmatprep.subr.bf16.mxu0 %v21438_v47  ;;  %v21485_v47 = vld [vmem:[%s30221_s3 + $0x3a8] sm:$0xff]  }
 0x289   : > { %20084 = vmatpush3.bf16.msra.mxu1 %v21437_v21  ;;  %v21483_v21 = vld [vmem:[%s30222_s4 + $0x60] sm:$0xff]  }
 0x28a   : > { %20085 = vmatprep.subr.bf16.mxu1 %v21440_v20 }
 0x28b   : > { %18900 = vmatpush3.bf16.msra.mxu0 %v21439_v54  ;;  %v21487_v54 = vld [vmem:[%s30222_s4 + $0x28] sm:$0xff]  }
 0x28c   : > { %18901 = vmatprep.subr.bf16.mxu0 %v21441_v7  ;;  %v21488_v7 = vld [vmem:[%s30221_s3 + $0x3b0] sm:$0xff]  }
 0x28d   : > { %20086 = vmatpush3.bf16.msra.mxu1 %v21440_v20  ;;  %v21486_v20 = vld [vmem:[%s30222_s4 + $0x68] sm:$0xff]  }
 0x28e   : > { %2070 = vmatmul.mubr.bf16.gmra.mrb[44].mxu0 %v24172_v13  ;;  %20087 = vmatprep.subr.bf16.mxu1 %v21443_v34 }
 0x28f   : > { %18902 = vmatpush3.bf16.msra.mxu0 %v21442_v16  ;;  %2368 = vmatprep.mubr.bf16.mxu0 %v24018_v30  ;;  %v21490_v16 = vld [vmem:[%s30222_s4 + $0x30] sm:$0xff]  }
 0x290   : > { %18903 = vmatprep.subr.bf16.mxu0 %v21444_v35  ;;  %v21491_v35 = vld [vmem:[%s30221_s3 + $0x3b8] sm:$0xff]  }
 0x291   : > { %20088 = vmatpush3.bf16.msra.mxu1 %v21443_v34  ;;  %v21489_v34 = vld [vmem:[%s30222_s4 + $0x70] sm:$0xff]  }
 0x292   : > { %20097 = vmatprep.subr.bf16.mxu1 %v21446_v36 }
 0x293   : > { %18904 = vmatpush3.bf16.msra.mxu0 %v21445_v0  ;;  %v21493_v0 = vld [vmem:[%s30222_s4 + $0x38] sm:$0xff]  }
 0x294   : > { %20090 = vmatmul.mubr.bf16.vlgmr.msra.gmra.mrb[32].mxu1 %v24214_v48  ;;  %18941 = vmatprep.subr.bf16.mxu0 %v21447_v50  ;;  %v21494_v50 = vld [vmem:[%s30221_s3 + $0x440] sm:$0xff]  }
 0x295   : > { %20093 = vmatprep.mubr.bf16.mxu1 %v24218_v42  ;;  %20098 = vmatpush3.bf16.msra.mxu1 %v21446_v36  ;;  %v21492_v36 = vld [vmem:[%s30222_s4 + $0x78] sm:$0xff]  }
 0x296   : > { %2369 = vmatmul.mubr.bf16.vlgmr.msra.gmra.mrb[48].mxu0 %v24016_v26  ;;  %20099 = vmatprep.subr.bf16.mxu1 %v21449_v6 }
 0x297   : > { %18942 = vmatpush3.bf16.msra.mxu0 %v21448_v37  ;;  %2376 = vmatprep.mubr.bf16.mxu0 %v24038_v46  ;;  %v21495_v37 = vld [vmem:[%s30222_s4 + $0x100] sm:$0xff]  }
 0x298   : > { %18943 = vmatprep.subr.bf16.mxu0 %v21450_v39  ;;  %v21497_v39 = vld [vmem:[%s30221_s3 + $0x448] sm:$0xff]  }
 0x299   : > { %20100 = vmatpush3.bf16.msra.mxu1 %v21449_v6  ;;  %v21496_v6 = vld [vmem:[%s30222_s4 + $0xc0] sm:$0xff]  }
 0x29a   : > { %20101 = vmatprep.subr.bf16.mxu1 %v21452_v44 }
 0x29b   : > { %18944 = vmatpush3.bf16.msra.mxu0 %v21451_v55  ;;  %v21499_v55 = vld [vmem:[%s30222_s4 + $0xc8] sm:$0xff]  }
 0x29c   : > { %20094 = vmatmul.mubr.bf16.gmra.mrb[36].mxu1 %v24245_v59  ;;  %18945 = vmatprep.subr.bf16.mxu0 %v21453_v53  ;;  %v21500_v53 = vld [vmem:[%s30221_s3 + $0x450] sm:$0xff]  }
 0x29d   : > { %20102 = vmatpush3.bf16.msra.mxu1 %v21452_v44  ;;  %20113 = vmatprep.mubr.bf16.mxu1 %v24177_v18  ;;  %v21498_v44 = vld [vmem:[%s30222_s4 + $0x108] sm:$0xff]  }
 0x29e   : > { %2377 = vmatmul.mubr.bf16.gmra.mrb[52].mxu0 %v24082_v19  ;;  %20103 = vmatprep.subr.bf16.mxu1 %v21455_v23 }
 0x29f   : > { %18946 = vmatpush3.bf16.msra.mxu0 %v21454_v5  ;;  %2384 = vmatprep.mubr.bf16.mxu0 %v24088_v3  ;;  %v21501_v5 = vld [vmem:[%s30222_s4 + $0x110] sm:$0xff]  }
 0x2a0   : > { %18947 = vmatprep.subr.bf16.mxu0 %v21456_v45  ;;  %v21503_v45 = vld [vmem:[%s30221_s3 + $0x458] sm:$0xff]  }
 0x2a1   : > { %20104 = vmatpush3.bf16.msra.mxu1 %v21455_v23  ;;  %v21502_v23 = vld [vmem:[%s30222_s4 + $0xd0] sm:$0xff]  }
 0x2a2   : > { %20105 = vmatprep.subr.bf16.mxu1 %v21458_v49 }
 0x2a3   : > { %18948 = vmatpush3.bf16.msra.mxu0 %v21457_v28  ;;  %v21505_v28 = vld [vmem:[%s30222_s4 + $0xd8] sm:$0xff]  }
 0x2a4   : > { %18949 = vmatprep.subr.bf16.mxu0 %v21459_v52  ;;  %v21506_v52 = vld [vmem:[%s30221_s3 + $0x460] sm:$0xff]  }
 0x2a5   : > { %20106 = vmatpush3.bf16.msra.mxu1 %v21458_v49  ;;  %v21504_v49 = vld [vmem:[%s30222_s4 + $0x118] sm:$0xff]  }
 0x2a6   : > { %2385 = vmatmul.mubr.bf16.gmra.mrb[56].mxu0 %v24128_v29  ;;  %20107 = vmatprep.subr.bf16.mxu1 %v21461_v38 }
 0x2a7   : > { %18950 = vmatpush3.bf16.msra.mxu0 %v21460_v63  ;;  %2392 = vmatprep.mubr.bf16.mxu0 %v24135_v57  ;;  %v21508_v63 = vld [vmem:[%s30222_s4 + $0xe0] sm:$0xff]  }
 0x2a8   : > { %18951 = vmatprep.subr.bf16.mxu0 %v21462_v60  ;;  %v21509_v60 = vld [vmem:[%s30221_s3 + $0x468] sm:$0xff]  }
 0x2a9   : > { %20108 = vmatpush3.bf16.msra.mxu1 %v21461_v38  ;;  %v21507_v38 = vld [vmem:[%s30222_s4 + $0x120] sm:$0xff]  }
 0x2aa   : > { %20109 = vmatprep.subr.bf16.mxu1 %v21464_v4 }
 0x2ab   : > { %18952 = vmatpush3.bf16.msra.mxu0 %v21463_v41  ;;  %v21510_v41 = vld [vmem:[%s30222_s4 + $0x128] sm:$0xff]  }
 0x2ac   : > { %18953 = vmatprep.subr.bf16.mxu0 %v21465_v40  ;;  %v21512_v40 = vld [vmem:[%s30221_s3 + $0x470] sm:$0xff]  }
 0x2ad   : > { %20110 = vmatpush3.bf16.msra.mxu1 %v21464_v4  ;;  %v21511_v4 = vld [vmem:[%s30222_s4 + $0xe8] sm:$0xff]  }
 0x2ae   : > { %2393 = vmatmul.mubr.bf16.gmra.mrb[60].mxu0 %v24172_v13  ;;  %20111 = vmatprep.subr.bf16.mxu1 %v21467_v1 }
 0x2af   : > { %18954 = vmatpush3.bf16.msra.mxu0 %v21466_v51  ;;  %2691 = vmatprep.mubr.bf16.mxu0 %v24018_v30  ;;  %v21513_v51 = vld [vmem:[%s30222_s4 + $0x130] sm:$0xff]  }
 0x2b0   : > { %18955 = vmatprep.subr.bf16.mxu0 %v21468_v11  ;;  %v21515_v11 = vld [vmem:[%s30221_s3 + $0x478] sm:$0xff]  }
 0x2b1   : > { %20112 = vmatpush3.bf16.msra.mxu1 %v21467_v1  ;;  %v21514_v1 = vld [vmem:[%s30222_s4 + $0xf0] sm:$0xff]  }
 0x2b2   : > { %20121 = vmatprep.subr.bf16.mxu1 %v21470_v17 }
 0x2b3   : > { %18956 = vmatpush3.bf16.msra.mxu0 %v21469_v12  ;;  %v21516_v12 = vld [vmem:[%s30222_s4 + $0x138] sm:$0xff]  }
 0x2b4   : > { %20114 = vmatmul.mubr.bf16.vlgmr.msra.gmra.mrb[40].mxu1 %v24214_v48  ;;  %18993 = vmatprep.subr.bf16.mxu0 %v21471_v10  ;;  %v21518_v10 = vld [vmem:[%s30222_s4 + $0x80] sm:$0xff]  }
 0x2b5   : > { %20117 = vmatprep.mubr.bf16.mxu1 %v24218_v42  ;;  %20122 = vmatpush3.bf16.msra.mxu1 %v21470_v17  ;;  %v21517_v17 = vld [vmem:[%s30222_s4 + $0xf8] sm:$0xff]  }
 0x2b6   : > { %2692 = vmatmul.mubr.bf16.vlgmr.msra.gmra.mrb[64].mxu0 %v24016_v26  ;;  %20123 = vmatprep.subr.bf16.mxu1 %v21473_v8 }
 0x2b7   : > { %18994 = vmatpush3.bf16.msra.mxu0 %v21472_v27  ;;  %2699 = vmatprep.mubr.bf16.mxu0 %v24038_v46  ;;  %v21519_v27 = vld [vmem:[%s30222_s4 + $0x1c0] sm:$0xff]  }
 0x2b8   : > { %18995 = vmatprep.subr.bf16.mxu0 %v21474_v62  ;;  %v21521_v62 = vld [vmem:[%s30222_s4 + $0x88] sm:$0xff]  }
 0x2b9   : > { %20124 = vmatpush3.bf16.msra.mxu1 %v21473_v8  ;;  %v21520_v8 = vld [vmem:[%s30222_s4 + $0x180] sm:$0xff]  }
 0x2ba   : > { %20125 = vmatprep.subr.bf16.mxu1 %v21476_v56 }
 0x2bb   : > { %18996 = vmatpush3.bf16.msra.mxu0 %v21475_v2  ;;  %v21522_v2 = vld [vmem:[%s30222_s4 + $0x1c8] sm:$0xff]  }
 0x2bc   : > { %20118 = vmatmul.mubr.bf16.gmra.mrb[44].mxu1 %v24245_v59  ;;  %18997 = vmatprep.subr.bf16.mxu0 %v21477_v43  ;;  %v21524_v43 = vld [vmem:[%s30222_s4 + $0x90] sm:$0xff]  }
 0x2bd   : > { %20126 = vmatpush3.bf16.msra.mxu1 %v21476_v56  ;;  %20137 = vmatprep.mubr.bf16.mxu1 %v24177_v18  ;;  %v21523_v56 = vld [vmem:[%s30222_s4 + $0x188] sm:$0xff]  }
 0x2be   : > { %2700 = vmatmul.mubr.bf16.gmra.mrb[68].mxu0 %v24082_v19  ;;  %20127 = vmatprep.subr.bf16.mxu1 %v21479_v25 }
 0x2bf   : > { %18998 = vmatpush3.bf16.msra.mxu0 %v21478_v61  ;;  %2707 = vmatprep.mubr.bf16.mxu0 %v24088_v3  ;;  %v21525_v61 = vld [vmem:[%s30222_s4 + $0x1d0] sm:$0xff]  }
 0x2c0   : > { %18999 = vmatprep.subr.bf16.mxu0 %v21480_v33  ;;  %v21527_v33 = vld [vmem:[%s30222_s4 + $0x98] sm:$0xff]  }
 0x2c1   : > { %20128 = vmatpush3.bf16.msra.mxu1 %v21479_v25  ;;  %v21526_v25 = vld [vmem:[%s30222_s4 + $0x190] sm:$0xff]  }
 0x2c2   : > { %20129 = vmatprep.subr.bf16.mxu1 %v21482_v58 }
 0x2c3   : > { %19000 = vmatpush3.bf16.msra.mxu0 %v21481_v22  ;;  %v21528_v22 = vld [vmem:[%s30222_s4 + $0x1d8] sm:$0xff]  }
 0x2c4   : > { %19001 = vmatprep.subr.bf16.mxu0 %v21483_v21  ;;  %v21530_v21 = vld [vmem:[%s30222_s4 + $0xa0] sm:$0xff]  }
 0x2c5   : > { %20130 = vmatpush3.bf16.msra.mxu1 %v21482_v58  ;;  %v21529_v58 = vld [vmem:[%s30222_s4 + $0x198] sm:$0xff]  }
 0x2c6   : > { %2708 = vmatmul.mubr.bf16.gmra.mrb[72].mxu0 %v24128_v29  ;;  %20131 = vmatprep.subr.bf16.mxu1 %v21485_v47 }
 0x2c7   : > { %19002 = vmatpush3.bf16.msra.mxu0 %v21484_v15  ;;  %2715 = vmatprep.mubr.bf16.mxu0 %v24135_v57  ;;  %v21531_v15 = vld [vmem:[%s30222_s4 + $0x1e0] sm:$0xff]  }
 0x2c8   : > { %19003 = vmatprep.subr.bf16.mxu0 %v21486_v20  ;;  %v21533_v20 = vld [vmem:[%s30222_s4 + $0xa8] sm:$0xff]  }
 0x2c9   : > { %20132 = vmatpush3.bf16.msra.mxu1 %v21485_v47  ;;  %v21532_v47 = vld [vmem:[%s30222_s4 + $0x1a0] sm:$0xff]  }
 0x2ca   : > { %20133 = vmatprep.subr.bf16.mxu1 %v21488_v7 }
 0x2cb   : > { %19004 = vmatpush3.bf16.msra.mxu0 %v21487_v54  ;;  %v21534_v54 = vld [vmem:[%s30222_s4 + $0x1e8] sm:$0xff]  }
 0x2cc   : > { %19005 = vmatprep.subr.bf16.mxu0 %v21489_v34  ;;  %v21535_v34 = vld [vmem:[%s30222_s4 + $0x1a8] sm:$0xff]  }
 0x2cd   : > { %20134 = vmatpush3.bf16.msra.mxu1 %v21488_v7 }
 0x2ce   : > { %2716 = vmatmul.mubr.bf16.gmra.mrb[76].mxu0 %v24172_v13  ;;  %20135 = vmatprep.subr.bf16.mxu1 %v21491_v35 }
 0x2cf   : > { %19006 = vmatpush3.bf16.msra.mxu0 %v21490_v16  ;;  %3085 = vmatprep.mubr.bf16.mxu0 %v24018_v30  ;;  %v21536_v16 = vld [vmem:[%s30222_s4 + $0xb0] sm:$0xff]  }
 0x2d0   : > { %19007 = vmatprep.subr.bf16.mxu0 %v21492_v36 }
 0x2d1   : > { %20136 = vmatpush3.bf16.msra.mxu1 %v21491_v35 }
 0x2d2   : > { %20145 = vmatprep.subr.bf16.mxu1 %v21494_v50 }
 0x2d3   : > { %19008 = vmatpush3.bf16.msra.mxu0 %v21493_v0 }
 0x2d4   : > { %20138 = vmatmul.mubr.bf16.vlgmr.msra.gmra.mrb[48].mxu1 %v24214_v48  ;;  %19045 = vmatprep.subr.bf16.mxu0 %v21495_v37 }
 0x2d5   : > { %20141 = vmatprep.mubr.bf16.mxu1 %v24218_v42  ;;  %20146 = vmatpush3.bf16.msra.mxu1 %v21494_v50 }
 0x2d6   : > { %3086 = vmatmul.mubr.bf16.vlgmr.msra.gmra.mrb[80].mxu0 %v24016_v26  ;;  %20147 = vmatprep.subr.bf16.mxu1 %v21497_v39 }
 0x2d7   : > { %19046 = vmatpush3.bf16.msra.mxu0 %v21496_v6  ;;  %3093 = vmatprep.mubr.bf16.mxu0 %v24038_v46 }
 0x2d8   : > { %19047 = vmatprep.subr.bf16.mxu0 %v21498_v44 }
 0x2d9   : > { %20148 = vmatpush3.bf16.msra.mxu1 %v21497_v39  ;;  %v21537_v39 = vld [vmem:[%s30222_s4 + $0x1f0] sm:$0xff]  }
 0x2da   : > { %20149 = vmatprep.subr.bf16.mxu1 %v21500_v53 }
 0x2db   : > { %19048 = vmatpush3.bf16.msra.mxu0 %v21499_v55 }
 0x2dc   : > { %20142 = vmatmul.mubr.bf16.gmra.mrb[52].mxu1 %v24245_v59  ;;  %19049 = vmatprep.subr.bf16.mxu0 %v21501_v5  ;;  %v21538_v5 = vld [vmem:[%s30222_s4 + $0x1b0] sm:$0xff]  }
 0x2dd   : > { %20150 = vmatpush3.bf16.msra.mxu1 %v21500_v53  ;;  %20161 = vmatprep.mubr.bf16.mxu1 %v24177_v18 }
 0x2de   : > { %3094 = vmatmul.mubr.bf16.gmra.mrb[84].mxu0 %v24082_v19  ;;  %20151 = vmatprep.subr.bf16.mxu1 %v21503_v45 }
 0x2df   : > { %19050 = vmatpush3.bf16.msra.mxu0 %v21502_v23  ;;  %3101 = vmatprep.mubr.bf16.mxu0 %v24088_v3  ;;  %v21539_v23 = vld [vmem:[%s30222_s4 + $0xb8] sm:$0xff]  }
 0x2e0   : > { %19051 = vmatprep.subr.bf16.mxu0 %v21504_v49 }
 0x2e1   : > { %20152 = vmatpush3.bf16.msra.mxu1 %v21503_v45 }
 0x2e2   : > { %20153 = vmatprep.subr.bf16.mxu1 %v21506_v52 }
 0x2e3   : > { %19052 = vmatpush3.bf16.msra.mxu0 %v21505_v28  ;;  %v21540_v28 = vld [vmem:[%s30222_s4 + $0x1f8] sm:$0xff]  }
 0x2e4   : > { %19053 = vmatprep.subr.bf16.mxu0 %v21507_v38  ;;  %v21542_v38 = vld [vmem:[%s30222_s4 + $0x140] sm:$0xff]  }
 0x2e5   : > { %20154 = vmatpush3.bf16.msra.mxu1 %v21506_v52  ;;  %v21541_v52 = vld [vmem:[%s30222_s4 + $0x1b8] sm:$0xff]  }
 0x2e6   : > { %3102 = vmatmul.mubr.bf16.gmra.mrb[88].mxu0 %v24128_v29  ;;  %20155 = vmatprep.subr.bf16.mxu1 %v21509_v60 }
 0x2e7   : > { %19054 = vmatpush3.bf16.msra.mxu0 %v21508_v63  ;;  %3109 = vmatprep.mubr.bf16.mxu0 %v24135_v57 }
 0x2e8   : > { %19055 = vmatprep.subr.bf16.mxu0 %v21510_v41 }
 0x2e9   : > { %20156 = vmatpush3.bf16.msra.mxu1 %v21509_v60 }
 0x2ea   : > { %20157 = vmatprep.subr.bf16.mxu1 %v21512_v40 }
 0x2eb   : > { %19056 = vmatpush3.bf16.msra.mxu0 %v21511_v4 }
 0x2ec   : > { %19057 = vmatprep.subr.bf16.mxu0 %v21513_v51 }
 0x2ed   : > { %20158 = vmatpush3.bf16.msra.mxu1 %v21512_v40 }
 0x2ee   : > { %3110 = vmatmul.mubr.bf16.gmra.mrb[92].mxu0 %v24172_v13  ;;  %20159 = vmatprep.subr.bf16.mxu1 %v21515_v11 }
 0x2ef   : > { %19058 = vmatpush3.bf16.msra.mxu0 %v21514_v1  ;;  %3408 = vmatprep.mubr.bf16.mxu0 %v24018_v30  ;;  %v21543_v1 = vld [vmem:[%s30222_s4 + $0x280] sm:$0xff]  }
 0x2f0   : > { %19059 = vmatprep.subr.bf16.mxu0 %v21516_v12 }
 0x2f1   : > { %20160 = vmatpush3.bf16.msra.mxu1 %v21515_v11 }
 0x2f2   : > { %20169 = vmatprep.subr.bf16.mxu1 %v21518_v10 }
 0x2f3   : > { %19060 = vmatpush3.bf16.msra.mxu0 %v21517_v17 }
 0x2f4   : > { %20162 = vmatmul.mubr.bf16.vlgmr.msra.gmra.mrb[56].mxu1 %v24214_v48  ;;  %19097 = vmatprep.subr.bf16.mxu0 %v21519_v27  ;;  %v21545_v27 = vld [vmem:[%s30222_s4 + $0x148] sm:$0xff]  }
 0x2f5   : > { %20165 = vmatprep.mubr.bf16.mxu1 %v24218_v42  ;;  %20170 = vmatpush3.bf16.msra.mxu1 %v21518_v10  ;;  %v21544_v10 = vld [vmem:[%s30222_s4 + $0x240] sm:$0xff]  }
 0x2f6   : > { %3409 = vmatmul.mubr.bf16.vlgmr.msra.gmra.mrb[96].mxu0 %v24016_v26  ;;  %20171 = vmatprep.subr.bf16.mxu1 %v21521_v62 }
 0x2f7   : > { %19098 = vmatpush3.bf16.msra.mxu0 %v21520_v8  ;;  %3416 = vmatprep.mubr.bf16.mxu0 %v24038_v46 }
 0x2f8   : > { %19099 = vmatprep.subr.bf16.mxu0 %v21522_v2 }
 0x2f9   : > { %20172 = vmatpush3.bf16.msra.mxu1 %v21521_v62 }
 0x2fa   : > { %20173 = vmatprep.subr.bf16.mxu1 %v21524_v43 }
 0x2fb   : > { %19100 = vmatpush3.bf16.msra.mxu0 %v21523_v56  ;;  %v21546_v56 = vld [vmem:[%s30222_s4 + $0x288] sm:$0xff]  }
 0x2fc   : > { %20166 = vmatmul.mubr.bf16.gmra.mrb[60].mxu1 %v24245_v59  ;;  %19101 = vmatprep.subr.bf16.mxu0 %v21525_v61  ;;  %v21548_v61 = vld [vmem:[%s30222_s4 + $0x150] sm:$0xff]  }
 0x2fd   : > { %20174 = vmatpush3.bf16.msra.mxu1 %v21524_v43  ;;  %20185 = vmatprep.mubr.bf16.mxu1 %v24177_v18  ;;  %v21547_v43 = vld [vmem:[%s30222_s4 + $0x248] sm:$0xff]  }
 0x2fe   : > { %3417 = vmatmul.mubr.bf16.gmra.mrb[100].mxu0 %v24082_v19  ;;  %20175 = vmatprep.subr.bf16.mxu1 %v21527_v33 }
 0x2ff   : > { %19102 = vmatpush3.bf16.msra.mxu0 %v21526_v25  ;;  %3424 = vmatprep.mubr.bf16.mxu0 %v24088_v3 }
 0x300   : > { %19103 = vmatprep.subr.bf16.mxu0 %v21528_v22 }
 0x301   : > { %20176 = vmatpush3.bf16.msra.mxu1 %v21527_v33 }
 0x302   : > { %20177 = vmatprep.subr.bf16.mxu1 %v21530_v21 }
 0x303   : > { %19104 = vmatpush3.bf16.msra.mxu0 %v21529_v58 }
 0x304   : > { %19105 = vmatprep.subr.bf16.mxu0 %v21531_v15 }
 0x305   : > { %20178 = vmatpush3.bf16.msra.mxu1 %v21530_v21 }
 0x306   : > { %3425 = vmatmul.mubr.bf16.gmra.mrb[104].mxu0 %v24128_v29  ;;  %20179 = vmatprep.subr.bf16.mxu1 %v21533_v20 }
 0x307   : > { %v18697_v7 = vpop.f32.mrb[0].mxu1  ;;  %19106 = vmatpush3.bf16.msra.mxu0 %v21532_v47  ;;  %3432 = vmatprep.mubr.bf16.mxu0 %v24135_v57  ;;  %v18749_v36 = vpop.f32.mrb[0].mxu0  ;;  %v21549_v47 = vld [vmem:[%s30222_s4 + $0x290] sm:$0xff]  }
 0x308   : > { %v18698_v35 = vpop.f32.mrb[1].mxu1  ;;  %19107 = vmatprep.subr.bf16.mxu0 %v21534_v54  ;;  %v18750_v37 = vpop.f32.mrb[1].mxu0 }
 0x309   : > { %v24700_v0 = vadd.f32 %v18698_v35, %v18697_v7  ;;  %v18700_v50 = vpop.f32.mrb[2].mxu1  ;;  %v24705_v44 = vadd.f32 %v18750_v37, %v18749_v36  ;;  %20180 = vmatpush3.bf16.msra.mxu1 %v21533_v20  ;;  %v18752_v55 = vpop.f32.mrb[2].mxu0  ;;  %v21552_v37 = vld [vmem:[%s30222_s4 + $0x298] sm:$0xff]  }
 0x30a   : > { %v18701_v6 = vpop.f32.mrb[3].mxu1  ;;  %v18753_v45 = vpop.f32.mrb[3].mxu0  ;;  %20181 = vmatprep.subr.bf16.mxu1 %v21536_v16 }
 0x30b   : > { %v24707_v53 = vadd.f32 %v18701_v6, %v18700_v50  ;;  %19108 = vmatpush3.bf16.msra.mxu0 %v21535_v34  ;;  %v24715_v49 = vadd.f32 %v18753_v45, %v18752_v55  ;;  %v21550_v34 = vld [vmem:[%s30222_s4 + $0x250] sm:$0xff]   ;;  %v21553_v6 = vld [vmem:[%s30222_s4 + $0x258] sm:$0xff]  }
 0x30c   : > { %19109 = vmatprep.subr.bf16.mxu0 %v21537_v39  ;;  %v21554_v39 = vld [vmem:[%s30222_s4 + $0x160] sm:$0xff]  }
 0x30d   : > { %20182 = vmatpush3.bf16.msra.mxu1 %v21536_v16  ;;  %v21551_v16 = vld [vmem:[%s30222_s4 + $0x158] sm:$0xff]  }
 0x30e   : > { %3433 = vmatmul.mubr.bf16.gmra.mrb[108].mxu0 %v24172_v13  ;;  %20183 = vmatprep.subr.bf16.mxu1 %v21539_v23 }
 0x30f   : > { %v18703_v63 = vpop.f32.mrb[4].mxu1  ;;  %19110 = vmatpush3.bf16.msra.mxu0 %v21538_v5  ;;  %3731 = vmatprep.mubr.bf16.mxu0 %v24018_v30  ;;  %v18755_v60 = vpop.f32.mrb[4].mxu0 }
 0x310   : > { %v18704_v41 = vpop.f32.mrb[5].mxu1  ;;  %19111 = vmatprep.subr.bf16.mxu0 %v21540_v28  ;;  %v18756_v40 = vpop.f32.mrb[5].mxu0 }
 0x311   : > { %v24728_v4 = vadd.f32 %v18704_v41, %v18703_v63  ;;  %v18706_v51 = vpop.f32.mrb[6].mxu1  ;;  %v24733_v11 = vadd.f32 %v18756_v40, %v18755_v60  ;;  %20184 = vmatpush3.bf16.msra.mxu1 %v21539_v23  ;;  %v18758_v12 = vpop.f32.mrb[6].mxu0  ;;  %v21556_v40 = vld [vmem:[%s30222_s4 + $0x260] sm:$0xff]  }
 0x312   : > { %v18707_v17 = vpop.f32.mrb[7].mxu1  ;;  %v18759_v62 = vpop.f32.mrb[7].mxu0  ;;  %20193 = vmatprep.subr.bf16.mxu1 %v21542_v38 }
 0x313   : > { %v24741_v8 = vadd.f32 %v18707_v17, %v18706_v51  ;;  %19112 = vmatpush3.bf16.msra.mxu0 %v21541_v52  ;;  %v24743_v2 = vadd.f32 %v18759_v62, %v18758_v12  ;;  %v21557_v51 = vld [vmem:[%s30222_s4 + $0x168] sm:$0xff]   ;;  %v21560_v62 = vld [vmem:[%s30222_s4 + $0x170] sm:$0xff]  }
 0x314   : > { %20186 = vmatmul.mubr.bf16.vlgmr.msra.gmra.mrb[64].mxu1 %v24214_v48  ;;  %19149 = vmatprep.subr.bf16.mxu0 %v21543_v1 }
 0x315   : > { %20189 = vmatprep.mubr.bf16.mxu1 %v24218_v42  ;;  %20194 = vmatpush3.bf16.msra.mxu1 %v21542_v38  ;;  %v21555_v38 = vld [vmem:[%s30222_s4 + $0x2a0] sm:$0xff]  }
 0x316   : > { %3732 = vmatmul.mubr.bf16.vlgmr.msra.gmra.mrb[112].mxu0 %v24016_v26  ;;  %20195 = vmatprep.subr.bf16.mxu1 %v21545_v27 }
 0x317   : > { %v18709_v25 = vpop.f32.mrb[8].mxu1  ;;  %19150 = vmatpush3.bf16.msra.mxu0 %v21544_v10  ;;  %3739 = vmatprep.mubr.bf16.mxu0 %v24038_v46  ;;  %v18761_v33 = vpop.f32.mrb[8].mxu0  ;;  %v21558_v10 = vld [vmem:[%s30222_s4 + $0x2a8] sm:$0xff]  }
 0x318   : > { %v18710_v22 = vpop.f32.mrb[9].mxu1  ;;  %19151 = vmatprep.subr.bf16.mxu0 %v21546_v56  ;;  %v18762_v21 = vpop.f32.mrb[9].mxu0 }
 0x319   : > { %v24758_v58 = vadd.f32 %v18710_v22, %v18709_v25  ;;  %v18712_v15 = vpop.f32.mrb[10].mxu1  ;;  %v24763_v20 = vadd.f32 %v18762_v21, %v18761_v33  ;;  %20196 = vmatpush3.bf16.msra.mxu1 %v21545_v27  ;;  %v18764_v54 = vpop.f32.mrb[10].mxu0  ;;  %v21559_v27 = vld [vmem:[%s30222_s4 + $0x268] sm:$0xff]   ;;  %v21561_v33 = vld [vmem:[%s30222_s4 + $0x2b0] sm:$0xff]  }
 0x31a   : > { %v18713_v7 = vpop.f32.mrb[11].mxu1  ;;  %v18765_v36 = vpop.f32.mrb[11].mxu0  ;;  %20197 = vmatprep.subr.bf16.mxu1 %v21548_v61 }
 0x31b   : > { %v24771_v35 = vadd.f32 %v18713_v7, %v18712_v15  ;;  %19152 = vmatpush3.bf16.msra.mxu0 %v21547_v43  ;;  %v24773_v50 = vadd.f32 %v18765_v36, %v18764_v54 }
 0x31c   : > { %20190 = vmatmul.mubr.bf16.gmra.mrb[68].mxu1 %v24245_v59  ;;  %19153 = vmatprep.subr.bf16.mxu0 %v21549_v47  ;;  %v21562_v47 = vld [vmem:[%s30222_s4 + $0x270] sm:$0xff]  }
 0x31d   : > { %20198 = vmatpush3.bf16.msra.mxu1 %v21548_v61  ;;  %20209 = vmatprep.mubr.bf16.mxu1 %v24177_v18 }
 0x31e   : > { %3740 = vmatmul.mubr.bf16.gmra.mrb[116].mxu0 %v24082_v19  ;;  %20199 = vmatprep.subr.bf16.mxu1 %v21551_v16 }
 0x31f   : > { %v18715_v55 = vpop.f32.mrb[12].mxu1  ;;  %19154 = vmatpush3.bf16.msra.mxu0 %v21550_v34  ;;  %3747 = vmatprep.mubr.bf16.mxu0 %v24088_v3  ;;  %v18767_v5 = vpop.f32.mrb[12].mxu0 }
 0x320   : > { %v18716_v23 = vpop.f32.mrb[13].mxu1  ;;  %19155 = vmatprep.subr.bf16.mxu0 %v21552_v37  ;;  %v18768_v28 = vpop.f32.mrb[13].mxu0 }
 0x321   : > { %v18717_v45 = vadd.f32 %v18716_v23, %v18715_v55  ;;  %v18718_v52 = vpop.f32.mrb[14].mxu1  ;;  %v24791_v63 = vadd.f32 %v18768_v28, %v18767_v5  ;;  %20200 = vmatpush3.bf16.msra.mxu1 %v21551_v16  ;;  %v18770_v60 = vpop.f32.mrb[14].mxu0  ;;  %v21565_v23 = vld [vmem:[%s30222_s4 + $0x278] sm:$0xff]   ;;  %v21566_v28 = vld [vmem:[%s30222_s4 + $0x200] sm:$0xff]  }
 0x322   : > { %v18719_v41 = vpop.f32.mrb[15].mxu1  ;;  %v18771_v12 = vpop.f32.mrb[15].mxu0  ;;  %20201 = vmatprep.subr.bf16.mxu1 %v21554_v39 }
 0x323   : > { %v18720_v1 = vadd.f32 %v18719_v41, %v18718_v52  ;;  %19156 = vmatpush3.bf16.msra.mxu0 %v21553_v6  ;;  %v24799_v17 = vadd.f32 %v18771_v12, %v18770_v60 }
 0x324   : > { %19157 = vmatprep.subr.bf16.mxu0 %v21555_v38 }
 0x325   : > { %20202 = vmatpush3.bf16.msra.mxu1 %v21554_v39 }
 0x326   : > { %3748 = vmatmul.mubr.bf16.gmra.mrb[120].mxu0 %v24128_v29  ;;  %20203 = vmatprep.subr.bf16.mxu1 %v21557_v51 }
 0x327   : > { %19158 = vmatpush3.bf16.msra.mxu0 %v21556_v40  ;;  %3755 = vmatprep.mubr.bf16.mxu0 %v24135_v57  ;;  %v20043_v56 = vpop.f32.mrb[16].mxu1 }
 0x328   : > { %v1152_v43 = vadd.f32 %v20043_v56, %v24728_v4  ;;  %v18801_v61 = vpop.f32.mrb[16].mxu0  ;;  %19159 = vmatprep.subr.bf16.mxu0 %v21558_v10  ;;  %v1143_v25 = vpop.f32.mrb[17].mxu1  ;;  %v21563_v4 = vld [vmem:[%s30222_s4 + $0x178] sm:$0xff]  }
 0x329   : > { %v1144_v22 = vadd.f32 %v24700_v0, %v1143_v25  ;;  %v18802_v21 = vpop.f32.mrb[17].mxu0  ;;  %20204 = vmatpush3.bf16.msra.mxu1 %v21557_v51  ;;  %v20044_v15 = vpop.f32.mrb[18].mxu1  ;;  %v21564_v0 = vld [vmem:[%s30222_s4 + $0x2b8] sm:$0xff]   ;;  %v21567_v51 = vld [vmem:[%s30222_s4 + $0x340] sm:$0xff]   ;;  %v21569_v25 = vld [vmem:[%s30222_s4 + $0x208] sm:$0xff]  }
 0x32a   : > { %v24823_v54 = vadd.f32 %v18802_v21, %v18801_v61  ;;  %v1155_v7 = vadd.f32 %v20044_v15, %v24741_v8  ;;  %v18804_v34 = vpop.f32.mrb[18].mxu0  ;;  %v1146_v16 = vpop.f32.mrb[19].mxu1  ;;  %20205 = vmatprep.subr.bf16.mxu1 %v21560_v62  ;;  %v24829_v36 = vmul.f32 0.05103104, %v1152_v43 }
 0x32b   : > { %19160 = vmatpush3.bf16.msra.mxu0 %v21559_v27  ;;  %v1147_v37 = vadd.f32 %v24707_v53, %v1146_v16  ;;  %v18805_v6 = vpop.f32.mrb[19].mxu0  ;;  %v24832_v39 = vmul.f32 0.05103104, %v1144_v22 }
 0x32c   : > { %v24834_v55 = vmul.f32 0.05103104, %v1155_v7  ;;  %v24836_v5 = vadd.f32 %v18805_v6, %v18804_v34  ;;  %19161 = vmatprep.subr.bf16.mxu0 %v21561_v33  ;;  %v21571_v7 = vld [vmem:[%s30222_s4 + $0x308] sm:$0xff]  }
 0x32d   : > { %v24838_v8 = vmul.f32 0.05103104, %v1147_v37  ;;  %20206 = vmatpush3.bf16.msra.mxu1 %v21560_v62  ;;  %v21568_v62 = vld [vmem:[%s30222_s4 + $0x300] sm:$0xff]   ;;  %v21573_v37 = vld [vmem:[%s30222_s4 + $0x350] sm:$0xff]  }
 0x32e   : > { %3756 = vmatmul.mubr.bf16.gmra.mrb[124].mxu0 %v24172_v13  ;;  %20207 = vmatprep.subr.bf16.mxu1 %v21563_v4 }
 0x32f   : > { %19162 = vmatpush3.bf16.msra.mxu0 %v21562_v47  ;;  %4054 = vmatprep.mubr.bf16.mxu0 %v24018_v30  ;;  %v20047_v52 = vpop.f32.mrb[20].mxu1 }
 0x330   : > { %v1168_v60 = vadd.f32 %v20047_v52, %v18717_v45  ;;  %v18807_v41 = vpop.f32.mrb[20].mxu0  ;;  %19163 = vmatprep.subr.bf16.mxu0 %v21564_v0  ;;  %v1159_v40 = vpop.f32.mrb[21].mxu1 }
 0x331   : > { %v1160_v12 = vadd.f32 %v24758_v58, %v1159_v40  ;;  %v18808_v10 = vpop.f32.mrb[21].mxu0  ;;  %20208 = vmatpush3.bf16.msra.mxu1 %v21563_v4  ;;  %v20048_v27 = vpop.f32.mrb[22].mxu1  ;;  %v21570_v58 = vld [vmem:[%s30222_s4 + $0x348] sm:$0xff]  }
 0x332   : > { %v24859_v56 = vadd.f32 %v18808_v10, %v18807_v41  ;;  %v1171_v43 = vadd.f32 %v20048_v27, %v18720_v1  ;;  %v18810_v45 = vpop.f32.mrb[22].mxu0  ;;  %v1162_v61 = vpop.f32.mrb[23].mxu1  ;;  %20217 = vmatprep.subr.bf16.mxu1 %v21566_v28  ;;  %v24867_v33 = vmul.f32 0.05103104, %v1168_v60  ;;  %v21578_v10 = vld [vmem:[%s30222_s4 + $0x220] sm:$0xff]  }
 0x333   : > { %19164 = vmatpush3.bf16.msra.mxu0 %v21565_v23  ;;  %v1163_v22 = vadd.f32 %v24771_v35, %v1162_v61  ;;  %v18811_v21 = vpop.f32.mrb[23].mxu0  ;;  %v24870_v15 = vmul.f32 0.05103104, %v1160_v12  ;;  %v21572_v35 = vld [vmem:[%s30222_s4 + $0x210] sm:$0xff]   ;;  %v21577_v12 = vld [vmem:[%s30222_s4 + $0x318] sm:$0xff]   ;;  %v21581_v61 = vld [vmem:[%s30222_s4 + $0x228] sm:$0xff]  }
 0x334   : > { %30337 = vst [vmem:[#allocation24_spill] sm:$0xff] %v24867_v33  ;;  %v24872_v1 = vmul.f32 0.05103104, %v1171_v43  ;;  %v24874_v47 = vadd.f32 %v18811_v21, %v18810_v45  ;;  %20210 = vmatmul.mubr.bf16.vlgmr.msra.gmra.mrb[72].mxu1 %v24214_v48  ;;  %19201 = vmatprep.subr.bf16.mxu0 %v21567_v51  ;;  %v21574_v23 = vld [vmem:[%s30222_s4 + $0x310] sm:$0xff]   ;;  %v21576_v51 = vld [vmem:[%s30222_s4 + $0x358] sm:$0xff]   ;;  %v21580_v45 = vld [vmem:[%s30222_s4 + $0x320] sm:$0xff]  }
 0x335   : > { %30338 = vst [vmem:[#allocation25_spill] sm:$0xff] %v24870_v15  ;;  %v24877_v4 = vmul.f32 0.05103104, %v1163_v22  ;;  %20213 = vmatprep.mubr.bf16.mxu1 %v24218_v42  ;;  %20218 = vmatpush3.bf16.msra.mxu1 %v21566_v28  ;;  %v21575_v28 = vld [vmem:[%s30222_s4 + $0x218] sm:$0xff]  }
 0x336   : > { %30339 = vst [vmem:[#allocation26_spill] sm:$0xff] %v24872_v1  ;;  %4055 = vmatmul.mubr.bf16.vlgmr.msra.gmra.mrb[128].mxu0 %v24016_v26  ;;  %20219 = vmatprep.subr.bf16.mxu1 %v21569_v25 }
 0x337   : > { %30340 = vst [vmem:[#allocation27_spill] sm:$0xff] %v24877_v4  ;;  %19202 = vmatpush3.bf16.msra.mxu0 %v21568_v62  ;;  %4062 = vmatprep.mubr.bf16.mxu0 %v24038_v46  ;;  %v21579_v62 = vld [vmem:[%s30222_s4 + $0x360] sm:$0xff]  }
 0x338   : > { %v18813_v0 = vpop.f32.mrb[24].mxu0  ;;  %19203 = vmatprep.subr.bf16.mxu0 %v21570_v58 }
 0x339   : > { %v18814_v6 = vpop.f32.mrb[25].mxu0  ;;  %20220 = vmatpush3.bf16.msra.mxu1 %v21569_v25 }
 0x33a   : > { %v24901_v52 = vadd.f32 %v18814_v6, %v18813_v0  ;;  %v18816_v60 = vpop.f32.mrb[26].mxu0  ;;  %20221 = vmatprep.subr.bf16.mxu1 %v21572_v35  ;;  %v21584_v0 = vld [vmem:[%s30222_s4 + $0x230] sm:$0xff]  }
 0x33b   : > { %19204 = vmatpush3.bf16.msra.mxu0 %v21571_v7  ;;  %v18817_v41 = vpop.f32.mrb[27].mxu0  ;;  %v21582_v7 = vld [vmem:[%s30222_s4 + $0x368] sm:$0xff]  }
 0x33c   : > { %v24903_v40 = vadd.f32 %v18817_v41, %v18816_v60  ;;  %20214 = vmatmul.mubr.bf16.gmra.mrb[76].mxu1 %v24245_v59  ;;  %19205 = vmatprep.subr.bf16.mxu0 %v21573_v37 }
 0x33d   : > { %20222 = vmatpush3.bf16.msra.mxu1 %v21572_v35  ;;  %20233 = vmatprep.mubr.bf16.mxu1 %v24177_v18  ;;  %v21583_v35 = vld [vmem:[%s30222_s4 + $0x328] sm:$0xff]  }
 0x33e   : > { %4063 = vmatmul.mubr.bf16.gmra.mrb[132].mxu0 %v24082_v19  ;;  %20223 = vmatprep.subr.bf16.mxu1 %v21575_v28 }
 0x33f   : > { %19206 = vmatpush3.bf16.msra.mxu0 %v21574_v23  ;;  %4070 = vmatprep.mubr.bf16.mxu0 %v24088_v3 }
 0x340   : > { %v18819_v27 = vpop.f32.mrb[28].mxu0  ;;  %19207 = vmatprep.subr.bf16.mxu0 %v21576_v51 }
 0x341   : > { %v18820_v43 = vpop.f32.mrb[29].mxu0  ;;  %20224 = vmatpush3.bf16.msra.mxu1 %v21575_v28  ;;  %v21585_v28 = vld [vmem:[%s30222_s4 + $0x370] sm:$0xff]  }
 0x342   : > { %v24927_v25 = vadd.f32 %v18820_v43, %v18819_v27  ;;  %v18822_v58 = vpop.f32.mrb[30].mxu0  ;;  %20225 = vmatprep.subr.bf16.mxu1 %v21578_v10 }
 0x343   : > { %19208 = vmatpush3.bf16.msra.mxu0 %v21577_v12  ;;  %v18823_v22 = vpop.f32.mrb[31].mxu0  ;;  %v21586_v12 = vld [vmem:[%s30222_s4 + $0x330] sm:$0xff]  }
 0x344   : > { %v24929_v21 = vadd.f32 %v18823_v22, %v18822_v58  ;;  %19209 = vmatprep.subr.bf16.mxu0 %v21579_v62 }
 0x345   : > { %20226 = vmatpush3.bf16.msra.mxu1 %v21578_v10 }
 0x346   : > { %4071 = vmatmul.mubr.bf16.gmra.mrb[136].mxu0 %v24128_v29  ;;  %20227 = vmatprep.subr.bf16.mxu1 %v21581_v61 }
 0x347   : > { %19210 = vmatpush3.bf16.msra.mxu0 %v21580_v45  ;;  %4078 = vmatprep.mubr.bf16.mxu0 %v24135_v57  ;;  %v20067_v37 = vpop.f32.mrb[24].mxu1 }
 0x348   : > { %v1475_v6 = vadd.f32 %v20067_v37, %v24733_v11  ;;  %v1466_v23 = vpop.f32.mrb[25].mxu1  ;;  %19211 = vmatprep.subr.bf16.mxu0 %v21582_v7  ;;  %v21587_v11 = vld [vmem:[%s30222_s4 + $0x238] sm:$0xff]  }
 0x349   : > { %v1467_v60 = vadd.f32 %v24705_v44, %v1466_v23  ;;  %v18853_v41 = vpop.f32.mrb[32].mxu0  ;;  %v20068_v51 = vpop.f32.mrb[26].mxu1  ;;  %20228 = vmatpush3.bf16.msra.mxu1 %v21581_v61  ;;  %v21588_v44 = vld [vmem:[%s30222_s4 + $0x378] sm:$0xff]  }
 0x34a   : > { %v1478_v10 = vadd.f32 %v20068_v51, %v24743_v2  ;;  %v18854_v27 = vpop.f32.mrb[33].mxu0  ;;  %v1469_v62 = vpop.f32.mrb[27].mxu1  ;;  %20229 = vmatprep.subr.bf16.mxu1 %v21584_v0  ;;  %v24957_v43 = vmul.f32 0.05103104, %v1475_v6  ;;  %v21589_v6 = vld [vmem:[%s30222_s4 + $0x338] sm:$0xff]   ;;  %v21591_v51 = vld [vmem:[%s30222_s4 + $0x400] sm:$0xff]  }
 0x34b   : > { %v24959_v45 = vadd.f32 %v18854_v27, %v18853_v41  ;;  %19212 = vmatpush3.bf16.msra.mxu0 %v21583_v35  ;;  %v1470_v61 = vadd.f32 %v24715_v49, %v1469_v62  ;;  %v18856_v58 = vpop.f32.mrb[34].mxu0  ;;  %v24962_v2 = vmul.f32 0.05103104, %v1467_v60  ;;  %v21590_v49 = vld [vmem:[%s30222_s4 + $0x2c0] sm:$0xff]  }
 0x34c   : > { %v24964_v22 = vmul.f32 0.05103104, %v1478_v10  ;;  %v18857_v7 = vpop.f32.mrb[35].mxu0  ;;  %19213 = vmatprep.subr.bf16.mxu0 %v21585_v28 }
 0x34d   : > { %v24966_v37 = vmul.f32 0.05103104, %v1470_v61  ;;  %v24968_v23 = vadd.f32 %v18857_v7, %v18856_v58  ;;  %20230 = vmatpush3.bf16.msra.mxu1 %v21584_v0 }
 0x34e   : > { %4079 = vmatmul.mubr.bf16.gmra.mrb[140].mxu0 %v24172_v13  ;;  %20231 = vmatprep.subr.bf16.mxu1 %v21587_v11 }
 0x34f   : > { %19214 = vmatpush3.bf16.msra.mxu0 %v21586_v12  ;;  %4377 = vmatprep.mubr.bf16.mxu0 %v24018_v30  ;;  %v20071_v28 = vpop.f32.mrb[28].mxu1  ;;  %v21592_v12 = vld [vmem:[%s30222_s4 + $0x3c0] sm:$0xff]  }
 0x350   : > { %v1491_v60 = vadd.f32 %v20071_v28, %v24791_v63  ;;  %v1482_v41 = vpop.f32.mrb[29].mxu1  ;;  %19215 = vmatprep.subr.bf16.mxu0 %v21588_v44  ;;  %v21593_v63 = vld [vmem:[%s30222_s4 + $0x2c8] sm:$0xff]  }
 0x351   : > { %v1483_v10 = vadd.f32 %v24763_v20, %v1482_v41  ;;  %v18859_v27 = vpop.f32.mrb[36].mxu0  ;;  %v20072_v62 = vpop.f32.mrb[30].mxu1  ;;  %20232 = vmatpush3.bf16.msra.mxu1 %v21587_v11  ;;  %v21594_v20 = vld [vmem:[%s30222_s4 + $0x408] sm:$0xff]  }
 0x352   : > { %v1494_v61 = vadd.f32 %v20072_v62, %v24799_v17  ;;  %v18860_v58 = vpop.f32.mrb[37].mxu0  ;;  %v1485_v7 = vpop.f32.mrb[31].mxu1  ;;  %20241 = vmatprep.subr.bf16.mxu1 %v21590_v49  ;;  %v24997_v44 = vmul.f32 0.05103104, %v1491_v60 }
 0x353   : > { %19216 = vmatpush3.bf16.msra.mxu0 %v21589_v6  ;;  %v1486_v11 = vadd.f32 %v24773_v50, %v1485_v7  ;;  %v18862_v28 = vpop.f32.mrb[38].mxu0  ;;  %v25000_v41 = vadd.f32 %v18860_v58, %v18859_v27  ;;  %v25002_v17 = vmul.f32 0.05103104, %v1483_v10  ;;  %v21595_v50 = vld [vmem:[%s30222_s4 + $0x3c8] sm:$0xff]   ;;  %v21596_v6 = vld [vmem:[%s30222_s4 + $0x2d0] sm:$0xff]  }
 0x354   : > { %30341 = vst [vmem:[#allocation28_spill] sm:$0xff] %v24997_v44  ;;  %v25004_v62 = vmul.f32 0.05103104, %v1494_v61  ;;  %v18863_v34 = vpop.f32.mrb[39].mxu0  ;;  %20234 = vmatmul.mubr.bf16.vlgmr.msra.gmra.mrb[80].mxu1 %v24214_v48  ;;  %19253 = vmatprep.subr.bf16.mxu0 %v21591_v51  ;;  %v21599_v61 = vld [vmem:[%s30222_s4 + $0x2d8] sm:$0xff]   ;;  %v21607_v51 = vld [vmem:[%s30222_s4 + $0x3e8] sm:$0xff]  }
 0x355   : > { %30342 = vst [vmem:[#allocation29_spill] sm:$0xff] %v25002_v17  ;;  %v25007_v16 = vmul.f32 0.05103104, %v1486_v11  ;;  %20237 = vmatprep.mubr.bf16.mxu1 %v24218_v42  ;;  %20242 = vmatpush3.bf16.msra.mxu1 %v21590_v49  ;;  %v25016_v60 = vadd.f32 %v18863_v34, %v18862_v28  ;;  %v21597_v49 = vld [vmem:[%s30222_s4 + $0x410] sm:$0xff]   ;;  %v21601_v11 = vld [vmem:[%s30222_s4 + $0x3d8] sm:$0xff]   ;;  %v21602_v28 = vld [vmem:[%s30222_s4 + $0x2e0] sm:$0xff]  }
 0x356   : > { %30343 = vst [vmem:[#allocation30_spill] sm:$0xff] %v25004_v62  ;;  %4378 = vmatmul.mubr.bf16.vlgmr.msra.gmra.mrb[144].mxu0 %v24016_v26  ;;  %20243 = vmatprep.subr.bf16.mxu1 %v21593_v63  ;;  %v21598_v34 = vld [vmem:[%s30222_s4 + $0x3d0] sm:$0xff]  }
 0x357   : > { %30344 = vst [vmem:[#allocation31_spill] sm:$0xff] %v25007_v16  ;;  %19254 = vmatpush3.bf16.msra.mxu0 %v21592_v12  ;;  %4385 = vmatprep.mubr.bf16.mxu0 %v24038_v46  ;;  %v21684_v16 = vld [vmem:[%s30346_s8 + $0x1f8] sm:$0xff]  }
 0x358   : > { %19255 = vmatprep.subr.bf16.mxu0 %v21594_v20 }
 0x359   : > { %v18865_v27 = vpop.f32.mrb[40].mxu0  ;;  %20244 = vmatpush3.bf16.msra.mxu1 %v21593_v63  ;;  %v21600_v63 = vld [vmem:[%s30222_s4 + $0x418] sm:$0xff]  }
 0x35a   : > { %v18866_v58 = vpop.f32.mrb[41].mxu0  ;;  %20245 = vmatprep.subr.bf16.mxu1 %v21596_v6 }
 0x35b   : > { %19256 = vmatpush3.bf16.msra.mxu0 %v21595_v50  ;;  %v18868_v12 = vpop.f32.mrb[42].mxu0  ;;  %v25033_v7 = vadd.f32 %v18866_v58, %v18865_v27  ;;  %v21604_v27 = vld [vmem:[%s30222_s4 + $0x3e0] sm:$0xff]   ;;  %v21605_v58 = vld [vmem:[%s30222_s4 + $0x2e8] sm:$0xff]  }
 0x35c   : > { %v18869_v20 = vpop.f32.mrb[43].mxu0  ;;  %20238 = vmatmul.mubr.bf16.gmra.mrb[84].mxu1 %v24245_v59  ;;  %19257 = vmatprep.subr.bf16.mxu0 %v21597_v49 }
 0x35d   : > { %20246 = vmatpush3.bf16.msra.mxu1 %v21596_v6  ;;  %20257 = vmatprep.mubr.bf16.mxu1 %v24177_v18  ;;  %v25046_v50 = vadd.f32 %v18869_v20, %v18868_v12  ;;  %v21603_v6 = vld [vmem:[%s30222_s4 + $0x420] sm:$0xff]  }
 0x35e   : > { %4386 = vmatmul.mubr.bf16.gmra.mrb[148].mxu0 %v24082_v19  ;;  %20247 = vmatprep.subr.bf16.mxu1 %v21599_v61 }
 0x35f   : > { %19258 = vmatpush3.bf16.msra.mxu0 %v21598_v34  ;;  %4393 = vmatprep.mubr.bf16.mxu0 %v24088_v3 }
 0x360   : > { %19259 = vmatprep.subr.bf16.mxu0 %v21600_v63 }
 0x361   : > { %v18871_v49 = vpop.f32.mrb[44].mxu0  ;;  %20248 = vmatpush3.bf16.msra.mxu1 %v21599_v61  ;;  %v21606_v61 = vld [vmem:[%s30222_s4 + $0x428] sm:$0xff]  }
 0x362   : > { %v18872_v12 = vpop.f32.mrb[45].mxu0  ;;  %20249 = vmatprep.subr.bf16.mxu1 %v21602_v28 }
 0x363   : > { %v25059_v34 = vadd.f32 %v18872_v12, %v18871_v49  ;;  %19260 = vmatpush3.bf16.msra.mxu0 %v21601_v11  ;;  %v18874_v20 = vpop.f32.mrb[46].mxu0  ;;  %v21608_v49 = vld [vmem:[%s30222_s4 + $0x2f0] sm:$0xff]  }
 0x364   : > { %v18875_v63 = vpop.f32.mrb[47].mxu0  ;;  %19261 = vmatprep.subr.bf16.mxu0 %v21603_v6 }
 0x365   : > { %v25064_v10 = vadd.f32 %v18875_v63, %v18874_v20  ;;  %20250 = vmatpush3.bf16.msra.mxu1 %v21602_v28  ;;  %v21609_v28 = vld [vmem:[%s30222_s4 + $0x430] sm:$0xff]  }
 0x366   : > { %4394 = vmatmul.mubr.bf16.gmra.mrb[152].mxu0 %v24128_v29  ;;  %20251 = vmatprep.subr.bf16.mxu1 %v21605_v58 }
 0x367   : > { %19262 = vmatpush3.bf16.msra.mxu0 %v21604_v27  ;;  %4401 = vmatprep.mubr.bf16.mxu0 %v24135_v57  ;;  %v20091_v11 = vpop.f32.mrb[32].mxu1  ;;  %v21610_v27 = vld [vmem:[%s30222_s4 + $0x3f0] sm:$0xff]  }
 0x368   : > { %v1798_v6 = vadd.f32 %v20091_v11, %v24859_v56  ;;  %v1789_v12 = vpop.f32.mrb[33].mxu1  ;;  %19263 = vmatprep.subr.bf16.mxu0 %v21606_v61  ;;  %v21611_v56 = vld [vmem:[%s30222_s4 + $0x2f8] sm:$0xff]  }
 0x369   : > { %v1790_v20 = vadd.f32 %v24823_v54, %v1789_v12  ;;  %v18905_v63 = vpop.f32.mrb[48].mxu0  ;;  %v20092_v9 = vpop.f32.mrb[34].mxu1  ;;  %20252 = vmatpush3.bf16.msra.mxu1 %v21605_v58  ;;  %v21612_v54 = vld [vmem:[%s30222_s4 + $0x438] sm:$0xff]  }
 0x36a   : > { %v1801_v53 = vadd.f32 %v20092_v9, %v24874_v47  ;;  %v18906_v38 = vpop.f32.mrb[49].mxu0  ;;  %v1792_v35 = vpop.f32.mrb[35].mxu1  ;;  %20253 = vmatprep.subr.bf16.mxu1 %v21608_v49  ;;  %v25089_v61 = vmul.f32 0.05103104, %v1798_v6  ;;  %v21615_v6 = vld [vmem:[%s30346_s8 + $0x40] sm:$0xff]  }
 0x36b   : > { %v25091_v58 = vadd.f32 %v18906_v38, %v18905_v63  ;;  %19264 = vmatpush3.bf16.msra.mxu0 %v21607_v51  ;;  %v1793_v11 = vadd.f32 %v24836_v5, %v1792_v35  ;;  %v18908_v12 = vpop.f32.mrb[50].mxu0  ;;  %v25094_v9 = vmul.f32 0.05103104, %v1790_v20  ;;  %v21614_v38 = vld [vmem:[%s30222_s4 + $0x380] sm:$0xff]   ;;  %v21613_v35 = vld [vmem:[%s30222_s4 + $0x3f8] sm:$0xff]  }
 0x36c   : > { %30345 = vst [vmem:[#allocation32_spill] sm:$0xff] %v25089_v61  ;;  %v25096_v47 = vmul.f32 0.05103104, %v1801_v53  ;;  %v18909_v0 = vpop.f32.mrb[51].mxu0  ;;  %19265 = vmatprep.subr.bf16.mxu0 %v21609_v28 }
 0x36d   : > { %v25098_v24 = vmul.f32 0.05103104, %v1793_v11  ;;  %v25100_v32 = vadd.f32 %v18909_v0, %v18908_v12  ;;  %20254 = vmatpush3.bf16.msra.mxu1 %v21608_v49 }
 0x36e   : > { %4402 = vmatmul.mubr.bf16.gmra.mrb[156].mxu0 %v24172_v13  ;;  %20255 = vmatprep.subr.bf16.mxu1 %v21611_v56 }
 0x36f   : > { %19266 = vmatpush3.bf16.msra.mxu0 %v21610_v27  ;;  %4700 = vmatprep.mubr.bf16.mxu0 %v24018_v30  ;;  %v20095_v53 = vpop.f32.mrb[36].mxu1  ;;  %v21616_v27 = vld [vmem:[%s30346_s8] sm:$0xff]  }
 0x370   : > { %v1814_v0 = vadd.f32 %v20095_v53, %v24927_v25  ;;  %v1805_v49 = vpop.f32.mrb[37].mxu1  ;;  %19267 = vmatprep.subr.bf16.mxu0 %v21612_v54  ;;  %v21617_v25 = vld [vmem:[%s30222_s4 + $0x388] sm:$0xff]  }
 0x371   : > { %v1806_v28 = vadd.f32 %v24901_v52, %v1805_v49  ;;  %v18911_v20 = vpop.f32.mrb[52].mxu0  ;;  %v20096_v63 = vpop.f32.mrb[38].mxu1  ;;  %20256 = vmatpush3.bf16.msra.mxu1 %v21611_v56  ;;  %v21618_v52 = vld [vmem:[%s30346_s8 + $0x48] sm:$0xff]  }
 0x372   : > { %v1817_v11 = vadd.f32 %v20096_v63, %v24929_v21  ;;  %v18912_v12 = vpop.f32.mrb[53].mxu0  ;;  %v1808_v51 = vpop.f32.mrb[39].mxu1  ;;  %20265 = vmatprep.subr.bf16.mxu1 %v21614_v38  ;;  %v25129_v54 = vmul.f32 0.05103104, %v1814_v0 }
 0x373   : > { %v25131_v56 = vadd.f32 %v18912_v12, %v18911_v20  ;;  %19268 = vmatpush3.bf16.msra.mxu0 %v21613_v35  ;;  %v1809_v53 = vadd.f32 %v24903_v40, %v1808_v51  ;;  %v18914_v49 = vpop.f32.mrb[54].mxu0  ;;  %v25134_v21 = vmul.f32 0.05103104, %v1806_v28  ;;  %v21619_v40 = vld [vmem:[%s30346_s8 + $0x8] sm:$0xff]   ;;  %v21620_v51 = vld [vmem:[%s30222_s4 + $0x390] sm:$0xff]   ;;  %v21623_v28 = vld [vmem:[%s30222_s4 + $0x398] sm:$0xff]  }
 0x374   : > { %30347 = vst [vmem:[#allocation33_spill] sm:$0xff] %v25129_v54  ;;  %v25136_v63 = vmul.f32 0.05103104, %v1817_v11  ;;  %v18915_v5 = vpop.f32.mrb[55].mxu0  ;;  %20258 = vmatmul.mubr.bf16.vlgmr.msra.gmra.mrb[88].mxu1 %v24214_v48  ;;  %19305 = vmatprep.subr.bf16.mxu0 %v21615_v6  ;;  %v21622_v6 = vld [vmem:[%s30346_s8 + $0x10] sm:$0xff]   ;;  %v21631_v35 = vld [vmem:[%s30346_s8 + $0x28] sm:$0xff]  }
 0x375   : > { %30348 = vst [vmem:[#allocation34_spill] sm:$0xff] %v25134_v21  ;;  %v25139_v31 = vmul.f32 0.05103104, %v1809_v53  ;;  %v25141_v44 = vadd.f32 %v18915_v5, %v18914_v49  ;;  %20261 = vmatprep.mubr.bf16.mxu1 %v24218_v42  ;;  %20266 = vmatpush3.bf16.msra.mxu1 %v21614_v38  ;;  %v21621_v38 = vld [vmem:[%s30346_s8 + $0x50] sm:$0xff]   ;;  %v21625_v53 = vld [vmem:[%s30346_s8 + $0x18] sm:$0xff]   ;;  %v21626_v49 = vld [vmem:[%s30222_s4 + $0x3a0] sm:$0xff]  }
 0x376   : > { %30349 = vst [vmem:[#allocation35_spill] sm:$0xff] %v25136_v63  ;;  %4701 = vmatmul.mubr.bf16.vlgmr.msra.gmra.mrb[160].mxu0 %v24016_v26  ;;  %20267 = vmatprep.subr.bf16.mxu1 %v21617_v25  ;;  %v21635_v54 = vld [vmem:[%s30222_s4 + $0x3b8] sm:$0xff]  }
 0x377   : > { %30350 = vst [vmem:[#allocation36_spill] sm:$0xff] %v25139_v31  ;;  %19306 = vmatpush3.bf16.msra.mxu0 %v21616_v27  ;;  %4708 = vmatprep.mubr.bf16.mxu0 %v24038_v46 }
 0x378   : > { %19307 = vmatprep.subr.bf16.mxu0 %v21618_v52 }
 0x379   : > { %v18917_v0 = vpop.f32.mrb[56].mxu0  ;;  %20268 = vmatpush3.bf16.msra.mxu1 %v21617_v25  ;;  %v21624_v25 = vld [vmem:[%s30346_s8 + $0x58] sm:$0xff]  }
 0x37a   : > { %v18918_v20 = vpop.f32.mrb[57].mxu0  ;;  %20269 = vmatprep.subr.bf16.mxu1 %v21620_v51 }
 0x37b   : > { %v25165_v27 = vadd.f32 %v18918_v20, %v18917_v0  ;;  %19308 = vmatpush3.bf16.msra.mxu0 %v21619_v40  ;;  %v18920_v11 = vpop.f32.mrb[58].mxu0  ;;  %v21627_v40 = vld [vmem:[%s30346_s8 + $0x60] sm:$0xff]   ;;  %v21629_v0 = vld [vmem:[%s30222_s4 + $0x3a8] sm:$0xff]  }
 0x37c   : > { %v18921_v12 = vpop.f32.mrb[59].mxu0  ;;  %20262 = vmatmul.mubr.bf16.gmra.mrb[92].mxu1 %v24245_v59  ;;  %19309 = vmatprep.subr.bf16.mxu0 %v21621_v38  ;;  %v21628_v38 = vld [vmem:[%s30346_s8 + $0x20] sm:$0xff]  }
 0x37d   : > { %v25171_v52 = vadd.f32 %v18921_v12, %v18920_v11  ;;  %20270 = vmatpush3.bf16.msra.mxu1 %v21620_v51  ;;  %20281 = vmatprep.mubr.bf16.mxu1 %v24177_v18 }
 0x37e   : > { %4709 = vmatmul.mubr.bf16.gmra.mrb[164].mxu0 %v24082_v19  ;;  %20271 = vmatprep.subr.bf16.mxu1 %v21623_v28 }
 0x37f   : > { %19310 = vmatpush3.bf16.msra.mxu0 %v21622_v6  ;;  %4716 = vmatprep.mubr.bf16.mxu0 %v24088_v3 }
 0x380   : > { %19311 = vmatprep.subr.bf16.mxu0 %v21624_v25 }
 0x381   : > { %v18923_v51 = vpop.f32.mrb[60].mxu0  ;;  %20272 = vmatpush3.bf16.msra.mxu1 %v21623_v28  ;;  %v21630_v28 = vld [vmem:[%s30346_s8 + $0x68] sm:$0xff]  }
 0x382   : > { %v18924_v20 = vpop.f32.mrb[61].mxu0  ;;  %20273 = vmatprep.subr.bf16.mxu1 %v21626_v49 }
 0x383   : > { %v25191_v6 = vadd.f32 %v18924_v20, %v18923_v51  ;;  %19312 = vmatpush3.bf16.msra.mxu0 %v21625_v53  ;;  %v18926_v11 = vpop.f32.mrb[62].mxu0  ;;  %v21632_v51 = vld [vmem:[%s30222_s4 + $0x3b0] sm:$0xff]  }
 0x384   : > { %v18927_v12 = vpop.f32.mrb[63].mxu0  ;;  %19313 = vmatprep.subr.bf16.mxu0 %v21627_v40 }
 0x385   : > { %v25196_v25 = vadd.f32 %v18927_v12, %v18926_v11  ;;  %20274 = vmatpush3.bf16.msra.mxu1 %v21626_v49  ;;  %v21633_v49 = vld [vmem:[%s30346_s8 + $0x70] sm:$0xff]  }
 0x386   : > { %4717 = vmatmul.mubr.bf16.gmra.mrb[168].mxu0 %v24128_v29  ;;  %20275 = vmatprep.subr.bf16.mxu1 %v21629_v0 }
 0x387   : > { %19314 = vmatpush3.bf16.msra.mxu0 %v21628_v38  ;;  %4724 = vmatprep.mubr.bf16.mxu0 %v24135_v57  ;;  %v20115_v53 = vpop.f32.mrb[40].mxu1  ;;  %v21634_v38 = vld [vmem:[%s30346_s8 + $0x30] sm:$0xff]  }
 0x388   : > { %v2121_v40 = vadd.f32 %v20115_v53, %v25000_v41  ;;  %v2112_v20 = vpop.f32.mrb[41].mxu1  ;;  %19315 = vmatprep.subr.bf16.mxu0 %v21630_v28 }
 0x389   : > { %v2113_v11 = vadd.f32 %v24959_v45, %v2112_v20  ;;  %v18957_v12 = vpop.f32.mrb[64].mxu0  ;;  %v20116_v5 = vpop.f32.mrb[42].mxu1  ;;  %20276 = vmatpush3.bf16.msra.mxu1 %v21629_v0  ;;  %v21636_v45 = vld [vmem:[%s30346_s8 + $0x78] sm:$0xff]  }
 0x38a   : > { %v2124_v41 = vadd.f32 %v20116_v5, %v25016_v60  ;;  %v18958_v28 = vpop.f32.mrb[65].mxu0  ;;  %v2115_v53 = vpop.f32.mrb[43].mxu1  ;;  %20277 = vmatprep.subr.bf16.mxu1 %v21632_v51  ;;  %v25221_v20 = vmul.f32 0.05103104, %v2121_v40  ;;  %v21637_v40 = vld [vmem:[%s30346_s8 + $0x38] sm:$0xff]  }
 0x38b   : > { %v25223_v0 = vadd.f32 %v18958_v28, %v18957_v12  ;;  %19316 = vmatpush3.bf16.msra.mxu0 %v21631_v35  ;;  %v2116_v63 = vadd.f32 %v24968_v23, %v2115_v53  ;;  %v18960_v21 = vpop.f32.mrb[66].mxu0  ;;  %v25226_v31 = vmul.f32 0.05103104, %v2113_v11  ;;  %v21638_v23 = vld [vmem:[%s30222_s4 + $0x440] sm:$0xff]  }
 0x38c   : > { %v25228_v62 = vmul.f32 0.05103104, %v2124_v41  ;;  %v18961_v60 = vpop.f32.mrb[67].mxu0  ;;  %19317 = vmatprep.subr.bf16.mxu0 %v21633_v49  ;;  %v21639_v11 = vld [vmem:[%s30346_s8 + $0x100] sm:$0xff]  }
 0x38d   : > { %v25230_v5 = vmul.f32 0.05103104, %v2116_v63  ;;  %v25232_v33 = vadd.f32 %v18961_v60, %v18960_v21  ;;  %20278 = vmatpush3.bf16.msra.mxu1 %v21632_v51 }
 0x38e   : > { %4725 = vmatmul.mubr.bf16.gmra.mrb[172].mxu0 %v24172_v13  ;;  %20279 = vmatprep.subr.bf16.mxu1 %v21635_v54 }
 0x38f   : > { %19318 = vmatpush3.bf16.msra.mxu0 %v21634_v38  ;;  %5046 = vmatprep.mubr.bf16.mxu0 %v24018_v30  ;;  %v20119_v21 = vpop.f32.mrb[44].mxu1  ;;  %v21640_v38 = vld [vmem:[%s30346_s8 + $0xc0] sm:$0xff]  }
 0x390   : > { %v2137_v51 = vadd.f32 %v20119_v21, %v25059_v34  ;;  %v2128_v49 = vpop.f32.mrb[45].mxu1  ;;  %19319 = vmatprep.subr.bf16.mxu0 %v21636_v45  ;;  %v21641_v34 = vld [vmem:[%s30222_s4 + $0x448] sm:$0xff]  }
 0x391   : > { %v2129_v12 = vadd.f32 %v25033_v7, %v2128_v49  ;;  %v18963_v41 = vpop.f32.mrb[68].mxu0  ;;  %v20120_v28 = vpop.f32.mrb[46].mxu1  ;;  %20280 = vmatpush3.bf16.msra.mxu1 %v21635_v54  ;;  %v21642_v7 = vld [vmem:[%s30346_s8 + $0x108] sm:$0xff]  }
 0x392   : > { %v2140_v53 = vadd.f32 %v20120_v28, %v25064_v10  ;;  %v18964_v60 = vpop.f32.mrb[69].mxu0  ;;  %v2131_v35 = vpop.f32.mrb[47].mxu1  ;;  %20289 = vmatprep.subr.bf16.mxu1 %v21638_v23  ;;  %v25261_v45 = vmul.f32 0.05103104, %v2137_v51 }
 0x393   : > { %19320 = vmatpush3.bf16.msra.mxu0 %v21637_v40  ;;  %v2132_v54 = vadd.f32 %v25046_v50, %v2131_v35  ;;  %v18966_v21 = vpop.f32.mrb[70].mxu0  ;;  %v25264_v49 = vadd.f32 %v18964_v60, %v18963_v41  ;;  %v25266_v10 = vmul.f32 0.05103104, %v2129_v12  ;;  %v21643_v50 = vld [vmem:[%s30346_s8 + $0xc8] sm:$0xff]   ;;  %v21644_v40 = vld [vmem:[%s30222_s4 + $0x450] sm:$0xff]   ;;  %v21647_v41 = vld [vmem:[%s30222_s4 + $0x458] sm:$0xff]  }
 0x394   : > { %30351 = vst [vmem:[#allocation37_spill] sm:$0xff] %v25261_v45  ;;  %v25268_v28 = vmul.f32 0.05103104, %v2140_v53  ;;  %v18967_v63 = vpop.f32.mrb[71].mxu0  ;;  %20282 = vmatmul.mubr.bf16.vlgmr.msra.gmra.mrb[96].mxu1 %v24214_v48  ;;  %19357 = vmatprep.subr.bf16.mxu0 %v21639_v11  ;;  %v21655_v11 = vld [vmem:[%s30346_s8 + $0xe8] sm:$0xff]  }
 0x395   : > { %30352 = vst [vmem:[#allocation38_spill] sm:$0xff] %v25266_v10  ;;  %v25271_v1 = vmul.f32 0.05103104, %v2132_v54  ;;  %20285 = vmatprep.mubr.bf16.mxu1 %v24218_v42  ;;  %20290 = vmatpush3.bf16.msra.mxu1 %v21638_v23  ;;  %v25280_v35 = vadd.f32 %v18967_v63, %v18966_v21  ;;  %v21645_v23 = vld [vmem:[%s30346_s8 + $0x110] sm:$0xff]   ;;  %v21649_v54 = vld [vmem:[%s30346_s8 + $0xd8] sm:$0xff]   ;;  %v21650_v21 = vld [vmem:[%s30222_s4 + $0x460] sm:$0xff]  }
 0x396   : > { %30353 = vst [vmem:[#allocation39_spill] sm:$0xff] %v25268_v28  ;;  %5047 = vmatmul.mubr.bf16.vlgmr.msra.gmra.mrb[176].mxu0 %v24016_v26  ;;  %20291 = vmatprep.subr.bf16.mxu1 %v21641_v34  ;;  %v21646_v63 = vld [vmem:[%s30346_s8 + $0xd0] sm:$0xff]  }
 0x397   : > { %30354 = vst [vmem:[#allocation40_spill] sm:$0xff] %v25271_v1  ;;  %19358 = vmatpush3.bf16.msra.mxu0 %v21640_v38  ;;  %5054 = vmatprep.mubr.bf16.mxu0 %v24038_v46 }
 0x398   : > { %19359 = vmatprep.subr.bf16.mxu0 %v21642_v7 }
 0x399   : > { %v18969_v12 = vpop.f32.mrb[72].mxu0  ;;  %20292 = vmatpush3.bf16.msra.mxu1 %v21641_v34  ;;  %v21648_v34 = vld [vmem:[%s30346_s8 + $0x118] sm:$0xff]  }
 0x39a   : > { %v18970_v53 = vpop.f32.mrb[73].mxu0  ;;  %20293 = vmatprep.subr.bf16.mxu1 %v21644_v40 }
 0x39b   : > { %19360 = vmatpush3.bf16.msra.mxu0 %v21643_v50  ;;  %v18972_v38 = vpop.f32.mrb[74].mxu0  ;;  %v25297_v60 = vadd.f32 %v18970_v53, %v18969_v12  ;;  %v21652_v12 = vld [vmem:[%s30346_s8 + $0xe0] sm:$0xff]   ;;  %v21653_v53 = vld [vmem:[%s30222_s4 + $0x468] sm:$0xff]  }
 0x39c   : > { %v18973_v7 = vpop.f32.mrb[75].mxu0  ;;  %20286 = vmatmul.mubr.bf16.gmra.mrb[100].mxu1 %v24245_v59  ;;  %19361 = vmatprep.subr.bf16.mxu0 %v21645_v23 }
 0x39d   : > { %20294 = vmatpush3.bf16.msra.mxu1 %v21644_v40  ;;  %20305 = vmatprep.mubr.bf16.mxu1 %v24177_v18  ;;  %v25310_v50 = vadd.f32 %v18973_v7, %v18972_v38  ;;  %v21651_v40 = vld [vmem:[%s30346_s8 + $0x120] sm:$0xff]  }
 0x39e   : > { %5055 = vmatmul.mubr.bf16.gmra.mrb[180].mxu0 %v24082_v19  ;;  %20295 = vmatprep.subr.bf16.mxu1 %v21647_v41 }
 0x39f   : > { %19362 = vmatpush3.bf16.msra.mxu0 %v21646_v63  ;;  %5062 = vmatprep.mubr.bf16.mxu0 %v24088_v3 }
 0x3a0   : > { %19363 = vmatprep.subr.bf16.mxu0 %v21648_v34 }
 0x3a1   : > { %v18975_v23 = vpop.f32.mrb[76].mxu0  ;;  %20296 = vmatpush3.bf16.msra.mxu1 %v21647_v41  ;;  %v21654_v41 = vld [vmem:[%s30346_s8 + $0x128] sm:$0xff]  }
 0x3a2   : > { %v18976_v38 = vpop.f32.mrb[77].mxu0  ;;  %20297 = vmatprep.subr.bf16.mxu1 %v21650_v21 }
 0x3a3   : > { %v25323_v63 = vadd.f32 %v18976_v38, %v18975_v23  ;;  %19364 = vmatpush3.bf16.msra.mxu0 %v21649_v54  ;;  %v18978_v7 = vpop.f32.mrb[78].mxu0  ;;  %v21656_v23 = vld [vmem:[%s30222_s4 + $0x470] sm:$0xff]  }
 0x3a4   : > { %v18979_v34 = vpop.f32.mrb[79].mxu0  ;;  %19365 = vmatprep.subr.bf16.mxu0 %v21651_v40 }
 0x3a5   : > { %v25328_v51 = vadd.f32 %v18979_v34, %v18978_v7  ;;  %20298 = vmatpush3.bf16.msra.mxu1 %v21650_v21  ;;  %v21657_v21 = vld [vmem:[%s30346_s8 + $0x130] sm:$0xff]  }
 0x3a6   : > { %5063 = vmatmul.mubr.bf16.gmra.mrb[184].mxu0 %v24128_v29  ;;  %20299 = vmatprep.subr.bf16.mxu1 %v21653_v53 }
 0x3a7   : > { %19366 = vmatpush3.bf16.msra.mxu0 %v21652_v12  ;;  %5070 = vmatprep.mubr.bf16.mxu0 %v24135_v57  ;;  %v20139_v54 = vpop.f32.mrb[48].mxu1 }
 0x3a8   : > { %v2444_v40 = vadd.f32 %v20139_v54, %v25131_v56  ;;  %v2435_v38 = vpop.f32.mrb[49].mxu1  ;;  %19367 = vmatprep.subr.bf16.mxu0 %v21654_v41  ;;  %v21659_v56 = vld [vmem:[%s30222_s4 + $0x478] sm:$0xff]  }
 0x3a9   : > { %v2436_v7 = vadd.f32 %v25091_v58, %v2435_v38  ;;  %v19009_v34 = vpop.f32.mrb[80].mxu0  ;;  %v20140_v45 = vpop.f32.mrb[50].mxu1  ;;  %20300 = vmatpush3.bf16.msra.mxu1 %v21653_v53  ;;  %v21658_v58 = vld [vmem:[%s30346_s8 + $0xf0] sm:$0xff]   ;;  %v21660_v38 = vld [vmem:[%s30346_s8 + $0x138] sm:$0xff]  }
 0x3aa   : > { %v2447_v28 = vadd.f32 %v20140_v45, %v25141_v44  ;;  %v19010_v10 = vpop.f32.mrb[81].mxu0  ;;  %v2438_v12 = vpop.f32.mrb[51].mxu1  ;;  %20301 = vmatprep.subr.bf16.mxu1 %v21656_v23  ;;  %v25353_v53 = vmul.f32 0.05103104, %v2444_v40 }
 0x3ab   : > { %v25347_v54 = vadd.f32 %v19010_v10, %v19009_v34  ;;  %19368 = vmatpush3.bf16.msra.mxu0 %v21655_v11  ;;  %v2439_v41 = vadd.f32 %v25100_v32, %v2438_v12  ;;  %v19012_v1 = vpop.f32.mrb[82].mxu0  ;;  %v25360_v10 = vmul.f32 0.05103104, %v2436_v7  ;;  %v21663_v12 = vld [vmem:[%s30346_s8 + $0x1c0] sm:$0xff]  }
 0x3ac   : > { %30355 = vst [vmem:[#allocation41_spill] sm:$0xff] %v25353_v53  ;;  %v25355_v44 = vmul.f32 0.05103104, %v2447_v28  ;;  %v19013_v45 = vpop.f32.mrb[83].mxu0  ;;  %19369 = vmatprep.subr.bf16.mxu0 %v21657_v21  ;;  %v21662_v28 = vld [vmem:[%s30346_s8 + $0x80] sm:$0xff]  }
 0x3ad   : > { %30357 = vst [vmem:[#allocation43_spill] sm:$0xff] %v25360_v10  ;;  %v25362_v11 = vmul.f32 0.05103104, %v2439_v41  ;;  %v25364_v32 = vadd.f32 %v19013_v45, %v19012_v1  ;;  %20302 = vmatpush3.bf16.msra.mxu1 %v21656_v23  ;;  %v21661_v1 = vld [vmem:[%s30346_s8 + $0xf8] sm:$0xff]  }
 0x3ae   : > { %30356 = vst [vmem:[#allocation42_spill] sm:$0xff] %v25355_v44  ;;  %5071 = vmatmul.mubr.bf16.gmra.mrb[188].mxu0 %v24172_v13  ;;  %20303 = vmatprep.subr.bf16.mxu1 %v21659_v56 }
 0x3af   : > { %30358 = vst [vmem:[#allocation44_spill] sm:$0xff] %v25362_v11  ;;  %19370 = vmatpush3.bf16.msra.mxu0 %v21658_v58  ;;  %5369 = vmatprep.mubr.bf16.mxu0 %v24018_v30  ;;  %v20143_v21 = vpop.f32.mrb[52].mxu1 }
 0x3b0   : > { %v2460_v23 = vadd.f32 %v20143_v21, %v25191_v6  ;;  %v2451_v7 = vpop.f32.mrb[53].mxu1  ;;  %19371 = vmatprep.subr.bf16.mxu0 %v21660_v38  ;;  %v21665_v6 = vld [vmem:[%s30346_s8 + $0x88] sm:$0xff]  }
 0x3b1   : > { %v2452_v41 = vadd.f32 %v25165_v27, %v2451_v7  ;;  %v19015_v45 = vpop.f32.mrb[84].mxu0  ;;  %v20144_v34 = vpop.f32.mrb[54].mxu1  ;;  %20304 = vmatpush3.bf16.msra.mxu1 %v21659_v56  ;;  %v21664_v27 = vld [vmem:[%s30346_s8 + $0x180] sm:$0xff]   ;;  %v21668_v7 = vld [vmem:[%s30346_s8 + $0x90] sm:$0xff]  }
 0x3b2   : > { %v2463_v58 = vadd.f32 %v20144_v34, %v25196_v25  ;;  %v19016_v40 = vpop.f32.mrb[85].mxu0  ;;  %v2454_v15 = vpop.f32.mrb[55].mxu1  ;;  %20313 = vmatprep.subr.bf16.mxu1 %v21662_v28  ;;  %v25393_v56 = vmul.f32 0.05103104, %v2460_v23 }
 0x3b3   : > { %v25387_v21 = vadd.f32 %v19016_v40, %v19015_v45  ;;  %19372 = vmatpush3.bf16.msra.mxu0 %v21661_v1  ;;  %v2455_v38 = vadd.f32 %v25171_v52, %v2454_v15  ;;  %v19018_v4 = vpop.f32.mrb[86].mxu0  ;;  %v21666_v40 = vld [vmem:[%s30346_s8 + $0x1c8] sm:$0xff]   ;;  %v25401_v1 = vmul.f32 0.05103104, %v2452_v41 }
 0x3b4   : > { %30359 = vst [vmem:[#allocation45_spill] sm:$0xff] %v25393_v56  ;;  %v25395_v25 = vmul.f32 0.05103104, %v2463_v58  ;;  %v19019_v34 = vpop.f32.mrb[87].mxu0  ;;  %20306 = vmatmul.mubr.bf16.vlgmr.msra.gmra.mrb[104].mxu1 %v24214_v48  ;;  %19409 = vmatprep.subr.bf16.mxu0 %v21663_v12  ;;  %v21671_v58 = vld [vmem:[%s30346_s8 + $0x98] sm:$0xff]  }
 0x3b5   : > { %30361 = vst [vmem:[#allocation47_spill] sm:$0xff] %v25401_v1  ;;  %v25403_v15 = vmul.f32 0.05103104, %v2455_v38  ;;  %v25405_v52 = vadd.f32 %v19019_v34, %v19018_v4  ;;  %20309 = vmatprep.mubr.bf16.mxu1 %v24218_v42  ;;  %20314 = vmatpush3.bf16.msra.mxu1 %v21662_v28  ;;  %v21667_v4 = vld [vmem:[%s30346_s8 + $0x188] sm:$0xff]   ;;  %v21669_v28 = vld [vmem:[%s30346_s8 + $0x1d0] sm:$0xff]  }
 0x3b6   : > { %30360 = vst [vmem:[#allocation46_spill] sm:$0xff] %v25395_v25  ;;  %5370 = vmatmul.mubr.bf16.vlgmr.msra.gmra.mrb[192].mxu0 %v24016_v26  ;;  %20315 = vmatprep.subr.bf16.mxu1 %v21665_v6  ;;  %v21670_v34 = vld [vmem:[%s30346_s8 + $0x190] sm:$0xff]  }
 0x3b7   : > { %30362 = vst [vmem:[#allocation48_spill] sm:$0xff] %v25403_v15  ;;  %19410 = vmatpush3.bf16.msra.mxu0 %v21664_v27  ;;  %5377 = vmatprep.mubr.bf16.mxu0 %v24038_v46 }
 0x3b8   : > { %19411 = vmatprep.subr.bf16.mxu0 %v21666_v40 }
 0x3b9   : > { %v19021_v41 = vpop.f32.mrb[88].mxu0  ;;  %20316 = vmatpush3.bf16.msra.mxu1 %v21665_v6  ;;  %v21672_v6 = vld [vmem:[%s30346_s8 + $0x1d8] sm:$0xff]  }
 0x3ba   : > { %v19022_v45 = vpop.f32.mrb[89].mxu0  ;;  %20317 = vmatprep.subr.bf16.mxu1 %v21668_v7 }
 0x3bb   : > { %v25426_v38 = vadd.f32 %v19022_v45, %v19021_v41  ;;  %19412 = vmatpush3.bf16.msra.mxu0 %v21667_v4  ;;  %v19024_v27 = vpop.f32.mrb[90].mxu0  ;;  %v21674_v4 = vld [vmem:[%s30346_s8 + $0xa0] sm:$0xff]  }
 0x3bc   : > { %v19025_v40 = vpop.f32.mrb[91].mxu0  ;;  %20310 = vmatmul.mubr.bf16.gmra.mrb[108].mxu1 %v24245_v59  ;;  %19413 = vmatprep.subr.bf16.mxu0 %v21669_v28  ;;  %v21673_v28 = vld [vmem:[%s30346_s8 + $0x198] sm:$0xff]  }
 0x3bd   : > { %v25435_v23 = vadd.f32 %v19025_v40, %v19024_v27  ;;  %20318 = vmatpush3.bf16.msra.mxu1 %v21668_v7  ;;  %20329 = vmatprep.mubr.bf16.mxu1 %v24177_v18  ;;  %v21675_v7 = vld [vmem:[%s30346_s8 + $0x1e0] sm:$0xff]   ;;  %v21677_v27 = vld [vmem:[%s30346_s8 + $0xa8] sm:$0xff]  }
 0x3be   : > { %5378 = vmatmul.mubr.bf16.gmra.mrb[196].mxu0 %v24082_v19  ;;  %20319 = vmatprep.subr.bf16.mxu1 %v21671_v58  ;;  %v21676_v40 = vld [vmem:[%s30346_s8 + $0x1a0] sm:$0xff]  }
 0x3bf   : > { %19414 = vmatpush3.bf16.msra.mxu0 %v21670_v34  ;;  %5385 = vmatprep.mubr.bf16.mxu0 %v24088_v3 }
 0x3c0   : > { %19415 = vmatprep.subr.bf16.mxu0 %v21672_v6 }
 0x3c1   : > { %v19027_v41 = vpop.f32.mrb[92].mxu0  ;;  %20320 = vmatpush3.bf16.msra.mxu1 %v21671_v58  ;;  %v21678_v58 = vld [vmem:[%s30346_s8 + $0x1e8] sm:$0xff]  }
 0x3c2   : > { %v19028_v45 = vpop.f32.mrb[93].mxu0  ;;  %20321 = vmatprep.subr.bf16.mxu1 %v21674_v4 }
 0x3c3   : > { %19416 = vmatpush3.bf16.msra.mxu0 %v21673_v28  ;;  %v19030_v34 = vpop.f32.mrb[94].mxu0  ;;  %v25455_v12 = vadd.f32 %v19028_v45, %v19027_v41  ;;  %v21680_v28 = vld [vmem:[%s30346_s8 + $0xb0] sm:$0xff]  }
 0x3c4   : > { %v19031_v6 = vpop.f32.mrb[95].mxu0  ;;  %19417 = vmatprep.subr.bf16.mxu0 %v21675_v7  ;;  %v21679_v7 = vld [vmem:[%s30346_s8 + $0x1a8] sm:$0xff]  }
 0x3c5   : > { %20322 = vmatpush3.bf16.msra.mxu1 %v21674_v4  ;;  %v25460_v56 = vadd.f32 %v19031_v6, %v19030_v34  ;;  %v21681_v34 = vld [vmem:[%s30346_s8 + $0x1f0] sm:$0xff]  }
 0x3c6   : > { %5386 = vmatmul.mubr.bf16.gmra.mrb[200].mxu0 %v24128_v29  ;;  %20323 = vmatprep.subr.bf16.mxu1 %v21677_v27 }
 0x3c7   : > { %19418 = vmatpush3.bf16.msra.mxu0 %v21676_v40  ;;  %5393 = vmatprep.mubr.bf16.mxu0 %v24135_v57  ;;  %v20163_v41 = vpop.f32.mrb[56].mxu1 }
 0x3c8   : > { %v2767_v45 = vadd.f32 %v20163_v41, %v25264_v49  ;;  %v2758_v4 = vpop.f32.mrb[57].mxu1  ;;  %19419 = vmatprep.subr.bf16.mxu0 %v21678_v58  ;;  %v21683_v49 = vld [vmem:[%s30346_s8 + $0xb8] sm:$0xff]  }
 0x3c9   : > { %v2759_v6 = vadd.f32 %v25223_v0, %v2758_v4  ;;  %v19061_v25 = vpop.f32.mrb[96].mxu0  ;;  %v20164_v1 = vpop.f32.mrb[58].mxu1  ;;  %20324 = vmatpush3.bf16.msra.mxu1 %v21677_v27  ;;  %v21682_v0 = vld [vmem:[%s30346_s8 + $0x1b0] sm:$0xff]  }
 0x3ca   : > { %v2770_v40 = vadd.f32 %v20164_v1, %v25280_v35  ;;  %v19062_v15 = vpop.f32.mrb[97].mxu0  ;;  %v2761_v17 = vpop.f32.mrb[59].mxu1  ;;  %20325 = vmatprep.subr.bf16.mxu1 %v21680_v28  ;;  %v25485_v27 = vmul.f32 0.05103104, %v2767_v45 }
 0x3cb   : > { %19420 = vmatpush3.bf16.msra.mxu0 %v21679_v7  ;;  %v2762_v58 = vadd.f32 %v25232_v33, %v2761_v17  ;;  %v19064_v41 = vpop.f32.mrb[98].mxu0  ;;  %v25483_v4 = vadd.f32 %v19062_v15, %v19061_v25  ;;  %v25492_v7 = vmul.f32 0.05103104, %v2759_v6  ;;  %v21686_v15 = vld [vmem:[%s30346_s8 + $0x140] sm:$0xff]  }
 0x3cc   : > { %30363 = vst [vmem:[#allocation49_spill] sm:$0xff] %v25485_v27  ;;  %v25487_v35 = vmul.f32 0.05103104, %v2770_v40  ;;  %v19065_v1 = vpop.f32.mrb[99].mxu0  ;;  %19421 = vmatprep.subr.bf16.mxu0 %v21681_v34 }
 0x3cd   : > { %v25494_v33 = vmul.f32 0.05103104, %v2762_v58  ;;  %20326 = vmatpush3.bf16.msra.mxu1 %v21680_v28  ;;  %v25496_v17 = vadd.f32 %v19065_v1, %v19064_v41  ;;  %v21685_v28 = vld [vmem:[%s30346_s8 + $0x1b8] sm:$0xff]   ;;  %v21687_v58 = vld [vmem:[%s30346_s8 + $0x280] sm:$0xff]  }
 0x3ce   : > { %30364 = vst [vmem:[#allocation50_spill] sm:$0xff] %v25487_v35  ;;  %5394 = vmatmul.mubr.bf16.gmra.mrb[204].mxu0 %v24172_v13  ;;  %20327 = vmatprep.subr.bf16.mxu1 %v21683_v49 }
 0x3cf   : > { %19422 = vmatpush3.bf16.msra.mxu0 %v21682_v0  ;;  %5692 = vmatprep.mubr.bf16.mxu0 %v24018_v30  ;;  %v20167_v34 = vpop.f32.mrb[60].mxu1 }
 0x3d0   : > { %v2783_v6 = vadd.f32 %v20167_v34, %v25323_v63  ;;  %v2774_v40 = vpop.f32.mrb[61].mxu1  ;;  %19423 = vmatprep.subr.bf16.mxu0 %v21684_v16  ;;  %v21689_v63 = vld [vmem:[%s30346_s8 + $0x148] sm:$0xff]  }
 0x3d1   : > { %v2775_v41 = vadd.f32 %v25297_v60, %v2774_v40  ;;  %v19067_v1 = vpop.f32.mrb[100].mxu0  ;;  %v20168_v25 = vpop.f32.mrb[62].mxu1  ;;  %20328 = vmatpush3.bf16.msra.mxu1 %v21683_v49  ;;  %v21688_v60 = vld [vmem:[%s30346_s8 + $0x240] sm:$0xff]  }
 0x3d2   : > { %v2786_v0 = vadd.f32 %v20168_v25, %v25328_v51  ;;  %v19068_v45 = vpop.f32.mrb[101].mxu0  ;;  %v2777_v14 = vpop.f32.mrb[63].mxu1  ;;  %20337 = vmatprep.subr.bf16.mxu1 %v21686_v15  ;;  %v25525_v49 = vmul.f32 0.05103104, %v2783_v6 }
 0x3d3   : > { %19424 = vmatpush3.bf16.msra.mxu0 %v21685_v28  ;;  %v2778_v16 = vadd.f32 %v25310_v50, %v2777_v14  ;;  %v19070_v34 = vpop.f32.mrb[102].mxu0  ;;  %v25523_v40 = vadd.f32 %v19068_v45, %v19067_v1  ;;  %v21690_v28 = vld [vmem:[%s30346_s8 + $0x288] sm:$0xff]   ;;  %v25533_v14 = vmul.f32 0.05103104, %v2775_v41  ;;  %v21693_v1 = vld [vmem:[%s30346_s8 + $0x290] sm:$0xff]  }
 0x3d4   : > { %30365 = vst [vmem:[#allocation51_spill] sm:$0xff] %v25525_v49  ;;  %v25527_v51 = vmul.f32 0.05103104, %v2786_v0  ;;  %v19071_v25 = vpop.f32.mrb[103].mxu0  ;;  %20330 = vmatmul.mubr.bf16.vlgmr.msra.gmra.mrb[112].mxu1 %v24214_v48  ;;  %19461 = vmatprep.subr.bf16.mxu0 %v21687_v58  ;;  %v21692_v58 = vld [vmem:[%s30346_s8 + $0x150] sm:$0xff]  }
 0x3d5   : > { %30367 = vst [vmem:[#allocation53_spill] sm:$0xff] %v25533_v14  ;;  %v25535_v50 = vmul.f32 0.05103104, %v2778_v16  ;;  %20333 = vmatprep.mubr.bf16.mxu1 %v24218_v42  ;;  %20338 = vmatpush3.bf16.msra.mxu1 %v21686_v15  ;;  %v25538_v45 = vadd.f32 %v19071_v25, %v19070_v34  ;;  %v21691_v15 = vld [vmem:[%s30346_s8 + $0x248] sm:$0xff]   ;;  %v21695_v34 = vld [vmem:[%s30346_s8 + $0x158] sm:$0xff]   ;;  %v21694_v25 = vld [vmem:[%s30346_s8 + $0x250] sm:$0xff]  }
 0x3d6   : > { %30366 = vst [vmem:[#allocation52_spill] sm:$0xff] %v25527_v51  ;;  %5693 = vmatmul.mubr.bf16.vlgmr.msra.gmra.mrb[208].mxu0 %v24016_v26  ;;  %20339 = vmatprep.subr.bf16.mxu1 %v21689_v63 }
 0x3d7   : > { %30368 = vst [vmem:[#allocation54_spill] sm:$0xff] %v25535_v50  ;;  %19462 = vmatpush3.bf16.msra.mxu0 %v21688_v60  ;;  %5700 = vmatprep.mubr.bf16.mxu0 %v24038_v46 }
 0x3d8   : > { %19463 = vmatprep.subr.bf16.mxu0 %v21690_v28 }
 0x3d9   : > { %v19073_v0 = vpop.f32.mrb[104].mxu0  ;;  %20340 = vmatpush3.bf16.msra.mxu1 %v21689_v63  ;;  %v21696_v63 = vld [vmem:[%s30346_s8 + $0x298] sm:$0xff]  }
 0x3da   : > { %v19074_v16 = vpop.f32.mrb[105].mxu0  ;;  %20341 = vmatprep.subr.bf16.mxu1 %v21692_v58 }
 0x3db   : > { %19464 = vmatpush3.bf16.msra.mxu0 %v21691_v15  ;;  %v19076_v60 = vpop.f32.mrb[106].mxu0  ;;  %v25561_v6 = vadd.f32 %v19074_v16, %v19073_v0  ;;  %v21698_v15 = vld [vmem:[%s30346_s8 + $0x160] sm:$0xff]  }
 0x3dc   : > { %v19077_v28 = vpop.f32.mrb[107].mxu0  ;;  %20334 = vmatmul.mubr.bf16.gmra.mrb[116].mxu1 %v24245_v59  ;;  %19465 = vmatprep.subr.bf16.mxu0 %v21693_v1  ;;  %v21697_v1 = vld [vmem:[%s30346_s8 + $0x258] sm:$0xff]  }
 0x3dd   : > { %20342 = vmatpush3.bf16.msra.mxu1 %v21692_v58  ;;  %20353 = vmatprep.mubr.bf16.mxu1 %v24177_v18  ;;  %v25568_v41 = vadd.f32 %v19077_v28, %v19076_v60  ;;  %v21699_v58 = vld [vmem:[%s30346_s8 + $0x2a0] sm:$0xff]   ;;  %v21701_v60 = vld [vmem:[%s30346_s8 + $0x168] sm:$0xff]  }
 0x3de   : > { %5701 = vmatmul.mubr.bf16.gmra.mrb[212].mxu0 %v24082_v19  ;;  %20343 = vmatprep.subr.bf16.mxu1 %v21695_v34  ;;  %v21700_v28 = vld [vmem:[%s30346_s8 + $0x260] sm:$0xff]  }
 0x3df   : > { %19466 = vmatpush3.bf16.msra.mxu0 %v21694_v25  ;;  %5708 = vmatprep.mubr.bf16.mxu0 %v24088_v3 }
 0x3e0   : > { %19467 = vmatprep.subr.bf16.mxu0 %v21696_v63 }
 0x3e1   : > { %v19079_v0 = vpop.f32.mrb[108].mxu0  ;;  %20344 = vmatpush3.bf16.msra.mxu1 %v21695_v34  ;;  %v21702_v34 = vld [vmem:[%s30346_s8 + $0x2a8] sm:$0xff]  }
 0x3e2   : > { %v19080_v16 = vpop.f32.mrb[109].mxu0  ;;  %20345 = vmatprep.subr.bf16.mxu1 %v21698_v15 }
 0x3e3   : > { %19468 = vmatpush3.bf16.msra.mxu0 %v21697_v1  ;;  %v19082_v25 = vpop.f32.mrb[110].mxu0  ;;  %v25587_v49 = vadd.f32 %v19080_v16, %v19079_v0  ;;  %v21704_v1 = vld [vmem:[%s30346_s8 + $0x170] sm:$0xff]  }
 0x3e4   : > { %v19083_v63 = vpop.f32.mrb[111].mxu0  ;;  %19469 = vmatprep.subr.bf16.mxu0 %v21699_v58  ;;  %v21703_v58 = vld [vmem:[%s30346_s8 + $0x268] sm:$0xff]  }
 0x3e5   : > { %20346 = vmatpush3.bf16.msra.mxu1 %v21698_v15  ;;  %v25592_v51 = vadd.f32 %v19083_v63, %v19082_v25  ;;  %v21705_v25 = vld [vmem:[%s30346_s8 + $0x2b0] sm:$0xff]  }
 0x3e6   : > { %5709 = vmatmul.mubr.bf16.gmra.mrb[216].mxu0 %v24128_v29  ;;  %20347 = vmatprep.subr.bf16.mxu1 %v21701_v60 }
 0x3e7   : > { %19470 = vmatpush3.bf16.msra.mxu0 %v21700_v28  ;;  %5716 = vmatprep.mubr.bf16.mxu0 %v24135_v57  ;;  %v20187_v0 = vpop.f32.mrb[64].mxu1 }
 0x3e8   : > { %v3161_v16 = vadd.f32 %v20187_v0, %v25387_v21  ;;  %v3152_v15 = vpop.f32.mrb[65].mxu1  ;;  %19471 = vmatprep.subr.bf16.mxu0 %v21702_v34  ;;  %v21707_v21 = vld [vmem:[%s30346_s8 + $0x178] sm:$0xff]  }
 0x3e9   : > { %v3153_v63 = vadd.f32 %v25347_v54, %v3152_v15  ;;  %v19113_v14 = vpop.f32.mrb[112].mxu0  ;;  %v20188_v50 = vpop.f32.mrb[66].mxu1  ;;  %20348 = vmatpush3.bf16.msra.mxu1 %v21701_v60  ;;  %v21706_v54 = vld [vmem:[%s30346_s8 + $0x270] sm:$0xff]  }
 0x3ea   : > { %v3164_v28 = vadd.f32 %v20188_v50, %v25405_v52  ;;  %v19114_v53 = vpop.f32.mrb[113].mxu0  ;;  %v3155_v44 = vpop.f32.mrb[67].mxu1  ;;  %20349 = vmatprep.subr.bf16.mxu1 %v21704_v1  ;;  %v21708_v50 = vld [vmem:[%s30346_s8 + $0x2b8] sm:$0xff]  }
 0x3eb   : > { %19472 = vmatpush3.bf16.msra.mxu0 %v21703_v58  ;;  %v3156_v34 = vadd.f32 %v25364_v32, %v3155_v44  ;;  %v19116_v0 = vpop.f32.mrb[114].mxu0  ;;  %v25615_v15 = vadd.f32 %v19114_v53, %v19113_v14  ;;  %v21710_v53 = vld [vmem:[%s30346_s8 + $0x200] sm:$0xff]   ;;  %v21709_v32 = vld [vmem:[%s30346_s8 + $0x278] sm:$0xff]  }
 0x3ec   : > { %v25617_v60 = vpack.c.bf16 %v3164_v28, %v3161_v16  ;;  %v19117_v52 = vpop.f32.mrb[115].mxu0  ;;  %19473 = vmatprep.subr.bf16.mxu0 %v21705_v25  ;;  %v21711_v16 = vld [vmem:[%s30346_s8 + $0x340] sm:$0xff]  }
 0x3ed   : > { %v25622_v27 = vpack.c.bf16 %v3156_v34, %v3153_v63  ;;  %20350 = vmatpush3.bf16.msra.mxu1 %v21704_v1  ;;  %v25624_v58 = vadd.f32 %v19117_v52, %v19116_v0 }
 0x3ee   : > { %5717 = vmatmul.mubr.bf16.gmra.mrb[220].mxu0 %v24172_v13  ;;  %20351 = vmatprep.subr.bf16.mxu1 %v21707_v21 }
 0x3ef   : > { %19474 = vmatpush3.bf16.msra.mxu0 %v21706_v54  ;;  %6015 = vmatprep.mubr.bf16.mxu0 %v24018_v30  ;;  %v20191_v44 = vpop.f32.mrb[68].mxu1 }
 0x3f0   : > { %v3177_v14 = vadd.f32 %v20191_v44, %v25455_v12  ;;  %v3168_v1 = vpop.f32.mrb[69].mxu1  ;;  %19475 = vmatprep.subr.bf16.mxu0 %v21708_v50  ;;  %v21713_v12 = vld [vmem:[%s30346_s8 + $0x208] sm:$0xff]  }
 0x3f1   : > { %v3169_v25 = vadd.f32 %v25426_v38, %v3168_v1  ;;  %v19119_v63 = vpop.f32.mrb[116].mxu0  ;;  %v20192_v28 = vpop.f32.mrb[70].mxu1  ;;  %20352 = vmatpush3.bf16.msra.mxu1 %v21707_v21  ;;  %v21712_v38 = vld [vmem:[%s30346_s8 + $0x300] sm:$0xff]   ;;  %v21714_v1 = vld [vmem:[%s30346_s8 + $0x348] sm:$0xff]  }
 0x3f2   : > { %v3180_v34 = vadd.f32 %v20192_v28, %v25460_v56  ;;  %v19120_v0 = vpop.f32.mrb[117].mxu0  ;;  %v3171_v54 = vpop.f32.mrb[71].mxu1  ;;  %20361 = vmatprep.subr.bf16.mxu1 %v21710_v53  ;;  %v21719_v28 = vld [vmem:[%s30346_s8 + $0x218] sm:$0xff]  }
 0x3f3   : > { %19476 = vmatpush3.bf16.msra.mxu0 %v21709_v32  ;;  %v3172_v52 = vadd.f32 %v25435_v23, %v3171_v54  ;;  %v19122_v50 = vpop.f32.mrb[118].mxu0  ;;  %v25647_v44 = vadd.f32 %v19120_v0, %v19119_v63  ;;  %v21718_v0 = vld [vmem:[%s30346_s8 + $0x310] sm:$0xff]  }
 0x3f4   : > { %v25649_v21 = vpack.c.bf16 %v3180_v34, %v3177_v14  ;;  %v19123_v56 = vpop.f32.mrb[119].mxu0  ;;  %20354 = vmatmul.mubr.bf16.vlgmr.msra.gmra.mrb[120].mxu1 %v24214_v48  ;;  %19513 = vmatprep.subr.bf16.mxu0 %v21711_v16  ;;  %v21716_v14 = vld [vmem:[%s30346_s8 + $0x210] sm:$0xff]   ;;  %v21715_v16 = vld [vmem:[%s30346_s8 + $0x308] sm:$0xff]  }
 0x3f5   : > { %v25655_v32 = vpack.c.bf16 %v3172_v52, %v3169_v25  ;;  %20357 = vmatprep.mubr.bf16.mxu1 %v24218_v42  ;;  %20362 = vmatpush3.bf16.msra.mxu1 %v21710_v53  ;;  %v25658_v23 = vadd.f32 %v19123_v56, %v19122_v50  ;;  %v21717_v53 = vld [vmem:[%s30346_s8 + $0x350] sm:$0xff]   ;;  %v21721_v56 = vld [vmem:[%s30346_s8 + $0x318] sm:$0xff]  }
 0x3f6   : > { %30369 = vst [vmem:[#allocation55_spill] sm:$0xff] %v25649_v21  ;;  %6016 = vmatmul.mubr.bf16.vlgmr.msra.gmra.mrb[224].mxu0 %v24016_v26  ;;  %20363 = vmatprep.subr.bf16.mxu1 %v21713_v12 }
 0x3f7   : > { %30370 = vst [vmem:[#allocation56_spill] sm:$0xff] %v25655_v32  ;;  %19514 = vmatpush3.bf16.msra.mxu0 %v21712_v38  ;;  %6023 = vmatprep.mubr.bf16.mxu0 %v24038_v46  ;;  %v21722_v38 = vld [vmem:[%s30346_s8 + $0x220] sm:$0xff]  }
 0x3f8   : > { %19515 = vmatprep.subr.bf16.mxu0 %v21714_v1  ;;  %v21723_v1 = vld [vmem:[%s30346_s8 + $0x360] sm:$0xff]  }
 0x3f9   : > { %v19125_v25 = vpop.f32.mrb[120].mxu0  ;;  %20364 = vmatpush3.bf16.msra.mxu1 %v21713_v12  ;;  %v21720_v12 = vld [vmem:[%s30346_s8 + $0x358] sm:$0xff]  }
 0x3fa   : > { %v19126_v63 = vpop.f32.mrb[121].mxu0  ;;  %20365 = vmatprep.subr.bf16.mxu1 %v21716_v14 }
 0x3fb   : > { %19516 = vmatpush3.bf16.msra.mxu0 %v21715_v16  ;;  %v19128_v34 = vpop.f32.mrb[122].mxu0  ;;  %v25677_v54 = vadd.f32 %v19126_v63, %v19125_v25  ;;  %v21724_v63 = vld [vmem:[%s30346_s8 + $0x320] sm:$0xff]  }
 0x3fc   : > { %v19129_v52 = vpop.f32.mrb[123].mxu0  ;;  %20358 = vmatmul.mubr.bf16.gmra.mrb[124].mxu1 %v24245_v59  ;;  %19517 = vmatprep.subr.bf16.mxu0 %v21717_v53  ;;  %v21725_v53 = vld [vmem:[%s30346_s8 + $0x228] sm:$0xff]  }
 0x3fd   : > { %20366 = vmatpush3.bf16.msra.mxu1 %v21716_v14  ;;  %20377 = vmatprep.mubr.bf16.mxu1 %v24177_v18  ;;  %v25684_v50 = vadd.f32 %v19129_v52, %v19128_v34 }
 0x3fe   : > { %6024 = vmatmul.mubr.bf16.gmra.mrb[228].mxu0 %v24082_v19  ;;  %20367 = vmatprep.subr.bf16.mxu1 %v21719_v28 }
 0x3ff   : > { %19518 = vmatpush3.bf16.msra.mxu0 %v21718_v0  ;;  %6031 = vmatprep.mubr.bf16.mxu0 %v24088_v3 }
 0x400   : > { %19519 = vmatprep.subr.bf16.mxu0 %v21720_v12  ;;  %v21728_v12 = vld [vmem:[%s30346_s8 + $0x230] sm:$0xff]  }
 0x401   : > { %v19131_v14 = vpop.f32.mrb[124].mxu0  ;;  %20368 = vmatpush3.bf16.msra.mxu1 %v21719_v28  ;;  %v21726_v28 = vld [vmem:[%s30346_s8 + $0x368] sm:$0xff]  }
 0x402   : > { %v19132_v16 = vpop.f32.mrb[125].mxu0  ;;  %20369 = vmatprep.subr.bf16.mxu1 %v21722_v38 }
 0x403   : > { %19520 = vmatpush3.bf16.msra.mxu0 %v21721_v56  ;;  %v19134_v25 = vpop.f32.mrb[126].mxu0  ;;  %v25703_v34 = vadd.f32 %v19132_v16, %v19131_v14  ;;  %v21729_v16 = vld [vmem:[%s30346_s8 + $0x370] sm:$0xff]  }
 0x404   : > { %v19135_v0 = vpop.f32.mrb[127].mxu0  ;;  %19521 = vmatprep.subr.bf16.mxu0 %v21723_v1  ;;  %v21727_v1 = vld [vmem:[%s30346_s8 + $0x328] sm:$0xff]  }
 0x405   : > { %20370 = vmatpush3.bf16.msra.mxu1 %v21722_v38  ;;  %v25708_v52 = vadd.f32 %v19135_v0, %v19134_v25 }
 0x406   : > { %6032 = vmatmul.mubr.bf16.gmra.mrb[232].mxu0 %v24128_v29  ;;  %20371 = vmatprep.subr.bf16.mxu1 %v21725_v53 }
 0x407   : > { %19522 = vmatpush3.bf16.msra.mxu0 %v21724_v63  ;;  %6039 = vmatprep.mubr.bf16.mxu0 %v24135_v57  ;;  %v20211_v56 = vpop.f32.mrb[72].mxu1 }
 0x408   : > { %v3484_v14 = vadd.f32 %v20211_v56, %v25523_v40  ;;  %v3475_v38 = vpop.f32.mrb[73].mxu1  ;;  %19523 = vmatprep.subr.bf16.mxu0 %v21726_v28  ;;  %v21731_v40 = vld [vmem:[%s30346_s8 + $0x238] sm:$0xff]  }
 0x409   : > { %v3476_v25 = vadd.f32 %v25483_v4, %v3475_v38  ;;  %v19165_v0 = vpop.f32.mrb[128].mxu0  ;;  %v20212_v21 = vpop.f32.mrb[74].mxu1  ;;  %20372 = vmatpush3.bf16.msra.mxu1 %v21725_v53  ;;  %v21730_v4 = vld [vmem:[%s30346_s8 + $0x330] sm:$0xff]  }
 0x40a   : > { %v3487_v63 = vadd.f32 %v20212_v21, %v25538_v45  ;;  %v19166_v32 = vpop.f32.mrb[129].mxu0  ;;  %v3478_v35 = vpop.f32.mrb[75].mxu1  ;;  %20373 = vmatprep.subr.bf16.mxu1 %v21728_v12  ;;  %v21732_v21 = vld [vmem:[%s30346_s8 + $0x378] sm:$0xff]  }
 0x40b   : > { %19524 = vmatpush3.bf16.msra.mxu0 %v21727_v1  ;;  %v3479_v28 = vadd.f32 %v25496_v17, %v3478_v35  ;;  %v19168_v56 = vpop.f32.mrb[130].mxu0  ;;  %v25731_v38 = vadd.f32 %v19166_v32, %v19165_v0  ;;  %v21734_v35 = vld [vmem:[%s30346_s8 + $0x2c0] sm:$0xff]   ;;  %v21733_v32 = vld [vmem:[%s30346_s8 + $0x338] sm:$0xff]  }
 0x40c   : > { %v25733_v53 = vpack.c.bf16 %v3487_v63, %v3484_v14  ;;  %v19169_v45 = vpop.f32.mrb[131].mxu0  ;;  %19525 = vmatprep.subr.bf16.mxu0 %v21729_v16  ;;  %v21735_v16 = vld [vmem:[%s30346_s8 + $0x400] sm:$0xff]  }
 0x40d   : > { %v25738_v10 = vpack.c.bf16 %v3479_v28, %v3476_v25  ;;  %20374 = vmatpush3.bf16.msra.mxu1 %v21728_v12  ;;  %v25740_v1 = vadd.f32 %v19169_v45, %v19168_v56 }
 0x40e   : > { %6040 = vmatmul.mubr.bf16.gmra.mrb[236].mxu0 %v24172_v13  ;;  %20375 = vmatprep.subr.bf16.mxu1 %v21731_v40 }
 0x40f   : > { %19526 = vmatpush3.bf16.msra.mxu0 %v21730_v4  ;;  %6338 = vmatprep.mubr.bf16.mxu0 %v24018_v30  ;;  %v20215_v17 = vpop.f32.mrb[76].mxu1 }
 0x410   : > { %v3500_v14 = vadd.f32 %v20215_v17, %v25587_v49  ;;  %v3491_v12 = vpop.f32.mrb[77].mxu1  ;;  %19527 = vmatprep.subr.bf16.mxu0 %v21732_v21  ;;  %v21737_v49 = vld [vmem:[%s30346_s8 + $0x2c8] sm:$0xff]  }
 0x411   : > { %v3492_v25 = vadd.f32 %v25561_v6, %v3491_v12  ;;  %v19171_v0 = vpop.f32.mrb[132].mxu0  ;;  %v20216_v63 = vpop.f32.mrb[78].mxu1  ;;  %20376 = vmatpush3.bf16.msra.mxu1 %v21731_v40  ;;  %v21736_v6 = vld [vmem:[%s30346_s8 + $0x3c0] sm:$0xff]   ;;  %v21738_v12 = vld [vmem:[%s30346_s8 + $0x408] sm:$0xff]  }
 0x412   : > { %v3503_v28 = vadd.f32 %v20216_v63, %v25592_v51  ;;  %v19172_v56 = vpop.f32.mrb[133].mxu0  ;;  %v3494_v4 = vpop.f32.mrb[79].mxu1  ;;  %20385 = vmatprep.subr.bf16.mxu1 %v21734_v35  ;;  %v21743_v63 = vld [vmem:[%s30346_s8 + $0x2d8] sm:$0xff]  }
 0x413   : > { %19528 = vmatpush3.bf16.msra.mxu0 %v21733_v32  ;;  %v3495_v45 = vadd.f32 %v25568_v41, %v3494_v4  ;;  %v19174_v21 = vpop.f32.mrb[134].mxu0  ;;  %v25763_v17 = vadd.f32 %v19172_v56, %v19171_v0  ;;  %v21742_v56 = vld [vmem:[%s30346_s8 + $0x3d0] sm:$0xff]  }
 0x414   : > { %v25765_v40 = vpack.c.bf16 %v3503_v28, %v3500_v14  ;;  %v19175_v51 = vpop.f32.mrb[135].mxu0  ;;  %20378 = vmatmul.mubr.bf16.vlgmr.msra.gmra.mrb[128].mxu1 %v24214_v48  ;;  %19565 = vmatprep.subr.bf16.mxu0 %v21735_v16  ;;  %v21740_v14 = vld [vmem:[%s30346_s8 + $0x2d0] sm:$0xff]   ;;  %v21739_v16 = vld [vmem:[%s30346_s8 + $0x3c8] sm:$0xff]  }
 0x415   : > { %v25771_v32 = vpack.c.bf16 %v3495_v45, %v3492_v25  ;;  %20381 = vmatprep.mubr.bf16.mxu1 %v24218_v42  ;;  %20386 = vmatpush3.bf16.msra.mxu1 %v21734_v35  ;;  %v25774_v41 = vadd.f32 %v19175_v51, %v19174_v21  ;;  %v21741_v35 = vld [vmem:[%s30346_s8 + $0x410] sm:$0xff]   ;;  %v21745_v51 = vld [vmem:[%s30346_s8 + $0x3d8] sm:$0xff]  }
 0x416   : > { %30371 = vst [vmem:[#allocation57_spill] sm:$0xff] %v25765_v40  ;;  %6339 = vmatmul.mubr.bf16.vlgmr.msra.gmra.mrb[240].mxu0 %v24016_v26  ;;  %20387 = vmatprep.subr.bf16.mxu1 %v21737_v49 }
 0x417   : > { %30372 = vst [vmem:[#allocation58_spill] sm:$0xff] %v25771_v32  ;;  %19566 = vmatpush3.bf16.msra.mxu0 %v21736_v6  ;;  %6346 = vmatprep.mubr.bf16.mxu0 %v24038_v46  ;;  %v21746_v6 = vld [vmem:[%s30346_s8 + $0x2e0] sm:$0xff]  }
 0x418   : > { %19567 = vmatprep.subr.bf16.mxu0 %v21738_v12  ;;  %v21747_v12 = vld [vmem:[%s30346_s8 + $0x420] sm:$0xff]  }
 0x419   : > { %v19177_v25 = vpop.f32.mrb[136].mxu0  ;;  %20388 = vmatpush3.bf16.msra.mxu1 %v21737_v49  ;;  %v21744_v49 = vld [vmem:[%s30346_s8 + $0x418] sm:$0xff]  }
 0x41a   : > { %v19178_v0 = vpop.f32.mrb[137].mxu0  ;;  %20389 = vmatprep.subr.bf16.mxu1 %v21740_v14 }
 0x41b   : > { %19568 = vmatpush3.bf16.msra.mxu0 %v21739_v16  ;;  %v19180_v28 = vpop.f32.mrb[138].mxu0  ;;  %v25793_v4 = vadd.f32 %v19178_v0, %v19177_v25 }
 0x41c   : > { %v19181_v45 = vpop.f32.mrb[139].mxu0  ;;  %20382 = vmatmul.mubr.bf16.gmra.mrb[132].mxu1 %v24245_v59  ;;  %19569 = vmatprep.subr.bf16.mxu0 %v21741_v35  ;;  %v21749_v35 = vld [vmem:[%s30346_s8 + $0x2e8] sm:$0xff]  }
 0x41d   : > { %20390 = vmatpush3.bf16.msra.mxu1 %v21740_v14  ;;  %20401 = vmatprep.mubr.bf16.mxu1 %v24177_v18  ;;  %v25800_v21 = vadd.f32 %v19181_v45, %v19180_v28  ;;  %v21748_v28 = vld [vmem:[%s30346_s8 + $0x3e0] sm:$0xff]  }
 0x41e   : > { %6347 = vmatmul.mubr.bf16.gmra.mrb[244].mxu0 %v24082_v19  ;;  %20391 = vmatprep.subr.bf16.mxu1 %v21743_v63 }
 0x41f   : > { %19570 = vmatpush3.bf16.msra.mxu0 %v21742_v56  ;;  %6354 = vmatprep.mubr.bf16.mxu0 %v24088_v3 }
 0x420   : > { %19571 = vmatprep.subr.bf16.mxu0 %v21744_v49  ;;  %v21752_v49 = vld [vmem:[%s30346_s8 + $0x2f0] sm:$0xff]  }
 0x421   : > { %v19183_v14 = vpop.f32.mrb[140].mxu0  ;;  %20392 = vmatpush3.bf16.msra.mxu1 %v21743_v63  ;;  %v21750_v63 = vld [vmem:[%s30346_s8 + $0x428] sm:$0xff]  }
 0x422   : > { %v19184_v16 = vpop.f32.mrb[141].mxu0  ;;  %20393 = vmatprep.subr.bf16.mxu1 %v21746_v6 }
 0x423   : > { %v25816_v25 = vadd.f32 %v19184_v16, %v19183_v14  ;;  %19572 = vmatpush3.bf16.msra.mxu0 %v21745_v51  ;;  %v19186_v0 = vpop.f32.mrb[142].mxu0 }
 0x424   : > { %v19187_v56 = vpop.f32.mrb[143].mxu0  ;;  %19573 = vmatprep.subr.bf16.mxu0 %v21747_v12  ;;  %v21751_v12 = vld [vmem:[%s30346_s8 + $0x3e8] sm:$0xff]  }
 0x425   : > { %v25824_v45 = vadd.f32 %v19187_v56, %v19186_v0  ;;  %20394 = vmatpush3.bf16.msra.mxu1 %v21746_v6  ;;  %v21753_v6 = vld [vmem:[%s30346_s8 + $0x430] sm:$0xff]  }
 0x426   : > { %6355 = vmatmul.mubr.bf16.gmra.mrb[248].mxu0 %v24128_v29  ;;  %20395 = vmatprep.subr.bf16.mxu1 %v21749_v35 }
 0x427   : > { %19574 = vmatpush3.bf16.msra.mxu0 %v21748_v28  ;;  %6362 = vmatprep.mubr.bf16.mxu0 %v24135_v57  ;;  %v20235_v51 = vpop.f32.mrb[80].mxu1 }
 0x428   : > { %v3807_v14 = vadd.f32 %v20235_v51, %v25647_v44  ;;  %v3798_v16 = vpop.f32.mrb[81].mxu1  ;;  %19575 = vmatprep.subr.bf16.mxu0 %v21750_v63  ;;  %v21755_v44 = vld [vmem:[%s30346_s8 + $0x2f8] sm:$0xff]  }
 0x429   : > { %v3799_v0 = vadd.f32 %v25615_v15, %v3798_v16  ;;  %v19217_v56 = vpop.f32.mrb[144].mxu0  ;;  %v20236_v40 = vpop.f32.mrb[82].mxu1  ;;  %20396 = vmatpush3.bf16.msra.mxu1 %v21749_v35  ;;  %v21754_v15 = vld [vmem:[%s30346_s8 + $0x3f0] sm:$0xff]  }
 0x42a   : > { %v3810_v28 = vadd.f32 %v20236_v40, %v25658_v23  ;;  %v19218_v32 = vpop.f32.mrb[145].mxu0  ;;  %v3801_v11 = vpop.f32.mrb[83].mxu1  ;;  %20397 = vmatprep.subr.bf16.mxu1 %v21752_v49  ;;  %v21756_v40 = vld [vmem:[%s30346_s8 + $0x438] sm:$0xff]  }
 0x42b   : > { %v25843_v51 = vadd.f32 %v19218_v32, %v19217_v56  ;;  %19576 = vmatpush3.bf16.msra.mxu0 %v21751_v12  ;;  %v3802_v63 = vadd.f32 %v25624_v58, %v3801_v11  ;;  %v19220_v61 = vpop.f32.mrb[146].mxu0  ;;  %v21758_v11 = vld [vmem:[%s30346_s8 + $0x380] sm:$0xff]   ;;  %v21757_v12 = vld [vmem:[%s30346_s8 + $0x3f8] sm:$0xff]  }
 0x42c   : > { %v25849_v35 = vpack.c.bf16 %v3810_v28, %v3807_v14  ;;  %v19221_v23 = vpop.f32.mrb[147].mxu0  ;;  %19577 = vmatprep.subr.bf16.mxu0 %v21753_v6 }
 0x42d   : > { %v25854_v16 = vpack.c.bf16 %v3802_v63, %v3799_v0  ;;  %v25856_v32 = vadd.f32 %v19221_v23, %v19220_v61  ;;  %20398 = vmatpush3.bf16.msra.mxu1 %v21752_v49 }
 0x42e   : > { %6363 = vmatmul.mubr.bf16.gmra.mrb[252].mxu0 %v24172_v13  ;;  %20399 = vmatprep.subr.bf16.mxu1 %v21755_v44 }
 0x42f   : > { %19578 = vmatpush3.bf16.msra.mxu0 %v21754_v15  ;;  %6661 = vmatprep.mubr.bf16.mxu0 %v24018_v30  ;;  %v20239_v58 = vpop.f32.mrb[84].mxu1  ;;  %v21759_v30 = vld [vmem:[%s30346_s8 + $0x388] sm:$0xff]  }
 0x430   : > { %v3823_v14 = vadd.f32 %v20239_v58, %v25703_v34  ;;  %v3814_v61 = vpop.f32.mrb[85].mxu1  ;;  %19579 = vmatprep.subr.bf16.mxu0 %v21756_v40 }
 0x431   : > { %v3815_v49 = vadd.f32 %v25677_v54, %v3814_v61  ;;  %v19223_v6 = vpop.f32.mrb[148].mxu0  ;;  %v20240_v0 = vpop.f32.mrb[86].mxu1  ;;  %20400 = vmatpush3.bf16.msra.mxu1 %v21755_v44 }
 0x432   : > { %v3826_v56 = vadd.f32 %v20240_v0, %v25708_v52  ;;  %v19224_v28 = vpop.f32.mrb[149].mxu0  ;;  %v3817_v63 = vpop.f32.mrb[87].mxu1  ;;  %20409 = vmatprep.subr.bf16.mxu1 %v21758_v11 }
 0x433   : > { %v25872_v15 = vadd.f32 %v19224_v28, %v19223_v6  ;;  %19580 = vmatpush3.bf16.msra.mxu0 %v21757_v12  ;;  %v3818_v34 = vadd.f32 %v25684_v50, %v3817_v63  ;;  %v19226_v23 = vpop.f32.mrb[150].mxu0  ;;  %v21760_v50 = vld [vmem:[%s30346_s8 + $0x390] sm:$0xff]  }
 0x434   : > { %v25875_v54 = vpack.c.bf16 %v3826_v56, %v3823_v14  ;;  %21203 = vmatprep.subr.msk.bf16.mxu0 %vm6894_vm0, %v25738_v10  ;;  %v19227_v52 = vpop.f32.mrb[151].mxu0  ;;  %20402 = vmatmul.mubr.bf16.vlgmr.msra.gmra.mrb[136].mxu1 %v24214_v48  ;;  %v21763_v56 = vld [vmem:[%s30346_s8 + $0x3a8] sm:$0xff]  }
 0x435   : > { %v25880_v44 = vpack.c.bf16 %v3818_v34, %v3815_v49  ;;  %v25882_v40 = vadd.f32 %v19227_v52, %v19226_v23  ;;  %20405 = vmatprep.mubr.bf16.mxu1 %v24218_v42  ;;  %20410 = vmatpush3.bf16.msra.mxu1 %v21758_v11  ;;  %v6963_v49 = vsel %vm6894_vm0, %v25738_v10, 0 }
 0x436   : > { %6662 = vmatmul.mubr.bf16.vlgmr.msra.gmra.mrb[0].mxu0 %v24016_v26  ;;  %20411 = vmatprep.subr.bf16.mxu1 %v21759_v30  ;;  %v21761_v26 = vld [vmem:[%s30346_s8 + $0x398] sm:$0xff]  }
 0x437   : > { %6669 = vmatprep.mubr.bf16.mxu0 %v24038_v46  ;;  %v21762_v46 = vld [vmem:[%s30346_s8 + $0x3a0] sm:$0xff]  }
 0x439   : > { %v19229_v58 = vpop.f32.mrb[152].mxu0  ;;  %20412 = vmatpush3.bf16.msra.mxu1 %v21759_v30 }
 0x43a   : > { %v19230_v12 = vpop.f32.mrb[153].mxu0  ;;  %20413 = vmatprep.subr.bf16.mxu1 %v21760_v50 }
 0x43b   : > { %v25890_v14 = vadd.f32 %v19230_v12, %v19229_v58  ;;  %v19232_v61 = vpop.f32.mrb[154].mxu0 }
 0x43c   : > { %20466 = vmatpush3.bf16.xpose.msra.mxu0 %v6963_v49  ;;  %v19233_v11 = vpop.f32.mrb[155].mxu0  ;;  %20406 = vmatmul.mubr.bf16.gmra.mrb[140].mxu1 %v24245_v59 }
 0x43d   : > { %v25898_v6 = vadd.f32 %v19233_v11, %v19232_v61  ;;  %21204 = vmatprep.subr.msk.bf16.mxu0 %vm6894_vm0, %v25733_v53  ;;  %20414 = vmatpush3.bf16.msra.mxu1 %v21760_v50 }
 0x43e   : > { %20425 = vmatprep.mubr.bf16.mxu1 %v24177_v18  ;;  %6670 = vmatmul.mubr.bf16.gmra.mrb[4].mxu0 %v24082_v19  ;;  %v6966_v19 = vsel %vm6894_vm0, %v25733_v53, 0 }
 0x43f   : > { %6677 = vmatprep.mubr.bf16.mxu0 %v24088_v3  ;;  %20415 = vmatprep.subr.bf16.mxu1 %v21761_v26  ;;  %v21764_v3 = vld [vmem:[%s30346_s8 + $0x3b0] sm:$0xff]  }
 0x441   : > { %v19235_v10 = vpop.f32.mrb[156].mxu0  ;;  %20416 = vmatpush3.bf16.msra.mxu1 %v21761_v26  ;;  %v21765_v26 = vld [vmem:[%s30346_s8 + $0x3b8] sm:$0xff]  }
 0x442   : > { %v19236_v0 = vpop.f32.mrb[157].mxu0  ;;  %20417 = vmatprep.subr.bf16.mxu1 %v21762_v46 }
 0x443   : > { %v25911_v28 = vadd.f32 %v19236_v0, %v19235_v10  ;;  %v19238_v63 = vpop.f32.mrb[158].mxu0 }
 0x444   : > { %20468 = vmatpush3.bf16.xpose.msra.mxu0 %v6966_v19  ;;  %v19239_v30 = vpop.f32.mrb[159].mxu0 }
 0x445   : > { %v25915_v34 = vadd.f32 %v19239_v30, %v19238_v63  ;;  %20418 = vmatpush3.bf16.msra.mxu1 %v21762_v46 }
 0x446   : > { %6678 = vmatmul.mubr.bf16.gmra.mrb[8].mxu0 %v24128_v29  ;;  %20419 = vmatprep.subr.bf16.mxu1 %v21763_v56 }
 0x447   : > { %6685 = vmatprep.mubr.bf16.mxu0 %v24135_v57  ;;  %v20259_v23 = vpop.f32.mrb[88].mxu1 }
 0x448   : > { %v4130_v52 = vadd.f32 %v20259_v23, %v25763_v17  ;;  %v4121_v50 = vpop.f32.mrb[89].mxu1 }
 0x449   : > { %v4122_v53 = vadd.f32 %v25731_v38, %v4121_v50  ;;  %v19269_v58 = vpop.f32.mrb[160].mxu0  ;;  %v20260_v12 = vpop.f32.mrb[90].mxu1  ;;  %20420 = vmatpush3.bf16.msra.mxu1 %v21763_v56  ;;  %v30373_v56 = vpack.c.bf16 %v24966_v37, %v24962_v2  ;;  %v21767_v2 = vld [vmem:[%s30346_s8 + $0x448] sm:$0xff]  }
 0x44a   : > { %v4133_v61 = vadd.f32 %v20260_v12, %v25774_v41  ;;  %v19270_v49 = vpop.f32.mrb[161].mxu0  ;;  %v4124_v29 = vpop.f32.mrb[91].mxu1  ;;  %20421 = vmatprep.subr.bf16.mxu1 %v21764_v3  ;;  %v21766_v41 = vld [vmem:[%s30346_s8 + $0x440] sm:$0xff]  }
 0x44b   : > { %v25928_v11 = vadd.f32 %v19270_v49, %v19269_v58  ;;  %v4125_v57 = vadd.f32 %v25740_v1, %v4124_v29  ;;  %v19272_v17 = vpop.f32.mrb[162].mxu0  ;;  %v21768_v49 = vld [vmem:[%s30346_s8 + $0x450] sm:$0xff]   ;;  %v30375_v29 = vpack.c.bf16 %v25230_v5, %v25226_v31  ;;  %v21770_v5 = vld [vmem:[%s30346_s8 + $0x460] sm:$0xff]  }
 0x44c   : > { %v4811_v46 = vpack.c.bf16 %v4133_v61, %v4130_v52  ;;  %v19273_v10 = vpop.f32.mrb[163].mxu0  ;;  %v30374_v61 = vpack.c.bf16 %v24964_v22, %v24957_v43  ;;  %v21769_v22 = vld [vmem:[%s30346_s8 + $0x458] sm:$0xff]  }
 0x44d   : > { %v4810_v38 = vpack.c.bf16 %v4125_v57, %v4122_v53  ;;  %v25931_v0 = vadd.f32 %v19273_v10, %v19272_v17  ;;  %20422 = vmatpush3.bf16.msra.mxu1 %v21764_v3 }
 0x44e   : > { %6686 = vmatmul.mubr.bf16.gmra.mrb[12].mxu0 %v24172_v13  ;;  %20423 = vmatprep.subr.bf16.mxu1 %v21765_v26  ;;  %v7088_v31 = vsel %vm6894_vm0, %v4811_v46, 0 }
 0x44f   : > { %20469 = vmatprep.mubr.msk.bf16.mxu0 %vm6894_vm0, %v30373_v56  ;;  %v20263_v1 = vpop.f32.mrb[92].mxu1  ;;  %21207 = vmatprep.subr.msk.bf16.mxu0 %vm6894_vm0, %v4810_v38 }
 0x450   : > { %v4146_v63 = vadd.f32 %v20263_v1, %v25816_v25  ;;  %v4137_v19 = vpop.f32.mrb[93].mxu1  ;;  %v21771_v1 = vld [vmem:[%s30346_s8 + $0x468] sm:$0xff]  }
 0x451   : > { %v4138_v30 = vadd.f32 %v25793_v4, %v4137_v19  ;;  %v19275_v3 = vpop.f32.mrb[164].mxu0  ;;  %v20264_v13 = vpop.f32.mrb[94].mxu1  ;;  %20424 = vmatpush3.bf16.msra.mxu1 %v21765_v26 }
 0x452   : > { %v4149_v23 = vadd.f32 %v20264_v13, %v25824_v45  ;;  %v19276_v52 = vpop.f32.mrb[165].mxu0  ;;  %v4140_v50 = vpop.f32.mrb[95].mxu1  ;;  %20433 = vmatprep.subr.bf16.mxu1 %v21766_v41  ;;  %v30377_v13 = vpack.c.bf16 %v25494_v33, %v25492_v7  ;;  %v21773_v7 = vld [vmem:[%s30346_s8 + $0x478] sm:$0xff]  }
 0x453   : > { %v25948_v37 = vadd.f32 %v19276_v52, %v19275_v3  ;;  %v4141_v53 = vadd.f32 %v25800_v21, %v4140_v50  ;;  %v19278_v25 = vpop.f32.mrb[166].mxu0  ;;  %v7085_v21 = vsel %vm6894_vm0, %v4810_v38, 0  ;;  %v21772_v3 = vld [vmem:[%s30346_s8 + $0x470] sm:$0xff]  }
 0x454   : > { %v25951_v58 = vpack.c.bf16 %v4149_v23, %v4146_v63  ;;  %v19279_v4 = vpop.f32.mrb[167].mxu0  ;;  %20426 = vmatmul.mubr.bf16.vlgmr.msra.gmra.mrb[144].mxu1 %v24214_v48 }
 0x455   : > { %v25954_v12 = vpack.c.bf16 %v4141_v53, %v4138_v30  ;;  %v25956_v45 = vadd.f32 %v19279_v4, %v19278_v25  ;;  %20429 = vmatprep.mubr.bf16.mxu1 %v24218_v42  ;;  %20434 = vmatpush3.bf16.msra.mxu1 %v21766_v41 }
 0x456   : > { %20470 = vmatmul.mubr.msk.bf16.vlgmr.msra.gmra.mrb[16].mxu0 %vm6894_vm0, %v30374_v61  ;;  %20435 = vmatprep.subr.bf16.mxu1 %v21767_v2 }
 0x457   : > { %20482 = vmatpush3.bf16.xpose.msra.mxu0 %v7085_v21  ;;  %20485 = vmatprep.mubr.msk.bf16.mxu0 %vm6894_vm0, %v30375_v29 }
 0x458   : > { %21208 = vmatprep.subr.msk.bf16.mxu0 %vm6894_vm0, %v4811_v46  ;;  %v30376_v46 = vpack.c.bf16 %v25228_v62, %v25221_v20 }
 0x459   : > { %v19281_v26 = vpop.f32.mrb[168].mxu0  ;;  %20436 = vmatpush3.bf16.msra.mxu1 %v21767_v2 }
 0x45a   : > { %v19282_v43 = vpop.f32.mrb[169].mxu0  ;;  %20437 = vmatprep.subr.bf16.mxu1 %v21768_v49 }
 0x45b   : > { %v25975_v57 = vadd.f32 %v19282_v43, %v19281_v26  ;;  %v19284_v17 = vpop.f32.mrb[170].mxu0 }
 0x45c   : > { %v19285_v10 = vpop.f32.mrb[171].mxu0  ;;  %20430 = vmatmul.mubr.bf16.gmra.mrb[148].mxu1 %v24245_v59 }
 0x45d   : > { %v25978_v38 = vadd.f32 %v19285_v10, %v19284_v17  ;;  %20438 = vmatpush3.bf16.msra.mxu1 %v21768_v49  ;;  %20449 = vmatprep.mubr.bf16.mxu1 %v24177_v18 }
 0x45e   : > { %20439 = vmatprep.subr.bf16.mxu1 %v21769_v22 }
 0x45f   : > { %20484 = vmatpush3.bf16.xpose.msra.mxu0 %v7088_v31 }
 0x461   : > { %v19287_v41 = vpop.f32.mrb[172].mxu0  ;;  %20440 = vmatpush3.bf16.msra.mxu1 %v21769_v22 }
 0x462   : > { %v19288_v56 = vpop.f32.mrb[173].mxu0  ;;  %20441 = vmatprep.subr.bf16.mxu1 %v21770_v5 }
 0x463   : > { %v25988_v63 = vadd.f32 %v19288_v56, %v19287_v41  ;;  %v19290_v19 = vpop.f32.mrb[174].mxu0 }
 0x464   : > { %v19291_v18 = vpop.f32.mrb[175].mxu0 }
 0x465   : > { %v25990_v30 = vadd.f32 %v19291_v18, %v19290_v19  ;;  %20442 = vmatpush3.bf16.msra.mxu1 %v21770_v5 }
 0x466   : > { %20486 = vmatmul.mubr.msk.bf16.vlgmr.msra.gmra.mrb[20].mxu0 %vm6894_vm0, %v30376_v46  ;;  %20443 = vmatprep.subr.bf16.mxu1 %v21771_v1  ;;  %v6902_v46 = vsel %vm6894_vm0, %v25622_v27, 0 }
 0x467   : > { %20501 = vmatprep.mubr.msk.bf16.mxu0 %vm6894_vm0, %v30377_v13  ;;  %v20283_v23 = vpop.f32.mrb[96].mxu1 }
 0x468   : > { %v4453_v52 = vadd.f32 %v20283_v23, %v25872_v15  ;;  %v4444_v50 = vpop.f32.mrb[97].mxu1 }
 0x469   : > { %v4445_v2 = vadd.f32 %v25843_v51, %v4444_v50  ;;  %v19321_v53 = vpop.f32.mrb[176].mxu0  ;;  %v20284_v62 = vpop.f32.mrb[98].mxu1  ;;  %20444 = vmatpush3.bf16.msra.mxu1 %v21771_v1 }
 0x46a   : > { %v4456_v20 = vadd.f32 %v20284_v62, %v25882_v40  ;;  %v19322_v25 = vpop.f32.mrb[177].mxu0  ;;  %v4447_v4 = vpop.f32.mrb[99].mxu1  ;;  %20445 = vmatprep.subr.bf16.mxu1 %v21772_v3 }
 0x46b   : > { %v26009_v33 = vadd.f32 %v19322_v25, %v19321_v53  ;;  %v4448_v61 = vadd.f32 %v25856_v32, %v4447_v4  ;;  %v19324_v15 = vpop.f32.mrb[178].mxu0 }
 0x46c   : > { %v26012_v21 = vpack.c.bf16 %v4456_v20, %v4453_v52  ;;  %v19325_v51 = vpop.f32.mrb[179].mxu0 }
 0x46d   : > { %v26014_v49 = vpack.c.bf16 %v4448_v61, %v4445_v2  ;;  %v26016_v29 = vadd.f32 %v19325_v51, %v19324_v15  ;;  %20446 = vmatpush3.bf16.msra.mxu1 %v21772_v3  ;;  %v7024_v61 = vsel %vm6894_vm0, %v25854_v16, 0 }
 0x46e   : > { %20447 = vmatprep.subr.bf16.mxu1 %v21773_v7 }
 0x46f   : > { %v20287_v40 = vpop.f32.mrb[100].mxu1 }
 0x470   : > { %v4469_v26 = vadd.f32 %v20287_v40, %v25911_v28  ;;  %v4460_v43 = vpop.f32.mrb[101].mxu1 }
 0x471   : > { %v4461_v22 = vadd.f32 %v25890_v14, %v4460_v43  ;;  %v19327_v17 = vpop.f32.mrb[180].mxu0  ;;  %v20288_v10 = vpop.f32.mrb[102].mxu1  ;;  %20448 = vmatpush3.bf16.msra.mxu1 %v21773_v7 }
 0x472   : > { %v4472_v32 = vadd.f32 %v20288_v10, %v25915_v34  ;;  %v19328_v31 = vpop.f32.mrb[181].mxu0  ;;  %v4463_v5 = vpop.f32.mrb[103].mxu1  ;;  %21201 = vmatprep.subr.msk.bf16.mxu1 %vm6894_vm0, %v25622_v27  ;;  %v6905_v27 = vsel %vm6894_vm0, %v25617_v60, 0 }
 0x473   : > { %v26023_v41 = vadd.f32 %v19328_v31, %v19327_v17  ;;  %v4464_v56 = vadd.f32 %v25898_v6, %v4463_v5  ;;  %v19330_v1 = vpop.f32.mrb[182].mxu0  ;;  %v7027_v31 = vsel %vm6894_vm0, %v25849_v35, 0 }
 0x474   : > { %v26026_v19 = vpack.c.bf16 %v4472_v32, %v4469_v26  ;;  %v19331_v28 = vpop.f32.mrb[183].mxu0  ;;  %20450 = vmatmul.mubr.bf16.vlgmr.msra.gmra.mrb[152].mxu1 %v24214_v48 }
 0x475   : > { %v26029_v14 = vpack.c.bf16 %v4464_v56, %v4461_v22  ;;  %v26031_v18 = vadd.f32 %v19331_v28, %v19330_v1  ;;  %20453 = vmatprep.mubr.bf16.mxu1 %v24218_v42  ;;  %v30378_v42 = vpack.c.bf16 %v24838_v8, %v24832_v39 }
 0x479   : > { %v19333_v34 = vpop.f32.mrb[184].mxu0 }
 0x47a   : > { %v19334_v3 = vpop.f32.mrb[185].mxu0  ;;  %20458 = vmatpush3.bf16.xpose.msra.mxu1 %v6902_v46 }
 0x47b   : > { %v26036_v13 = vadd.f32 %v19334_v3, %v19333_v34  ;;  %v19336_v6 = vpop.f32.mrb[186].mxu0  ;;  %21202 = vmatprep.subr.msk.bf16.mxu1 %vm6894_vm0, %v25617_v60  ;;  %v30379_v60 = vpack.c.bf16 %v24834_v55, %v24829_v36 }
 0x47c   : > { %v19337_v23 = vpop.f32.mrb[187].mxu0  ;;  %20454 = vmatmul.mubr.bf16.gmra.mrb[156].mxu1 %v24245_v59 }
 0x47d   : > { %v26041_v48 = vadd.f32 %v19337_v23, %v19336_v6  ;;  %20461 = vmatprep.mubr.msk.bf16.mxu1 %vm6894_vm0, %v30378_v42  ;;  %v30381_v23 = vld [vmem:[#allocation32_spill] sm:$0xff] }
 0x47e   : > { %v30382_v42 = vpack.c.bf16 %v25096_v47, %v30381_v23 }
 0x481   : > { %v19339_v52 = vpop.f32.mrb[188].mxu0 }
 0x482   : > { %v19340_v50 = vpop.f32.mrb[189].mxu0  ;;  %20460 = vmatpush3.bf16.xpose.msra.mxu1 %v6905_v27  ;;  %v30383_v27 = vld [vmem:[#allocation44_spill] sm:$0xff] }
 0x483   : > { %v26049_v2 = vadd.f32 %v19340_v50, %v19339_v52  ;;  %v19342_v53 = vpop.f32.mrb[190].mxu0  ;;  %21205 = vmatprep.subr.msk.bf16.mxu1 %vm6894_vm0, %v25854_v16  ;;  %v30384_v50 = vld [vmem:[#allocation43_spill] sm:$0xff] }
 0x484   : > { %v19343_v59 = vpop.f32.mrb[191].mxu0 }
 0x485   : > { %v26053_v62 = vadd.f32 %v19343_v59, %v19342_v53  ;;  %v30385_v53 = vpack.c.bf16 %v30383_v27, %v30384_v50 }
 0x487   : > { %v20307_v20 = vpop.f32.mrb[104].mxu1 }
 0x488   : > { %v4776_v39 = vadd.f32 %v20307_v20, %v25948_v37  ;;  %v4767_v8 = vpop.f32.mrb[105].mxu1  ;;  %v30380_v37 = vpack.c.bf16 %v25098_v24, %v25094_v9 }
 0x489   : > { %v4768_v25 = vadd.f32 %v25928_v11, %v4767_v8  ;;  %v19373_v4 = vpop.f32.mrb[192].mxu0  ;;  %v20308_v7 = vpop.f32.mrb[106].mxu1  ;;  %20462 = vmatmul.mubr.msk.bf16.vlgmr.msra.gmra.mrb[160].mxu1 %vm6894_vm0, %v30379_v60  ;;  %v30386_v8 = vld [vmem:[#allocation50_spill] sm:$0xff] }
 0x48a   : > { %v4779_v15 = vadd.f32 %v20308_v7, %v25956_v45  ;;  %v19374_v51 = vpop.f32.mrb[193].mxu0  ;;  %v4770_v40 = vpop.f32.mrb[107].mxu1  ;;  %20474 = vmatpush3.bf16.xpose.msra.mxu1 %v7024_v61  ;;  %20477 = vmatprep.mubr.msk.bf16.mxu1 %vm6894_vm0, %v30380_v37  ;;  %v7149_v7 = vsel %vm6894_vm0, %v26012_v21, 0 }
 0x48b   : > { %v26068_v11 = vadd.f32 %v19374_v51, %v19373_v4  ;;  %v4771_v26 = vadd.f32 %v25931_v0, %v4770_v40  ;;  %v19376_v36 = vpop.f32.mrb[194].mxu0  ;;  %21206 = vmatprep.subr.msk.bf16.mxu1 %vm6894_vm0, %v25849_v35 }
 0x48c   : > { %v4819_v55 = vpack.c.bf16 %v4779_v15, %v4776_v39  ;;  %v19377_v16 = vpop.f32.mrb[195].mxu0 }
 0x48d   : > { %v4818_v43 = vpack.c.bf16 %v4771_v26, %v4768_v25  ;;  %v26073_v45 = vadd.f32 %v19377_v16, %v19376_v36  ;;  %v30387_v25 = vld [vmem:[#allocation49_spill] sm:$0xff] }
 0x48e   : > { %v7210_v35 = vsel %vm6894_vm0, %v4819_v55, 0  ;;  %v30388_v4 = vpack.c.bf16 %v30386_v8, %v30387_v25 }
 0x48f   : > { %v20311_v22 = vpop.f32.mrb[108].mxu1  ;;  %21211 = vmatprep.subr.msk.bf16.mxu0 %vm6894_vm0, %v4818_v43  ;;  %v7207_v24 = vsel %vm6894_vm0, %v4818_v43, 0 }
 0x490   : > { %v4792_v9 = vadd.f32 %v20311_v22, %v25988_v63  ;;  %v4783_v17 = vpop.f32.mrb[109].mxu1  ;;  %20498 = vmatpush3.bf16.xpose.msra.mxu0 %v7207_v24  ;;  %v30389_v22 = vld [vmem:[#allocation42_spill] sm:$0xff]  ;;  %v30390_v24 = vld [vmem:[#allocation41_spill] sm:$0xff] }
 0x491   : > { %v4784_v0 = vadd.f32 %v25975_v57, %v4783_v17  ;;  %v19379_v10 = vpop.f32.mrb[196].mxu0  ;;  %v20312_v32 = vpop.f32.mrb[110].mxu1  ;;  %21212 = vmatprep.subr.msk.bf16.mxu0 %vm6894_vm0, %v4819_v55 }
 0x492   : > { %v4795_v5 = vadd.f32 %v20312_v32, %v25990_v30  ;;  %v19380_v56 = vpop.f32.mrb[197].mxu0  ;;  %v4786_v1 = vpop.f32.mrb[111].mxu1  ;;  %20476 = vmatpush3.bf16.xpose.msra.mxu1 %v7027_v31 }
 0x493   : > { %v26083_v28 = vadd.f32 %v19380_v56, %v19379_v10  ;;  %v4787_v63 = vadd.f32 %v25978_v38, %v4786_v1  ;;  %v19382_v34 = vpop.f32.mrb[198].mxu0  ;;  %21209 = vmatprep.subr.msk.bf16.mxu1 %vm6894_vm0, %v26014_v49  ;;  %v7146_v38 = vsel %vm6894_vm0, %v26014_v49, 0 }
 0x494   : > { %v26088_v57 = vpack.c.bf16 %v4795_v5, %v4792_v9  ;;  %v19383_v46 = vpop.f32.mrb[199].mxu0  ;;  %v30391_v9 = vpack.c.bf16 %v30389_v22, %v30390_v24 }
 0x495   : > { %v26090_v3 = vpack.c.bf16 %v4787_v63, %v4784_v0  ;;  %v26092_v6 = vadd.f32 %v19383_v46, %v19382_v34 }
 0x498   : > { %20500 = vmatpush3.bf16.xpose.msra.mxu0 %v7210_v35 }
 0x499   : > { %v19385_v30 = vpop.f32.mrb[200].mxu0  ;;  %20478 = vmatmul.mubr.msk.bf16.vlgmr.msra.gmra.mrb[164].mxu1 %vm6894_vm0, %v30382_v42 }
 0x49a   : > { %v19386_v52 = vpop.f32.mrb[201].mxu0  ;;  %20490 = vmatpush3.bf16.xpose.msra.mxu1 %v7146_v38  ;;  %20493 = vmatprep.mubr.msk.bf16.mxu1 %vm6894_vm0, %v30385_v53 }
 0x49b   : > { %v26105_v59 = vadd.f32 %v19386_v52, %v19385_v30  ;;  %v19388_v20 = vpop.f32.mrb[202].mxu0  ;;  %21210 = vmatprep.subr.msk.bf16.mxu1 %vm6894_vm0, %v26012_v21 }
 0x49c   : > { %v19389_v39 = vpop.f32.mrb[203].mxu0 }
 0x49d   : > { %v26109_v47 = vadd.f32 %v19389_v39, %v19388_v20 }
 0x49f   : > { %20502 = vmatmul.mubr.msk.bf16.vlgmr.msra.gmra.mrb[24].mxu0 %vm6894_vm0, %v30388_v4 }
 0x4a1   : > { %v19391_v49 = vpop.f32.mrb[204].mxu0 }
 0x4a2   : > { %v19392_v60 = vpop.f32.mrb[205].mxu0  ;;  %20492 = vmatpush3.bf16.xpose.msra.mxu1 %v7149_v7 }
 0x4a3   : > { %v26117_v61 = vadd.f32 %v19392_v60, %v19391_v49  ;;  %v19394_v15 = vpop.f32.mrb[206].mxu0 }
 0x4a4   : > { %v19395_v51 = vpop.f32.mrb[207].mxu0 }
 0x4a5   : > { %v26119_v40 = vadd.f32 %v19395_v51, %v19394_v15 }
 0x4a7   : > { %v20331_v37 = vpop.f32.mrb[112].mxu1 }
 0x4a8   : > { %v5122_v26 = vadd.f32 %v20331_v37, %v26023_v41  ;;  %v5113_v36 = vpop.f32.mrb[113].mxu1 }
 0x4a9   : > { %v5114_v55 = vadd.f32 %v26009_v33, %v5113_v36  ;;  %v19425_v16 = vpop.f32.mrb[208].mxu0  ;;  %v20332_v43 = vpop.f32.mrb[114].mxu1  ;;  %20494 = vmatmul.mubr.msk.bf16.vlgmr.msra.gmra.mrb[168].mxu1 %vm6894_vm0, %v30391_v9 }
 0x4aa   : > { %v5125_v21 = vadd.f32 %v20332_v43, %v26031_v18  ;;  %v19426_v17 = vpop.f32.mrb[209].mxu0  ;;  %v5116_v0 = vpop.f32.mrb[115].mxu1 }
 0x4ab   : > { %v26128_v10 = vadd.f32 %v19426_v17, %v19425_v16  ;;  %v5117_v32 = vadd.f32 %v26016_v29, %v5116_v0  ;;  %v19428_v31 = vpop.f32.mrb[210].mxu0 }
 0x4ac   : > { %v19429_v41 = vpop.f32.mrb[211].mxu0  ;;  %v6760_v5 = vpack.c.bf16 %v5125_v21, %v5122_v26 }
 0x4ad   : > { %v26131_v56 = vadd.f32 %v19429_v41, %v19428_v31  ;;  %v6759_v33 = vpack.c.bf16 %v5117_v32, %v5114_v55 }
 0x4af   : > { %v20335_v1 = vpop.f32.mrb[116].mxu1  ;;  %20505 = vmatprep.subr.bf16.mxu1 %v6759_v33 }
 0x4b0   : > { %v5138_v63 = vadd.f32 %v20335_v1, %v26049_v2  ;;  %v5129_v34 = vpop.f32.mrb[117].mxu1  ;;  %20506 = vmatpush3.bf16.msra.mxu1 %v6759_v33 }
 0x4b1   : > { %v5130_v18 = vadd.f32 %v26036_v13, %v5129_v34  ;;  %v19431_v46 = vpop.f32.mrb[212].mxu0  ;;  %v20336_v35 = vpop.f32.mrb[118].mxu1  ;;  %20507 = vmatprep.subr.bf16.mxu1 %v6760_v5 }
 0x4b2   : > { %v5141_v30 = vadd.f32 %v20336_v35, %v26053_v62  ;;  %v19432_v29 = vpop.f32.mrb[213].mxu0  ;;  %v5132_v23 = vpop.f32.mrb[119].mxu1 }
 0x4b3   : > { %v26136_v42 = vadd.f32 %v19432_v29, %v19431_v46  ;;  %v5133_v38 = vadd.f32 %v26041_v48, %v5132_v23  ;;  %v19434_v52 = vpop.f32.mrb[214].mxu0 }
 0x4b4   : > { %v19435_v27 = vpop.f32.mrb[215].mxu0  ;;  %20508 = vmatpush3.bf16.msra.mxu1 %v6760_v5  ;;  %v26139_v50 = vpack.c.bf16 %v5141_v30, %v5138_v63 }
 0x4b5   : > { %v26141_v2 = vadd.f32 %v19435_v27, %v19434_v52  ;;  %v26143_v53 = vpack.c.bf16 %v5133_v38, %v5130_v18 }
 0x4b9   : > { %v19437_v13 = vpop.f32.mrb[216].mxu0 }
 0x4ba   : > { %v19438_v20 = vpop.f32.mrb[217].mxu0 }
 0x4bb   : > { %v26145_v39 = vadd.f32 %v19438_v20, %v19437_v13  ;;  %v19440_v62 = vpop.f32.mrb[218].mxu0 }
 0x4bc   : > { %v19441_v8 = vpop.f32.mrb[219].mxu0 }
 0x4bd   : > { %v26147_v25 = vadd.f32 %v19441_v8, %v19440_v62 }
 0x4c1   : > { %v19443_v4 = vpop.f32.mrb[220].mxu0 }
 0x4c2   : > { %v19444_v49 = vpop.f32.mrb[221].mxu0 }
 0x4c3   : > { %v26149_v48 = vadd.f32 %v19444_v49, %v19443_v4  ;;  %v19446_v7 = vpop.f32.mrb[222].mxu0 }
 0x4c4   : > { %v19447_v60 = vpop.f32.mrb[223].mxu0 }
 0x4c5   : > { %v26151_v15 = vadd.f32 %v19447_v60, %v19446_v7 }
 0x4c7   : > { %v20355_v51 = vpop.f32.mrb[120].mxu1 }
 0x4c8   : > { %v5445_v37 = vadd.f32 %v20355_v51, %v26083_v28  ;;  %v5436_v26 = vpop.f32.mrb[121].mxu1 }
 0x4c9   : > { %v5437_v36 = vadd.f32 %v26068_v11, %v5436_v26  ;;  %v19477_v55 = vpop.f32.mrb[224].mxu0  ;;  %v20356_v16 = vpop.f32.mrb[122].mxu1 }
 0x4ca   : > { %v5448_v43 = vadd.f32 %v20356_v16, %v26092_v6  ;;  %v19478_v22 = vpop.f32.mrb[225].mxu0  ;;  %v5439_v24 = vpop.f32.mrb[123].mxu1 }
 0x4cb   : > { %v26156_v9 = vadd.f32 %v19478_v22, %v19477_v55  ;;  %v5440_v21 = vadd.f32 %v26073_v45, %v5439_v24  ;;  %v19480_v17 = vpop.f32.mrb[226].mxu0 }
 0x4cc   : > { %v19481_v0 = vpop.f32.mrb[227].mxu0  ;;  %v26159_v32 = vpack.c.bf16 %v5448_v43, %v5445_v37 }
 0x4cd   : > { %v26161_v31 = vadd.f32 %v19481_v0, %v19480_v17  ;;  %v26163_v28 = vpack.c.bf16 %v5440_v21, %v5437_v36 }
 0x4cf   : > { %v20359_v41 = vpop.f32.mrb[124].mxu1  ;;  %20513 = vmatprep.subr.bf16.mxu1 %v26163_v28 }
 0x4d0   : > { %v5461_v11 = vadd.f32 %v20359_v41, %v26117_v61  ;;  %v5452_v6 = vpop.f32.mrb[125].mxu1 }
 0x4d1   : > { %v5453_v5 = vadd.f32 %v26105_v59, %v5452_v6  ;;  %v19483_v33 = vpop.f32.mrb[228].mxu0  ;;  %v20360_v1 = vpop.f32.mrb[126].mxu1 }
 0x4d2   : > { %v5464_v45 = vadd.f32 %v20360_v1, %v26119_v40  ;;  %v19484_v63 = vpop.f32.mrb[229].mxu0  ;;  %v5455_v34 = vpop.f32.mrb[127].mxu1 }
 0x4d3   : > { %v26169_v18 = vadd.f32 %v19484_v63, %v19483_v33  ;;  %v5456_v46 = vadd.f32 %v26109_v47, %v5455_v34  ;;  %v19486_v35 = vpop.f32.mrb[230].mxu0 }
 0x4d4   : > { %v26172_v30 = vpack.c.bf16 %v5464_v45, %v5461_v11  ;;  %v19487_v29 = vpop.f32.mrb[231].mxu0 }
 0x4d5   : > { %v26174_v23 = vpack.c.bf16 %v5456_v46, %v5453_v5  ;;  %v26176_v61 = vadd.f32 %v19487_v29, %v19486_v35 }
 0x4d9   : > { %v19489_v38 = vpop.f32.mrb[232].mxu0 }
 0x4da   : > { %v19490_v59 = vpop.f32.mrb[233].mxu0 }
 0x4db   : > { %v26178_v52 = vadd.f32 %v19490_v59, %v19489_v38  ;;  %v19492_v27 = vpop.f32.mrb[234].mxu0 }
 0x4dc   : > { %v19493_v40 = vpop.f32.mrb[235].mxu0 }
 0x4dd   : > { %v26180_v13 = vadd.f32 %v19493_v40, %v19492_v27 }
 0x4e1   : > { %v19495_v20 = vpop.f32.mrb[236].mxu0 }
 0x4e2   : > { %v19496_v62 = vpop.f32.mrb[237].mxu0 }
 0x4e3   : > { %v26182_v8 = vadd.f32 %v19496_v62, %v19495_v20  ;;  %v19498_v47 = vpop.f32.mrb[238].mxu0 }
 0x4e4   : > { %v19499_v4 = vpop.f32.mrb[239].mxu0 }
 0x4e5   : > { %v26184_v49 = vadd.f32 %v19499_v4, %v19498_v47 }
 0x4e7   : > { %v20379_v7 = vpop.f32.mrb[128].mxu1 }
 0x4e8   : > { %v5768_v60 = vadd.f32 %v20379_v7, %v26136_v42  ;;  %v5759_v51 = vpop.f32.mrb[129].mxu1 }
 0x4e9   : > { %v5760_v37 = vadd.f32 %v26128_v10, %v5759_v51  ;;  %v19529_v26 = vpop.f32.mrb[240].mxu0  ;;  %v20380_v36 = vpop.f32.mrb[130].mxu1 }
 0x4ea   : > { %v5771_v55 = vadd.f32 %v20380_v36, %v26141_v2  ;;  %v19530_v16 = vpop.f32.mrb[241].mxu0  ;;  %v5762_v43 = vpop.f32.mrb[131].mxu1 }
 0x4eb   : > { %v26189_v22 = vadd.f32 %v19530_v16, %v19529_v26  ;;  %v5763_v24 = vadd.f32 %v26131_v56, %v5762_v43  ;;  %v19532_v21 = vpop.f32.mrb[242].mxu0 }
 0x4ec   : > { %v6768_v17 = vpack.c.bf16 %v5771_v55, %v5768_v60  ;;  %v19533_v0 = vpop.f32.mrb[243].mxu0 }
 0x4ed   : > { %v6767_v41 = vpack.c.bf16 %v5763_v24, %v5760_v37  ;;  %v26192_v11 = vadd.f32 %v19533_v0, %v19532_v21 }
 0x4ef   : > { %v20383_v42 = vpop.f32.mrb[132].mxu1  ;;  %20521 = vmatprep.subr.bf16.mxu0 %v6767_v41 }
 0x4f0   : > { %v5784_v10 = vadd.f32 %v20383_v42, %v26149_v48  ;;  %v5775_v6 = vpop.f32.mrb[133].mxu1  ;;  %20522 = vmatpush3.bf16.msra.mxu0 %v6767_v41 }
 0x4f1   : > { %v5776_v2 = vadd.f32 %v26145_v39, %v5775_v6  ;;  %v19535_v5 = vpop.f32.mrb[244].mxu0  ;;  %v20384_v33 = vpop.f32.mrb[134].mxu1  ;;  %20523 = vmatprep.subr.bf16.mxu0 %v6768_v17 }
 0x4f2   : > { %v5787_v1 = vadd.f32 %v20384_v33, %v26151_v15  ;;  %v19536_v56 = vpop.f32.mrb[245].mxu0  ;;  %v5778_v45 = vpop.f32.mrb[135].mxu1 }
 0x4f3   : > { %v26197_v63 = vadd.f32 %v19536_v56, %v19535_v5  ;;  %v5779_v34 = vadd.f32 %v26147_v25, %v5778_v45  ;;  %v19538_v46 = vpop.f32.mrb[246].mxu0 }
 0x4f4   : > { %v26200_v35 = vpack.c.bf16 %v5787_v1, %v5784_v10  ;;  %v19539_v29 = vpop.f32.mrb[247].mxu0  ;;  %20524 = vmatpush3.bf16.msra.mxu0 %v6768_v17 }
 0x4f5   : > { %v26202_v48 = vpack.c.bf16 %v5779_v34, %v5776_v2  ;;  %v26204_v38 = vadd.f32 %v19539_v29, %v19538_v46 }
 0x4f6   : > { %30392 = vst [vmem:[#allocation32_spill] sm:$0xff] %v26200_v35 }
 0x4f9   : > { %v19541_v39 = vpop.f32.mrb[248].mxu0 }
 0x4fa   : > { %v19542_v59 = vpop.f32.mrb[249].mxu0 }
 0x4fb   : > { %v26206_v27 = vadd.f32 %v19542_v59, %v19541_v39  ;;  %v19544_v15 = vpop.f32.mrb[250].mxu0 }
 0x4fc   : > { %v19545_v40 = vpop.f32.mrb[251].mxu0 }
 0x4fd   : > { %v26208_v20 = vadd.f32 %v19545_v40, %v19544_v15 }
 0x501   : > { %v19547_v62 = vpop.f32.mrb[252].mxu0 }
 0x502   : > { %v19548_v47 = vpop.f32.mrb[253].mxu0 }
 0x503   : > { %v26210_v25 = vadd.f32 %v19548_v47, %v19547_v62  ;;  %v19550_v4 = vpop.f32.mrb[254].mxu0 }
 0x504   : > { %v19551_v7 = vpop.f32.mrb[255].mxu0 }
 0x505   : > { %v26212_v60 = vadd.f32 %v19551_v7, %v19550_v4 }
 0x507   : > { %v20403_v51 = vpop.f32.mrb[136].mxu1 }
 0x508   : > { %v6091_v37 = vadd.f32 %v20403_v51, %v26169_v18  ;;  %v6082_v26 = vpop.f32.mrb[137].mxu1 }
 0x509   : > { %v6083_v36 = vadd.f32 %v26156_v9, %v6082_v26  ;;  %v19581_v55 = vpop.f32.mrb[0].mxu0  ;;  %v20404_v16 = vpop.f32.mrb[138].mxu1 }
 0x50a   : > { %v6094_v43 = vadd.f32 %v20404_v16, %v26176_v61  ;;  %v19582_v24 = vpop.f32.mrb[1].mxu0  ;;  %v6085_v21 = vpop.f32.mrb[139].mxu1 }
 0x50b   : > { %v26217_v17 = vadd.f32 %v19582_v24, %v19581_v55  ;;  %v6086_v0 = vadd.f32 %v26161_v31, %v6085_v21  ;;  %v19584_v41 = vpop.f32.mrb[2].mxu0 }
 0x50c   : > { %v26220_v42 = vpack.c.bf16 %v6094_v43, %v6091_v37  ;;  %v19585_v10 = vpop.f32.mrb[3].mxu0 }
 0x50d   : > { %v26222_v6 = vpack.c.bf16 %v6086_v0, %v6083_v36  ;;  %v26224_v18 = vadd.f32 %v19585_v10, %v19584_v41 }
 0x50f   : > { %v20407_v2 = vpop.f32.mrb[140].mxu1 }
 0x510   : > { %v6107_v9 = vadd.f32 %v20407_v2, %v26182_v8  ;;  %v6098_v5 = vpop.f32.mrb[141].mxu1 }
 0x511   : > { %v6099_v61 = vadd.f32 %v26178_v52, %v6098_v5  ;;  %v19587_v33 = vpop.f32.mrb[4].mxu0  ;;  %v20408_v1 = vpop.f32.mrb[142].mxu1 }
 0x512   : > { %v6110_v56 = vadd.f32 %v20408_v1, %v26184_v49  ;;  %v19588_v45 = vpop.f32.mrb[5].mxu0  ;;  %v6101_v31 = vpop.f32.mrb[143].mxu1 }
 0x513   : > { %v19589_v34 = vadd.f32 %v19588_v45, %v19587_v33  ;;  %v6102_v46 = vadd.f32 %v26180_v13, %v6101_v31  ;;  %v19590_v29 = vpop.f32.mrb[6].mxu0 }
 0x514   : > { %v26230_v39 = vpack.c.bf16 %v6110_v56, %v6107_v9  ;;  %v19591_v59 = vpop.f32.mrb[7].mxu0 }
 0x515   : > { %v26232_v15 = vpack.c.bf16 %v6102_v46, %v6099_v61  ;;  %v19592_v40 = vadd.f32 %v19591_v59, %v19590_v29 }
 0x516   : > { %30393 = vst [vmem:[#allocation44_spill] sm:$0xff] %v26230_v39 }
 0x519   : > { %v19593_v8 = vpop.f32.mrb[8].mxu0 }
 0x51a   : > { %v19594_v62 = vpop.f32.mrb[9].mxu0 }
 0x51b   : > { %v19595_v47 = vadd.f32 %v19594_v62, %v19593_v8  ;;  %v19596_v52 = vpop.f32.mrb[10].mxu0 }
 0x51c   : > { %v19597_v4 = vpop.f32.mrb[11].mxu0 }
 0x51d   : > { %v19598_v7 = vadd.f32 %v19597_v4, %v19596_v52 }
 0x521   : > { %v19599_v51 = vpop.f32.mrb[12].mxu0 }
 0x522   : > { %v19600_v49 = vpop.f32.mrb[13].mxu0 }
 0x523   : > { %v19601_v37 = vadd.f32 %v19600_v49, %v19599_v51  ;;  %v19602_v26 = vpop.f32.mrb[14].mxu0 }
 0x524   : > { %v19603_v36 = vpop.f32.mrb[15].mxu0 }
 0x525   : > { %v19604_v55 = vadd.f32 %v19603_v36, %v19602_v26 }
 0x527   : > { %v20427_v13 = vpop.f32.mrb[144].mxu1 }
 0x528   : > { %v6414_v16 = vadd.f32 %v20427_v13, %v26197_v63  ;;  %v6405_v43 = vpop.f32.mrb[145].mxu1 }
 0x529   : > { %v6406_v24 = vadd.f32 %v26189_v22, %v6405_v43  ;;  %v26236_v21 = vpop.f32.mrb[16].mxu0  ;;  %v20428_v0 = vpop.f32.mrb[146].mxu1 }
 0x52a   : > { %v6417_v41 = vadd.f32 %v20428_v0, %v26204_v38  ;;  %v26239_v10 = vpop.f32.mrb[17].mxu0  ;;  %v6408_v2 = vpop.f32.mrb[147].mxu1 }
 0x52b   : > { %v6409_v9 = vadd.f32 %v26192_v11, %v6408_v2  ;;  %v26242_v5 = vpop.f32.mrb[18].mxu0 }
 0x52c   : > { %v26244_v61 = vpack.c.bf16 %v6417_v41, %v6414_v16  ;;  %v26246_v33 = vpop.f32.mrb[19].mxu0 }
 0x52d   : > { %v26248_v63 = vpack.c.bf16 %v6409_v9, %v6406_v24 }
 0x52f   : > { %v20431_v1 = vpop.f32.mrb[148].mxu1  ;;  %20537 = vmatprep.subr.bf16.mxu0 %v26248_v63 }
 0x530   : > { %v6430_v22 = vadd.f32 %v20431_v1, %v26210_v25  ;;  %v6421_v56 = vpop.f32.mrb[149].mxu1 }
 0x531   : > { %v6422_v38 = vadd.f32 %v26206_v27, %v6421_v56  ;;  %v20432_v45 = vpop.f32.mrb[150].mxu1 }
 0x532   : > { %v6433_v31 = vadd.f32 %v20432_v45, %v26212_v60  ;;  %v6424_v11 = vpop.f32.mrb[151].mxu1 }
 0x533   : > { %v6425_v46 = vadd.f32 %v26208_v20, %v6424_v11 }
 0x534   : > { %v26255_v29 = vpack.c.bf16 %v6433_v31, %v6430_v22 }
 0x535   : > { %v26257_v59 = vpack.c.bf16 %v6425_v46, %v6422_v38  ;;  %v30399_v38 = vld [vmem:[#allocation20_spill] sm:$0xff] }
 0x536   : > { %30394 = vst [vmem:[#allocation43_spill] sm:$0xff] %v26255_v29  ;;  %v6881_v45 = vadd.s32 8, %v30399_v38 }
 0x537   : > { %30395 = vst [vmem:[#allocation50_spill] sm:$0xff] %v26257_v59 }
 0x539   : > { %v26259_v8 = vpop.f32.mrb[20].mxu0 }
 0x53a   : > { %v26261_v62 = vpop.f32.mrb[21].mxu0 }
 0x53b   : > { %v26263_v52 = vpop.f32.mrb[22].mxu0 }
 0x53c   : > { %v26265_v25 = vpop.f32.mrb[23].mxu0 }
 0x547   : > { %v20451_v4 = vpop.f32.mrb[152].mxu1 }
 0x548   : > { %v6737_v27 = vadd.f32 %v20451_v4, %v19589_v34  ;;  %v6728_v51 = vpop.f32.mrb[153].mxu1 }
 0x549   : > { %v6729_v60 = vadd.f32 %v26217_v17, %v6728_v51  ;;  %v20452_v49 = vpop.f32.mrb[154].mxu1 }
 0x54a   : > { %v6740_v26 = vadd.f32 %v20452_v49, %v19592_v40  ;;  %v6731_v20 = vpop.f32.mrb[155].mxu1  ;;  %v30398_v40 = vlaneseq }
 0x54b   : > { %v6732_v36 = vadd.f32 %v26224_v18, %v6731_v20  ;;  %v6882_v18 = vadd.s32 16, %v30399_v38 }
 0x54c   : > { %v26269_v13 = vpack.c.bf16 %v6740_v26, %v6737_v27  ;;  %v6885_v56 = vand.u32 127, %v30398_v40 }
 0x54d   : > { %v26271_v16 = vpack.c.bf16 %v6732_v36, %v6729_v60 }
 0x54e   : > { %vm6886_vm1 = vcmp.le.s32.totalorder %v6885_v56, %v30399_v38  ;;  %vm6888_vm2 = vcmp.le.s32.totalorder %v6885_v56, %v6882_v18  ;;  %vm6887_vm3 = vcmp.le.s32.totalorder %v6885_v56, %v6881_v45 }
 0x54f   : > { %v20455_v43 = vpop.f32.mrb[156].mxu1 }
 0x550   : > { %v6753_v24 = vadd.f32 %v20455_v43, %v19601_v37  ;;  %v6744_v0 = vpop.f32.mrb[157].mxu1  ;;  %v6883_v37 = vadd.s32 24, %v30399_v38 }
 0x551   : > { %v6745_v41 = vadd.f32 %v19595_v47, %v6744_v0  ;;  %v20456_v2 = vpop.f32.mrb[158].mxu1 }
 0x552   : > { %v6756_v9 = vadd.f32 %v20456_v2, %v19604_v55  ;;  %v6747_v1 = vpop.f32.mrb[159].mxu1  ;;  %v23306_v55 = vmov -1e+09   ;;  %vm6889_vm4 = vcmp.le.s32.totalorder %v6885_v56, %v6883_v37 }
 0x553   : > { %v6748_v34 = vadd.f32 %v19598_v7, %v6747_v1  ;;  %v26282_v31 = vsel %vm6886_vm1, 0.0, %v23306_v55  ;;  %v26287_v4 = vsel %vm6888_vm2, 0.0, %v23306_v55  ;;  %v26289_v27 = vsel %vm6887_vm3, 0.0, %v23306_v55 }
 0x554   : > { %v26273_v22 = vpack.c.bf16 %v6756_v9, %v6753_v24  ;;  %v26299_v20 = vsel %vm6889_vm4, 0.0, %v23306_v55  ;;  %v26308_v24 = vadd.f32 %v26239_v10, %v26282_v31  ;;  %v26320_v9 = vadd.f32 %v26236_v21, %v26287_v4 }
 0x555   : > { %v26275_v17 = vpack.c.bf16 %v6748_v34, %v6745_v41  ;;  %30400 = vst [vmem:[#allocation41_spill] sm:$0xff] %v26299_v20  ;;  %v26314_v41 = vadd.f32 %v26246_v33, %v26289_v27  ;;  %v26326_v1 = vadd.f32 %v26242_v5, %v26299_v20 }
 0x556   : > { %30396 = vst [vmem:[#allocation49_spill] sm:$0xff] %v26273_v22  ;;  %v7274_v10 = vsel %vm7261_vm5, %v26308_v24, -inf  ;;  %v7280_v40 = vsel %vm7261_vm5, %v26320_v9, -inf }
 0x557   : > { %30397 = vst [vmem:[#allocation42_spill] sm:$0xff] %v26275_v17  ;;  %v7277_v33 = vsel %vm7261_vm5, %v26314_v41, -inf  ;;  %v7283_v45 = vsel %vm7261_vm5, %v26326_v1, -inf }
 0x55c   : > { %v20463_v47 = vpop.f32.mrb[160].mxu1 }
 0x55d   : > { %v6941_v7 = vpop.f32.mrb[161].mxu1  ;;  %v26292_v60 = vadd.f32 %v20463_v47, %v26287_v4 }
 0x55e   : > { %v26285_v11 = vadd.f32 %v6941_v7, %v26282_v31  ;;  %v20464_v46 = vpop.f32.mrb[162].mxu1 }
 0x55f   : > { %v6944_v51 = vpop.f32.mrb[163].mxu1  ;;  %v26302_v36 = vadd.f32 %v20464_v46, %v26299_v20  ;;  %v7268_v0 = vsel %vm7261_vm5, %v26292_v60, -inf }
 0x560   : > { %v26295_v49 = vadd.f32 %v6944_v51, %v26289_v27  ;;  %v7262_v26 = vsel %vm7261_vm5, %v26285_v11, -inf }
 0x561   : > { %7263 = vmax.xlane.f32.xlu0 %v7262_v26  ;;  %v7271_v2 = vsel %vm7261_vm5, %v26302_v36, -inf }
 0x562   : > { %v7265_v43 = vsel %vm7261_vm5, %v26295_v49, -inf }
 0x563   : > { %7266 = vmax.xlane.f32.xlu1 %v7265_v43  ;;  %v26352_v43 = vadd.f32 %v26261_v62, %v26282_v31 }
 0x565   : > { %7269 = vmax.xlane.f32.xlu0 %v7268_v0  ;;  %v7298_v62 = vsel %vm7261_vm5, %v26352_v43, -inf }
 0x567   : > { %7272 = vmax.xlane.f32.xlu1 %v7271_v2 }
 0x569   : > { %7275 = vmax.xlane.f32.xlu0 %v7274_v10 }
 0x56b   : > { %7278 = vmax.xlane.f32.xlu1 %v7277_v33  ;;  %v26358_v33 = vadd.f32 %v26265_v25, %v26289_v27 }
 0x56c   : > { %v20479_v34 = vpop.f32.mrb[164].mxu1 }
 0x56d   : > { %v7063_v56 = vpop.f32.mrb[165].mxu1  ;;  %7281 = vmax.xlane.f32.xlu0 %v7280_v40  ;;  %v26338_v5 = vadd.f32 %v20479_v34, %v26287_v4  ;;  %v26364_v40 = vadd.f32 %v26259_v8, %v26287_v4  ;;  %v7301_v25 = vsel %vm7261_vm5, %v26358_v33, -inf }
 0x56e   : > { %v26333_v21 = vadd.f32 %v7063_v56, %v26282_v31  ;;  %v20480_v18 = vpop.f32.mrb[166].mxu1  ;;  %v26370_v56 = vadd.f32 %v26263_v52, %v26299_v20 }
 0x56f   : > { %v7066_v37 = vpop.f32.mrb[167].mxu1  ;;  %7284 = vmax.xlane.f32.xlu1 %v7283_v45  ;;  %v26346_v7 = vadd.f32 %v20480_v18, %v26299_v20  ;;  %v7292_v2 = vsel %vm7261_vm5, %v26338_v5, -inf  ;;  %v7304_v45 = vsel %vm7261_vm5, %v26364_v40, -inf }
 0x570   : > { %v26341_v47 = vadd.f32 %v7066_v37, %v26289_v27  ;;  %v7286_v55 = vsel %vm7261_vm5, %v26333_v21, -inf }
 0x571   : > { %7287 = vmax.xlane.f32.xlu0 %v7286_v55  ;;  %v7295_v34 = vsel %vm7261_vm5, %v26346_v7, -inf }
 0x572   : > { %v20503_v46 = vpop.f32.mrb[24].mxu0  ;;  %v7289_v51 = vsel %vm7261_vm5, %v26341_v47, -inf }
 0x573   : > { %v7246_v26 = vpop.f32.mrb[25].mxu0  ;;  %7290 = vmax.xlane.f32.xlu1 %v7289_v51  ;;  %v7307_v51 = vsel %vm7261_vm5, %v26370_v56, -inf }
 0x574   : > { %v20504_v0 = vpop.f32.mrb[26].mxu0 }
 0x575   : > { %v7249_v10 = vpop.f32.mrb[27].mxu0  ;;  %7293 = vmax.xlane.f32.xlu0 %v7292_v2 }
 0x577   : > { %7296 = vmax.xlane.f32.xlu1 %v7295_v34 }
 0x579   : > { %7299 = vmax.xlane.f32.xlu0 %v7298_v62 }
 0x57b   : > { %7302 = vmax.xlane.f32.xlu1 %v7301_v25 }
 0x57c   : > { %v20495_v18 = vpop.f32.mrb[168].mxu1 }
 0x57d   : > { %v7185_v37 = vpop.f32.mrb[169].mxu1  ;;  %7305 = vmax.xlane.f32.xlu0 %v7304_v45  ;;  %v26382_v52 = vadd.f32 %v20495_v18, %v26287_v4 }
 0x57e   : > { %v26377_v8 = vadd.f32 %v7185_v37, %v26282_v31  ;;  %v20496_v55 = vpop.f32.mrb[170].mxu1  ;;  %v26395_v37 = vadd.f32 %v7246_v26, %v26282_v31  ;;  %v26410_v26 = vadd.f32 %v20504_v0, %v26299_v20 }
 0x57f   : > { %v7188_v2 = vpop.f32.mrb[171].mxu1  ;;  %7308 = vmax.xlane.f32.xlu1 %v7307_v51  ;;  %v26390_v25 = vadd.f32 %v20496_v55, %v26299_v20  ;;  %v7316_v18 = vsel %vm7261_vm5, %v26382_v52, -inf  ;;  %v26400_v51 = vadd.f32 %v7249_v10, %v26289_v27  ;;  %v26405_v55 = vadd.f32 %v20503_v46, %v26287_v4 }
 0x580   : > { %v26385_v34 = vadd.f32 %v7188_v2, %v26289_v27  ;;  %v7310_v62 = vsel %vm7261_vm5, %v26377_v8, -inf }
 0x581   : > { %7311 = vmax.xlane.f32.xlu0 %v7310_v62  ;;  %v7319_v2 = vsel %vm7261_vm5, %v26390_v25, -inf  ;;  %v7322_v62 = vsel %vm7261_vm5, %v26395_v37, -inf  ;;  %v7328_v10 = vsel %vm7261_vm5, %v26405_v55, -inf }
 0x582   : > { %v7313_v45 = vsel %vm7261_vm5, %v26385_v34, -inf }
 0x583   : > { %7314 = vmax.xlane.f32.xlu1 %v7313_v45  ;;  %v7325_v45 = vsel %vm7261_vm5, %v26400_v51, -inf }
 0x585   : > { %7317 = vmax.xlane.f32.xlu0 %v7316_v18  ;;  %v7331_v18 = vsel %vm7261_vm5, %v26410_v26, -inf }
 0x587   : > { %7320 = vmax.xlane.f32.xlu1 %v7319_v2 }
 0x589   : > { %7323 = vmax.xlane.f32.xlu0 %v7322_v62 }
 0x58b   : > { %7326 = vmax.xlane.f32.xlu1 %v7325_v45 }
 0x58d   : > { %7329 = vmax.xlane.f32.xlu0 %v7328_v10 }
 0x58f   : > { %7332 = vmax.xlane.f32.xlu1 %v7331_v18 }
 0x5ee   : > { %v7264_v46 = vpop.xlane.xlu0 %7263 }
 0x5ef   : > { %v7334_v2 = vsub.f32 %v26285_v11, %v7264_v46 }
 0x5f0   : > { %v7267_v38 = vpop.xlane.xlu1 %7266 }
 0x5f1   : > { %v7358_v62 = vmul.f32 1.442695, %v7334_v2  ;;  %v7335_v0 = vsub.f32 %v26295_v49, %v7267_v38 }
 0x5f2   : > { %v7270_v22 = vpop.xlane.xlu0 %7269 }
 0x5f3   : > { %22702 = vpow2.f32 %v7358_v62  ;;  %v7360_v29 = vmul.f32 1.442695, %v7335_v0  ;;  %v7336_v45 = vsub.f32 %v26292_v60, %v7270_v22 }
 0x5f4   : > { %v7273_v17 = vpop.xlane.xlu1 %7272 }
 0x5f5   : > { %22704 = vpow2.f32 %v7360_v29  ;;  %v7362_v39 = vmul.f32 1.442695, %v7336_v45  ;;  %v7337_v10 = vsub.f32 %v26302_v36, %v7273_v17 }
 0x5f6   : > { %v7276_v59 = vpop.xlane.xlu0 %7275 }
 0x5f7   : > { %22706 = vpow2.f32 %v7362_v39  ;;  %v7364_v18 = vmul.f32 1.442695, %v7337_v10  ;;  %v7338_v35 = vsub.f32 %v26308_v24, %v7276_v59 }
 0x5f8   : > { %v7279_v11 = vpop.xlane.xlu1 %7278 }
 0x5f9   : > { %22708 = vpow2.f32 %v7364_v18  ;;  %v7366_v46 = vmul.f32 1.442695, %v7338_v35  ;;  %v7339_v38 = vsub.f32 %v26314_v41, %v7279_v11 }
 0x5fa   : > { %v7282_v49 = vpop.xlane.xlu0 %7281 }
 0x5fb   : > { %22710 = vpow2.f32 %v7366_v46  ;;  %v7368_v2 = vmul.f32 1.442695, %v7339_v38  ;;  %v7340_v22 = vsub.f32 %v26320_v9, %v7282_v49 }
 0x5fc   : > { %v7285_v60 = vpop.xlane.xlu1 %7284 }
 0x5fd   : > { %v26425_v29 = vpop.eup %22702  ;;  %22712 = vpow2.f32 %v7368_v2  ;;  %v7370_v17 = vmul.f32 1.442695, %v7340_v22  ;;  %v7341_v39 = vsub.f32 %v26326_v1, %v7285_v60 }
 0x5fe   : > { %v7288_v36 = vpop.xlane.xlu0 %7287  ;;  %v7406_v59 = vsel %vm7261_vm5, %v26425_v29, 0.0 }
 0x5ff   : > { %v26430_v24 = vpop.eup %22704  ;;  %22714 = vpow2.f32 %v7370_v17  ;;  %v7372_v35 = vmul.f32 1.442695, %v7341_v39  ;;  %v7342_v41 = vsub.f32 %v26333_v21, %v7288_v36  ;;  %7407 = vadd.xlane.f32.xlu0 %v7406_v59 }
 0x600   : > { %v7291_v62 = vpop.xlane.xlu1 %7290  ;;  %v7409_v9 = vsel %vm7261_vm5, %v26430_v24, 0.0 }
 0x601   : > { %v26435_v0 = vpop.eup %22706  ;;  %22716 = vpow2.f32 %v7372_v35  ;;  %v7374_v45 = vmul.f32 1.442695, %v7342_v41  ;;  %v7343_v1 = vsub.f32 %v26341_v47, %v7291_v62  ;;  %7410 = vadd.xlane.f32.xlu1 %v7409_v9 }
 0x602   : > { %v7294_v10 = vpop.xlane.xlu0 %7293  ;;  %v7412_v18 = vsel %vm7261_vm5, %v26435_v0, 0.0 }
 0x603   : > { %v26440_v11 = vpop.eup %22708  ;;  %22718 = vpow2.f32 %v7374_v45  ;;  %v7376_v21 = vmul.f32 1.442695, %v7343_v1  ;;  %v7344_v46 = vsub.f32 %v26338_v5, %v7294_v10  ;;  %7413 = vadd.xlane.f32.xlu0 %v7412_v18 }
 0x604   : > { %v7297_v38 = vpop.xlane.xlu1 %7296  ;;  %v7415_v49 = vsel %vm7261_vm5, %v26440_v11, 0.0 }
 0x605   : > { %v26445_v2 = vpop.eup %22710  ;;  %22720 = vpow2.f32 %v7376_v21  ;;  %v7378_v47 = vmul.f32 1.442695, %v7344_v46  ;;  %v7345_v22 = vsub.f32 %v26346_v7, %v7297_v38  ;;  %7416 = vadd.xlane.f32.xlu1 %v7415_v49 }
 0x606   : > { %v7300_v60 = vpop.xlane.xlu0 %7299  ;;  %v7418_v17 = vsel %vm7261_vm5, %v26445_v2, 0.0 }
 0x607   : > { %v26450_v39 = vpop.eup %22712  ;;  %22722 = vpow2.f32 %v7378_v47  ;;  %v7380_v5 = vmul.f32 1.442695, %v7345_v22  ;;  %v7346_v36 = vsub.f32 %v26352_v43, %v7300_v60  ;;  %7419 = vadd.xlane.f32.xlu0 %v7418_v17 }
 0x608   : > { %v7303_v59 = vpop.xlane.xlu1 %7302  ;;  %v7421_v35 = vsel %vm7261_vm5, %v26450_v39, 0.0 }
 0x609   : > { %v26455_v41 = vpop.eup %22714  ;;  %22724 = vpow2.f32 %v7380_v5  ;;  %v7382_v7 = vmul.f32 1.442695, %v7346_v36  ;;  %v7347_v62 = vsub.f32 %v26358_v33, %v7303_v59  ;;  %7422 = vadd.xlane.f32.xlu1 %v7421_v35 }
 0x60a   : > { %v7306_v9 = vpop.xlane.xlu0 %7305  ;;  %v7424_v45 = vsel %vm7261_vm5, %v26455_v41, 0.0 }
 0x60b   : > { %v26460_v1 = vpop.eup %22716  ;;  %22726 = vpow2.f32 %v7382_v7  ;;  %v7384_v43 = vmul.f32 1.442695, %v7347_v62  ;;  %v7348_v10 = vsub.f32 %v26364_v40, %v7306_v9  ;;  %7425 = vadd.xlane.f32.xlu0 %v7424_v45 }
 0x60c   : > { %v7309_v18 = vpop.xlane.xlu1 %7308  ;;  %v7427_v21 = vsel %vm7261_vm5, %v26460_v1, 0.0 }
 0x60d   : > { %v26465_v46 = vpop.eup %22718  ;;  %22728 = vpow2.f32 %v7384_v43  ;;  %v7386_v33 = vmul.f32 1.442695, %v7348_v10  ;;  %v7349_v38 = vsub.f32 %v26370_v56, %v7309_v18  ;;  %7428 = vadd.xlane.f32.xlu1 %v7427_v21 }
 0x60e   : > { %v7312_v49 = vpop.xlane.xlu0 %7311  ;;  %v7430_v47 = vsel %vm7261_vm5, %v26465_v46, 0.0 }
 0x60f   : > { %v26470_v22 = vpop.eup %22720  ;;  %22730 = vpow2.f32 %v7386_v33  ;;  %v7388_v40 = vmul.f32 1.442695, %v7349_v38  ;;  %v7350_v60 = vsub.f32 %v26377_v8, %v7312_v49  ;;  %7431 = vadd.xlane.f32.xlu0 %v7430_v47 }
 0x610   : > { %v7315_v17 = vpop.xlane.xlu1 %7314  ;;  %v7433_v5 = vsel %vm7261_vm5, %v26470_v22, 0.0 }
 0x611   : > { %v26475_v36 = vpop.eup %22722  ;;  %22732 = vpow2.f32 %v7388_v40  ;;  %v7390_v56 = vmul.f32 1.442695, %v7350_v60  ;;  %v7351_v59 = vsub.f32 %v26385_v34, %v7315_v17  ;;  %7434 = vadd.xlane.f32.xlu1 %v7433_v5 }
 0x612   : > { %v7318_v35 = vpop.xlane.xlu0 %7317  ;;  %v7436_v7 = vsel %vm7261_vm5, %v26475_v36, 0.0 }
 0x613   : > { %v26480_v62 = vpop.eup %22724  ;;  %22734 = vpow2.f32 %v7390_v56  ;;  %v7392_v8 = vmul.f32 1.442695, %v7351_v59  ;;  %v7352_v9 = vsub.f32 %v26382_v52, %v7318_v35  ;;  %7437 = vadd.xlane.f32.xlu0 %v7436_v7 }
 0x614   : > { %v7321_v45 = vpop.xlane.xlu1 %7320  ;;  %v7439_v43 = vsel %vm7261_vm5, %v26480_v62, 0.0 }
 0x615   : > { %v26485_v10 = vpop.eup %22726  ;;  %22736 = vpow2.f32 %v7392_v8  ;;  %v7394_v34 = vmul.f32 1.442695, %v7352_v9  ;;  %v7353_v18 = vsub.f32 %v26390_v25, %v7321_v45  ;;  %7440 = vadd.xlane.f32.xlu1 %v7439_v43 }
 0x616   : > { %v7324_v21 = vpop.xlane.xlu0 %7323  ;;  %v7442_v33 = vsel %vm7261_vm5, %v26485_v10, 0.0 }
 0x617   : > { %v26490_v38 = vpop.eup %22728  ;;  %22738 = vpow2.f32 %v7394_v34  ;;  %v7396_v52 = vmul.f32 1.442695, %v7353_v18  ;;  %v7354_v49 = vsub.f32 %v26395_v37, %v7324_v21  ;;  %7443 = vadd.xlane.f32.xlu0 %v7442_v33 }
 0x618   : > { %v7327_v47 = vpop.xlane.xlu1 %7326  ;;  %v7445_v40 = vsel %vm7261_vm5, %v26490_v38, 0.0 }
 0x619   : > { %v26495_v60 = vpop.eup %22730  ;;  %22740 = vpow2.f32 %v7396_v52  ;;  %v7398_v25 = vmul.f32 1.442695, %v7354_v49  ;;  %v7355_v17 = vsub.f32 %v26400_v51, %v7327_v47  ;;  %7446 = vadd.xlane.f32.xlu1 %v7445_v40 }
 0x61a   : > { %v7330_v5 = vpop.xlane.xlu0 %7329  ;;  %v7448_v56 = vsel %vm7261_vm5, %v26495_v60, 0.0 }
 0x61b   : > { %v26500_v59 = vpop.eup %22732  ;;  %22742 = vpow2.f32 %v7398_v25  ;;  %v7400_v37 = vmul.f32 1.442695, %v7355_v17  ;;  %v7356_v35 = vsub.f32 %v26405_v55, %v7330_v5  ;;  %7449 = vadd.xlane.f32.xlu0 %v7448_v56 }
 0x61c   : > { %v7333_v7 = vpop.xlane.xlu1 %7332  ;;  %v7451_v8 = vsel %vm7261_vm5, %v26500_v59, 0.0 }
 0x61d   : > { %v26505_v9 = vpop.eup %22734  ;;  %22744 = vpow2.f32 %v7400_v37  ;;  %v7402_v51 = vmul.f32 1.442695, %v7356_v35  ;;  %v7357_v45 = vsub.f32 %v26410_v26, %v7333_v7  ;;  %7452 = vadd.xlane.f32.xlu1 %v7451_v8 }
 0x61e   : > { %v7454_v43 = vsel %vm7261_vm5, %v26505_v9, 0.0 }
 0x61f   : > { %v26510_v34 = vpop.eup %22736  ;;  %22746 = vpow2.f32 %v7402_v51  ;;  %v7404_v18 = vmul.f32 1.442695, %v7357_v45  ;;  %7455 = vadd.xlane.f32.xlu0 %v7454_v43 }
 0x620   : > { %v7457_v55 = vsel %vm7261_vm5, %v26510_v34, 0.0 }
 0x621   : > { %v26514_v21 = vpop.eup %22738  ;;  %22748 = vpow2.f32 %v7404_v18  ;;  %7458 = vadd.xlane.f32.xlu1 %v7457_v55 }
 0x622   : > { %v7460_v33 = vsel %vm7261_vm5, %v26514_v21, 0.0 }
 0x623   : > { %v26518_v26 = vpop.eup %22740  ;;  %7461 = vadd.xlane.f32.xlu0 %v7460_v33 }
 0x624   : > { %v7463_v52 = vsel %vm7261_vm5, %v26518_v26, 0.0 }
 0x625   : > { %v26522_v49 = vpop.eup %22742  ;;  %7464 = vadd.xlane.f32.xlu1 %v7463_v52 }
 0x626   : > { %v7466_v47 = vsel %vm7261_vm5, %v26522_v49, 0.0 }
 0x627   : > { %v26526_v40 = vpop.eup %22744  ;;  %7467 = vadd.xlane.f32.xlu0 %v7466_v47 }
 0x628   : > { %v7469_v25 = vsel %vm7261_vm5, %v26526_v40, 0.0 }
 0x629   : > { %v26530_v17 = vpop.eup %22746  ;;  %7470 = vadd.xlane.f32.xlu1 %v7469_v25 }
 0x62a   : > { %v7472_v5 = vsel %vm7261_vm5, %v26530_v17, 0.0 }
 0x62b   : > { %v26534_v56 = vpop.eup %22748  ;;  %7473 = vadd.xlane.f32.xlu0 %v7472_v5 }
 0x62c   : > { %v7475_v37 = vsel %vm7261_vm5, %v26534_v56, 0.0 }
 0x62d   : > { %7476 = vadd.xlane.f32.xlu1 %v7475_v37 }
 0x68c   : > { %v7408_v35 = vpop.xlane.xlu0 %7407 }
 0x68d   : > { %22750 = vrcp.f32 %v7408_v35 }
 0x68e   : > { %v7411_v7 = vpop.xlane.xlu1 %7410 }
 0x68f   : > { %22752 = vrcp.f32 %v7411_v7 }
 0x690   : > { %v7414_v8 = vpop.xlane.xlu0 %7413 }
 0x691   : > { %22754 = vrcp.f32 %v7414_v8 }
 0x692   : > { %v7417_v51 = vpop.xlane.xlu1 %7416 }
 0x693   : > { %22756 = vrcp.f32 %v7417_v51 }
 0x694   : > { %v7420_v45 = vpop.xlane.xlu0 %7419 }
 0x695   : > { %22758 = vrcp.f32 %v7420_v45 }
 0x696   : > { %v7423_v43 = vpop.xlane.xlu1 %7422 }
 0x697   : > { %v22751_v18 = vpop.eup %22750  ;;  %22760 = vrcp.f32 %v7423_v43 }
 0x698   : > { %v7426_v55 = vpop.xlane.xlu0 %7425  ;;  %v7502_v47 = vmul.f32 %v22751_v18, %v26425_v29 }
 0x699   : > { %v22753_v33 = vpop.eup %22752  ;;  %22762 = vrcp.f32 %v7426_v55 }
 0x69a   : > { %v7429_v52 = vpop.xlane.xlu1 %7428  ;;  %v7503_v25 = vmul.f32 %v22753_v33, %v26430_v24 }
 0x69b   : > { %v22755_v5 = vpop.eup %22754  ;;  %22764 = vrcp.f32 %v7429_v52 }
 0x69c   : > { %v7432_v37 = vpop.xlane.xlu0 %7431  ;;  %v7526_v35 = vpack.c.bf16 %v7503_v25, %v7502_v47  ;;  %v7504_v8 = vmul.f32 %v22755_v5, %v26435_v0 }
 0x69d   : > { %v22757_v7 = vpop.eup %22756  ;;  %22766 = vrcp.f32 %v7432_v37 }
 0x69e   : > { %v7505_v51 = vmul.f32 %v22757_v7, %v26440_v11  ;;  %v7435_v45 = vpop.xlane.xlu1 %7434  ;;  %20509 = vmatprep.mubr.msk.bf16.mxu1 %vm7261_vm5, %v7526_v35 }
 0x69f   : > { %v22759_v43 = vpop.eup %22758  ;;  %22768 = vrcp.f32 %v7435_v45 }
 0x6a0   : > { %v7438_v55 = vpop.xlane.xlu0 %7437  ;;  %v7527_v20 = vpack.c.bf16 %v7505_v51, %v7504_v8  ;;  %v7506_v18 = vmul.f32 %v22759_v43, %v26445_v2 }
 0x6a1   : > { %v22761_v29 = vpop.eup %22760  ;;  %22770 = vrcp.f32 %v7438_v55 }
 0x6a2   : > { %v7441_v24 = vpop.xlane.xlu1 %7440  ;;  %20510 = vmatmul.mubr.msk.bf16.vlgmr.msra.gmra.mrb[172].mxu1 %vm7261_vm5, %v7527_v20  ;;  %v7507_v33 = vmul.f32 %v22761_v29, %v26450_v39 }
 0x6a3   : > { %v22763_v52 = vpop.eup %22762  ;;  %22772 = vrcp.f32 %v7441_v24  ;;  %20514 = vmatpush3.bf16.msra.mxu1 %v26163_v28 }
 0x6a4   : > { %20515 = vmatprep.subr.bf16.mxu1 %v26159_v32  ;;  %v7444_v0 = vpop.xlane.xlu0 %7443  ;;  %v7528_v11 = vpack.c.bf16 %v7507_v33, %v7506_v18  ;;  %v7508_v25 = vmul.f32 %v22763_v52, %v26455_v41  ;;  %v21776_v52 = vld [vmem:[%s30401_s2 + $0x4] ss:$12 sps:$4 sm:$0xff]  }
 0x6a5   : > { %v22765_v47 = vpop.eup %22764  ;;  %22774 = vrcp.f32 %v7444_v0 }
 0x6a6   : > { %v7509_v5 = vmul.f32 %v22765_v47, %v26460_v1  ;;  %v7447_v37 = vpop.xlane.xlu1 %7446  ;;  %20517 = vmatprep.mubr.msk.bf16.mxu1 %vm7261_vm5, %v7528_v11 }
 0x6a7   : > { %v22767_v20 = vpop.eup %22766  ;;  %22776 = vrcp.f32 %v7447_v37  ;;  %20516 = vmatpush3.bf16.msra.mxu1 %v26159_v32 }
 0x6a8   : > { %20529 = vmatprep.subr.bf16.mxu1 %v26222_v6  ;;  %v7450_v28 = vpop.xlane.xlu0 %7449  ;;  %v7529_v2 = vpack.c.bf16 %v7509_v5, %v7508_v25  ;;  %v7510_v41 = vmul.f32 %v22767_v20, %v26465_v46 }
 0x6a9   : > { %v22769_v39 = vpop.eup %22768  ;;  %22778 = vrcp.f32 %v7450_v28 }
 0x6aa   : > { %v7453_v35 = vpop.xlane.xlu1 %7452  ;;  %20518 = vmatmul.mubr.msk.bf16.vlgmr.msra.gmra.mrb[176].mxu1 %vm7261_vm5, %v7529_v2  ;;  %v7511_v1 = vmul.f32 %v22769_v39, %v26470_v22 }
 0x6ab   : > { %v22771_v7 = vpop.eup %22770  ;;  %22780 = vrcp.f32 %v7453_v35  ;;  %20530 = vmatpush3.bf16.msra.mxu1 %v26222_v6 }
 0x6ac   : > { %20531 = vmatprep.subr.bf16.mxu1 %v26220_v42  ;;  %v7456_v32 = vpop.xlane.xlu0 %7455  ;;  %v7530_v8 = vpack.c.bf16 %v7511_v1, %v7510_v41  ;;  %v7512_v45 = vmul.f32 %v22771_v7, %v26475_v36  ;;  %v21780_v41 = vld [vmem:[%s30401_s2 + $0x1c] ss:$12 sps:$4 sm:$0xff]  }
 0x6ad   : > { %v22773_v51 = vpop.eup %22772  ;;  %22782 = vrcp.f32 %v7456_v32 }
 0x6ae   : > { %v7513_v43 = vmul.f32 %v22773_v51, %v26480_v62  ;;  %v7459_v55 = vpop.xlane.xlu1 %7458  ;;  %20525 = vmatprep.mubr.msk.bf16.mxu0 %vm7261_vm5, %v7530_v8  ;;  %v21784_v8 = vld [vmem:[%s30401_s2 + $0x34] ss:$12 sps:$4 sm:$0xff]  }
 0x6af   : > { %v22775_v46 = vpop.eup %22774  ;;  %22784 = vrcp.f32 %v7459_v55  ;;  %20532 = vmatpush3.bf16.msra.mxu1 %v26220_v42  ;;  %v21781_v55 = vld [vmem:[%s30401_s2 + $0x20] ss:$12 sps:$4 sm:$0xff]  }
 0x6b0   : > { %v7531_v22 = vpack.c.bf16 %v7513_v43, %v7512_v45  ;;  %20545 = vmatprep.subr.bf16.mxu1 %v26271_v16  ;;  %v7462_v6 = vpop.xlane.xlu0 %7461  ;;  %v7514_v36 = vmul.f32 %v22775_v46, %v26485_v10  ;;  %v21788_v46 = vld [vmem:[%s30401_s2 + $0x4c] ss:$12 sps:$4 sm:$0xff]  }
 0x6b1   : > { %v22777_v29 = vpop.eup %22776  ;;  %22786 = vrcp.f32 %v7462_v6  ;;  %v21792_v6 = vld [vmem:[%s30401_s2 + $0x64] ss:$12 sps:$4 sm:$0xff]  }
 0x6b2   : > { %v7465_v24 = vpop.xlane.xlu1 %7464  ;;  %20526 = vmatmul.mubr.msk.bf16.vlgmr.msra.gmra.mrb[28].mxu0 %vm7261_vm5, %v7531_v22  ;;  %v7515_v62 = vmul.f32 %v22777_v29, %v26490_v38  ;;  %v21789_v22 = vld [vmem:[%s30401_s2 + $0x50] ss:$12 sps:$4 sm:$0xff]   ;;  %v30295_v29 = vmov 0  }
 0x6b3   : > { %v22779_v18 = vpop.eup %22778  ;;  %22788 = vrcp.f32 %v7465_v24  ;;  %20538 = vmatpush3.bf16.msra.mxu0 %v26248_v63  ;;  %v21793_v24 = vld [vmem:[%s30401_s2 + $0x68] ss:$12 sps:$4 sm:$0xff]  }
 0x6b4   : > { %20539 = vmatprep.subr.bf16.mxu0 %v26244_v61  ;;  %v7468_v42 = vpop.xlane.xlu0 %7467  ;;  %v7532_v33 = vpack.c.bf16 %v7515_v62, %v7514_v36  ;;  %v7516_v11 = vmul.f32 %v22779_v18, %v26495_v60 }
 0x6b5   : > { %v22781_v0 = vpop.eup %22780  ;;  %22790 = vrcp.f32 %v7468_v42 }
 0x6b6   : > { %v7517_v10 = vmul.f32 %v22781_v0, %v26500_v59  ;;  %v7471_v47 = vpop.xlane.xlu1 %7470  ;;  %20533 = vmatprep.mubr.msk.bf16.mxu1 %vm7261_vm5, %v7532_v33 }
 0x6b7   : > { %v22783_v38 = vpop.eup %22782  ;;  %22792 = vrcp.f32 %v7471_v47  ;;  %20540 = vmatpush3.bf16.msra.mxu0 %v26244_v61  ;;  %v21777_v61 = vld [vmem:[%s30401_s2 + $0x8] ss:$12 sps:$4 sm:$0xff]   ;;  %v21794_v47 = vld [vmem:[%s30401_s2 + $0x78] ss:$12 sps:$4 sm:$0xff]  }
 0x6b8   : > { %v7474_v63 = vpop.xlane.xlu0 %7473  ;;  %v7533_v25 = vpack.c.bf16 %v7517_v10, %v7516_v11  ;;  %7950 = vmatprep.subr.bf16.mxu0 %v21776_v52  ;;  %v7518_v20 = vmul.f32 %v22783_v38, %v26505_v9  ;;  %v21790_v52 = vld [vmem:[%s30401_s2 + $0x60] ss:$12 sps:$4 sm:$0xff]   ;;  %v21796_v11 = vld [vmem:[%s30401_s2 + $0x7c] ss:$12 sps:$4 sm:$0xff]  }
 0x6b9   : > { %v22785_v5 = vpop.eup %22784  ;;  %22794 = vrcp.f32 %v7474_v63  ;;  %v21797_v10 = vld [vmem:[%s30401_s2 + $0x80] ss:$12 sps:$4 sm:$0xff]  }
 0x6ba   : > { %v7477_v37 = vpop.xlane.xlu1 %7476  ;;  %20534 = vmatmul.mubr.msk.bf16.vlgmr.msra.gmra.mrb[180].mxu1 %vm7261_vm5, %v7533_v25  ;;  %v7519_v60 = vmul.f32 %v22785_v5, %v26510_v34  ;;  %v21800_v63 = vld [vmem:[%s30401_s2 + $0x94] ss:$12 sps:$4 sm:$0xff]   ;;  %v21801_v5 = vld [vmem:[%s30401_s2 + $0x98] ss:$12 sps:$4 sm:$0xff]  }
 0x6bb   : > { %v22787_v59 = vpop.eup %22786  ;;  %22796 = vrcp.f32 %v7477_v37  ;;  %20546 = vmatpush3.bf16.msra.mxu1 %v26271_v16  ;;  %v21774_v16 = vld [vmem:[%s30401_s2] ss:$12 sps:$4 sm:$0xff]  }
 0x6bc   : > { %20547 = vmatprep.subr.bf16.mxu1 %v26269_v13  ;;  %v7534_v28 = vpack.c.bf16 %v7519_v60, %v7518_v20  ;;  %v7520_v39 = vmul.f32 %v22787_v59, %v26514_v21  ;;  %v21798_v59 = vld [vmem:[%s30401_s2 + $0x90] ss:$12 sps:$4 sm:$0xff]  }
 0x6bd   : > { %v22789_v2 = vpop.eup %22788 }
 0x6be   : > { %v7521_v35 = vmul.f32 %v22789_v2, %v26518_v26  ;;  %20541 = vmatprep.mubr.msk.bf16.mxu0 %vm7261_vm5, %v7534_v28  ;;  %v21805_v2 = vld [vmem:[%s30401_s2 + $0xb0] ss:$12 sps:$4 sm:$0xff]  }
 0x6bf   : > { %v22791_v9 = vpop.eup %22790  ;;  %20548 = vmatpush3.bf16.msra.mxu1 %v26269_v13  ;;  %v21778_v13 = vld [vmem:[%s30401_s2 + $0x18] ss:$12 sps:$4 sm:$0xff]  }
 0x6c0   : > { %v7535_v34 = vpack.c.bf16 %v7521_v35, %v7520_v39  ;;  %20553 = vmatprep.subr.bf16.mxu1 %v21777_v61  ;;  %v7522_v21 = vmul.f32 %v22791_v9, %v26522_v49  ;;  %v21782_v49 = vld [vmem:[%s30401_s2 + $0x30] ss:$12 sps:$4 sm:$0xff]   ;;  %v21802_v39 = vld [vmem:[%s30401_s2 + $0xa8] ss:$12 sps:$4 sm:$0xff]  }
 0x6c1   : > { %v22793_v1 = vpop.eup %22792  ;;  %v21808_v9 = vld [vmem:[%s30401_s2 + $0xc4] ss:$12 sps:$4 sm:$0xff]  }
 0x6c2   : > { %20542 = vmatmul.mubr.msk.bf16.vlgmr.msra.gmra.mrb[32].mxu0 %vm7261_vm5, %v7535_v34  ;;  %v7523_v26 = vmul.f32 %v22793_v1, %v26526_v40  ;;  %v21809_v34 = vld [vmem:[%s30401_s2 + $0xc8] ss:$12 sps:$4 sm:$0xff]  }
 0x6c3   : > { %v22795_v7 = vpop.eup %22794  ;;  %7951 = vmatpush1.bf16.msra.mxu0 %v21774_v16  ;;  %7982 = vmatprep.mubr.bf16.mxu0 %v30295_v29 }
 0x6c4   : > { %v7536_v32 = vpack.c.bf16 %v7523_v26, %v7522_v21  ;;  %7952 = vmatprep.subr.bf16.mxu0 %v21780_v41  ;;  %v7524_v45 = vmul.f32 %v22795_v7, %v26530_v17  ;;  %v21785_v17 = vld [vmem:[%s30401_s2 + $0x38] ss:$12 sps:$4 sm:$0xff]   ;;  %v21806_v26 = vld [vmem:[%s30401_s2 + $0xc0] ss:$12 sps:$4 sm:$0xff]  }
 0x6c5   : > { %v22797_v51 = vpop.eup %22796 }
 0x6c6   : > { %v7525_v43 = vmul.f32 %v22797_v51, %v26534_v56  ;;  %20549 = vmatprep.mubr.msk.bf16.mxu1 %vm7261_vm5, %v7536_v32  ;;  %v21786_v56 = vld [vmem:[%s30401_s2 + $0x48] ss:$12 sps:$4 sm:$0xff]   ;;  %v21813_v32 = vld [vmem:[%s30401_s2 + $0xe0] ss:$12 sps:$4 sm:$0xff]  }
 0x6c7   : > { %7953 = vmatpush1.bf16.msra.mxu0 %v21778_v13  ;;  %v21812_v13 = vld [vmem:[%s30401_s2 + $0xdc] ss:$12 sps:$4 sm:$0xff]  }
 0x6c8   : > { %v7537_v40 = vpack.c.bf16 %v7525_v43, %v7524_v45  ;;  %7954 = vmatprep.subr.bf16.mxu0 %v21784_v8  ;;  %v21810_v8 = vld [vmem:[%s30401_s2 + $0xd8] ss:$12 sps:$4 sm:$0xff]   ;;  %v21816_v45 = vld [vmem:[%s30401_s2 + $0xf4] ss:$12 sps:$4 sm:$0xff]  }
 0x6ca   : > { %20550 = vmatmul.mubr.msk.bf16.vlgmr.msra.gmra.mrb[184].mxu1 %vm7261_vm5, %v7537_v40 }
 0x6cb   : > { %20554 = vmatpush3.bf16.msra.mxu1 %v21777_v61  ;;  %7955 = vmatpush1.bf16.msra.mxu0 %v21782_v49  ;;  %v21804_v61 = vld [vmem:[%s30401_s2 + $0xac] ss:$12 sps:$4 sm:$0xff]  }
 0x6cc   : > { %20555 = vmatprep.subr.bf16.mxu1 %v21781_v55  ;;  %7956 = vmatprep.subr.bf16.mxu0 %v21788_v46  ;;  %v21817_v49 = vld [vmem:[%s30401_s2 + $0xf8] ss:$12 sps:$4 sm:$0xff]  }
 0x6cf   : > { %20556 = vmatpush3.bf16.msra.mxu1 %v21781_v55  ;;  %7957 = vmatpush1.bf16.msra.mxu0 %v21786_v56  ;;  %v21814_v56 = vld [vmem:[%s30401_s2 + $0xf0] ss:$12 sps:$4 sm:$0xff]  }
 0x6d0   : > { %20557 = vmatprep.subr.bf16.mxu1 %v21785_v17  ;;  %8122 = vmatprep.subr.bf16.mxu0 %v21792_v6  ;;  %v21821_v6 = vld [vmem:[%s30401_s2 + $0x110] ss:$12 sps:$4 sm:$0xff]  }
 0x6d3   : > { %20558 = vmatpush3.bf16.msra.mxu1 %v21785_v17 }
 0x6d4   : > { %20559 = vmatprep.subr.bf16.mxu1 %v21789_v22 }
 0x6d7   : > { %20560 = vmatpush3.bf16.msra.mxu1 %v21789_v22  ;;  %v21820_v22 = vld [vmem:[%s30401_s2 + $0x10c] ss:$12 sps:$4 sm:$0xff]  }
 0x6d8   : > { %20565 = vmatprep.subr.bf16.mxu1 %v21793_v24 }
 0x775   : > { %v20511_v36 = vpop.f32.mrb[172].mxu1 }
 0x776   : > { %v7578_v62 = vpop.f32.mrb[173].mxu1 }
 0x777   : > { %v20512_v18 = vpop.f32.mrb[174].mxu1 }
 0x778   : > { %v7869_v42 = vpack.c.bf16 %v20512_v18, %v20511_v36  ;;  %v7581_v33 = vpop.f32.mrb[175].mxu1 }
 0x779   : > { %v7868_v0 = vpack.c.bf16 %v7581_v33, %v7578_v62  ;;  %v21824_v62 = vld [vmem:[%s30401_s2 + $0x124] ss:$12 sps:$4 sm:$0xff]  }
 0x77b   : > { %17968 = vmatmul.mubr.msk.bf16.vlgmr.msra.gmra.mrb[36].mxu0 %vm6894_vm0, %v7868_v0  ;;  %20561 = vmatprep.mubr.msk.bf16.mxu1 %vm6894_vm0, %v7868_v0 }
 0x77c   : > { %8123 = vmatpush1.bf16.msra.mxu0 %v21790_v52  ;;  %20562 = vmatmul.mubr.msk.bf16.vlgmr.msra.gmra.mrb[188].mxu1 %vm6894_vm0, %v7869_v42 }
 0x77d   : > { %20566 = vmatpush3.bf16.msra.mxu1 %v21793_v24  ;;  %v20519_v38 = vpop.f32.mrb[176].mxu1  ;;  %8124 = vmatprep.subr.bf16.mxu0 %v21796_v11  ;;  %v21818_v24 = vld [vmem:[%s30401_s2 + $0x108] ss:$12 sps:$4 sm:$0xff]   ;;  %v21822_v11 = vld [vmem:[%s30401_s2 + $0x120] ss:$12 sps:$4 sm:$0xff]  }
 0x77e   : > { %v7633_v25 = vpop.f32.mrb[177].mxu1  ;;  %20567 = vmatprep.subr.bf16.mxu1 %v21797_v10  ;;  %7992 = vmatprep.mubr.bf16.mxu0 %v30295_v29 }
 0x77f   : > { %v20520_v37 = vpop.f32.mrb[178].mxu1 }
 0x780   : > { %v7871_v20 = vpack.c.bf16 %v20520_v37, %v20519_v38  ;;  %8125 = vmatpush1.bf16.msra.mxu0 %v21794_v47  ;;  %v7636_v60 = vpop.f32.mrb[179].mxu1  ;;  %v21828_v47 = vld [vmem:[%s30401_s2 + $0x13c] ss:$12 sps:$4 sm:$0xff]   ;;  %v21829_v38 = vld [vmem:[%s30401_s2 + $0x140] ss:$12 sps:$4 sm:$0xff]  }
 0x781   : > { %v7870_v28 = vpack.c.bf16 %v7636_v60, %v7633_v25  ;;  %20568 = vmatpush3.bf16.msra.mxu1 %v21797_v10  ;;  %8126 = vmatprep.subr.bf16.mxu0 %v21800_v63  ;;  %v21826_v63 = vld [vmem:[%s30401_s2 + $0x138] ss:$12 sps:$4 sm:$0xff]  }
 0x782   : > { %20569 = vmatprep.subr.bf16.mxu1 %v21801_v5 }
 0x783   : > { %17969 = vmatmul.mubr.msk.bf16.gmra.mrb[40].mxu0 %vm6894_vm0, %v7869_v42  ;;  %20573 = vmatprep.mubr.msk.bf16.mxu1 %vm6894_vm0, %v7870_v28  ;;  %v21825_v42 = vld [vmem:[%s30401_s2 + $0x128] ss:$12 sps:$4 sm:$0xff]  }
 0x784   : > { %8127 = vmatpush1.bf16.msra.mxu0 %v21798_v59  ;;  %8154 = vmatprep.mubr.bf16.mxu0 %v30295_v29 }
 0x785   : > { %20570 = vmatpush3.bf16.msra.mxu1 %v21801_v5  ;;  %v20527_v35 = vpop.f32.mrb[28].mxu0  ;;  %8128 = vmatprep.subr.bf16.mxu0 %v21804_v61  ;;  %v21832_v5 = vld [vmem:[%s30401_s2 + $0x154] ss:$12 sps:$4 sm:$0xff]   ;;  %v21830_v61 = vld [vmem:[%s30401_s2 + $0x150] ss:$12 sps:$4 sm:$0xff]  }
 0x786   : > { %v7688_v16 = vpop.f32.mrb[29].mxu0  ;;  %20571 = vmatprep.subr.bf16.mxu1 %v21805_v2 }
 0x787   : > { %v20528_v41 = vpop.f32.mrb[30].mxu0 }
 0x788   : > { %v26674_v1 = vpack.c.bf16 %v20528_v41, %v20527_v35  ;;  %8129 = vmatpush1.bf16.msra.mxu0 %v21802_v39  ;;  %v7691_v21 = vpop.f32.mrb[31].mxu0  ;;  %v21836_v39 = vld [vmem:[%s30401_s2 + $0x16c] ss:$12 sps:$4 sm:$0xff]   ;;  %v21837_v35 = vld [vmem:[%s30401_s2 + $0x170] ss:$12 sps:$4 sm:$0xff]  }
 0x789   : > { %v7872_v7 = vpack.c.bf16 %v7691_v21, %v7688_v16  ;;  %20572 = vmatpush3.bf16.msra.mxu1 %v21805_v2  ;;  %8294 = vmatprep.subr.bf16.mxu0 %v21808_v9  ;;  %v21834_v9 = vld [vmem:[%s30401_s2 + $0x168] ss:$12 sps:$4 sm:$0xff]   ;;  %v21840_v16 = vld [vmem:[%s30401_s2 + $0x184] ss:$12 sps:$4 sm:$0xff]   ;;  %v21838_v41 = vld [vmem:[%s30401_s2 + $0x180] ss:$12 sps:$4 sm:$0xff]  }
 0x78a   : > { %20577 = vmatprep.subr.bf16.mxu1 %v21809_v34  ;;  %v21845_v21 = vld [vmem:[%s30401_s2 + $0x1a0] ss:$12 sps:$4 sm:$0xff]  }
 0x78b   : > { %17984 = vmatmul.mubr.msk.bf16.vlgmr.msra.gmra.mrb[36].mxu0 %vm6894_vm0, %v7870_v28 }
 0x78c   : > { %20574 = vmatmul.mubr.msk.bf16.vlgmr.msra.gmra.mrb[188].mxu1 %vm6894_vm0, %v7871_v20  ;;  %8295 = vmatpush1.bf16.msra.mxu0 %v21806_v26  ;;  %v21842_v26 = vld [vmem:[%s30401_s2 + $0x198] ss:$12 sps:$4 sm:$0xff]  }
 0x78d   : > { %20578 = vmatpush3.bf16.msra.mxu1 %v21809_v34  ;;  %20585 = vmatprep.mubr.msk.bf16.mxu1 %vm6894_vm0, %v7872_v7  ;;  %v20535_v51 = vpop.f32.mrb[180].mxu1  ;;  %v21841_v34 = vld [vmem:[%s30401_s2 + $0x188] ss:$12 sps:$4 sm:$0xff]  }
 0x78e   : > { %v7743_v43 = vpop.f32.mrb[181].mxu1  ;;  %8296 = vmatprep.subr.bf16.mxu0 %v21812_v13  ;;  %20579 = vmatprep.subr.bf16.mxu1 %v21813_v32  ;;  %v21849_v13 = vld [vmem:[%s30401_s2 + $0x1b8] ss:$12 sps:$4 sm:$0xff]  }
 0x78f   : > { %v20536_v40 = vpop.f32.mrb[182].mxu1  ;;  %8164 = vmatprep.mubr.bf16.mxu0 %v30295_v29 }
 0x790   : > { %v26698_v55 = vpack.c.bf16 %v20536_v40, %v20535_v51  ;;  %8297 = vmatpush1.bf16.msra.mxu0 %v21810_v8  ;;  %v7746_v17 = vpop.f32.mrb[183].mxu1  ;;  %v21852_v8 = vld [vmem:[%s30401_s2 + $0x1cc] ss:$12 sps:$4 sm:$0xff]   ;;  %v21853_v51 = vld [vmem:[%s30401_s2 + $0x1d0] ss:$12 sps:$4 sm:$0xff]  }
 0x791   : > { %v26703_v46 = vpack.c.bf16 %v7746_v17, %v7743_v43  ;;  %20580 = vmatpush3.bf16.msra.mxu1 %v21813_v32  ;;  %8298 = vmatprep.subr.bf16.mxu0 %v21816_v45  ;;  %v21846_v32 = vld [vmem:[%s30401_s2 + $0x1b0] ss:$12 sps:$4 sm:$0xff]   ;;  %v21850_v45 = vld [vmem:[%s30401_s2 + $0x1c8] ss:$12 sps:$4 sm:$0xff]   ;;  %v21854_v40 = vld [vmem:[%s30401_s2 + $0x1e0] ss:$12 sps:$4 sm:$0xff]  }
 0x792   : > { %20581 = vmatprep.subr.bf16.mxu1 %v21817_v49  ;;  %v21856_v43 = vld [vmem:[%s30401_s2 + $0x1e4] ss:$12 sps:$4 sm:$0xff]   ;;  %v21861_v17 = vld [vmem:[%s30401_s2 + $0x200] ss:$12 sps:$4 sm:$0xff]  }
 0x793   : > { %17985 = vmatmul.mubr.msk.bf16.gmra.mrb[40].mxu0 %vm6894_vm0, %v7871_v20  ;;  %v21833_v20 = vld [vmem:[%s30401_s2 + $0x158] ss:$12 sps:$4 sm:$0xff]  }
 0x794   : > { %8299 = vmatpush1.bf16.msra.mxu0 %v21814_v56  ;;  %8326 = vmatprep.mubr.bf16.mxu0 %v30295_v29  ;;  %v21858_v56 = vld [vmem:[%s30401_s2 + $0x1f8] ss:$12 sps:$4 sm:$0xff]  }
 0x795   : > { %20582 = vmatpush3.bf16.msra.mxu1 %v21817_v49  ;;  %v20543_v36 = vpop.f32.mrb[32].mxu0  ;;  %8300 = vmatprep.subr.bf16.mxu0 %v21820_v22  ;;  %v21857_v49 = vld [vmem:[%s30401_s2 + $0x1e8] ss:$12 sps:$4 sm:$0xff]   ;;  %v21865_v22 = vld [vmem:[%s30401_s2 + $0x218] ss:$12 sps:$4 sm:$0xff]  }
 0x796   : > { %v7798_v18 = vpop.f32.mrb[33].mxu0  ;;  %20583 = vmatprep.subr.bf16.mxu1 %v21821_v6 }
 0x797   : > { %v20544_v33 = vpop.f32.mrb[34].mxu0 }
 0x798   : > { %v26722_v52 = vpack.c.bf16 %v20544_v33, %v20543_v36  ;;  %8301 = vmatpush1.bf16.msra.mxu0 %v21818_v24  ;;  %v7801_v0 = vpop.f32.mrb[35].mxu0  ;;  %v21868_v24 = vld [vmem:[%s30401_s2 + $0x22c] ss:$12 sps:$4 sm:$0xff]   ;;  %v21869_v36 = vld [vmem:[%s30401_s2 + $0x230] ss:$12 sps:$4 sm:$0xff]  }
 0x799   : > { %v26727_v10 = vpack.c.bf16 %v7801_v0, %v7798_v18  ;;  %20584 = vmatpush3.bf16.msra.mxu1 %v21821_v6  ;;  %8466 = vmatprep.subr.bf16.mxu0 %v21824_v62  ;;  %v21862_v6 = vld [vmem:[%s30401_s2 + $0x210] ss:$12 sps:$4 sm:$0xff]   ;;  %v21866_v62 = vld [vmem:[%s30401_s2 + $0x228] ss:$12 sps:$4 sm:$0xff]   ;;  %v30402_v18 = vld [vmem:[#allocation56_spill] sm:$0xff] }
 0x79a   : > { %20589 = vmatprep.subr.bf16.mxu1 %v21825_v42  ;;  %v30404_v33 = vld [vmem:[#allocation31_spill] sm:$0xff] }
 0x79b   : > { %18000 = vmatmul.mubr.msk.bf16.vlgmr.msra.gmra.mrb[36].mxu0 %vm6894_vm0, %v7872_v7  ;;  %v21848_v7 = vld [vmem:[%s30401_s2 + $0x1b4] ss:$12 sps:$4 sm:$0xff]  }
 0x79c   : > { %20586 = vmatmul.mubr.msk.bf16.vlgmr.msra.gmra.mrb[188].mxu1 %vm6894_vm0, %v26674_v1  ;;  %8467 = vmatpush1.bf16.msra.mxu0 %v21822_v11  ;;  %v8979_v11 = vsel %vm6894_vm0, %v30402_v18, 0 }
 0x79d   : > { %20590 = vmatpush3.bf16.msra.mxu1 %v21825_v42  ;;  %20597 = vmatprep.mubr.msk.bf16.mxu1 %vm6894_vm0, %v26703_v46  ;;  %v20551_v25 = vpop.f32.mrb[184].mxu1  ;;  %v30403_v42 = vld [vmem:[#allocation58_spill] sm:$0xff] }
 0x79e   : > { %v7853_v37 = vpop.f32.mrb[185].mxu1  ;;  %8468 = vmatprep.subr.bf16.mxu0 %v21828_v47  ;;  %20591 = vmatprep.subr.bf16.mxu1 %v21829_v38  ;;  %v30407_v47 = vld [vmem:[#allocation55_spill] sm:$0xff] }
 0x79f   : > { %v20552_v60 = vpop.f32.mrb[186].mxu1  ;;  %8336 = vmatprep.mubr.bf16.mxu0 %v30295_v29 }
 0x7a0   : > { %v26750_v59 = vpack.c.bf16 %v20552_v60, %v20551_v25  ;;  %8469 = vmatpush1.bf16.msra.mxu0 %v21826_v63  ;;  %v7856_v28 = vpop.f32.mrb[187].mxu1  ;;  %v30409_v63 = vld [vmem:[#allocation27_spill] sm:$0xff]  ;;  %v30410_v25 = vld [vmem:[#allocation25_spill] sm:$0xff]  ;;  %v30412_v60 = vld [vmem:[#allocation26_spill] sm:$0xff] }
 0x7a1   : > { %v26755_v2 = vpack.c.bf16 %v7856_v28, %v7853_v37  ;;  %20592 = vmatpush3.bf16.msra.mxu1 %v21829_v38  ;;  %8470 = vmatprep.subr.bf16.mxu0 %v21832_v5  ;;  %v30408_v38 = vld [vmem:[#allocation57_spill] sm:$0xff]  ;;  %v30411_v5 = vpack.c.bf16 %v30409_v63, %v30410_v25  ;;  %v8982_v37 = vsel %vm6894_vm0, %v30407_v47, 0 }
 0x7a2   : > { %20593 = vmatprep.subr.bf16.mxu1 %v21833_v20 }
 0x7a3   : > { %18001 = vmatmul.mubr.msk.bf16.gmra.mrb[40].mxu0 %vm6894_vm0, %v26674_v1  ;;  %v21844_v1 = vld [vmem:[%s30401_s2 + $0x19c] ss:$12 sps:$4 sm:$0xff]  }
 0x7a4   : > { %8471 = vmatpush1.bf16.msra.mxu0 %v21830_v61  ;;  %8498 = vmatprep.mubr.bf16.mxu0 %v30295_v29  ;;  %v9101_v61 = vsel %vm6894_vm0, %v25880_v44, 0 }
 0x7a5   : > { %20594 = vmatpush3.bf16.msra.mxu1 %v21833_v20  ;;  %8472 = vmatprep.subr.bf16.mxu0 %v21836_v39  ;;  %v9043_v20 = vsel %vm6894_vm0, %v30408_v38, 0  ;;  %v30416_v39 = vld [vmem:[#allocation28_spill] sm:$0xff] }
 0x7a6   : > { %20595 = vmatprep.subr.bf16.mxu1 %v21837_v35 }
 0x7a8   : > { %8473 = vmatpush1.bf16.msra.mxu0 %v21834_v9  ;;  %v30418_v9 = vld [vmem:[#allocation36_spill] sm:$0xff] }
 0x7a9   : > { %20596 = vmatpush3.bf16.msra.mxu1 %v21837_v35  ;;  %8638 = vmatprep.subr.bf16.mxu0 %v21840_v16  ;;  %v30419_v16 = vld [vmem:[#allocation34_spill] sm:$0xff] }
 0x7aa   : > { %20601 = vmatprep.subr.bf16.mxu1 %v21841_v34 }
 0x7ab   : > { %18016 = vmatmul.mubr.msk.bf16.vlgmr.msra.gmra.mrb[36].mxu0 %vm6894_vm0, %v26703_v46  ;;  %v21864_v46 = vld [vmem:[%s30401_s2 + $0x214] ss:$12 sps:$4 sm:$0xff]  }
 0x7ac   : > { %20598 = vmatmul.mubr.msk.bf16.vlgmr.msra.gmra.mrb[188].mxu1 %vm6894_vm0, %v26698_v55  ;;  %8639 = vmatpush1.bf16.msra.mxu0 %v21838_v41  ;;  %v9162_v41 = vsel %vm6894_vm0, %v25954_v12, 0 }
 0x7ad   : > { %20602 = vmatpush3.bf16.msra.mxu1 %v21841_v34  ;;  %20609 = vmatprep.mubr.msk.bf16.mxu1 %vm6894_vm0, %v26727_v10  ;;  %v30420_v34 = vpack.c.bf16 %v30418_v9, %v30419_v16 }
 0x7ae   : > { %8640 = vmatprep.subr.bf16.mxu0 %v21844_v1  ;;  %20603 = vmatprep.subr.bf16.mxu1 %v21845_v21  ;;  %v30421_v1 = vld [vmem:[#allocation40_spill] sm:$0xff] }
 0x7af   : > { %8508 = vmatprep.mubr.bf16.mxu0 %v30295_v29 }
 0x7b0   : > { %8641 = vmatpush1.bf16.msra.mxu0 %v21842_v26  ;;  %v9104_v26 = vsel %vm6894_vm0, %v25875_v54, 0 }
 0x7b1   : > { %20604 = vmatpush3.bf16.msra.mxu1 %v21845_v21  ;;  %8642 = vmatprep.subr.bf16.mxu0 %v21848_v7  ;;  %v9165_v7 = vsel %vm6894_vm0, %v25951_v58, 0 }
 0x7b2   : > { %20605 = vmatprep.subr.bf16.mxu1 %v21849_v13 }
 0x7b3   : > { %18017 = vmatmul.mubr.msk.bf16.gmra.mrb[40].mxu0 %vm6894_vm0, %v26698_v55  ;;  %v21860_v55 = vld [vmem:[%s30401_s2 + $0x1fc] ss:$12 sps:$4 sm:$0xff]  }
 0x7b4   : > { %8643 = vmatpush1.bf16.msra.mxu0 %v21846_v32  ;;  %8670 = vmatprep.mubr.bf16.mxu0 %v30295_v29 }
 0x7b5   : > { %20606 = vmatpush3.bf16.msra.mxu1 %v21849_v13  ;;  %8644 = vmatprep.subr.bf16.mxu0 %v21852_v8  ;;  %v30425_v13 = vld [vmem:[#allocation33_spill] sm:$0xff]  ;;  %v9223_v8 = vsel %vm6894_vm0, %v26029_v14, 0 }
 0x7b6   : > { %20607 = vmatprep.subr.bf16.mxu1 %v21853_v51 }
 0x7b8   : > { %8645 = vmatpush1.bf16.msra.mxu0 %v21850_v45 }
 0x7b9   : > { %20608 = vmatpush3.bf16.msra.mxu1 %v21853_v51  ;;  %8810 = vmatprep.subr.bf16.mxu0 %v21856_v43  ;;  %v30428_v51 = vld [vmem:[#allocation47_spill] sm:$0xff]  ;;  %v30431_v43 = vld [vmem:[#allocation37_spill] sm:$0xff] }
 0x7ba   : > { %20613 = vmatprep.subr.bf16.mxu1 %v21857_v49 }
 0x7bb   : > { %18032 = vmatmul.mubr.msk.bf16.vlgmr.msra.gmra.mrb[36].mxu0 %vm6894_vm0, %v26727_v10  ;;  %v9040_v10 = vsel %vm6894_vm0, %v30403_v42, 0 }
 0x7bc   : > { %20610 = vmatmul.mubr.msk.bf16.vlgmr.msra.gmra.mrb[188].mxu1 %vm6894_vm0, %v26722_v52  ;;  %8811 = vmatpush1.bf16.msra.mxu0 %v21854_v40  ;;  %v9284_v40 = vsel %vm6894_vm0, %v26090_v3, 0 }
 0x7bd   : > { %20614 = vmatpush3.bf16.msra.mxu1 %v21857_v49  ;;  %20621 = vmatprep.mubr.msk.bf16.mxu1 %vm6894_vm0, %v26755_v2 }
 0x7be   : > { %8812 = vmatprep.subr.bf16.mxu0 %v21860_v55  ;;  %20615 = vmatprep.subr.bf16.mxu1 %v21861_v17  ;;  %v30433_v55 = vld [vmem:[#allocation54_spill] sm:$0xff] }
 0x7bf   : > { %8680 = vmatprep.mubr.bf16.mxu0 %v30295_v29 }
 0x7c0   : > { %8813 = vmatpush1.bf16.msra.mxu0 %v21858_v56  ;;  %v9226_v56 = vsel %vm6894_vm0, %v26026_v19, 0 }
 0x7c1   : > { %20616 = vmatpush3.bf16.msra.mxu1 %v21861_v17  ;;  %8814 = vmatprep.subr.bf16.mxu0 %v21864_v46  ;;  %v9287_v46 = vsel %vm6894_vm0, %v26088_v57, 0 }
 0x7c2   : > { %20617 = vmatprep.subr.bf16.mxu1 %v21865_v22 }
 0x7c3   : > { %18033 = vmatmul.mubr.msk.bf16.gmra.mrb[40].mxu0 %vm6894_vm0, %v26722_v52  ;;  %v30405_v52 = vld [vmem:[#allocation29_spill] sm:$0xff] }
 0x7c4   : > { %8815 = vmatpush1.bf16.msra.mxu0 %v21862_v6  ;;  %8842 = vmatprep.mubr.bf16.mxu0 %v30295_v29  ;;  %v30406_v0 = vpack.c.bf16 %v30404_v33, %v30405_v52 }
 0x7c5   : > { %20618 = vmatpush3.bf16.msra.mxu1 %v21865_v22  ;;  %8816 = vmatprep.subr.bf16.mxu0 %v21868_v24  ;;  %v30437_v22 = vld [vmem:[#allocation45_spill] sm:$0xff]  ;;  %v30439_v24 = vld [vmem:[#allocation52_spill] sm:$0xff] }
 0x7c6   : > { %20619 = vmatprep.subr.bf16.mxu1 %v21869_v36 }
 0x7c8   : > { %8817 = vmatpush1.bf16.msra.mxu0 %v21866_v62 }
 0x7c9   : > { %20620 = vmatpush3.bf16.msra.mxu1 %v21869_v36  ;;  %21213 = vmatprep.subr.msk.bf16.mxu0 %vm6894_vm0, %v30402_v18  ;;  %v30440_v36 = vld [vmem:[#allocation51_spill] sm:$0xff] }
 0x7ca   : > { %21215 = vmatprep.subr.msk.bf16.mxu1 %vm6894_vm0, %v30403_v42  ;;  %v30441_v62 = vpack.c.bf16 %v30439_v24, %v30440_v36 }
 0x7cb   : > { %18048 = vmatmul.mubr.msk.bf16.vlgmr.msra.gmra.mrb[36].mxu0 %vm6894_vm0, %v26755_v2  ;;  %v30415_v2 = vld [vmem:[#allocation30_spill] sm:$0xff] }
 0x7cc   : > { %20622 = vmatmul.mubr.msk.bf16.vlgmr.msra.gmra.mrb[188].mxu1 %vm6894_vm0, %v26750_v59  ;;  %8852 = vmatprep.mubr.bf16.mxu0 %v30295_v29  ;;  %v30417_v35 = vpack.c.bf16 %v30415_v2, %v30416_v39  ;;  %v30442_v2 = vld [vmem:[#allocation41_spill] sm:$0xff] }
 0x7cd   : > { %20637 = vmatprep.mubr.msk.bf16.mxu1 %vm6894_vm0, %v30406_v0 }
 0x7d1   : > { %20626 = vmatpush3.bf16.xpose.msra.mxu0 %v8979_v11 }
 0x7d2   : > { %21214 = vmatprep.subr.msk.bf16.mxu0 %vm6894_vm0, %v30407_v47  ;;  %20634 = vmatpush3.bf16.xpose.msra.mxu1 %v9040_v10 }
 0x7d3   : > { %21216 = vmatprep.subr.msk.bf16.mxu1 %vm6894_vm0, %v30408_v38  ;;  %18049 = vmatmul.mubr.msk.bf16.gmra.mrb[40].mxu0 %vm6894_vm0, %v26750_v59  ;;  %v30413_v59 = vld [vmem:[#allocation24_spill] sm:$0xff] }
 0x7d4   : > { %20629 = vmatprep.mubr.msk.bf16.mxu0 %vm6894_vm0, %v30411_v5  ;;  %v30414_v28 = vpack.c.bf16 %v30412_v60, %v30413_v59 }
 0x7d9   : > { %20628 = vmatpush3.bf16.xpose.msra.mxu0 %v8982_v37 }
 0x7da   : > { %20636 = vmatpush3.bf16.xpose.msra.mxu1 %v9043_v20  ;;  %21217 = vmatprep.subr.msk.bf16.mxu0 %vm6894_vm0, %v25880_v44  ;;  %v30422_v44 = vld [vmem:[#allocation38_spill] sm:$0xff] }
 0x7db   : > { %21219 = vmatprep.subr.msk.bf16.mxu1 %vm6894_vm0, %v25954_v12  ;;  %v30423_v21 = vpack.c.bf16 %v30421_v1, %v30422_v44  ;;  %v30424_v12 = vld [vmem:[#allocation35_spill] sm:$0xff] }
 0x7dc   : > { %v30426_v32 = vpack.c.bf16 %v30424_v12, %v30425_v13 }
 0x7e0   : > { %20630 = vmatmul.mubr.msk.bf16.vlgmr.msra.gmra.mrb[44].mxu0 %vm6894_vm0, %v30414_v28 }
 0x7e1   : > { %20638 = vmatmul.mubr.msk.bf16.vlgmr.msra.gmra.mrb[192].mxu1 %vm6894_vm0, %v30417_v35  ;;  %20642 = vmatpush3.bf16.xpose.msra.mxu0 %v9101_v61 }
 0x7e2   : > { %20645 = vmatprep.mubr.msk.bf16.mxu0 %vm6894_vm0, %v30420_v34  ;;  %21218 = vmatprep.subr.msk.bf16.mxu0 %vm6894_vm0, %v25875_v54  ;;  %v30427_v54 = vld [vmem:[#allocation48_spill] sm:$0xff] }
 0x7e3   : > { %20650 = vmatpush3.bf16.xpose.msra.mxu1 %v9162_v41  ;;  %20653 = vmatprep.mubr.msk.bf16.mxu1 %vm6894_vm0, %v30423_v21  ;;  %v30429_v45 = vpack.c.bf16 %v30427_v54, %v30428_v51 }
 0x7e4   : > { %21220 = vmatprep.subr.msk.bf16.mxu1 %vm6894_vm0, %v25951_v58  ;;  %v30430_v58 = vld [vmem:[#allocation39_spill] sm:$0xff] }
 0x7e5   : > { %v30432_v49 = vpack.c.bf16 %v30430_v58, %v30431_v43 }
 0x7e9   : > { %20644 = vmatpush3.bf16.xpose.msra.mxu0 %v9104_v26 }
 0x7ea   : > { %21221 = vmatprep.subr.msk.bf16.mxu0 %vm6894_vm0, %v26029_v14  ;;  %v30434_v14 = vld [vmem:[#allocation53_spill] sm:$0xff] }
 0x7eb   : > { %20652 = vmatpush3.bf16.xpose.msra.mxu1 %v9165_v7  ;;  %v30435_v17 = vpack.c.bf16 %v30433_v55, %v30434_v14 }
 0x7ec   : > { %21223 = vmatprep.subr.msk.bf16.mxu1 %vm6894_vm0, %v26090_v3  ;;  %v30436_v3 = vld [vmem:[#allocation46_spill] sm:$0xff] }
 0x7ed   : > { %v30438_v6 = vpack.c.bf16 %v30436_v3, %v30437_v22 }
 0x7f0   : > { %20646 = vmatmul.mubr.msk.bf16.vlgmr.msra.gmra.mrb[48].mxu0 %vm6894_vm0, %v30426_v32 }
 0x7f1   : > { %20658 = vmatpush3.bf16.xpose.msra.mxu0 %v9223_v8  ;;  %20661 = vmatprep.mubr.msk.bf16.mxu0 %vm6894_vm0, %v30429_v45 }
 0x7f2   : > { %20654 = vmatmul.mubr.msk.bf16.vlgmr.msra.gmra.mrb[196].mxu1 %vm6894_vm0, %v30432_v49  ;;  %21222 = vmatprep.subr.msk.bf16.mxu0 %vm6894_vm0, %v26026_v19 }
 0x7f3   : > { %20666 = vmatpush3.bf16.xpose.msra.mxu1 %v9284_v40  ;;  %20669 = vmatprep.mubr.msk.bf16.mxu1 %vm6894_vm0, %v30435_v17 }
 0x7f4   : > { %21224 = vmatprep.subr.msk.bf16.mxu1 %vm6894_vm0, %v26088_v57 }
 0x7f9   : > { %20660 = vmatpush3.bf16.xpose.msra.mxu0 %v9226_v56 }
 0x7fa   : > { %20673 = vmatprep.subr.bf16.mxu0 %v26143_v53 }
 0x7fb   : > { %20668 = vmatpush3.bf16.xpose.msra.mxu1 %v9287_v46 }
 0x7fc   : > { %20681 = vmatprep.subr.bf16.mxu1 %v26174_v23 }
 0x800   : > { %20662 = vmatmul.mubr.msk.bf16.vlgmr.msra.gmra.mrb[52].mxu0 %vm6894_vm0, %v30438_v6 }
 0x801   : > { %20674 = vmatpush3.bf16.msra.mxu0 %v26143_v53 }
 0x802   : > { %20670 = vmatmul.mubr.msk.bf16.vlgmr.msra.gmra.mrb[200].mxu1 %vm6894_vm0, %v30441_v62  ;;  %20675 = vmatprep.subr.bf16.mxu0 %v26139_v50 }
 0x803   : > { %20682 = vmatpush3.bf16.msra.mxu1 %v26174_v23 }
 0x804   : > { %20683 = vmatprep.subr.bf16.mxu1 %v26172_v30 }
 0x805   : > { %20676 = vmatpush3.bf16.msra.mxu0 %v26139_v50 }
 0x806   : > { %20689 = vmatprep.subr.bf16.mxu0 %v26202_v48 }
 0x807   : > { %20684 = vmatpush3.bf16.msra.mxu1 %v26172_v30 }
 0x808   : > { %20697 = vmatprep.subr.bf16.mxu1 %v26232_v15 }
 0x89e   : > { %v26974_v19 = vpop.f32.mrb[36].mxu0 }
 0x89f   : > { %v26976_v57 = vpop.f32.mrb[188].mxu1  ;;  %v26978_v53 = vpop.f32.mrb[37].mxu0 }
 0x8a0   : > { %v26980_v18 = vpop.f32.mrb[189].mxu1  ;;  %v26982_v42 = vpop.f32.mrb[38].mxu0 }
 0x8a1   : > { %v26984_v23 = vpop.f32.mrb[190].mxu1  ;;  %v26986_v33 = vpop.f32.mrb[39].mxu0 }
 0x8a2   : > { %v26988_v50 = vpop.f32.mrb[191].mxu1 }
 0x8a6   : > { %v26990_v52 = vpop.f32.mrb[40].mxu0 }
 0x8a7   : > { %v26992_v30 = vpop.f32.mrb[41].mxu0 }
 0x8a8   : > { %v26994_v0 = vpop.f32.mrb[42].mxu0 }
 0x8a9   : > { %v26996_v11 = vpop.f32.mrb[43].mxu0 }
 0x8b3   : > { %v20631_v10 = vpop.f32.mrb[44].mxu0 }
 0x8b4   : > { %v9018_v47 = vpop.f32.mrb[45].mxu0  ;;  %v20639_v38 = vpop.f32.mrb[192].mxu1  ;;  %v27002_v60 = vadd.f32 %v20631_v10, %v26287_v4 }
 0x8b5   : > { %v26999_v63 = vadd.f32 %v9018_v47, %v26282_v31  ;;  %v20632_v25 = vpop.f32.mrb[46].mxu0  ;;  %v9079_v5 = vpop.f32.mrb[193].mxu1  ;;  %v27025_v1 = vadd.f32 %v20639_v38, %v26287_v4 }
 0x8b6   : > { %v9021_v37 = vpop.f32.mrb[47].mxu0  ;;  %v20640_v20 = vpop.f32.mrb[194].mxu1  ;;  %v27010_v39 = vadd.f32 %v20632_v25, %v30442_v2  ;;  %v27015_v9 = vadd.f32 %v9079_v5, %v26282_v31  ;;  %v9344_v16 = vsel %vm7261_vm5, %v27002_v60, -inf }
 0x8b7   : > { %v27005_v59 = vadd.f32 %v9021_v37, %v26289_v27  ;;  %v9082_v28 = vpop.f32.mrb[195].mxu1  ;;  %v9338_v61 = vsel %vm7261_vm5, %v26999_v63, -inf  ;;  %v27030_v21 = vadd.f32 %v20640_v20, %v30442_v2  ;;  %v9356_v12 = vsel %vm7261_vm5, %v27025_v1, -inf }
 0x8b8   : > { %9339 = vmax.xlane.f32.xlu0 %v9338_v61  ;;  %v27020_v34 = vadd.f32 %v9082_v28, %v26289_v27  ;;  %v9347_v41 = vsel %vm7261_vm5, %v27010_v39, -inf  ;;  %v9350_v44 = vsel %vm7261_vm5, %v27015_v9, -inf }
 0x8b9   : > { %v9341_v35 = vsel %vm7261_vm5, %v27005_v59, -inf  ;;  %v9359_v51 = vsel %vm7261_vm5, %v27030_v21, -inf }
 0x8ba   : > { %9342 = vmax.xlane.f32.xlu1 %v9341_v35  ;;  %v9353_v26 = vsel %vm7261_vm5, %v27020_v34, -inf }
 0x8bc   : > { %9345 = vmax.xlane.f32.xlu0 %v9344_v16 }
 0x8be   : > { %9348 = vmax.xlane.f32.xlu1 %v9347_v41 }
 0x8c0   : > { %9351 = vmax.xlane.f32.xlu0 %v9350_v44 }
 0x8c2   : > { %9354 = vmax.xlane.f32.xlu1 %v9353_v26 }
 0x8c3   : > { %v20647_v7 = vpop.f32.mrb[48].mxu0 }
 0x8c4   : > { %v9140_v13 = vpop.f32.mrb[49].mxu0  ;;  %9357 = vmax.xlane.f32.xlu0 %v9356_v12  ;;  %v27042_v43 = vadd.f32 %v20647_v7, %v26287_v4 }
 0x8c5   : > { %v27037_v32 = vadd.f32 %v9140_v13, %v26282_v31  ;;  %v20655_v8 = vpop.f32.mrb[196].mxu1  ;;  %v20648_v54 = vpop.f32.mrb[50].mxu0 }
 0x8c6   : > { %v9201_v45 = vpop.f32.mrb[197].mxu1  ;;  %v9143_v58 = vpop.f32.mrb[51].mxu0  ;;  %9360 = vmax.xlane.f32.xlu1 %v9359_v51  ;;  %v27050_v17 = vadd.f32 %v20648_v54, %v30442_v2  ;;  %v9368_v3 = vsel %vm7261_vm5, %v27042_v43, -inf  ;;  %v27065_v24 = vadd.f32 %v20655_v8, %v26287_v4 }
 0x8c7   : > { %v27045_v49 = vadd.f32 %v9143_v58, %v26289_v27  ;;  %v20656_v40 = vpop.f32.mrb[198].mxu1  ;;  %v9362_v55 = vsel %vm7261_vm5, %v27037_v32, -inf  ;;  %v27055_v46 = vadd.f32 %v9201_v45, %v26282_v31 }
 0x8c8   : > { %v9204_v14 = vpop.f32.mrb[199].mxu1  ;;  %9363 = vmax.xlane.f32.xlu0 %v9362_v55  ;;  %v9371_v6 = vsel %vm7261_vm5, %v27050_v17, -inf  ;;  %v27070_v62 = vadd.f32 %v20656_v40, %v30442_v2  ;;  %v9380_v38 = vsel %vm7261_vm5, %v27065_v24, -inf }
 0x8c9   : > { %v9365_v56 = vsel %vm7261_vm5, %v27045_v49, -inf  ;;  %v27060_v22 = vadd.f32 %v9204_v14, %v26289_v27  ;;  %v9374_v36 = vsel %vm7261_vm5, %v27055_v46, -inf }
 0x8ca   : > { %9366 = vmax.xlane.f32.xlu1 %v9365_v56  ;;  %v9383_v28 = vsel %vm7261_vm5, %v27070_v62, -inf }
 0x8cb   : > { %v9377_v10 = vsel %vm7261_vm5, %v27060_v22, -inf }
 0x8cc   : > { %9369 = vmax.xlane.f32.xlu0 %v9368_v3 }
 0x8ce   : > { %9372 = vmax.xlane.f32.xlu1 %v9371_v6 }
 0x8d0   : > { %9375 = vmax.xlane.f32.xlu0 %v9374_v36 }
 0x8d2   : > { %9378 = vmax.xlane.f32.xlu1 %v9377_v10 }
 0x8d3   : > { %v20663_v47 = vpop.f32.mrb[52].mxu0 }
 0x8d4   : > { %v9262_v25 = vpop.f32.mrb[53].mxu0  ;;  %9381 = vmax.xlane.f32.xlu0 %v9380_v38  ;;  %v27082_v16 = vadd.f32 %v20663_v47, %v26287_v4 }
 0x8d5   : > { %v27077_v5 = vadd.f32 %v9262_v25, %v26282_v31  ;;  %v20671_v37 = vpop.f32.mrb[200].mxu1  ;;  %v20664_v20 = vpop.f32.mrb[54].mxu0 }
 0x8d6   : > { %v9323_v61 = vpop.f32.mrb[201].mxu1  ;;  %v9265_v35 = vpop.f32.mrb[55].mxu0  ;;  %9384 = vmax.xlane.f32.xlu1 %v9383_v28  ;;  %v27090_v12 = vadd.f32 %v20664_v20, %v30442_v2  ;;  %v9392_v54 = vsel %vm7261_vm5, %v27082_v16, -inf  ;;  %v27105_v58 = vadd.f32 %v20671_v37, %v26287_v4 }
 0x8d7   : > { %v27085_v41 = vadd.f32 %v9265_v35, %v26289_v27  ;;  %v20672_v44 = vpop.f32.mrb[202].mxu1  ;;  %v9386_v26 = vsel %vm7261_vm5, %v27077_v5, -inf  ;;  %v27095_v8 = vadd.f32 %v9323_v61, %v26282_v31 }
 0x8d8   : > { %v9326_v7 = vpop.f32.mrb[203].mxu1  ;;  %9387 = vmax.xlane.f32.xlu0 %v9386_v26  ;;  %v9395_v45 = vsel %vm7261_vm5, %v27090_v12, -inf  ;;  %v27110_v31 = vadd.f32 %v20672_v44, %v30442_v2 }
 0x8d9   : > { %v9389_v13 = vsel %vm7261_vm5, %v27085_v41, -inf  ;;  %v27100_v51 = vadd.f32 %v9326_v7, %v26289_v27  ;;  %v9398_v40 = vsel %vm7261_vm5, %v27095_v8, -inf  ;;  %v9404_v27 = vsel %vm7261_vm5, %v27105_v58, -inf }
 0x8da   : > { %9390 = vmax.xlane.f32.xlu1 %v9389_v13  ;;  %v9407_v14 = vsel %vm7261_vm5, %v27110_v31, -inf }
 0x8db   : > { %v9401_v55 = vsel %vm7261_vm5, %v27100_v51, -inf }
 0x8dc   : > { %9393 = vmax.xlane.f32.xlu0 %v9392_v54 }
 0x8de   : > { %9396 = vmax.xlane.f32.xlu1 %v9395_v45 }
 0x8e0   : > { %9399 = vmax.xlane.f32.xlu0 %v9398_v40 }
 0x8e2   : > { %9402 = vmax.xlane.f32.xlu1 %v9401_v55 }
 0x8e4   : > { %9405 = vmax.xlane.f32.xlu0 %v9404_v27 }
 0x8e6   : > { %9408 = vmax.xlane.f32.xlu1 %v9407_v14 }
 0x945   : > { %v9340_v4 = vpop.xlane.xlu0 %9339 }
 0x946   : > { %v9410_v56 = vsub.f32 %v26999_v63, %v9340_v4 }
 0x947   : > { %v9343_v3 = vpop.xlane.xlu1 %9342 }
 0x948   : > { %v9434_v6 = vmul.f32 1.442695, %v9410_v56  ;;  %v9411_v2 = vsub.f32 %v27005_v59, %v9343_v3 }
 0x949   : > { %v9346_v36 = vpop.xlane.xlu0 %9345 }
 0x94a   : > { %22798 = vpow2.f32 %v9434_v6  ;;  %v9436_v10 = vmul.f32 1.442695, %v9411_v2  ;;  %v9412_v47 = vsub.f32 %v27002_v60, %v9346_v36 }
 0x94b   : > { %v9349_v38 = vpop.xlane.xlu1 %9348 }
 0x94c   : > { %22800 = vpow2.f32 %v9436_v10  ;;  %v9438_v25 = vmul.f32 1.442695, %v9412_v47  ;;  %v9413_v37 = vsub.f32 %v27010_v39, %v9349_v38 }
 0x94d   : > { %v9352_v20 = vpop.xlane.xlu0 %9351 }
 0x94e   : > { %22802 = vpow2.f32 %v9438_v25  ;;  %v9440_v28 = vmul.f32 1.442695, %v9413_v37  ;;  %v9414_v61 = vsub.f32 %v27015_v9, %v9352_v20 }
 0x94f   : > { %v9355_v63 = vpop.xlane.xlu1 %9354 }
 0x950   : > { %22804 = vpow2.f32 %v9440_v28  ;;  %v9442_v35 = vmul.f32 1.442695, %v9414_v61  ;;  %v9415_v59 = vsub.f32 %v27020_v34, %v9355_v63 }
 0x951   : > { %v9358_v44 = vpop.xlane.xlu0 %9357 }
 0x952   : > { %22806 = vpow2.f32 %v9442_v35  ;;  %v9444_v26 = vmul.f32 1.442695, %v9415_v59  ;;  %v9416_v60 = vsub.f32 %v27025_v1, %v9358_v44 }
 0x953   : > { %v9361_v7 = vpop.xlane.xlu1 %9360 }
 0x954   : > { %v27125_v13 = vpop.eup %22798  ;;  %22808 = vpow2.f32 %v9444_v26  ;;  %v9446_v39 = vmul.f32 1.442695, %v9416_v60  ;;  %v9417_v54 = vsub.f32 %v27030_v21, %v9361_v7 }
 0x955   : > { %v9364_v45 = vpop.xlane.xlu0 %9363  ;;  %v9482_v9 = vsel %vm7261_vm5, %v27125_v13, 0.0 }
 0x956   : > { %v27130_v40 = vpop.eup %22800  ;;  %22810 = vpow2.f32 %v9446_v39  ;;  %v9448_v34 = vmul.f32 1.442695, %v9417_v54  ;;  %v9418_v55 = vsub.f32 %v27037_v32, %v9364_v45  ;;  %9483 = vadd.xlane.f32.xlu0 %v9482_v9 }
 0x957   : > { %v9367_v27 = vpop.xlane.xlu1 %9366  ;;  %v9485_v1 = vsel %vm7261_vm5, %v27130_v40, 0.0 }
 0x958   : > { %v27135_v14 = vpop.eup %22802  ;;  %22812 = vpow2.f32 %v9448_v34  ;;  %v9450_v4 = vmul.f32 1.442695, %v9418_v55  ;;  %v9419_v21 = vsub.f32 %v27045_v49, %v9367_v27  ;;  %9486 = vadd.xlane.f32.xlu1 %v9485_v1 }
 0x959   : > { %v9370_v56 = vpop.xlane.xlu0 %9369  ;;  %v9488_v3 = vsel %vm7261_vm5, %v27135_v14, 0.0 }
 0x95a   : > { %v27140_v6 = vpop.eup %22804  ;;  %22814 = vpow2.f32 %v9450_v4  ;;  %v9452_v32 = vmul.f32 1.442695, %v9419_v21  ;;  %v9420_v2 = vsub.f32 %v27042_v43, %v9370_v56  ;;  %9489 = vadd.xlane.f32.xlu0 %v9488_v3 }
 0x95b   : > { %v9373_v36 = vpop.xlane.xlu1 %9372  ;;  %v9491_v10 = vsel %vm7261_vm5, %v27140_v6, 0.0 }
 0x95c   : > { %v27145_v47 = vpop.eup %22806  ;;  %22816 = vpow2.f32 %v9452_v32  ;;  %v9454_v49 = vmul.f32 1.442695, %v9420_v2  ;;  %v9421_v38 = vsub.f32 %v27050_v17, %v9373_v36  ;;  %9492 = vadd.xlane.f32.xlu1 %v9491_v10 }
 0x95d   : > { %v9376_v25 = vpop.xlane.xlu0 %9375  ;;  %v9494_v37 = vsel %vm7261_vm5, %v27145_v47, 0.0 }
 0x95e   : > { %v27150_v20 = vpop.eup %22808  ;;  %22818 = vpow2.f32 %v9454_v49  ;;  %v9456_v43 = vmul.f32 1.442695, %v9421_v38  ;;  %v9422_v28 = vsub.f32 %v27055_v46, %v9376_v25  ;;  %9495 = vadd.xlane.f32.xlu0 %v9494_v37 }
 0x95f   : > { %v9379_v61 = vpop.xlane.xlu1 %9378  ;;  %v9497_v63 = vsel %vm7261_vm5, %v27150_v20, 0.0 }
 0x960   : > { %v27155_v35 = vpop.eup %22810  ;;  %22820 = vpow2.f32 %v9456_v43  ;;  %v9458_v17 = vmul.f32 1.442695, %v9422_v28  ;;  %v9423_v59 = vsub.f32 %v27060_v22, %v9379_v61  ;;  %9498 = vadd.xlane.f32.xlu1 %v9497_v63 }
 0x961   : > { %v9382_v44 = vpop.xlane.xlu0 %9381  ;;  %v9500_v26 = vsel %vm7261_vm5, %v27155_v35, 0.0 }
 0x962   : > { %v27160_v60 = vpop.eup %22812  ;;  %22822 = vpow2.f32 %v9458_v17  ;;  %v9460_v46 = vmul.f32 1.442695, %v9423_v59  ;;  %v9424_v7 = vsub.f32 %v27065_v24, %v9382_v44  ;;  %9501 = vadd.xlane.f32.xlu0 %v9500_v26 }
 0x963   : > { %v9385_v39 = vpop.xlane.xlu1 %9384  ;;  %v9503_v54 = vsel %vm7261_vm5, %v27160_v60, 0.0 }
 0x964   : > { %v27165_v45 = vpop.eup %22814  ;;  %22824 = vpow2.f32 %v9460_v46  ;;  %v9462_v22 = vmul.f32 1.442695, %v9424_v7  ;;  %v9425_v9 = vsub.f32 %v27070_v62, %v9385_v39  ;;  %9504 = vadd.xlane.f32.xlu1 %v9503_v54 }
 0x965   : > { %v9388_v34 = vpop.xlane.xlu0 %9387  ;;  %v9506_v55 = vsel %vm7261_vm5, %v27165_v45, 0.0 }
 0x966   : > { %v27170_v27 = vpop.eup %22816  ;;  %22826 = vpow2.f32 %v9462_v22  ;;  %v9464_v24 = vmul.f32 1.442695, %v9425_v9  ;;  %v9426_v1 = vsub.f32 %v27077_v5, %v9388_v34  ;;  %9507 = vadd.xlane.f32.xlu0 %v9506_v55 }
 0x967   : > { %v9391_v4 = vpop.xlane.xlu1 %9390  ;;  %v9509_v21 = vsel %vm7261_vm5, %v27170_v27, 0.0 }
 0x968   : > { %v27175_v56 = vpop.eup %22818  ;;  %22828 = vpow2.f32 %v9464_v24  ;;  %v9466_v62 = vmul.f32 1.442695, %v9426_v1  ;;  %v9427_v3 = vsub.f32 %v27085_v41, %v9391_v4  ;;  %9510 = vadd.xlane.f32.xlu1 %v9509_v21  ;;  %v30443_v21 = vld [vmem:[#allocation21_spill] sm:$0xff] }
 0x969   : > { %v9394_v32 = vpop.xlane.xlu0 %9393  ;;  %v9512_v2 = vsel %vm7261_vm5, %v27175_v56, 0.0 }
 0x96a   : > { %v27180_v36 = vpop.eup %22820  ;;  %22830 = vpow2.f32 %v9466_v62  ;;  %v9468_v5 = vmul.f32 1.442695, %v9427_v3  ;;  %v9428_v10 = vsub.f32 %v27082_v16, %v9394_v32  ;;  %9513 = vadd.xlane.f32.xlu0 %v9512_v2 }
 0x96b   : > { %v9397_v49 = vpop.xlane.xlu1 %9396  ;;  %v9515_v38 = vsel %vm7261_vm5, %v27180_v36, 0.0 }
 0x96c   : > { %v27185_v25 = vpop.eup %22822  ;;  %22832 = vpow2.f32 %v9468_v5  ;;  %v9470_v41 = vmul.f32 1.442695, %v9428_v10  ;;  %v9429_v37 = vsub.f32 %v27090_v12, %v9397_v49  ;;  %9516 = vadd.xlane.f32.xlu1 %v9515_v38  ;;  %v22923_v5 = vld [vmem:[%s23646_s17 + $0x8] sm:$0xff]  ;;  %v30444_v49 = vld [vmem:[#allocation22_spill] sm:$0xff] }
 0x96d   : > { %v9400_v43 = vpop.xlane.xlu0 %9399  ;;  %v9518_v28 = vsel %vm7261_vm5, %v27185_v25, 0.0  ;;  %v10665_v10 = vadd.f32 %v22923_v5, %v26978_v53 }
 0x96e   : > { %v27190_v61 = vpop.eup %22824  ;;  %22834 = vpow2.f32 %v9470_v41  ;;  %v9472_v16 = vmul.f32 1.442695, %v9429_v37  ;;  %v9430_v63 = vsub.f32 %v27095_v8, %v9400_v43  ;;  %9519 = vadd.xlane.f32.xlu0 %v9518_v28  ;;  %v22924_v43 = vld [vmem:[%s23646_s17 + $0x18] sm:$0xff] }
 0x96f   : > { %v9403_v17 = vpop.xlane.xlu1 %9402  ;;  %v9521_v59 = vsel %vm7261_vm5, %v27190_v61, 0.0  ;;  %v10667_v28 = vadd.f32 %v22924_v43, %v26982_v42 }
 0x970   : > { %v27195_v44 = vpop.eup %22826  ;;  %22836 = vpow2.f32 %v9472_v16  ;;  %v9474_v12 = vmul.f32 1.442695, %v9430_v63  ;;  %v9431_v26 = vsub.f32 %v27100_v51, %v9403_v17  ;;  %9522 = vadd.xlane.f32.xlu1 %v9521_v59  ;;  %v10688_v51 = vld [vmem:[#allocation7] sm:$0x7] }
 0x971   : > { %v9406_v46 = vpop.xlane.xlu0 %9405  ;;  %v9524_v7 = vsel %vm7261_vm5, %v27195_v44, 0.0  ;;  %v27213_v62 = vrot.slane %v10688_v51, %v30443_v21  ;;  %v27224_v38 = vrot.slane %v10688_v51, %v30444_v49 }
 0x972   : > { %v27200_v39 = vpop.eup %22828  ;;  %22838 = vpow2.f32 %v9474_v12  ;;  %v9476_v8 = vmul.f32 1.442695, %v9431_v26  ;;  %v9432_v54 = vsub.f32 %v27105_v58, %v9406_v46  ;;  %9525 = vadd.xlane.f32.xlu0 %v9524_v7  ;;  %v22926_v12 = vld [vmem:[%s23646_s17 + $0x30] sm:$0xff]  ;;  %v22927_v26 = vld [vmem:[%s23646_s17 + $0x38] sm:$0xff] }
 0x973   : > { %v9409_v22 = vpop.xlane.xlu1 %9408  ;;  %v9527_v9 = vsel %vm7261_vm5, %v27200_v39, 0.0  ;;  %v27242_v59 = vadd.f32 %v27224_v38, %v10665_v10  ;;  %v10670_v42 = vadd.f32 %v22926_v12, %v26990_v52  ;;  %v30445_v46 = vld [vmem:[#allocation23_spill] sm:$0xff] }
 0x974   : > { %v27205_v34 = vpop.eup %22830  ;;  %22840 = vpow2.f32 %v9476_v8  ;;  %v9478_v55 = vmul.f32 1.442695, %v9432_v54  ;;  %v9433_v24 = vsub.f32 %v27110_v31, %v9409_v22  ;;  %9528 = vadd.xlane.f32.xlu1 %v9527_v9  ;;  %v22922_v31 = vld [vmem:[%s23646_s17] sm:$0xff]  ;;  %v27249_v7 = vrot.slane %v10688_v51, %v30445_v46  ;;  %v22928_v8 = vld [vmem:[%s23646_s17 + $0x10] sm:$0xff] }
 0x975   : > { %v9530_v1 = vsel %vm7261_vm5, %v27205_v34, 0.0  ;;  %v10664_v2 = vadd.f32 %v22922_v31, %v26974_v19  ;;  %v22925_v19 = vld [vmem:[%s23646_s17 + $0x20] sm:$0xff]  ;;  %v10666_v54 = vadd.f32 %v22928_v8, %v26980_v18  ;;  %v22930_v51 = vld [vmem:[%s23646_s17 + $0x50] sm:$0xff] }
 0x976   : > { %v27210_v4 = vpop.eup %22832  ;;  %22842 = vpow2.f32 %v9478_v55  ;;  %v9480_v58 = vmul.f32 1.442695, %v9433_v24  ;;  %9531 = vadd.xlane.f32.xlu0 %v9530_v1  ;;  %v10668_v16 = vadd.f32 %v22925_v19, %v26986_v33  ;;  %v10671_v33 = vadd.f32 %v22927_v26, %v26992_v30  ;;  %v22929_v30 = vld [vmem:[%s23646_s17 + $0x48] sm:$0xff] }
 0x977   : > { %v9533_v3 = vsel %vm7261_vm5, %v27210_v4, 0.0  ;;  %v27239_v17 = vadd.f32 %v27213_v62, %v10664_v2  ;;  %v27258_v55 = vadd.f32 %v27213_v62, %v10667_v28  ;;  %v10673_v24 = vadd.f32 %v22929_v30, %v26994_v0 }
 0x978   : > { %v27217_v32 = vpop.eup %22834  ;;  %22844 = vpow2.f32 %v9480_v58  ;;  %9534 = vadd.xlane.f32.xlu1 %v9533_v3  ;;  %v27261_v52 = vadd.f32 %v27224_v38, %v10668_v16  ;;  %v10674_v1 = vadd.f32 %v22930_v51, %v26996_v11  ;;  %v22931_v3 = vld [vmem:[%s23646_s17 + $0x28] sm:$0xff]  ;;  %v27274_v2 = vadd.f32 %v27213_v62, %v10670_v42  ;;  %v22932_v11 = vld [vmem:[%s23646_s17 + $0x40] sm:$0xff] }
 0x979   : > { %v9536_v41 = vsel %vm7261_vm5, %v27217_v32, 0.0  ;;  %v10669_v31 = vadd.f32 %v22931_v3, %v26988_v50  ;;  %v27277_v5 = vadd.f32 %v27224_v38, %v10671_v33  ;;  %v10731_v0 = vadd.f32 %v27242_v59, %v27239_v17 }
 0x97a   : > { %v27228_v37 = vpop.eup %22836  ;;  %9537 = vadd.xlane.f32.xlu0 %v9536_v41  ;;  %v10672_v10 = vadd.f32 %v22932_v11, %v26976_v57  ;;  %v27288_v50 = vadd.f32 %v27249_v7, %v10666_v54  ;;  %v27291_v28 = vadd.f32 %v27213_v62, %v10673_v24  ;;  %v27294_v19 = vadd.f32 %v27224_v38, %v10674_v1 }
 0x97b   : > { %v9539_v53 = vsel %vm7261_vm5, %v27228_v37, 0.0  ;;  %v10735_v16 = vadd.f32 %v27261_v52, %v27258_v55  ;;  %v27303_v42 = vadd.f32 %v27249_v7, %v10669_v31  ;;  %v10739_v33 = vadd.f32 %v27277_v5, %v27274_v2 }
 0x97c   : > { %v27236_v63 = vpop.eup %22838  ;;  %9540 = vadd.xlane.f32.xlu1 %v9539_v53  ;;  %v22933_v53 = vld [vmem:[%s23646_s17 + $0x58] sm:$0xff]  ;;  %v10732_v26 = vadd.f32 %v10731_v0, %v27288_v50  ;;  %v27309_v8 = vadd.f32 %v27249_v7, %v10672_v10 }
 0x97d   : > { %v9542_v22 = vsel %vm7261_vm5, %v27236_v63, 0.0  ;;  %v10675_v12 = vadd.f32 %v22933_v53, %v26984_v23  ;;  %v10736_v54 = vadd.f32 %v10735_v16, %v27303_v42 }
 0x97e   : > { %v27255_v9 = vpop.eup %22840  ;;  %9543 = vadd.xlane.f32.xlu0 %v9542_v22  ;;  %v10743_v22 = vadd.f32 %v27294_v19, %v27291_v28  ;;  %v10740_v30 = vadd.f32 %v10739_v33, %v27309_v8 }
 0x97f   : > { %v9545_v18 = vsel %vm7261_vm5, %v27255_v9, 0.0  ;;  %v27315_v23 = vadd.f32 %v27249_v7, %v10675_v12 }
 0x980   : > { %v27269_v58 = vpop.eup %22842  ;;  %9546 = vadd.xlane.f32.xlu1 %v9545_v18 }
 0x981   : > { %v9548_v41 = vsel %vm7261_vm5, %v27269_v58, 0.0  ;;  %v10744_v24 = vadd.f32 %v10743_v22, %v27315_v23 }
 0x982   : > { %v27285_v43 = vpop.eup %22844  ;;  %9549 = vadd.xlane.f32.xlu0 %v9548_v41 }
 0x983   : > { %v9551_v57 = vsel %vm7261_vm5, %v27285_v43, 0.0 }
 0x984   : > { %9552 = vadd.xlane.f32.xlu1 %v9551_v57 }
 0x986   : > { %10733 = vadd.xlane.f32.xlu0 %v10732_v26 }
 0x988   : > { %10737 = vadd.xlane.f32.xlu1 %v10736_v54 }
 0x98a   : > { %10741 = vadd.xlane.f32.xlu0 %v10740_v30 }
 0x98c   : > { %10745 = vadd.xlane.f32.xlu1 %v10744_v24 }
 0x9e3   : > { %v9484_v51 = vpop.xlane.xlu0 %9483 }
 0x9e4   : > { %22846 = vrcp.f32 %v9484_v51 }
 0x9e5   : > { %v9487_v1 = vpop.xlane.xlu1 %9486 }
 0x9e6   : > { %22848 = vrcp.f32 %v9487_v1 }
 0x9e7   : > { %v9490_v18 = vpop.xlane.xlu0 %9489 }
 0x9e8   : > { %22850 = vrcp.f32 %v9490_v18 }
 0x9e9   : > { %v9493_v3 = vpop.xlane.xlu1 %9492 }
 0x9ea   : > { %22852 = vrcp.f32 %v9493_v3 }
 0x9eb   : > { %v9496_v31 = vpop.xlane.xlu0 %9495 }
 0x9ec   : > { %22854 = vrcp.f32 %v9496_v31 }
 0x9ed   : > { %v9499_v0 = vpop.xlane.xlu1 %9498 }
 0x9ee   : > { %v22847_v11 = vpop.eup %22846  ;;  %22856 = vrcp.f32 %v9499_v0 }
 0x9ef   : > { %v9502_v10 = vpop.xlane.xlu0 %9501  ;;  %v9578_v57 = vmul.f32 %v22847_v11, %v27125_v13 }
 0x9f0   : > { %v22849_v41 = vpop.eup %22848  ;;  %22858 = vrcp.f32 %v9502_v10 }
 0x9f1   : > { %v9505_v16 = vpop.xlane.xlu1 %9504  ;;  %v9579_v53 = vmul.f32 %v22849_v41, %v27130_v40 }
 0x9f2   : > { %v22851_v12 = vpop.eup %22850  ;;  %22860 = vrcp.f32 %v9505_v16 }
 0x9f3   : > { %v9508_v26 = vpop.xlane.xlu0 %9507  ;;  %v9602_v33 = vpack.c.bf16 %v9579_v53, %v9578_v57  ;;  %v9580_v22 = vmul.f32 %v22851_v12, %v27135_v14  ;;  %v30446_v14 = vld [vmem:[#allocation32_spill] sm:$0xff] }
 0x9f4   : > { %v22853_v54 = vpop.eup %22852  ;;  %22862 = vrcp.f32 %v9508_v26 }
 0x9f5   : > { %v9581_v30 = vmul.f32 %v22853_v54, %v27140_v6  ;;  %v9511_v24 = vpop.xlane.xlu1 %9510  ;;  %20677 = vmatprep.mubr.msk.bf16.mxu0 %vm7261_vm5, %v9602_v33  ;;  %v30448_v54 = vld [vmem:[#allocation44_spill] sm:$0xff] }
 0x9f6   : > { %v22855_v51 = vpop.eup %22854  ;;  %22864 = vrcp.f32 %v9511_v24 }
 0x9f7   : > { %v9603_v1 = vpack.c.bf16 %v9581_v30, %v9580_v22  ;;  %v9514_v18 = vpop.xlane.xlu0 %9513  ;;  %v9582_v3 = vmul.f32 %v22855_v51, %v27145_v47 }
 0x9f8   : > { %v22857_v13 = vpop.eup %22856  ;;  %22866 = vrcp.f32 %v9514_v18 }
 0x9f9   : > { %v9517_v40 = vpop.xlane.xlu1 %9516  ;;  %20678 = vmatmul.mubr.msk.bf16.vlgmr.msra.gmra.mrb[56].mxu0 %vm7261_vm5, %v9603_v1  ;;  %v9583_v31 = vmul.f32 %v22857_v13, %v27150_v20  ;;  %v30447_v20 = vld [vmem:[#allocation50_spill] sm:$0xff] }
 0x9fa   : > { %v22859_v0 = vpop.eup %22858  ;;  %22868 = vrcp.f32 %v9517_v40  ;;  %20690 = vmatpush3.bf16.msra.mxu0 %v26202_v48  ;;  %v30449_v13 = vld [vmem:[#allocation42_spill] sm:$0xff] }
 0x9fb   : > { %20691 = vmatprep.subr.bf16.mxu0 %v30446_v14  ;;  %v9520_v6 = vpop.xlane.xlu0 %9519  ;;  %v9604_v11 = vpack.c.bf16 %v9583_v31, %v9582_v3  ;;  %v9584_v41 = vmul.f32 %v22859_v0, %v27155_v35  ;;  %v30450_v0 = vld [vmem:[#allocation43_spill] sm:$0xff] }
 0x9fc   : > { %v22861_v10 = vpop.eup %22860  ;;  %22870 = vrcp.f32 %v9520_v6 }
 0x9fd   : > { %v9585_v16 = vmul.f32 %v22861_v10, %v27160_v60  ;;  %v9523_v57 = vpop.xlane.xlu1 %9522  ;;  %20685 = vmatprep.mubr.msk.bf16.mxu1 %vm7261_vm5, %v9604_v11 }
 0x9fe   : > { %v22863_v47 = vpop.eup %22862  ;;  %22872 = vrcp.f32 %v9523_v57  ;;  %20692 = vmatpush3.bf16.msra.mxu0 %v30446_v14 }
 0x9ff   : > { %20705 = vmatprep.subr.bf16.mxu0 %v30447_v20  ;;  %v9526_v48 = vpop.xlane.xlu0 %9525  ;;  %v9605_v53 = vpack.c.bf16 %v9585_v16, %v9584_v41  ;;  %v9586_v35 = vmul.f32 %v22863_v47, %v27165_v45  ;;  %v22934_v47 = vld [vmem:[%s30401_s2 + $0x4] ss:$12 sps:$4 sm:$0xff]  }
 0xa00   : > { %v22865_v12 = vpop.eup %22864  ;;  %22874 = vrcp.f32 %v9526_v48 }
 0xa01   : > { %v9529_v26 = vpop.xlane.xlu1 %9528  ;;  %20686 = vmatmul.mubr.msk.bf16.vlgmr.msra.gmra.mrb[204].mxu1 %vm7261_vm5, %v9605_v53  ;;  %v9587_v60 = vmul.f32 %v22865_v12, %v27170_v27  ;;  %v30451_v12 = vld [vmem:[#allocation49_spill] sm:$0xff] }
 0xa02   : > { %v22867_v33 = vpop.eup %22866  ;;  %22876 = vrcp.f32 %v9529_v26  ;;  %20698 = vmatpush3.bf16.msra.mxu1 %v26232_v15 }
 0xa03   : > { %20699 = vmatprep.subr.bf16.mxu1 %v30448_v54  ;;  %v9532_v22 = vpop.xlane.xlu0 %9531  ;;  %v9606_v30 = vpack.c.bf16 %v9587_v60, %v9586_v35  ;;  %v9588_v51 = vmul.f32 %v22867_v33, %v27175_v56 }
 0xa04   : > { %v22869_v24 = vpop.eup %22868  ;;  %22878 = vrcp.f32 %v9532_v22 }
 0xa05   : > { %v9589_v1 = vmul.f32 %v22869_v24, %v27180_v36  ;;  %v9535_v18 = vpop.xlane.xlu1 %9534  ;;  %20693 = vmatprep.mubr.msk.bf16.mxu0 %vm7261_vm5, %v9606_v30 }
 0xa06   : > { %v22871_v45 = vpop.eup %22870  ;;  %22880 = vrcp.f32 %v9535_v18  ;;  %20700 = vmatpush3.bf16.msra.mxu1 %v30448_v54 }
 0xa07   : > { %v9607_v27 = vpack.c.bf16 %v9589_v1, %v9588_v51  ;;  %20713 = vmatprep.subr.bf16.mxu1 %v30449_v13  ;;  %v9538_v15 = vpop.xlane.xlu0 %9537  ;;  %v9590_v56 = vmul.f32 %v22871_v45, %v27185_v25  ;;  %v22937_v51 = vld [vmem:[%s30401_s2 + $0x1c] ss:$12 sps:$4 sm:$0xff]  }
 0xa08   : > { %v22873_v40 = vpop.eup %22872  ;;  %22882 = vrcp.f32 %v9538_v15  ;;  %v22942_v15 = vld [vmem:[%s30401_s2 + $0x4c] ss:$12 sps:$4 sm:$0xff]  }
 0xa09   : > { %v9541_v3 = vpop.xlane.xlu1 %9540  ;;  %20694 = vmatmul.mubr.msk.bf16.vlgmr.msra.gmra.mrb[60].mxu0 %vm7261_vm5, %v9607_v27  ;;  %v9591_v36 = vmul.f32 %v22873_v40, %v27190_v61  ;;  %v22943_v40 = vld [vmem:[%s30401_s2 + $0x48] ss:$12 sps:$4 sm:$0xff]  }
 0xa0a   : > { %v22875_v31 = vpop.eup %22874  ;;  %22884 = vrcp.f32 %v9541_v3  ;;  %20706 = vmatpush3.bf16.msra.mxu0 %v30447_v20  ;;  %v22944_v3 = vld [vmem:[%s30401_s2 + $0x38] ss:$12 sps:$4 sm:$0xff]  }
 0xa0b   : > { %20707 = vmatprep.subr.bf16.mxu0 %v30450_v0  ;;  %v9544_v14 = vpop.xlane.xlu0 %9543  ;;  %v9608_v6 = vpack.c.bf16 %v9591_v36, %v9590_v56  ;;  %v9592_v10 = vmul.f32 %v22875_v31, %v27195_v44  ;;  %v22945_v56 = vld [vmem:[%s30401_s2 + $0x64] ss:$12 sps:$4 sm:$0xff]   ;;  %v22947_v31 = vld [vmem:[%s30401_s2 + $0x68] ss:$12 sps:$4 sm:$0xff]  }
 0xa0c   : > { %v22877_v11 = vpop.eup %22876  ;;  %22886 = vrcp.f32 %v9544_v14  ;;  %v22946_v36 = vld [vmem:[%s30401_s2 + $0x50] ss:$12 sps:$4 sm:$0xff]  }
 0xa0d   : > { %v9593_v41 = vmul.f32 %v22877_v11, %v27200_v39  ;;  %v9547_v16 = vpop.xlane.xlu1 %9546  ;;  %20701 = vmatprep.mubr.msk.bf16.mxu1 %vm7261_vm5, %v9608_v6 }
 0xa0e   : > { %v22879_v25 = vpop.eup %22878  ;;  %22888 = vrcp.f32 %v9547_v16  ;;  %20708 = vmatpush3.bf16.msra.mxu0 %v30450_v0  ;;  %v22948_v16 = vld [vmem:[%s30401_s2 + $0x60] ss:$12 sps:$4 sm:$0xff]  }
 0xa0f   : > { %v9550_v61 = vpop.xlane.xlu0 %9549  ;;  %v9609_v57 = vpack.c.bf16 %v9593_v41, %v9592_v10  ;;  %9962 = vmatprep.subr.bf16.mxu0 %v22934_v47  ;;  %v9594_v39 = vmul.f32 %v22879_v25, %v27205_v34  ;;  %v22950_v47 = vld [vmem:[%s30401_s2 + $0x80] ss:$12 sps:$4 sm:$0xff]  }
 0xa10   : > { %v22881_v20 = vpop.eup %22880  ;;  %22890 = vrcp.f32 %v9550_v61  ;;  %v22949_v61 = vld [vmem:[%s30401_s2 + $0x7c] ss:$12 sps:$4 sm:$0xff]  }
 0xa11   : > { %v9553_v44 = vpop.xlane.xlu1 %9552  ;;  %20702 = vmatmul.mubr.msk.bf16.vlgmr.msra.gmra.mrb[208].mxu1 %vm7261_vm5, %v9609_v57  ;;  %v9595_v48 = vmul.f32 %v22881_v20, %v27210_v4  ;;  %v22935_v4 = vld [vmem:[%s30401_s2 + $0x8] ss:$12 sps:$4 sm:$0xff]  }
 0xa12   : > { %v22883_v53 = vpop.eup %22882  ;;  %22892 = vrcp.f32 %v9553_v44  ;;  %20714 = vmatpush3.bf16.msra.mxu1 %v30449_v13  ;;  %v22939_v13 = vld [vmem:[%s30401_s2 + $0x34] ss:$12 sps:$4 sm:$0xff]  }
 0xa13   : > { %20715 = vmatprep.subr.bf16.mxu1 %v30451_v12  ;;  %v9610_v26 = vpack.c.bf16 %v9595_v48, %v9594_v39  ;;  %v9596_v60 = vmul.f32 %v22883_v53, %v27217_v32  ;;  %v22951_v48 = vld [vmem:[%s30401_s2 + $0x78] ss:$12 sps:$4 sm:$0xff]  }
 0xa14   : > { %v22885_v35 = vpop.eup %22884 }
 0xa15   : > { %v9597_v33 = vmul.f32 %v22885_v35, %v27228_v37  ;;  %20709 = vmatprep.mubr.msk.bf16.mxu0 %vm7261_vm5, %v9610_v26  ;;  %v22936_v37 = vld [vmem:[%s30401_s2] ss:$12 sps:$4 sm:$0xff]   ;;  %v22953_v26 = vld [vmem:[%s30401_s2 + $0x98] ss:$12 sps:$4 sm:$0xff]   ;;  %v22954_v35 = vld [vmem:[%s30401_s2 + $0x90] ss:$12 sps:$4 sm:$0xff]  }
 0xa16   : > { %20716 = vmatpush3.bf16.msra.mxu1 %v30451_v12  ;;  %v22887_v54 = vpop.eup %22886  ;;  %v22952_v12 = vld [vmem:[%s30401_s2 + $0x94] ss:$12 sps:$4 sm:$0xff]  }
 0xa17   : > { %v9611_v34 = vpack.c.bf16 %v9597_v33, %v9596_v60  ;;  %20721 = vmatprep.subr.bf16.mxu1 %v22935_v4  ;;  %v9598_v32 = vmul.f32 %v22887_v54, %v27236_v63  ;;  %v22938_v63 = vld [vmem:[%s30401_s2 + $0x18] ss:$12 sps:$4 sm:$0xff]  }
 0xa18   : > { %v22889_v22 = vpop.eup %22888  ;;  %v22955_v33 = vld [vmem:[%s30401_s2 + $0xac] ss:$12 sps:$4 sm:$0xff]  }
 0xa19   : > { %20710 = vmatmul.mubr.msk.bf16.vlgmr.msra.gmra.mrb[64].mxu0 %vm7261_vm5, %v9611_v34  ;;  %v9599_v30 = vmul.f32 %v22889_v22, %v27255_v9  ;;  %v22956_v34 = vld [vmem:[%s30401_s2 + $0xb0] ss:$12 sps:$4 sm:$0xff]  }
 0xa1a   : > { %v22891_v24 = vpop.eup %22890  ;;  %9963 = vmatpush1.bf16.msra.mxu0 %v22936_v37  ;;  %9994 = vmatprep.mubr.bf16.mxu0 %v30295_v29  ;;  %v22958_v37 = vld [vmem:[%s30401_s2 + $0xc4] ss:$12 sps:$4 sm:$0xff]  }
 0xa1b   : > { %9964 = vmatprep.subr.bf16.mxu0 %v22937_v51  ;;  %v9612_v18 = vpack.c.bf16 %v9599_v30, %v9598_v32  ;;  %v9600_v45 = vmul.f32 %v22891_v24, %v27269_v58  ;;  %v22940_v58 = vld [vmem:[%s30401_s2 + $0x30] ss:$12 sps:$4 sm:$0xff]   ;;  %v22957_v24 = vld [vmem:[%s30401_s2 + $0xa8] ss:$12 sps:$4 sm:$0xff]  }
 0xa1c   : > { %v22893_v1 = vpop.eup %22892  ;;  %v22959_v51 = vld [vmem:[%s30401_s2 + $0xc8] ss:$12 sps:$4 sm:$0xff]  }
 0xa1d   : > { %v9601_v9 = vmul.f32 %v22893_v1, %v27285_v43  ;;  %20717 = vmatprep.mubr.msk.bf16.mxu1 %vm7261_vm5, %v9612_v18  ;;  %v22941_v43 = vld [vmem:[%s30401_s2 + $0x20] ss:$12 sps:$4 sm:$0xff]  }
 0xa1e   : > { %9965 = vmatpush1.bf16.msra.mxu0 %v22938_v63  ;;  %v22960_v1 = vld [vmem:[%s30401_s2 + $0xc0] ss:$12 sps:$4 sm:$0xff]  }
 0xa1f   : > { %v9613_v27 = vpack.c.bf16 %v9601_v9, %v9600_v45  ;;  %9966 = vmatprep.subr.bf16.mxu0 %v22939_v13  ;;  %v22961_v9 = vld [vmem:[%s30401_s2 + $0xdc] ss:$12 sps:$4 sm:$0xff]   ;;  %v22962_v63 = vld [vmem:[%s30401_s2 + $0xe0] ss:$12 sps:$4 sm:$0xff]  }
 0xa21   : > { %20718 = vmatmul.mubr.msk.bf16.vlgmr.msra.gmra.mrb[212].mxu1 %vm7261_vm5, %v9613_v27 }
 0xa22   : > { %20722 = vmatpush3.bf16.msra.mxu1 %v22935_v4  ;;  %9967 = vmatpush1.bf16.msra.mxu0 %v22940_v58 }
 0xa23   : > { %20723 = vmatprep.subr.bf16.mxu1 %v22941_v43  ;;  %9968 = vmatprep.subr.bf16.mxu0 %v22942_v15 }
 0xa26   : > { %20724 = vmatpush3.bf16.msra.mxu1 %v22941_v43  ;;  %9969 = vmatpush1.bf16.msra.mxu0 %v22943_v40  ;;  %v22963_v43 = vld [vmem:[%s30401_s2 + $0xd8] ss:$12 sps:$4 sm:$0xff]   ;;  %v22964_v40 = vld [vmem:[%s30401_s2 + $0xf4] ss:$12 sps:$4 sm:$0xff]  }
 0xa27   : > { %20725 = vmatprep.subr.bf16.mxu1 %v22944_v3  ;;  %10070 = vmatprep.subr.bf16.mxu0 %v22945_v56  ;;  %v22966_v56 = vld [vmem:[%s30401_s2 + $0xf0] ss:$12 sps:$4 sm:$0xff]  }
 0xa2a   : > { %20726 = vmatpush3.bf16.msra.mxu1 %v22944_v3  ;;  %v22965_v3 = vld [vmem:[%s30401_s2 + $0xf8] ss:$12 sps:$4 sm:$0xff]  }
 0xa2b   : > { %20727 = vmatprep.subr.bf16.mxu1 %v22946_v36 }
 0xa2e   : > { %20728 = vmatpush3.bf16.msra.mxu1 %v22946_v36 }
 0xa2f   : > { %20733 = vmatprep.subr.bf16.mxu1 %v22947_v31 }
 0xacc   : > { %v20679_v0 = vpop.f32.mrb[56].mxu0 }
 0xacd   : > { %v9654_v14 = vpop.f32.mrb[57].mxu0 }
 0xace   : > { %v20680_v6 = vpop.f32.mrb[58].mxu0 }
 0xacf   : > { %v9945_v11 = vpack.c.bf16 %v20680_v6, %v20679_v0  ;;  %v9657_v10 = vpop.f32.mrb[59].mxu0 }
 0xad0   : > { %v9944_v41 = vpack.c.bf16 %v9657_v10, %v9654_v14  ;;  %v22968_v14 = vld [vmem:[%s30401_s2 + $0x110] ss:$12 sps:$4 sm:$0xff]  }
 0xad2   : > { %18076 = vmatmul.mubr.msk.bf16.vlgmr.msra.gmra.mrb[68].mxu0 %vm6894_vm0, %v9944_v41  ;;  %20729 = vmatprep.mubr.msk.bf16.mxu1 %vm6894_vm0, %v9944_v41  ;;  %v22969_v41 = vld [vmem:[%s30401_s2 + $0x108] ss:$12 sps:$4 sm:$0xff]  }
 0xad3   : > { %20730 = vmatmul.mubr.msk.bf16.vlgmr.msra.gmra.mrb[216].mxu1 %vm6894_vm0, %v9945_v11  ;;  %10071 = vmatpush1.bf16.msra.mxu0 %v22948_v16 }
 0xad4   : > { %20734 = vmatpush3.bf16.msra.mxu1 %v22947_v31  ;;  %v20687_v25 = vpop.f32.mrb[204].mxu1  ;;  %10072 = vmatprep.subr.bf16.mxu0 %v22949_v61  ;;  %v22967_v31 = vld [vmem:[%s30401_s2 + $0x10c] ss:$12 sps:$4 sm:$0xff]   ;;  %v22971_v61 = vld [vmem:[%s30401_s2 + $0x128] ss:$12 sps:$4 sm:$0xff]  }
 0xad5   : > { %v9709_v57 = vpop.f32.mrb[205].mxu1  ;;  %20735 = vmatprep.subr.bf16.mxu1 %v22950_v47  ;;  %10004 = vmatprep.mubr.bf16.mxu0 %v30295_v29 }
 0xad6   : > { %v20688_v20 = vpop.f32.mrb[206].mxu1 }
 0xad7   : > { %v9947_v44 = vpack.c.bf16 %v20688_v20, %v20687_v25  ;;  %v9712_v39 = vpop.f32.mrb[207].mxu1  ;;  %10073 = vmatpush1.bf16.msra.mxu0 %v22951_v48  ;;  %v22970_v25 = vld [vmem:[%s30401_s2 + $0x124] ss:$12 sps:$4 sm:$0xff]  }
 0xad8   : > { %v9946_v53 = vpack.c.bf16 %v9712_v39, %v9709_v57  ;;  %20736 = vmatpush3.bf16.msra.mxu1 %v22950_v47  ;;  %10074 = vmatprep.subr.bf16.mxu0 %v22952_v12  ;;  %v22972_v57 = vld [vmem:[%s30401_s2 + $0x120] ss:$12 sps:$4 sm:$0xff]  }
 0xad9   : > { %20737 = vmatprep.subr.bf16.mxu1 %v22953_v26  ;;  %v22974_v39 = vld [vmem:[%s30401_s2 + $0x140] ss:$12 sps:$4 sm:$0xff]  }
 0xada   : > { %18077 = vmatmul.mubr.msk.bf16.gmra.mrb[72].mxu0 %vm6894_vm0, %v9945_v11  ;;  %20741 = vmatprep.mubr.msk.bf16.mxu1 %vm6894_vm0, %v9946_v53 }
 0xadb   : > { %10075 = vmatpush1.bf16.msra.mxu0 %v22954_v35  ;;  %10102 = vmatprep.mubr.bf16.mxu0 %v30295_v29 }
 0xadc   : > { %20738 = vmatpush3.bf16.msra.mxu1 %v22953_v26  ;;  %v20695_v60 = vpop.f32.mrb[60].mxu0  ;;  %10076 = vmatprep.subr.bf16.mxu0 %v22955_v33  ;;  %v22975_v26 = vld [vmem:[%s30401_s2 + $0x138] ss:$12 sps:$4 sm:$0xff]  }
 0xadd   : > { %v9764_v54 = vpop.f32.mrb[61].mxu0  ;;  %20739 = vmatprep.subr.bf16.mxu1 %v22956_v34  ;;  %v22977_v33 = vld [vmem:[%s30401_s2 + $0x158] ss:$12 sps:$4 sm:$0xff]  }
 0xade   : > { %v20696_v4 = vpop.f32.mrb[62].mxu0 }
 0xadf   : > { %v27446_v22 = vpack.c.bf16 %v20696_v4, %v20695_v60  ;;  %v9767_v30 = vpop.f32.mrb[63].mxu0  ;;  %10077 = vmatpush1.bf16.msra.mxu0 %v22957_v24  ;;  %v22976_v60 = vld [vmem:[%s30401_s2 + $0x154] ss:$12 sps:$4 sm:$0xff]   ;;  %v22980_v4 = vld [vmem:[%s30401_s2 + $0x170] ss:$12 sps:$4 sm:$0xff]  }
 0xae0   : > { %v9948_v32 = vpack.c.bf16 %v9767_v30, %v9764_v54  ;;  %20740 = vmatpush3.bf16.msra.mxu1 %v22956_v34  ;;  %10178 = vmatprep.subr.bf16.mxu0 %v22958_v37  ;;  %v22978_v54 = vld [vmem:[%s30401_s2 + $0x150] ss:$12 sps:$4 sm:$0xff]   ;;  %v22979_v34 = vld [vmem:[%s30401_s2 + $0x16c] ss:$12 sps:$4 sm:$0xff]   ;;  %v22983_v24 = vld [vmem:[%s30401_s2 + $0x188] ss:$12 sps:$4 sm:$0xff]  }
 0xae1   : > { %20745 = vmatprep.subr.bf16.mxu1 %v22959_v51  ;;  %v22982_v30 = vld [vmem:[%s30401_s2 + $0x184] ss:$12 sps:$4 sm:$0xff]   ;;  %v22985_v37 = vld [vmem:[%s30401_s2 + $0x19c] ss:$12 sps:$4 sm:$0xff]  }
 0xae2   : > { %18080 = vmatmul.mubr.msk.bf16.vlgmr.msra.gmra.mrb[68].mxu0 %vm6894_vm0, %v9946_v53 }
 0xae3   : > { %20742 = vmatmul.mubr.msk.bf16.vlgmr.msra.gmra.mrb[216].mxu1 %vm6894_vm0, %v9947_v44  ;;  %10179 = vmatpush1.bf16.msra.mxu0 %v22960_v1  ;;  %v22987_v1 = vld [vmem:[%s30401_s2 + $0x198] ss:$12 sps:$4 sm:$0xff]  }
 0xae4   : > { %20746 = vmatpush3.bf16.msra.mxu1 %v22959_v51  ;;  %20753 = vmatprep.mubr.msk.bf16.mxu1 %vm6894_vm0, %v9948_v32  ;;  %v20703_v18 = vpop.f32.mrb[208].mxu1  ;;  %v22986_v51 = vld [vmem:[%s30401_s2 + $0x1a0] ss:$12 sps:$4 sm:$0xff]  }
 0xae5   : > { %v9819_v45 = vpop.f32.mrb[209].mxu1  ;;  %10180 = vmatprep.subr.bf16.mxu0 %v22961_v9  ;;  %20747 = vmatprep.subr.bf16.mxu1 %v22962_v63  ;;  %v22990_v9 = vld [vmem:[%s30401_s2 + $0x1b0] ss:$12 sps:$4 sm:$0xff]  }
 0xae6   : > { %v20704_v27 = vpop.f32.mrb[210].mxu1  ;;  %10112 = vmatprep.mubr.bf16.mxu0 %v30295_v29 }
 0xae7   : > { %v27470_v13 = vpack.c.bf16 %v20704_v27, %v20703_v18  ;;  %v9822_v58 = vpop.f32.mrb[211].mxu1  ;;  %10181 = vmatpush1.bf16.msra.mxu0 %v22963_v43  ;;  %v22988_v18 = vld [vmem:[%s30401_s2 + $0x1b4] ss:$12 sps:$4 sm:$0xff]   ;;  %v22992_v27 = vld [vmem:[%s30401_s2 + $0x1d0] ss:$12 sps:$4 sm:$0xff]  }
 0xae8   : > { %v27475_v15 = vpack.c.bf16 %v9822_v58, %v9819_v45  ;;  %20748 = vmatpush3.bf16.msra.mxu1 %v22962_v63  ;;  %10182 = vmatprep.subr.bf16.mxu0 %v22964_v40  ;;  %v22989_v45 = vld [vmem:[%s30401_s2 + $0x1b8] ss:$12 sps:$4 sm:$0xff]   ;;  %v22995_v43 = vld [vmem:[%s30401_s2 + $0x1e8] ss:$12 sps:$4 sm:$0xff]  }
 0xae9   : > { %20749 = vmatprep.subr.bf16.mxu1 %v22965_v3  ;;  %v22991_v63 = vld [vmem:[%s30401_s2 + $0x1cc] ss:$12 sps:$4 sm:$0xff]   ;;  %v22994_v58 = vld [vmem:[%s30401_s2 + $0x1e4] ss:$12 sps:$4 sm:$0xff]   ;;  %v22997_v40 = vld [vmem:[%s30401_s2 + $0x1fc] ss:$12 sps:$4 sm:$0xff]  }
 0xaea   : > { %18081 = vmatmul.mubr.msk.bf16.gmra.mrb[72].mxu0 %vm6894_vm0, %v9947_v44  ;;  %v22973_v44 = vld [vmem:[%s30401_s2 + $0x13c] ss:$12 sps:$4 sm:$0xff]  }
 0xaeb   : > { %10183 = vmatpush1.bf16.msra.mxu0 %v22966_v56  ;;  %10210 = vmatprep.mubr.bf16.mxu0 %v30295_v29  ;;  %v22999_v56 = vld [vmem:[%s30401_s2 + $0x1f8] ss:$12 sps:$4 sm:$0xff]  }
 0xaec   : > { %20750 = vmatpush3.bf16.msra.mxu1 %v22965_v3  ;;  %v20711_v36 = vpop.f32.mrb[64].mxu0  ;;  %10184 = vmatprep.subr.bf16.mxu0 %v22967_v31  ;;  %v22998_v3 = vld [vmem:[%s30401_s2 + $0x200] ss:$12 sps:$4 sm:$0xff]   ;;  %v23001_v31 = vld [vmem:[%s30401_s2 + $0x218] ss:$12 sps:$4 sm:$0xff]  }
 0xaed   : > { %v9874_v0 = vpop.f32.mrb[65].mxu0  ;;  %20751 = vmatprep.subr.bf16.mxu1 %v22968_v14 }
 0xaee   : > { %v20712_v6 = vpop.f32.mrb[66].mxu0 }
 0xaef   : > { %v27494_v11 = vpack.c.bf16 %v20712_v6, %v20711_v36  ;;  %v9877_v10 = vpop.f32.mrb[67].mxu0  ;;  %10185 = vmatpush1.bf16.msra.mxu0 %v22969_v41  ;;  %v23000_v36 = vld [vmem:[%s30401_s2 + $0x214] ss:$12 sps:$4 sm:$0xff]   ;;  %v23004_v6 = vld [vmem:[%s30401_s2 + $0x230] ss:$12 sps:$4 sm:$0xff]  }
 0xaf0   : > { %v27499_v16 = vpack.c.bf16 %v9877_v10, %v9874_v0  ;;  %20752 = vmatpush3.bf16.msra.mxu1 %v22968_v14  ;;  %10286 = vmatprep.subr.bf16.mxu0 %v22970_v25  ;;  %v23002_v0 = vld [vmem:[%s30401_s2 + $0x210] ss:$12 sps:$4 sm:$0xff]   ;;  %v23003_v14 = vld [vmem:[%s30401_s2 + $0x22c] ss:$12 sps:$4 sm:$0xff]   ;;  %v21872_v41 = vld [vmem:[%s30452_s23 + $0x4] ss:$48 sps:$4 sm:$0xff]  }
 0xaf1   : > { %20757 = vmatprep.subr.bf16.mxu1 %v22971_v61  ;;  %v21870_v10 = vld [vmem:[%s30452_s23] ss:$48 sps:$4 sm:$0xff]  }
 0xaf2   : > { %18084 = vmatmul.mubr.msk.bf16.vlgmr.msra.gmra.mrb[68].mxu0 %vm6894_vm0, %v9948_v32  ;;  %v22984_v32 = vld [vmem:[%s30401_s2 + $0x180] ss:$12 sps:$4 sm:$0xff]  }
 0xaf3   : > { %20754 = vmatmul.mubr.msk.bf16.vlgmr.msra.gmra.mrb[216].mxu1 %vm6894_vm0, %v27446_v22  ;;  %10287 = vmatpush1.bf16.msra.mxu0 %v22972_v57  ;;  %v21873_v25 = vld [vmem:[%s30452_s23 + $0x60] ss:$48 sps:$4 sm:$0xff]  }
 0xaf4   : > { %20758 = vmatpush3.bf16.msra.mxu1 %v22971_v61  ;;  %20765 = vmatprep.mubr.msk.bf16.mxu1 %vm6894_vm0, %v27475_v15  ;;  %v20719_v47 = vpop.f32.mrb[212].mxu1  ;;  %v21878_v61 = vld [vmem:[%s30452_s23 + $0xc4] ss:$48 sps:$4 sm:$0xff]   ;;  %v21876_v57 = vld [vmem:[%s30452_s23 + $0xc0] ss:$48 sps:$4 sm:$0xff]  }
 0xaf5   : > { %v9929_v20 = vpop.f32.mrb[213].mxu1  ;;  %10288 = vmatprep.subr.bf16.mxu0 %v22973_v44  ;;  %20759 = vmatprep.subr.bf16.mxu1 %v22974_v39  ;;  %v21884_v44 = vld [vmem:[%s30452_s23 + $0x184] ss:$48 sps:$4 sm:$0xff]  }
 0xaf6   : > { %v20720_v48 = vpop.f32.mrb[214].mxu1  ;;  %10220 = vmatprep.mubr.bf16.mxu0 %v30295_v29 }
 0xaf7   : > { %v27522_v53 = vpack.c.bf16 %v20720_v48, %v20719_v47  ;;  %v9932_v12 = vpop.f32.mrb[215].mxu1  ;;  %10289 = vmatpush1.bf16.msra.mxu0 %v22975_v26  ;;  %v21881_v47 = vld [vmem:[%s30452_s23 + $0x124] ss:$48 sps:$4 sm:$0xff]   ;;  %v21888_v26 = vld [vmem:[%s30452_s23 + $0x240] ss:$48 sps:$4 sm:$0xff]  }
 0xaf8   : > { %v27527_v35 = vpack.c.bf16 %v9932_v12, %v9929_v20  ;;  %20760 = vmatpush3.bf16.msra.mxu1 %v22974_v39  ;;  %10290 = vmatprep.subr.bf16.mxu0 %v22976_v60  ;;  %v21879_v20 = vld [vmem:[%s30452_s23 + $0x120] ss:$48 sps:$4 sm:$0xff]   ;;  %v21887_v48 = vld [vmem:[%s30452_s23 + $0x1e4] ss:$48 sps:$4 sm:$0xff]   ;;  %v10738_v60 = vpop.xlane.xlu1 %10737 }
 0xaf9   : > { %20761 = vmatprep.subr.bf16.mxu1 %v22977_v33  ;;  %v21882_v39 = vld [vmem:[%s30452_s23 + $0x180] ss:$48 sps:$4 sm:$0xff]   ;;  %v21890_v12 = vld [vmem:[%s30452_s23 + $0x244] ss:$48 sps:$4 sm:$0xff]  }
 0xafa   : > { %18085 = vmatmul.mubr.msk.bf16.gmra.mrb[72].mxu0 %vm6894_vm0, %v27446_v22  ;;  %v22981_v22 = vld [vmem:[%s30401_s2 + $0x168] ss:$12 sps:$4 sm:$0xff]  }
 0xafb   : > { %10291 = vmatpush1.bf16.msra.mxu0 %v22978_v54  ;;  %10318 = vmatprep.mubr.bf16.mxu0 %v30295_v29  ;;  %v23006_v54 = vld [vmem:[%s23646_s17 + $0x60] sm:$0xff] }
 0xafc   : > { %20762 = vmatpush3.bf16.msra.mxu1 %v22977_v33  ;;  %10292 = vmatprep.subr.bf16.mxu0 %v22979_v34 }
 0xafd   : > { %20763 = vmatprep.subr.bf16.mxu1 %v22980_v4 }
 0xaff   : > { %10293 = vmatpush1.bf16.msra.mxu0 %v22981_v22 }
 0xb00   : > { %20764 = vmatpush3.bf16.msra.mxu1 %v22980_v4  ;;  %10394 = vmatprep.subr.bf16.mxu0 %v22982_v30 }
 0xb01   : > { %20769 = vmatprep.subr.bf16.mxu1 %v22983_v24 }
 0xb02   : > { %18088 = vmatmul.mubr.msk.bf16.vlgmr.msra.gmra.mrb[68].mxu0 %vm6894_vm0, %v27475_v15  ;;  %v22996_v15 = vld [vmem:[%s30401_s2 + $0x1e0] ss:$12 sps:$4 sm:$0xff]  }
 0xb03   : > { %20766 = vmatmul.mubr.msk.bf16.vlgmr.msra.gmra.mrb[216].mxu1 %vm6894_vm0, %v27470_v13  ;;  %10395 = vmatpush1.bf16.msra.mxu0 %v22984_v32 }
 0xb04   : > { %20770 = vmatpush3.bf16.msra.mxu1 %v22983_v24  ;;  %20777 = vmatprep.mubr.msk.bf16.mxu1 %vm6894_vm0, %v27499_v16  ;;  %v23007_v24 = vld [vmem:[%s23646_s17 + $0x68] sm:$0xff] }
 0xb05   : > { %10396 = vmatprep.subr.bf16.mxu0 %v22985_v37  ;;  %20771 = vmatprep.subr.bf16.mxu1 %v22986_v51 }
 0xb06   : > { %10328 = vmatprep.mubr.bf16.mxu0 %v30295_v29 }
 0xb07   : > { %10397 = vmatpush1.bf16.msra.mxu0 %v22987_v1 }
 0xb08   : > { %20772 = vmatpush3.bf16.msra.mxu1 %v22986_v51  ;;  %10398 = vmatprep.subr.bf16.mxu0 %v22988_v18  ;;  %v23008_v18 = vld [vmem:[%s23646_s17 + $0x70] sm:$0xff] }
 0xb09   : > { %20773 = vmatprep.subr.bf16.mxu1 %v22989_v45 }
 0xb0a   : > { %18089 = vmatmul.mubr.msk.bf16.gmra.mrb[72].mxu0 %vm6894_vm0, %v27470_v13  ;;  %v22993_v13 = vld [vmem:[%s30401_s2 + $0x1c8] ss:$12 sps:$4 sm:$0xff]  }
 0xb0b   : > { %10399 = vmatpush1.bf16.msra.mxu0 %v22990_v9  ;;  %10426 = vmatprep.mubr.bf16.mxu0 %v30295_v29  ;;  %v23009_v9 = vld [vmem:[%s23646_s17 + $0x78] sm:$0xff] }
 0xb0c   : > { %20774 = vmatpush3.bf16.msra.mxu1 %v22989_v45  ;;  %10400 = vmatprep.subr.bf16.mxu0 %v22991_v63 }
 0xb0d   : > { %20775 = vmatprep.subr.bf16.mxu1 %v22992_v27 }
 0xb0f   : > { %10401 = vmatpush1.bf16.msra.mxu0 %v22993_v13 }
 0xb10   : > { %20776 = vmatpush3.bf16.msra.mxu1 %v22992_v27  ;;  %10502 = vmatprep.subr.bf16.mxu0 %v22994_v58 }
 0xb11   : > { %20781 = vmatprep.subr.bf16.mxu1 %v22995_v43 }
 0xb12   : > { %18092 = vmatmul.mubr.msk.bf16.vlgmr.msra.gmra.mrb[68].mxu0 %vm6894_vm0, %v27499_v16  ;;  %v21875_v16 = vld [vmem:[%s30452_s23 + $0x64] ss:$48 sps:$4 sm:$0xff]  }
 0xb13   : > { %20778 = vmatmul.mubr.msk.bf16.vlgmr.msra.gmra.mrb[216].mxu1 %vm6894_vm0, %v27494_v11  ;;  %10503 = vmatpush1.bf16.msra.mxu0 %v22996_v15  ;;  %v23010_v15 = vld [vmem:[%s23646_s17 + $0x80] sm:$0xff] }
 0xb14   : > { %20782 = vmatpush3.bf16.msra.mxu1 %v22995_v43  ;;  %20789 = vmatprep.mubr.msk.bf16.mxu1 %vm6894_vm0, %v27527_v35 }
 0xb15   : > { %10504 = vmatprep.subr.bf16.mxu0 %v22997_v40  ;;  %20783 = vmatprep.subr.bf16.mxu1 %v22998_v3 }
 0xb16   : > { %10436 = vmatprep.mubr.bf16.mxu0 %v30295_v29 }
 0xb17   : > { %10505 = vmatpush1.bf16.msra.mxu0 %v22999_v56  ;;  %v10764_v56 = vmul.f32 0.0026041667, %v10738_v60 }
 0xb18   : > { %20784 = vmatpush3.bf16.msra.mxu1 %v22998_v3  ;;  %10506 = vmatprep.subr.bf16.mxu0 %v23000_v36 }
 0xb19   : > { %20785 = vmatprep.subr.bf16.mxu1 %v23001_v31 }
 0xb1a   : > { %18093 = vmatmul.mubr.msk.bf16.gmra.mrb[72].mxu0 %vm6894_vm0, %v27494_v11  ;;  %v23005_v11 = vld [vmem:[%s30401_s2 + $0x228] ss:$12 sps:$4 sm:$0xff]  }
 0xb1b   : > { %10507 = vmatpush1.bf16.msra.mxu0 %v23002_v0  ;;  %10534 = vmatprep.mubr.bf16.mxu0 %v30295_v29 }
 0xb1c   : > { %20786 = vmatpush3.bf16.msra.mxu1 %v23001_v31  ;;  %10508 = vmatprep.subr.bf16.mxu0 %v23003_v14  ;;  %v23011_v31 = vld [vmem:[%s23646_s17 + $0x88] sm:$0xff] }
 0xb1d   : > { %20787 = vmatprep.subr.bf16.mxu1 %v23004_v6 }
 0xb1f   : > { %10509 = vmatpush1.bf16.msra.mxu0 %v23005_v11 }
 0xb20   : > { %20788 = vmatpush3.bf16.msra.mxu1 %v23004_v6  ;;  %v10746_v6 = vpop.xlane.xlu1 %10745 }
 0xb21   : > { %12783 = vmatprep.subr.bf16.mxu1 %v21872_v41 }
 0xb22   : > { %18096 = vmatmul.mubr.msk.bf16.vlgmr.msra.gmra.mrb[68].mxu0 %vm6894_vm0, %v27527_v35  ;;  %v10734_v35 = vpop.xlane.xlu0 %10733 }
 0xb23   : > { %20790 = vmatmul.mubr.msk.bf16.vlgmr.msra.gmra.mrb[216].mxu1 %vm6894_vm0, %v27522_v53  ;;  %10544 = vmatprep.mubr.bf16.mxu0 %v30295_v29  ;;  %v10763_v30 = vmul.f32 0.0026041667, %v10734_v35 }
 0xb24   : > { %12784 = vmatpush1.bf16.msra.mxu1 %v21870_v10 }
 0xb25   : > { %12785 = vmatprep.subr.bf16.mxu1 %v21875_v16  ;;  %v27708_v14 = vsub.f32 %v27239_v17, %v10763_v30  ;;  %v27719_v16 = vsub.f32 %v27242_v59, %v10763_v30 }
 0xb26   : > { %v10742_v58 = vpop.xlane.xlu0 %10741 }
 0xb27   : > { %v10795_v60 = vmul.f32 %v27708_v14, %v27708_v14 }
 0xb28   : > { %12786 = vmatpush1.bf16.msra.mxu1 %v21873_v25  ;;  %v10765_v25 = vmul.f32 0.0026041667, %v10742_v58 }
 0xb29   : > { %12787 = vmatprep.subr.bf16.mxu1 %v21878_v61  ;;  %v27722_v61 = vsub.f32 %v27288_v50, %v10763_v30 }
 0xb2a   : > { %18097 = vmatmul.mubr.msk.bf16.gmra.mrb[72].mxu0 %vm6894_vm0, %v27522_v53  ;;  %v21885_v53 = vld [vmem:[%s30452_s23 + $0x1e0] ss:$48 sps:$4 sm:$0xff]  }
 0xb2b   : > { %12888 = vmatprep.mubr.bf16.mxu0 %v30295_v29 }
 0xb2c   : > { %12788 = vmatpush1.bf16.msra.mxu1 %v21876_v57 }
 0xb2d   : > { %12789 = vmatprep.subr.bf16.mxu1 %v21881_v47 }
 0xb30   : > { %12790 = vmatpush1.bf16.msra.mxu1 %v21879_v20 }
 0xb31   : > { %12791 = vmatprep.subr.bf16.mxu1 %v21884_v44 }
 0xb34   : > { %12792 = vmatpush1.bf16.msra.mxu1 %v21882_v39  ;;  %v27731_v39 = vsub.f32 %v27258_v55, %v10764_v56 }
 0xb35   : > { %12793 = vmatprep.subr.bf16.mxu1 %v21887_v48  ;;  %v27734_v48 = vsub.f32 %v27261_v52, %v10764_v56 }
 0xb38   : > { %12794 = vmatpush1.bf16.msra.mxu1 %v21885_v53  ;;  %v10766_v53 = vmul.f32 0.0026041667, %v10746_v6 }
 0xb39   : > { %12795 = vmatprep.subr.bf16.mxu1 %v21890_v12  ;;  %v23012_v12 = vld [vmem:[%s23646_s17 + $0x90] sm:$0xff] }
 0xb3c   : > { %12796 = vmatpush1.bf16.msra.mxu1 %v21888_v26 }
 0xbf5   : > { %v10536_v33 = vpop.f32.mrb[68].mxu0 }
 0xbf6   : > { %v10676_v34 = vadd.f32 %v23006_v54, %v10536_v33  ;;  %v20791_v4 = vpop.f32.mrb[216].mxu1  ;;  %v10538_v22 = vpop.f32.mrb[69].mxu0  ;;  %v23013_v33 = vld [vmem:[%s23646_s17 + $0xa0] sm:$0xff] }
 0xbf7   : > { %v10677_v32 = vadd.f32 %v23007_v24, %v10538_v22  ;;  %v10589_v37 = vpop.f32.mrb[217].mxu1  ;;  %v10540_v51 = vpop.f32.mrb[70].mxu0  ;;  %v10684_v54 = vadd.f32 %v23013_v33, %v20791_v4  ;;  %v27752_v4 = vsub.f32 %v27277_v5, %v10765_v25 }
 0xbf8   : > { %v27695_v1 = vadd.f32 %v27213_v62, %v10676_v34  ;;  %v10678_v45 = vadd.f32 %v23008_v18, %v10589_v37  ;;  %v10679_v63 = vadd.f32 %v23009_v9, %v10540_v51  ;;  %v20792_v27 = vpop.f32.mrb[218].mxu1  ;;  %v10542_v13 = vpop.f32.mrb[71].mxu0  ;;  %v23014_v34 = vld [vmem:[%s23646_s17 + $0x98] sm:$0xff]  ;;  %v27745_v37 = vsub.f32 %v27274_v2, %v10765_v25  ;;  %v23015_v18 = vld [vmem:[%s23646_s17 + $0xa8] sm:$0xff] }
 0xbf9   : > { %v27700_v43 = vadd.f32 %v27224_v38, %v10677_v32  ;;  %v10680_v40 = vadd.f32 %v23010_v15, %v10542_v13  ;;  %v10592_v3 = vpop.f32.mrb[219].mxu1  ;;  %v10796_v32 = vmul.f32 %v27719_v16, %v27719_v16  ;;  %v23017_v15 = vld [vmem:[%s23646_s17 + $0xb0] sm:$0xff] }
 0xbfa   : > { %30453 = vst [vmem:[#allocation56_spill] sm:$0xff] %v27695_v1  ;;  %v27704_v36 = vadd.f32 %v27213_v62, %v10679_v63  ;;  %v10681_v0 = vadd.f32 %v23011_v31, %v10592_v3  ;;  %v27711_v11 = vadd.f32 %v27249_v7, %v10678_v45  ;;  %v23016_v63 = vld [vmem:[%s23646_s17 + $0xb8] sm:$0xff]  ;;  %v10798_v3 = vmul.f32 %v27731_v39, %v27731_v39 }
 0xbfb   : > { %30454 = vst [vmem:[#allocation58_spill] sm:$0xff] %v27700_v43  ;;  %v27714_v10 = vadd.f32 %v27224_v38, %v10680_v40  ;;  %v10747_v41 = vadd.f32 %v27700_v43, %v27695_v1  ;;  %v10687_v13 = vadd.f32 %v23016_v63, %v20792_v27  ;;  %v10799_v31 = vmul.f32 %v27734_v48, %v27734_v48 }
 0xbfc   : > { %30455 = vst [vmem:[#allocation31_spill] sm:$0xff] %v27704_v36  ;;  %v27725_v57 = vadd.f32 %v27249_v7, %v10681_v0  ;;  %v27764_v0 = vsub.f32 %v27291_v28, %v10766_v53  ;;  %v27770_v27 = vsub.f32 %v27294_v19, %v10766_v53 }
 0xbfd   : > { %30456 = vst [vmem:[#allocation29_spill] sm:$0xff] %v27714_v10  ;;  %v10546_v47 = vpop.f32.mrb[72].mxu0  ;;  %v10748_v20 = vadd.f32 %v10747_v41, %v27711_v11  ;;  %v10751_v44 = vadd.f32 %v27714_v10, %v27704_v36  ;;  %v27773_v41 = vadd.f32 %v27249_v7, %v10684_v54  ;;  %v27794_v54 = vsub.f32 %v27309_v8, %v10765_v25 }
 0xbfe   : > { %v10682_v26 = vadd.f32 %v23012_v12, %v10546_v47  ;;  %v10548_v35 = vpop.f32.mrb[73].mxu0  ;;  %v10801_v12 = vmul.f32 %v27745_v37, %v27745_v37 }
 0xbff   : > { %v10683_v22 = vadd.f32 %v23014_v34, %v10548_v35  ;;  %10749 = vadd.xlane.f32.xlu0 %v10748_v20  ;;  %v10550_v30 = vpop.f32.mrb[74].mxu0  ;;  %v10752_v24 = vadd.f32 %v10751_v44, %v27725_v57  ;;  %v27781_v44 = vsub.f32 %v27303_v42, %v10764_v56  ;;  %v27788_v35 = vadd.f32 %v27249_v7, %v10687_v13 }
 0xc00   : > { %v27748_v51 = vadd.f32 %v27213_v62, %v10682_v26  ;;  %v10685_v45 = vadd.f32 %v23015_v18, %v10550_v30  ;;  %v10552_v9 = vpop.f32.mrb[75].mxu0  ;;  %v10802_v26 = vmul.f32 %v27752_v4, %v27752_v4  ;;  %v10797_v56 = vmul.f32 %v27722_v61, %v27722_v61 }
 0xc01   : > { %v27756_v58 = vadd.f32 %v27224_v38, %v10683_v22  ;;  %v10686_v40 = vadd.f32 %v23017_v15, %v10552_v9  ;;  %10753 = vadd.xlane.f32.xlu1 %v10752_v24  ;;  %v10805_v34 = vmul.f32 %v27770_v27, %v27770_v27  ;;  %v10823_v22 = vadd.f32 %v10799_v31, %v10798_v3  ;;  %v21893_v15 = vld [vmem:[%s30452_s23 + $0x2a4] ss:$48 sps:$4 sm:$0xff]   ;;  %v21894_v3 = vld [vmem:[%s30452_s23 + $0x600] ss:$48 sps:$4 sm:$0xff]  }
 0xc02   : > { %30457 = vst [vmem:[#allocation55_spill] sm:$0xff] %v27748_v51  ;;  %v27767_v6 = vadd.f32 %v27213_v62, %v10685_v45  ;;  %v10819_v62 = vadd.f32 %v10796_v32, %v10795_v60  ;;  %v10804_v60 = vmul.f32 %v27764_v0, %v27764_v0  ;;  %v27804_v30 = vsub.f32 %v27315_v23, %v10766_v53  ;;  %v21896_v31 = vld [vmem:[%s30452_s23 + $0x604] ss:$48 sps:$4 sm:$0xff]  }
 0xc03   : > { %30458 = vst [vmem:[#allocation57_spill] sm:$0xff] %v27756_v58  ;;  %v27776_v47 = vadd.f32 %v27224_v38, %v10686_v40  ;;  %v10755_v20 = vadd.f32 %v27756_v58, %v27748_v51  ;;  %v10800_v25 = vmul.f32 %v27781_v44, %v27781_v44  ;;  %v10827_v32 = vadd.f32 %v10802_v26, %v10801_v12  ;;  %v21891_v40 = vld [vmem:[%s30452_s23 + $0x2a0] ss:$48 sps:$4 sm:$0xff]   ;;  %v21899_v12 = vld [vmem:[%s30452_s23 + $0x304] ss:$48 sps:$4 sm:$0xff]  }
 0xc04   : > { %30459 = vst [vmem:[#allocation27_spill] sm:$0xff] %v27767_v6  ;;  %v10820_v24 = vadd.f32 %v10819_v62, %v10797_v56  ;;  %v10803_v45 = vmul.f32 %v27794_v54, %v27794_v54  ;;  %v10831_v9 = vadd.f32 %v10805_v34, %v10804_v60  ;;  %v10806_v13 = vmul.f32 %v27804_v30, %v27804_v30  ;;  %v21902_v62 = vld [vmem:[%s30452_s23 + $0x664] ss:$48 sps:$4 sm:$0xff]   ;;  %v21900_v26 = vld [vmem:[%s30452_s23 + $0x660] ss:$48 sps:$4 sm:$0xff]  }
 0xc05   : > { %30460 = vst [vmem:[#allocation25_spill] sm:$0xff] %v27776_v47  ;;  %v10756_v33 = vadd.f32 %v10755_v20, %v27773_v41  ;;  %v10759_v38 = vadd.f32 %v27776_v47, %v27767_v6  ;;  %v10824_v18 = vadd.f32 %v10823_v22, %v10800_v25  ;;  %12797 = vmatprep.subr.bf16.mxu1 %v21893_v15  ;;  %v21897_v20 = vld [vmem:[%s30452_s23 + $0x300] ss:$48 sps:$4 sm:$0xff]   ;;  %v21908_v56 = vld [vmem:[%s30452_s23 + $0x6c4] ss:$48 sps:$4 sm:$0xff]  }
 0xc06   : > { %v10828_v63 = vadd.f32 %v10827_v32, %v10803_v45  ;;  %v10832_v53 = vadd.f32 %v10831_v9, %v10806_v13  ;;  %12798 = vmatpush1.bf16.msra.mxu1 %v21891_v40  ;;  %12856 = vmatprep.subr.bf16.mxu0 %v21896_v31  ;;  %v21906_v60 = vld [vmem:[%s30452_s23 + $0x6c0] ss:$48 sps:$4 sm:$0xff]   ;;  %v21911_v34 = vld [vmem:[%s30452_s23 + $0x3c4] ss:$48 sps:$4 sm:$0xff]  }
 0xc07   : > { %10757 = vadd.xlane.f32.xlu0 %v10756_v33  ;;  %v10760_v7 = vadd.f32 %v10759_v38, %v27788_v35  ;;  %12799 = vmatprep.subr.bf16.mxu1 %v21899_v12  ;;  %v21905_v33 = vld [vmem:[%s30452_s23 + $0x364] ss:$48 sps:$4 sm:$0xff]   ;;  %v21903_v38 = vld [vmem:[%s30452_s23 + $0x360] ss:$48 sps:$4 sm:$0xff]  }
 0xc08   : > { %12857 = vmatpush1.bf16.msra.mxu0 %v21894_v3  ;;  %v21914_v22 = vld [vmem:[%s30452_s23 + $0x724] ss:$48 sps:$4 sm:$0xff]   ;;  %v21915_v32 = vld [vmem:[%s30452_s23 + $0x420] ss:$48 sps:$4 sm:$0xff]  }
 0xc09   : > { %10761 = vadd.xlane.f32.xlu1 %v10760_v7  ;;  %12858 = vmatprep.subr.bf16.mxu0 %v21902_v62  ;;  %v21909_v7 = vld [vmem:[%s30452_s23 + $0x3c0] ss:$48 sps:$4 sm:$0xff]   ;;  %v21917_v25 = vld [vmem:[%s30452_s23 + $0x424] ss:$48 sps:$4 sm:$0xff]  }
 0xc0a   : > { %12800 = vmatpush1.bf16.msra.mxu1 %v21897_v20  ;;  %v21918_v45 = vld [vmem:[%s30452_s23 + $0x780] ss:$48 sps:$4 sm:$0xff]   ;;  %v21923_v9 = vld [vmem:[%s30452_s23 + $0x484] ss:$48 sps:$4 sm:$0xff]  }
 0xc0b   : > { %10821 = vadd.xlane.f32.xlu0 %v10820_v24  ;;  %12801 = vmatprep.subr.bf16.mxu1 %v21905_v33  ;;  %v21912_v24 = vld [vmem:[%s30452_s23 + $0x720] ss:$48 sps:$4 sm:$0xff]   ;;  %v21926_v13 = vld [vmem:[%s30452_s23 + $0x7e4] ss:$48 sps:$4 sm:$0xff]  }
 0xc0c   : > { %12859 = vmatpush1.bf16.msra.mxu0 %v21900_v26  ;;  %v21929_v15 = vld [vmem:[%s30452_s23 + $0x4e4] ss:$48 sps:$4 sm:$0xff]   ;;  %v21927_v40 = vld [vmem:[%s30452_s23 + $0x4e0] ss:$48 sps:$4 sm:$0xff]  }
 0xc0d   : > { %10825 = vadd.xlane.f32.xlu1 %v10824_v18  ;;  %12860 = vmatprep.subr.bf16.mxu0 %v21908_v56  ;;  %v21920_v18 = vld [vmem:[%s30452_s23 + $0x784] ss:$48 sps:$4 sm:$0xff]   ;;  %v21930_v31 = vld [vmem:[%s30452_s23 + $0x840] ss:$48 sps:$4 sm:$0xff]  }
 0xc0e   : > { %12802 = vmatpush1.bf16.msra.mxu1 %v21903_v38  ;;  %v21932_v3 = vld [vmem:[%s30452_s23 + $0x844] ss:$48 sps:$4 sm:$0xff]   ;;  %v21933_v12 = vld [vmem:[%s30452_s23 + $0x540] ss:$48 sps:$4 sm:$0xff]  }
 0xc0f   : > { %10829 = vadd.xlane.f32.xlu0 %v10828_v63  ;;  %12803 = vmatprep.subr.bf16.mxu1 %v21911_v34  ;;  %v21921_v63 = vld [vmem:[%s30452_s23 + $0x480] ss:$48 sps:$4 sm:$0xff]   ;;  %v21935_v20 = vld [vmem:[%s30452_s23 + $0x544] ss:$48 sps:$4 sm:$0xff]  }
 0xc10   : > { %12861 = vmatpush1.bf16.msra.mxu0 %v21906_v60  ;;  %v21936_v62 = vld [vmem:[%s30452_s23 + $0x8a0] ss:$48 sps:$4 sm:$0xff]   ;;  %v21938_v26 = vld [vmem:[%s30452_s23 + $0x8a4] ss:$48 sps:$4 sm:$0xff]   ;;  %v21947_v60 = vld [vmem:[%s30452_s23 + $0xc] ss:$48 sps:$4 sm:$0xff]  }
 0xc11   : > { %10833 = vadd.xlane.f32.xlu1 %v10832_v53  ;;  %12862 = vmatprep.subr.bf16.mxu0 %v21914_v22  ;;  %v21924_v53 = vld [vmem:[%s30452_s23 + $0x7e0] ss:$48 sps:$4 sm:$0xff]   ;;  %v21941_v38 = vld [vmem:[%s30452_s23 + $0x5a4] ss:$48 sps:$4 sm:$0xff]  }
 0xc12   : > { %12804 = vmatpush1.bf16.msra.mxu1 %v21909_v7  ;;  %v21939_v33 = vld [vmem:[%s30452_s23 + $0x5a0] ss:$48 sps:$4 sm:$0xff]   ;;  %v21944_v56 = vld [vmem:[%s30452_s23 + $0x14] ss:$48 sps:$4 sm:$0xff]  }
 0xc13   : > { %12805 = vmatprep.subr.bf16.mxu1 %v21917_v25 }
 0xc14   : > { %12863 = vmatpush1.bf16.msra.mxu0 %v21912_v24 }
 0xc15   : > { %12864 = vmatprep.subr.bf16.mxu0 %v21920_v18 }
 0xc16   : > { %12806 = vmatpush1.bf16.msra.mxu1 %v21915_v32 }
 0xc17   : > { %12807 = vmatprep.subr.bf16.mxu1 %v21923_v9 }
 0xc18   : > { %12865 = vmatpush1.bf16.msra.mxu0 %v21918_v45 }
 0xc19   : > { %12866 = vmatprep.subr.bf16.mxu0 %v21926_v13 }
 0xc1a   : > { %12808 = vmatpush1.bf16.msra.mxu1 %v21921_v63 }
 0xc1b   : > { %12809 = vmatprep.subr.bf16.mxu1 %v21929_v15 }
 0xc1c   : > { %12867 = vmatpush1.bf16.msra.mxu0 %v21924_v53 }
 0xc1d   : > { %12868 = vmatprep.subr.bf16.mxu0 %v21932_v3 }
 0xc1e   : > { %12810 = vmatpush1.bf16.msra.mxu1 %v21927_v40 }
 0xc1f   : > { %12811 = vmatprep.subr.bf16.mxu1 %v21935_v20 }
 0xc20   : > { %12869 = vmatpush1.bf16.msra.mxu0 %v21930_v31 }
 0xc21   : > { %12870 = vmatprep.subr.bf16.mxu0 %v21938_v26 }
 0xc22   : > { %12812 = vmatpush1.bf16.msra.mxu1 %v21933_v12 }
 0xc23   : > { %12813 = vmatprep.subr.bf16.mxu1 %v21941_v38 }
 0xc24   : > { %12871 = vmatpush1.bf16.msra.mxu0 %v21936_v62 }
 0xc25   : > { %13075 = vmatprep.subr.bf16.mxu0 %v21944_v56 }
 0xc26   : > { %12814 = vmatpush1.bf16.msra.mxu1 %v21939_v33 }
 0xc27   : > { %12929 = vmatprep.subr.bf16.mxu1 %v21947_v60 }
 0xc8c   : > { %v10750_v34 = vpop.xlane.xlu0 %10749 }
 0xc8d   : > { %v10767_v7 = vmul.f32 0.0026041667, %v10750_v34 }
 0xc8e   : > { %v10754_v22 = vpop.xlane.xlu1 %10753 }
 0xc8f   : > { %v27921_v24 = vsub.f32 %v27695_v1, %v10767_v7  ;;  %v27924_v25 = vsub.f32 %v27700_v43, %v10767_v7  ;;  %v27927_v32 = vsub.f32 %v27711_v11, %v10767_v7  ;;  %v10768_v18 = vmul.f32 0.0026041667, %v10754_v22 }
 0xc91   : > { %v10807_v45 = vmul.f32 %v27921_v24, %v27921_v24  ;;  %v10808_v9 = vmul.f32 %v27924_v25, %v27924_v25  ;;  %v27934_v63 = vsub.f32 %v27704_v36, %v10768_v18  ;;  %v27937_v13 = vsub.f32 %v27714_v10, %v10768_v18 }
 0xc92   : > { %v27940_v53 = vsub.f32 %v27725_v57, %v10768_v18  ;;  %v10809_v3 = vmul.f32 %v27927_v32, %v27927_v32 }
 0xc93   : > { %v10810_v15 = vmul.f32 %v27934_v63, %v27934_v63  ;;  %v10811_v40 = vmul.f32 %v27937_v13, %v27937_v13  ;;  %v10835_v31 = vadd.f32 %v10808_v9, %v10807_v45 }
 0xc94   : > { %v10758_v20 = vpop.xlane.xlu0 %10757  ;;  %v10812_v38 = vmul.f32 %v27940_v53, %v27940_v53 }
 0xc95   : > { %v10769_v12 = vmul.f32 0.0026041667, %v10758_v20  ;;  %v10836_v62 = vadd.f32 %v10835_v31, %v10809_v3  ;;  %v10839_v26 = vadd.f32 %v10811_v40, %v10810_v15 }
 0xc96   : > { %v10762_v33 = vpop.xlane.xlu1 %10761 }
 0xc97   : > { %v27951_v56 = vsub.f32 %v27748_v51, %v10769_v12  ;;  %v27954_v60 = vsub.f32 %v27756_v58, %v10769_v12  ;;  %v27957_v34 = vsub.f32 %v27773_v41, %v10769_v12  ;;  %v10770_v7 = vmul.f32 0.0026041667, %v10762_v33  ;;  %10837 = vadd.xlane.f32.xlu0 %v10836_v62 }
 0xc98   : > { %v10822_v22 = vpop.xlane.xlu0 %10821  ;;  %v10840_v18 = vadd.f32 %v10839_v26, %v10812_v38 }
 0xc99   : > { %v10813_v45 = vmul.f32 %v27951_v56, %v27951_v56  ;;  %v10814_v9 = vmul.f32 %v27954_v60, %v27954_v60  ;;  %v27964_v15 = vsub.f32 %v27767_v6, %v10770_v7  ;;  %v27967_v40 = vsub.f32 %v27776_v47, %v10770_v7 }
 0xc9a   : > { %v27970_v3 = vsub.f32 %v27788_v35, %v10770_v7  ;;  %v10851_v31 = vmul.f32 0.0026041667, %v10822_v22  ;;  %10841 = vadd.xlane.f32.xlu1 %v10840_v18  ;;  %v10826_v20 = vpop.xlane.xlu1 %10825  ;;  %v10815_v12 = vmul.f32 %v27957_v34, %v27957_v34 }
 0xc9b   : > { %v10816_v62 = vmul.f32 %v27964_v15, %v27964_v15  ;;  %v10817_v26 = vmul.f32 %v27967_v40, %v27967_v40  ;;  %v10852_v33 = vmul.f32 0.0026041667, %v10826_v20  ;;  %v10843_v38 = vadd.f32 %v10814_v9, %v10813_v45  ;;  %v10729_v45 = vld [vmem:[#allocation8] sm:$0x7]  ;;  %v10730_v9 = vld [vmem:[#allocation10] sm:$0x7] }
 0xc9c   : > { %v10859_v29 = vadd.f32 1e-05, %v10851_v31  ;;  %v10830_v47 = vpop.xlane.xlu0 %10829  ;;  %v10818_v7 = vmul.f32 %v27970_v3, %v27970_v3  ;;  %v27981_v31 = vrot.slane %v10729_v45, %v30445_v46  ;;  %v27999_v20 = vrot.slane %v10730_v9, %v30443_v21 }
 0xc9d   : > { %v10860_v6 = vadd.f32 1e-05, %v10852_v33  ;;  %v10853_v22 = vmul.f32 0.0026041667, %v10830_v47  ;;  %v10844_v18 = vadd.f32 %v10843_v38, %v10815_v12  ;;  %v10847_v58 = vadd.f32 %v10817_v26, %v10816_v62 }
 0xc9e   : > { %22894 = vrsqrt.f32 %v10859_v29  ;;  %v10834_v51 = vpop.xlane.xlu1 %10833  ;;  %v27984_v47 = vrot.slane %v10729_v45, %v30444_v49  ;;  %v27987_v29 = vrot.slane %v10729_v45, %v30443_v21 }
 0xc9f   : > { %22896 = vrsqrt.f32 %v10860_v6  ;;  %v10861_v10 = vadd.f32 1e-05, %v10853_v22  ;;  %v10854_v36 = vmul.f32 0.0026041667, %v10834_v51  ;;  %10845 = vadd.xlane.f32.xlu0 %v10844_v18  ;;  %v10848_v43 = vadd.f32 %v10847_v58, %v10818_v7 }
 0xca0   : > { %v27990_v51 = vrot.slane %v10730_v9, %v30445_v46 }
 0xca1   : > { %22898 = vrsqrt.f32 %v10861_v10  ;;  %v10862_v1 = vadd.f32 1e-05, %v10854_v36  ;;  %10849 = vadd.xlane.f32.xlu1 %v10848_v43  ;;  %v27993_v10 = vrot.slane %v10730_v9, %v30444_v49 }
 0xca3   : > { %22900 = vrsqrt.f32 %v10862_v1 }
 0xca8   : > { %v22895_v6 = vpop.eup %22894 }
 0xca9   : > { %v22897_v43 = vpop.eup %22896  ;;  %v10877_v1 = vmul.f32 %v22895_v6, %v27722_v61  ;;  %v10876_v36 = vmul.f32 %v22895_v6, %v27719_v16  ;;  %v10875_v58 = vmul.f32 %v22895_v6, %v27708_v14 }
 0xcaa   : > { %v10880_v12 = vmul.f32 %v22897_v43, %v27781_v44  ;;  %v10879_v62 = vmul.f32 %v22897_v43, %v27734_v48  ;;  %v10878_v26 = vmul.f32 %v22897_v43, %v27731_v39 }
 0xcab   : > { %v22899_v33 = vpop.eup %22898  ;;  %v10917_v38 = vmul.f32 %v27981_v31, %v10877_v1  ;;  %v10916_v7 = vmul.f32 %v27984_v47, %v10876_v36  ;;  %v10915_v61 = vmul.f32 %v27987_v29, %v10875_v58 }
 0xcac   : > { %v10920_v16 = vmul.f32 %v27981_v31, %v10880_v12  ;;  %v10883_v14 = vmul.f32 %v22899_v33, %v27794_v54  ;;  %v10919_v22 = vmul.f32 %v27984_v47, %v10879_v62  ;;  %v10918_v18 = vmul.f32 %v27987_v29, %v10878_v26 }
 0xcad   : > { %v22901_v44 = vpop.eup %22900  ;;  %v10957_v48 = vadd.f32 %v27990_v51, %v10917_v38  ;;  %v10956_v39 = vadd.f32 %v27993_v10, %v10916_v7  ;;  %v10955_v45 = vadd.f32 %v27999_v20, %v10915_v61  ;;  %v10882_v9 = vmul.f32 %v22899_v33, %v27752_v4  ;;  %v21953_v61 = vld [vmem:[%s30452_s23 + $0x6c] ss:$48 sps:$4 sm:$0xff]  }
 0xcae   : > { %v10960_v6 = vadd.f32 %v27990_v51, %v10920_v16  ;;  %v10886_v43 = vmul.f32 %v22901_v44, %v27804_v30  ;;  %v10959_v1 = vadd.f32 %v27993_v10, %v10919_v22  ;;  %v10958_v54 = vadd.f32 %v27999_v20, %v10918_v18  ;;  %v21942_v30 = vld [vmem:[%s30452_s23 + $0x10] ss:$48 sps:$4 sm:$0xff]  }
 0xcaf   : > { %v10885_v36 = vmul.f32 %v22901_v44, %v27770_v27  ;;  %v10922_v58 = vmul.f32 %v27984_v47, %v10882_v9  ;;  %v10881_v12 = vmul.f32 %v22899_v33, %v27745_v37  ;;  %v21945_v27 = vld [vmem:[%s30452_s23 + $0x8] ss:$48 sps:$4 sm:$0xff]   ;;  %v10884_v37 = vmul.f32 %v22901_v44, %v27764_v0  ;;  %v21950_v33 = vld [vmem:[%s30452_s23 + $0x74] ss:$48 sps:$4 sm:$0xff]  }
 0xcb0   : > { %v28022_v62 = vpack.c.bf16 %v10960_v6, %v10957_v48  ;;  %v28024_v26 = vpack.c.bf16 %v10959_v1, %v10956_v39  ;;  %v28026_v38 = vpack.c.bf16 %v10958_v54, %v10955_v45  ;;  %v10926_v4 = vmul.f32 %v27981_v31, %v10886_v43  ;;  %v21948_v45 = vld [vmem:[%s30452_s23 + $0x70] ss:$48 sps:$4 sm:$0xff]   ;;  %v21956_v43 = vld [vmem:[%s30452_s23 + $0xd4] ss:$48 sps:$4 sm:$0xff]   ;;  %v21959_v1 = vld [vmem:[%s30452_s23 + $0xcc] ss:$48 sps:$4 sm:$0xff]  }
 0xcb1   : > { %v10925_v7 = vmul.f32 %v27984_v47, %v10885_v36  ;;  %v10962_v16 = vadd.f32 %v27993_v10, %v10922_v58  ;;  %v10923_v22 = vmul.f32 %v27981_v31, %v10883_v14  ;;  %v30461_v18 = vmov 0   ;;  %v21951_v14 = vld [vmem:[%s30452_s23 + $0x68] ss:$48 sps:$4 sm:$0xff]  }
 0xcb2   : > { %12815 = vmatprep.mubr.bf16.mxu1 %v28024_v26  ;;  %12889 = vmatmul.mubr.bf16.vlgmr.msra.gmra.mrb[76].mxu0 %v28022_v62  ;;  %v10921_v44 = vmul.f32 %v27987_v29, %v10881_v12  ;;  %v10924_v48 = vmul.f32 %v27987_v29, %v10884_v37  ;;  %v10966_v39 = vadd.f32 %v27990_v51, %v10926_v4  ;;  %v21954_v12 = vld [vmem:[%s30452_s23 + $0xd0] ss:$48 sps:$4 sm:$0xff]   ;;  %v21957_v4 = vld [vmem:[%s30452_s23 + $0xc8] ss:$48 sps:$4 sm:$0xff]  }
 0xcb3   : > { %12816 = vmatmul.mubr.bf16.vlgmr.msra.gmra.mrb[220].mxu1 %v28026_v38  ;;  %v10965_v0 = vadd.f32 %v27993_v10, %v10925_v7  ;;  %12898 = vmatprep.mubr.bf16.mxu0 %v30461_v18  ;;  %v10963_v54 = vadd.f32 %v27990_v51, %v10923_v22  ;;  %v21965_v7 = vld [vmem:[%s30452_s23 + $0x12c] ss:$48 sps:$4 sm:$0xff]   ;;  %v21960_v37 = vld [vmem:[%s30452_s23 + $0x130] ss:$48 sps:$4 sm:$0xff]  }
 0xcb4   : > { %13076 = vmatpush1.bf16.msra.mxu0 %v21942_v30  ;;  %12930 = vmatpush1.bf16.msra.mxu1 %v21945_v27  ;;  %v10964_v6 = vadd.f32 %v27999_v20, %v10924_v48  ;;  %v10961_v36 = vadd.f32 %v27999_v20, %v10921_v44  ;;  %v21962_v27 = vld [vmem:[%s30452_s23 + $0x134] ss:$48 sps:$4 sm:$0xff]   ;;  %v21966_v22 = vld [vmem:[%s30452_s23 + $0x190] ss:$48 sps:$4 sm:$0xff]   ;;  %v21977_v48 = vld [vmem:[%s30452_s23 + $0x1ec] ss:$48 sps:$4 sm:$0xff]  }
 0xcb5   : > { %v28059_v9 = vpack.c.bf16 %v10965_v0, %v10962_v16  ;;  %13077 = vmatprep.subr.bf16.mxu0 %v21950_v33  ;;  %12931 = vmatprep.subr.bf16.mxu1 %v21953_v61  ;;  %v28071_v58 = vpack.c.bf16 %v10966_v39, %v10963_v54  ;;  %v21963_v33 = vld [vmem:[%s30452_s23 + $0x128] ss:$48 sps:$4 sm:$0xff]   ;;  %v21968_v61 = vld [vmem:[%s30452_s23 + $0x194] ss:$48 sps:$4 sm:$0xff]   ;;  %v21971_v16 = vld [vmem:[%s30452_s23 + $0x18c] ss:$48 sps:$4 sm:$0xff]  }
 0xcb6   : > { %v28079_v30 = vpack.c.bf16 %v10964_v6, %v10961_v36  ;;  %v21969_v0 = vld [vmem:[%s30452_s23 + $0x188] ss:$48 sps:$4 sm:$0xff]   ;;  %v21974_v44 = vld [vmem:[%s30452_s23 + $0x1f4] ss:$48 sps:$4 sm:$0xff]   ;;  %v21972_v39 = vld [vmem:[%s30452_s23 + $0x1f0] ss:$48 sps:$4 sm:$0xff]  }
 0xcb7   : > { %12825 = vmatprep.mubr.bf16.mxu1 %v28059_v9  ;;  %v21983_v6 = vld [vmem:[%s30452_s23 + $0x24c] ss:$48 sps:$4 sm:$0xff]   ;;  %v21986_v54 = vld [vmem:[%s30452_s23 + $0x2b4] ss:$48 sps:$4 sm:$0xff]  }
 0xcb8   : > { %13078 = vmatpush1.bf16.msra.mxu0 %v21948_v45  ;;  %12932 = vmatpush1.bf16.msra.mxu1 %v21951_v14  ;;  %v21975_v45 = vld [vmem:[%s30452_s23 + $0x1e8] ss:$48 sps:$4 sm:$0xff]   ;;  %v21980_v14 = vld [vmem:[%s30452_s23 + $0x254] ss:$48 sps:$4 sm:$0xff]   ;;  %v21989_v36 = vld [vmem:[%s30452_s23 + $0x2ac] ss:$48 sps:$4 sm:$0xff]  }
 0xcb9   : > { %13079 = vmatprep.subr.bf16.mxu0 %v21956_v43  ;;  %12933 = vmatprep.subr.bf16.mxu1 %v21959_v1  ;;  %v21978_v43 = vld [vmem:[%s30452_s23 + $0x250] ss:$48 sps:$4 sm:$0xff]   ;;  %v21981_v1 = vld [vmem:[%s30452_s23 + $0x248] ss:$48 sps:$4 sm:$0xff]  }
 0xcba   : > { %12899 = vmatmul.mubr.bf16.gmra.mrb[80].mxu0 %v28071_v58 }
 0xcbb   : > { %12826 = vmatmul.mubr.bf16.gmra.mrb[224].mxu1 %v28079_v30  ;;  %12908 = vmatprep.mubr.bf16.mxu0 %v30461_v18 }
 0xcbc   : > { %13080 = vmatpush1.bf16.msra.mxu0 %v21954_v12  ;;  %12934 = vmatpush1.bf16.msra.mxu1 %v21957_v4  ;;  %v21984_v12 = vld [vmem:[%s30452_s23 + $0x2b0] ss:$48 sps:$4 sm:$0xff]   ;;  %v21987_v4 = vld [vmem:[%s30452_s23 + $0x2a8] ss:$48 sps:$4 sm:$0xff]  }
 0xcbd   : > { %13081 = vmatprep.subr.bf16.mxu0 %v21962_v27  ;;  %12935 = vmatprep.subr.bf16.mxu1 %v21965_v7  ;;  %v21992_v27 = vld [vmem:[%s30452_s23 + $0x314] ss:$48 sps:$4 sm:$0xff]   ;;  %v21995_v7 = vld [vmem:[%s30452_s23 + $0x30c] ss:$48 sps:$4 sm:$0xff]  }
 0xcc0   : > { %13082 = vmatpush1.bf16.msra.mxu0 %v21960_v37  ;;  %12936 = vmatpush1.bf16.msra.mxu1 %v21963_v33  ;;  %v21990_v37 = vld [vmem:[%s30452_s23 + $0x310] ss:$48 sps:$4 sm:$0xff]   ;;  %v21993_v33 = vld [vmem:[%s30452_s23 + $0x308] ss:$48 sps:$4 sm:$0xff]  }
 0xcc1   : > { %13083 = vmatprep.subr.bf16.mxu0 %v21968_v61  ;;  %12937 = vmatprep.subr.bf16.mxu1 %v21971_v16  ;;  %v21998_v61 = vld [vmem:[%s30452_s23 + $0x374] ss:$48 sps:$4 sm:$0xff]   ;;  %v22001_v16 = vld [vmem:[%s30452_s23 + $0x36c] ss:$48 sps:$4 sm:$0xff]  }
 0xcc4   : > { %13084 = vmatpush1.bf16.msra.mxu0 %v21966_v22  ;;  %12938 = vmatpush1.bf16.msra.mxu1 %v21969_v0  ;;  %v21996_v22 = vld [vmem:[%s30452_s23 + $0x370] ss:$48 sps:$4 sm:$0xff]   ;;  %v21999_v0 = vld [vmem:[%s30452_s23 + $0x368] ss:$48 sps:$4 sm:$0xff]  }
 0xcc5   : > { %13085 = vmatprep.subr.bf16.mxu0 %v21974_v44  ;;  %12939 = vmatprep.subr.bf16.mxu1 %v21977_v48  ;;  %v22004_v44 = vld [vmem:[%s30452_s23 + $0x3d4] ss:$48 sps:$4 sm:$0xff]   ;;  %v22007_v48 = vld [vmem:[%s30452_s23 + $0x3cc] ss:$48 sps:$4 sm:$0xff]  }
 0xcc8   : > { %13086 = vmatpush1.bf16.msra.mxu0 %v21972_v39  ;;  %12940 = vmatpush1.bf16.msra.mxu1 %v21975_v45  ;;  %v22002_v39 = vld [vmem:[%s30452_s23 + $0x3d0] ss:$48 sps:$4 sm:$0xff]   ;;  %v22005_v45 = vld [vmem:[%s30452_s23 + $0x3c8] ss:$48 sps:$4 sm:$0xff]  }
 0xcc9   : > { %13087 = vmatprep.subr.bf16.mxu0 %v21980_v14  ;;  %12941 = vmatprep.subr.bf16.mxu1 %v21983_v6  ;;  %v22010_v14 = vld [vmem:[%s30452_s23 + $0x434] ss:$48 sps:$4 sm:$0xff]   ;;  %v22013_v6 = vld [vmem:[%s30452_s23 + $0x42c] ss:$48 sps:$4 sm:$0xff]  }
 0xccc   : > { %13088 = vmatpush1.bf16.msra.mxu0 %v21978_v43  ;;  %12942 = vmatpush1.bf16.msra.mxu1 %v21981_v1  ;;  %v22008_v43 = vld [vmem:[%s30452_s23 + $0x430] ss:$48 sps:$4 sm:$0xff]   ;;  %v22011_v1 = vld [vmem:[%s30452_s23 + $0x428] ss:$48 sps:$4 sm:$0xff]  }
 0xccd   : > { %13089 = vmatprep.subr.bf16.mxu0 %v21986_v54  ;;  %12943 = vmatprep.subr.bf16.mxu1 %v21989_v36  ;;  %v22016_v54 = vld [vmem:[%s30452_s23 + $0x494] ss:$48 sps:$4 sm:$0xff]   ;;  %v22019_v36 = vld [vmem:[%s30452_s23 + $0x48c] ss:$48 sps:$4 sm:$0xff]  }
 0xcd0   : > { %13090 = vmatpush1.bf16.msra.mxu0 %v21984_v12  ;;  %12944 = vmatpush1.bf16.msra.mxu1 %v21987_v4  ;;  %v22014_v12 = vld [vmem:[%s30452_s23 + $0x490] ss:$48 sps:$4 sm:$0xff]   ;;  %v22017_v4 = vld [vmem:[%s30452_s23 + $0x488] ss:$48 sps:$4 sm:$0xff]  }
 0xcd1   : > { %13091 = vmatprep.subr.bf16.mxu0 %v21992_v27  ;;  %12945 = vmatprep.subr.bf16.mxu1 %v21995_v7  ;;  %v22022_v27 = vld [vmem:[%s30452_s23 + $0x4f4] ss:$48 sps:$4 sm:$0xff]   ;;  %v22025_v7 = vld [vmem:[%s30452_s23 + $0x4ec] ss:$48 sps:$4 sm:$0xff]  }
 0xcd4   : > { %13092 = vmatpush1.bf16.msra.mxu0 %v21990_v37  ;;  %12946 = vmatpush1.bf16.msra.mxu1 %v21993_v33  ;;  %v22020_v37 = vld [vmem:[%s30452_s23 + $0x4f0] ss:$48 sps:$4 sm:$0xff]   ;;  %v22023_v33 = vld [vmem:[%s30452_s23 + $0x4e8] ss:$48 sps:$4 sm:$0xff]  }
 0xcd5   : > { %13093 = vmatprep.subr.bf16.mxu0 %v21998_v61  ;;  %12947 = vmatprep.subr.bf16.mxu1 %v22001_v16  ;;  %v22028_v61 = vld [vmem:[%s30452_s23 + $0x554] ss:$48 sps:$4 sm:$0xff]   ;;  %v22031_v16 = vld [vmem:[%s30452_s23 + $0x54c] ss:$48 sps:$4 sm:$0xff]  }
 0xcd8   : > { %13094 = vmatpush1.bf16.msra.mxu0 %v21996_v22  ;;  %12948 = vmatpush1.bf16.msra.mxu1 %v21999_v0  ;;  %v22026_v22 = vld [vmem:[%s30452_s23 + $0x550] ss:$48 sps:$4 sm:$0xff]   ;;  %v22029_v0 = vld [vmem:[%s30452_s23 + $0x548] ss:$48 sps:$4 sm:$0xff]  }
 0xcd9   : > { %13095 = vmatprep.subr.bf16.mxu0 %v22004_v44  ;;  %12949 = vmatprep.subr.bf16.mxu1 %v22007_v48  ;;  %v22034_v44 = vld [vmem:[%s30452_s23 + $0x5b4] ss:$48 sps:$4 sm:$0xff]   ;;  %v22037_v48 = vld [vmem:[%s30452_s23 + $0x5ac] ss:$48 sps:$4 sm:$0xff]  }
 0xcdc   : > { %13096 = vmatpush1.bf16.msra.mxu0 %v22002_v39  ;;  %12950 = vmatpush1.bf16.msra.mxu1 %v22005_v45  ;;  %v22032_v39 = vld [vmem:[%s30452_s23 + $0x5b0] ss:$48 sps:$4 sm:$0xff]   ;;  %v22035_v45 = vld [vmem:[%s30452_s23 + $0x5a8] ss:$48 sps:$4 sm:$0xff]  }
 0xcdd   : > { %13097 = vmatprep.subr.bf16.mxu0 %v22010_v14  ;;  %12951 = vmatprep.subr.bf16.mxu1 %v22013_v6  ;;  %v22040_v14 = vld [vmem:[%s30452_s23 + $0x614] ss:$48 sps:$4 sm:$0xff]   ;;  %v22043_v6 = vld [vmem:[%s30452_s23 + $0x60c] ss:$48 sps:$4 sm:$0xff]  }
 0xce0   : > { %13098 = vmatpush1.bf16.msra.mxu0 %v22008_v43  ;;  %12952 = vmatpush1.bf16.msra.mxu1 %v22011_v1 }
 0xce1   : > { %13099 = vmatprep.subr.bf16.mxu0 %v22016_v54  ;;  %12953 = vmatprep.subr.bf16.mxu1 %v22019_v36 }
 0xce4   : > { %13100 = vmatpush1.bf16.msra.mxu0 %v22014_v12  ;;  %12954 = vmatpush1.bf16.msra.mxu1 %v22017_v4 }
 0xce5   : > { %13101 = vmatprep.subr.bf16.mxu0 %v22022_v27  ;;  %12955 = vmatprep.subr.bf16.mxu1 %v22025_v7 }
 0xce8   : > { %13102 = vmatpush1.bf16.msra.mxu0 %v22020_v37  ;;  %12956 = vmatpush1.bf16.msra.mxu1 %v22023_v33 }
 0xce9   : > { %13103 = vmatprep.subr.bf16.mxu0 %v22028_v61  ;;  %12957 = vmatprep.subr.bf16.mxu1 %v22031_v16 }
 0xcec   : > { %13104 = vmatpush1.bf16.msra.mxu0 %v22026_v22  ;;  %12958 = vmatpush1.bf16.msra.mxu1 %v22029_v0 }
 0xced   : > { %13105 = vmatprep.subr.bf16.mxu0 %v22034_v44  ;;  %12959 = vmatprep.subr.bf16.mxu1 %v22037_v48 }
 0xcf0   : > { %13106 = vmatpush1.bf16.msra.mxu0 %v22032_v39  ;;  %12960 = vmatpush1.bf16.msra.mxu1 %v22035_v45 }
 0xcf1   : > { %13148 = vmatprep.subr.bf16.mxu0 %v22040_v14  ;;  %13002 = vmatprep.subr.bf16.mxu1 %v22043_v6 }
 0xd24   : > { %v10838_v43 = vpop.xlane.xlu0 %10837 }
 0xd25   : > { %v10855_v1 = vmul.f32 0.0026041667, %v10838_v43 }
 0xd27   : > { %v10863_v54 = vadd.f32 1e-05, %v10855_v1  ;;  %v10842_v36 = vpop.xlane.xlu1 %10841 }
 0xd28   : > { %v10856_v12 = vmul.f32 0.0026041667, %v10842_v36 }
 0xd29   : > { %22902 = vrsqrt.f32 %v10863_v54 }
 0xd2a   : > { %v10864_v4 = vadd.f32 1e-05, %v10856_v12 }
 0xd2c   : > { %22904 = vrsqrt.f32 %v10864_v4  ;;  %v10846_v27 = vpop.xlane.xlu0 %10845 }
 0xd2d   : > { %v10857_v7 = vmul.f32 0.0026041667, %v10846_v27 }
 0xd2e   : > { %v10850_v37 = vpop.xlane.xlu1 %10849 }
 0xd2f   : > { %v10865_v33 = vadd.f32 1e-05, %v10857_v7  ;;  %v10858_v61 = vmul.f32 0.0026041667, %v10850_v37 }
 0xd31   : > { %22906 = vrsqrt.f32 %v10865_v33  ;;  %v10866_v16 = vadd.f32 1e-05, %v10858_v61 }
 0xd33   : > { %v22903_v22 = vpop.eup %22902  ;;  %22908 = vrsqrt.f32 %v10866_v16 }
 0xd34   : > { %v10889_v0 = vmul.f32 %v22903_v22, %v27927_v32  ;;  %v10888_v44 = vmul.f32 %v22903_v22, %v27924_v25  ;;  %v10887_v48 = vmul.f32 %v22903_v22, %v27921_v24 }
 0xd36   : > { %v22905_v39 = vpop.eup %22904  ;;  %v10928_v45 = vmul.f32 %v27984_v47, %v10888_v44  ;;  %v10929_v14 = vmul.f32 %v27981_v31, %v10889_v0  ;;  %v10927_v54 = vmul.f32 %v27987_v29, %v10887_v48 }
 0xd37   : > { %v10892_v6 = vmul.f32 %v22905_v39, %v27940_v53  ;;  %v10891_v43 = vmul.f32 %v22905_v39, %v27937_v13  ;;  %v10890_v1 = vmul.f32 %v22905_v39, %v27934_v63 }
 0xd38   : > { %v10968_v24 = vadd.f32 %v27993_v10, %v10928_v45  ;;  %v10969_v12 = vadd.f32 %v27990_v51, %v10929_v14  ;;  %v10967_v13 = vadd.f32 %v27999_v20, %v10927_v54 }
 0xd39   : > { %v10931_v36 = vmul.f32 %v27984_v47, %v10891_v43  ;;  %v10932_v32 = vmul.f32 %v27981_v31, %v10892_v6  ;;  %v10930_v25 = vmul.f32 %v27987_v29, %v10890_v1 }
 0xd3b   : > { %v22907_v4 = vpop.eup %22906  ;;  %v10971_v27 = vadd.f32 %v27993_v10, %v10931_v36  ;;  %v10972_v53 = vadd.f32 %v27990_v51, %v10932_v32  ;;  %v10970_v63 = vadd.f32 %v27999_v20, %v10930_v25  ;;  %v22047_v25 = vld [vmem:[%s30452_s23 + $0x668] ss:$48 sps:$4 sm:$0xff]  }
 0xd3c   : > { %v10895_v7 = vmul.f32 %v22907_v4, %v27957_v34  ;;  %v10894_v37 = vmul.f32 %v22907_v4, %v27954_v60  ;;  %v10893_v33 = vmul.f32 %v22907_v4, %v27951_v56  ;;  %v22050_v4 = vld [vmem:[%s30452_s23 + $0x6d0] ss:$48 sps:$4 sm:$0xff]  }
 0xd3d   : > { %v22909_v61 = vpop.eup %22908  ;;  %v28267_v16 = vpack.c.bf16 %v10971_v27, %v10968_v24  ;;  %v28269_v22 = vpack.c.bf16 %v10972_v53, %v10969_v12  ;;  %v28271_v0 = vpack.c.bf16 %v10970_v63, %v10967_v13  ;;  %v22052_v24 = vld [vmem:[%s30452_s23 + $0x6d4] ss:$48 sps:$4 sm:$0xff]   ;;  %v22055_v12 = vld [vmem:[%s30452_s23 + $0x6cc] ss:$48 sps:$4 sm:$0xff]   ;;  %v22053_v27 = vld [vmem:[%s30452_s23 + $0x6c8] ss:$48 sps:$4 sm:$0xff]  }
 0xd3e   : > { %v10935_v44 = vmul.f32 %v27981_v31, %v10895_v7  ;;  %v10898_v48 = vmul.f32 %v22909_v61, %v27970_v3  ;;  %v10897_v39 = vmul.f32 %v22909_v61, %v27967_v40  ;;  %v10934_v45 = vmul.f32 %v27984_v47, %v10894_v37  ;;  %v22058_v53 = vld [vmem:[%s30452_s23 + $0x734] ss:$48 sps:$4 sm:$0xff]   ;;  %v22061_v13 = vld [vmem:[%s30452_s23 + $0x72c] ss:$48 sps:$4 sm:$0xff]   ;;  %v22056_v63 = vld [vmem:[%s30452_s23 + $0x730] ss:$48 sps:$4 sm:$0xff]  }
 0xd3f   : > { %12835 = vmatprep.mubr.bf16.mxu1 %v28267_v16  ;;  %12909 = vmatmul.mubr.bf16.gmra.mrb[84].mxu0 %v28269_v22  ;;  %v10896_v56 = vmul.f32 %v22909_v61, %v27964_v15  ;;  %v10933_v60 = vmul.f32 %v27987_v29, %v10893_v33  ;;  %v22059_v7 = vld [vmem:[%s30452_s23 + $0x728] ss:$48 sps:$4 sm:$0xff]   ;;  %v22064_v37 = vld [vmem:[%s30452_s23 + $0x794] ss:$48 sps:$4 sm:$0xff]   ;;  %v22067_v33 = vld [vmem:[%s30452_s23 + $0x78c] ss:$48 sps:$4 sm:$0xff]  }
 0xd40   : > { %v10938_v34 = vmul.f32 %v27981_v31, %v10898_v48  ;;  %12836 = vmatmul.mubr.bf16.gmra.mrb[228].mxu1 %v28271_v0  ;;  %12918 = vmatprep.mubr.bf16.mxu0 %v30461_v18  ;;  %v10937_v3 = vmul.f32 %v27984_v47, %v10897_v39  ;;  %v10974_v14 = vadd.f32 %v27993_v10, %v10934_v45  ;;  %v22038_v47 = vld [vmem:[%s30452_s23 + $0x610] ss:$48 sps:$4 sm:$0xff]   ;;  %v22070_v48 = vld [vmem:[%s30452_s23 + $0x7f4] ss:$48 sps:$4 sm:$0xff]   ;;  %v22073_v39 = vld [vmem:[%s30452_s23 + $0x7ec] ss:$48 sps:$4 sm:$0xff]  }
 0xd41   : > { %v10936_v40 = vmul.f32 %v27987_v29, %v10896_v56  ;;  %v10975_v43 = vadd.f32 %v27990_v51, %v10935_v44  ;;  %v10973_v1 = vadd.f32 %v27999_v20, %v10933_v60  ;;  %v22041_v29 = vld [vmem:[%s30452_s23 + $0x608] ss:$48 sps:$4 sm:$0xff]   ;;  %v22062_v61 = vld [vmem:[%s30452_s23 + $0x790] ss:$48 sps:$4 sm:$0xff]   ;;  %v22076_v60 = vld [vmem:[%s30452_s23 + $0x854] ss:$48 sps:$4 sm:$0xff]  }
 0xd42   : > { %v10977_v6 = vadd.f32 %v27993_v10, %v10937_v3  ;;  %v10978_v15 = vadd.f32 %v27990_v51, %v10938_v34  ;;  %v22046_v51 = vld [vmem:[%s30452_s23 + $0x674] ss:$48 sps:$4 sm:$0xff]   ;;  %v22049_v10 = vld [vmem:[%s30452_s23 + $0x66c] ss:$48 sps:$4 sm:$0xff]   ;;  %v22065_v44 = vld [vmem:[%s30452_s23 + $0x788] ss:$48 sps:$4 sm:$0xff]  }
 0xd43   : > { %v10976_v31 = vadd.f32 %v27999_v20, %v10936_v40  ;;  %v22044_v20 = vld [vmem:[%s30452_s23 + $0x670] ss:$48 sps:$4 sm:$0xff]   ;;  %v22071_v56 = vld [vmem:[%s30452_s23 + $0x7e8] ss:$48 sps:$4 sm:$0xff]   ;;  %v22079_v34 = vld [vmem:[%s30452_s23 + $0x84c] ss:$48 sps:$4 sm:$0xff]  }
 0xd44   : > { %v28292_v54 = vpack.c.bf16 %v10977_v6, %v10974_v14  ;;  %v28294_v36 = vpack.c.bf16 %v10978_v15, %v10975_v43  ;;  %v22068_v45 = vld [vmem:[%s30452_s23 + $0x7f0] ss:$48 sps:$4 sm:$0xff]   ;;  %v22077_v40 = vld [vmem:[%s30452_s23 + $0x848] ss:$48 sps:$4 sm:$0xff]   ;;  %v22082_v14 = vld [vmem:[%s30452_s23 + $0x8b4] ss:$48 sps:$4 sm:$0xff]  }
 0xd45   : > { %v28296_v32 = vpack.c.bf16 %v10976_v31, %v10973_v1  ;;  %v22074_v3 = vld [vmem:[%s30452_s23 + $0x850] ss:$48 sps:$4 sm:$0xff]   ;;  %v22085_v6 = vld [vmem:[%s30452_s23 + $0x8ac] ss:$48 sps:$4 sm:$0xff]   ;;  %v22083_v15 = vld [vmem:[%s30452_s23 + $0x8a8] ss:$48 sps:$4 sm:$0xff]  }
 0xd46   : > { %12845 = vmatprep.mubr.bf16.mxu1 %v28292_v54  ;;  %v22080_v43 = vld [vmem:[%s30452_s23 + $0x8b0] ss:$48 sps:$4 sm:$0xff]   ;;  %v22088_v1 = vld [vmem:[%s30452_s23 + $0x24] ss:$48 sps:$4 sm:$0xff]   ;;  %v22091_v31 = vld [vmem:[%s30452_s23 + $0x1c] ss:$48 sps:$4 sm:$0xff]  }
 0xd47   : > { %12919 = vmatmul.mubr.bf16.gmra.mrb[88].mxu0 %v28294_v36 }
 0xd48   : > { %12846 = vmatmul.mubr.bf16.gmra.mrb[232].mxu1 %v28296_v32  ;;  %13107 = vmatprep.mubr.bf16.mxu0 %v28024_v26 }
 0xd49   : > { %12961 = vmatprep.mubr.bf16.mxu1 %v28024_v26 }
 0xd4f   : > { %13108 = vmatmul.mubr.bf16.vlgmr.msra.gmra.mrb[92].mxu0 %v28026_v38 }
 0xd50   : > { %13149 = vmatpush1.bf16.msra.mxu0 %v22038_v47  ;;  %12962 = vmatmul.mubr.bf16.vlgmr.msra.gmra.mrb[236].mxu1 %v28026_v38  ;;  %v22086_v47 = vld [vmem:[%s30452_s23 + $0x20] ss:$48 sps:$4 sm:$0xff]  }
 0xd51   : > { %13003 = vmatpush1.bf16.msra.mxu1 %v22041_v29  ;;  %13117 = vmatprep.mubr.bf16.mxu0 %v28059_v9  ;;  %v22089_v29 = vld [vmem:[%s30452_s23 + $0x18] ss:$48 sps:$4 sm:$0xff]  }
 0xd52   : > { %12971 = vmatprep.mubr.bf16.mxu1 %v28059_v9  ;;  %13150 = vmatprep.subr.bf16.mxu0 %v22046_v51  ;;  %v22094_v51 = vld [vmem:[%s30452_s23 + $0x84] ss:$48 sps:$4 sm:$0xff]  }
 0xd53   : > { %13004 = vmatprep.subr.bf16.mxu1 %v22049_v10  ;;  %v22097_v10 = vld [vmem:[%s30452_s23 + $0x7c] ss:$48 sps:$4 sm:$0xff]  }
 0xd54   : > { %13151 = vmatpush1.bf16.msra.mxu0 %v22044_v20  ;;  %v22092_v20 = vld [vmem:[%s30452_s23 + $0x80] ss:$48 sps:$4 sm:$0xff]  }
 0xd55   : > { %13005 = vmatpush1.bf16.msra.mxu1 %v22047_v25  ;;  %13152 = vmatprep.subr.bf16.mxu0 %v22052_v24  ;;  %v22095_v25 = vld [vmem:[%s30452_s23 + $0x78] ss:$48 sps:$4 sm:$0xff]   ;;  %v22100_v24 = vld [vmem:[%s30452_s23 + $0xe4] ss:$48 sps:$4 sm:$0xff]  }
 0xd56   : > { %13006 = vmatprep.subr.bf16.mxu1 %v22055_v12  ;;  %v22103_v12 = vld [vmem:[%s30452_s23 + $0xdc] ss:$48 sps:$4 sm:$0xff]  }
 0xd57   : > { %13118 = vmatmul.mubr.bf16.gmra.mrb[96].mxu0 %v28079_v30 }
 0xd58   : > { %13153 = vmatpush1.bf16.msra.mxu0 %v22050_v4  ;;  %12972 = vmatmul.mubr.bf16.gmra.mrb[240].mxu1 %v28079_v30  ;;  %v22098_v4 = vld [vmem:[%s30452_s23 + $0xe0] ss:$48 sps:$4 sm:$0xff]  }
 0xd59   : > { %13007 = vmatpush1.bf16.msra.mxu1 %v22053_v27  ;;  %13127 = vmatprep.mubr.bf16.mxu0 %v28267_v16  ;;  %v22101_v27 = vld [vmem:[%s30452_s23 + $0xd8] ss:$48 sps:$4 sm:$0xff]  }
 0xd5a   : > { %12981 = vmatprep.mubr.bf16.mxu1 %v28267_v16  ;;  %13154 = vmatprep.subr.bf16.mxu0 %v22058_v53  ;;  %v22106_v53 = vld [vmem:[%s30452_s23 + $0x144] ss:$48 sps:$4 sm:$0xff]  }
 0xd5b   : > { %13008 = vmatprep.subr.bf16.mxu1 %v22061_v13  ;;  %v22109_v13 = vld [vmem:[%s30452_s23 + $0x13c] ss:$48 sps:$4 sm:$0xff]  }
 0xd5c   : > { %13155 = vmatpush1.bf16.msra.mxu0 %v22056_v63  ;;  %v22104_v63 = vld [vmem:[%s30452_s23 + $0x140] ss:$48 sps:$4 sm:$0xff]  }
 0xd5d   : > { %13009 = vmatpush1.bf16.msra.mxu1 %v22059_v7  ;;  %13156 = vmatprep.subr.bf16.mxu0 %v22064_v37  ;;  %v22107_v7 = vld [vmem:[%s30452_s23 + $0x138] ss:$48 sps:$4 sm:$0xff]   ;;  %v22112_v37 = vld [vmem:[%s30452_s23 + $0x1a4] ss:$48 sps:$4 sm:$0xff]  }
 0xd5e   : > { %13010 = vmatprep.subr.bf16.mxu1 %v22067_v33  ;;  %v22115_v33 = vld [vmem:[%s30452_s23 + $0x19c] ss:$48 sps:$4 sm:$0xff]  }
 0xd5f   : > { %13128 = vmatmul.mubr.bf16.gmra.mrb[100].mxu0 %v28271_v0 }
 0xd60   : > { %13157 = vmatpush1.bf16.msra.mxu0 %v22062_v61  ;;  %12982 = vmatmul.mubr.bf16.gmra.mrb[244].mxu1 %v28271_v0  ;;  %v22110_v61 = vld [vmem:[%s30452_s23 + $0x1a0] ss:$48 sps:$4 sm:$0xff]  }
 0xd61   : > { %13011 = vmatpush1.bf16.msra.mxu1 %v22065_v44  ;;  %13137 = vmatprep.mubr.bf16.mxu0 %v28292_v54  ;;  %v22113_v44 = vld [vmem:[%s30452_s23 + $0x198] ss:$48 sps:$4 sm:$0xff]  }
 0xd62   : > { %12991 = vmatprep.mubr.bf16.mxu1 %v28292_v54  ;;  %13158 = vmatprep.subr.bf16.mxu0 %v22070_v48  ;;  %v22118_v48 = vld [vmem:[%s30452_s23 + $0x204] ss:$48 sps:$4 sm:$0xff]  }
 0xd63   : > { %13012 = vmatprep.subr.bf16.mxu1 %v22073_v39  ;;  %v22121_v39 = vld [vmem:[%s30452_s23 + $0x1fc] ss:$48 sps:$4 sm:$0xff]  }
 0xd64   : > { %13159 = vmatpush1.bf16.msra.mxu0 %v22068_v45  ;;  %v22116_v45 = vld [vmem:[%s30452_s23 + $0x200] ss:$48 sps:$4 sm:$0xff]  }
 0xd65   : > { %13013 = vmatpush1.bf16.msra.mxu1 %v22071_v56  ;;  %13160 = vmatprep.subr.bf16.mxu0 %v22076_v60  ;;  %v11279_v56 = vld [vmem:[#allocation11] sm:$0xff]  ;;  %v22119_v60 = vld [vmem:[%s30452_s23 + $0x1f8] ss:$48 sps:$4 sm:$0xff]  }
 0xd66   : > { %13014 = vmatprep.subr.bf16.mxu1 %v22079_v34  ;;  %v22124_v34 = vld [vmem:[%s30452_s23 + $0x264] ss:$48 sps:$4 sm:$0xff]  }
 0xd67   : > { %13138 = vmatmul.mubr.bf16.gmra.mrb[104].mxu0 %v28296_v32 }
 0xd68   : > { %13161 = vmatpush1.bf16.msra.mxu0 %v22074_v3  ;;  %12992 = vmatmul.mubr.bf16.gmra.mrb[248].mxu1 %v28296_v32  ;;  %v22127_v3 = vld [vmem:[%s30452_s23 + $0x25c] ss:$48 sps:$4 sm:$0xff]  }
 0xd69   : > { %13015 = vmatpush1.bf16.msra.mxu1 %v22077_v40  ;;  %13162 = vmatprep.subr.bf16.mxu0 %v22082_v14  ;;  %v28499_v40 = vrot.slane %v11279_v56, %v30443_v21  ;;  %v22122_v14 = vld [vmem:[%s30452_s23 + $0x260] ss:$48 sps:$4 sm:$0xff]  }
 0xd6a   : > { %13016 = vmatprep.subr.bf16.mxu1 %v22085_v6  ;;  %13180 = vmatprep.mubr.bf16.mxu0 %v30461_v18  ;;  %v28506_v6 = vrot.slane %v11279_v56, %v30444_v49 }
 0xd6b   : > { %13034 = vmatprep.mubr.bf16.mxu1 %v30461_v18 }
 0xd6c   : > { %13163 = vmatpush1.bf16.msra.mxu0 %v22080_v43 }
 0xd6d   : > { %13017 = vmatpush1.bf16.msra.mxu1 %v22083_v15  ;;  %13367 = vmatprep.subr.bf16.mxu0 %v22088_v1  ;;  %v22125_v15 = vld [vmem:[%s30452_s23 + $0x258] ss:$48 sps:$4 sm:$0xff]  }
 0xd6e   : > { %13221 = vmatprep.subr.bf16.mxu1 %v22091_v31 }
 0xd6f   : > { %13181 = vmatmul.mubr.bf16.vlgmr.msra.gmra.mrb[92].mxu0 %v28022_v62 }
 0xd70   : > { %13368 = vmatpush1.bf16.msra.mxu0 %v22086_v47  ;;  %13035 = vmatmul.mubr.bf16.vlgmr.msra.gmra.mrb[236].mxu1 %v28022_v62  ;;  %v22130_v47 = vld [vmem:[%s30452_s23 + $0x2c4] ss:$48 sps:$4 sm:$0xff]  }
 0xd71   : > { %13222 = vmatpush1.bf16.msra.mxu1 %v22089_v29  ;;  %13369 = vmatprep.subr.bf16.mxu0 %v22094_v51 }
 0xd72   : > { %13223 = vmatprep.subr.bf16.mxu1 %v22097_v10  ;;  %13190 = vmatprep.mubr.bf16.mxu0 %v30461_v18 }
 0xd73   : > { %13044 = vmatprep.mubr.bf16.mxu1 %v30461_v18 }
 0xd74   : > { %13370 = vmatpush1.bf16.msra.mxu0 %v22092_v20  ;;  %v22133_v20 = vld [vmem:[%s30452_s23 + $0x2bc] ss:$48 sps:$4 sm:$0xff]  }
 0xd75   : > { %13224 = vmatpush1.bf16.msra.mxu1 %v22095_v25  ;;  %13371 = vmatprep.subr.bf16.mxu0 %v22100_v24 }
 0xd76   : > { %13225 = vmatprep.subr.bf16.mxu1 %v22103_v12 }
 0xd77   : > { %13191 = vmatmul.mubr.bf16.gmra.mrb[96].mxu0 %v28071_v58 }
 0xd78   : > { %13372 = vmatpush1.bf16.msra.mxu0 %v22098_v4  ;;  %13045 = vmatmul.mubr.bf16.gmra.mrb[240].mxu1 %v28071_v58  ;;  %v22128_v4 = vld [vmem:[%s30452_s23 + $0x2c0] ss:$48 sps:$4 sm:$0xff]  }
 0xd79   : > { %13226 = vmatpush1.bf16.msra.mxu1 %v22101_v27  ;;  %13373 = vmatprep.subr.bf16.mxu0 %v22106_v53 }
 0xd7a   : > { %13227 = vmatprep.subr.bf16.mxu1 %v22109_v13  ;;  %13200 = vmatprep.mubr.bf16.mxu0 %v30461_v18 }
 0xd7b   : > { %13054 = vmatprep.mubr.bf16.mxu1 %v30461_v18 }
 0xd7c   : > { %13374 = vmatpush1.bf16.msra.mxu0 %v22104_v63  ;;  %v22131_v63 = vld [vmem:[%s30452_s23 + $0x2b8] ss:$48 sps:$4 sm:$0xff]  }
 0xd7d   : > { %13228 = vmatpush1.bf16.msra.mxu1 %v22107_v7  ;;  %13375 = vmatprep.subr.bf16.mxu0 %v22112_v37  ;;  %v22136_v7 = vld [vmem:[%s30452_s23 + $0x324] ss:$48 sps:$4 sm:$0xff]  }
 0xd7e   : > { %13229 = vmatprep.subr.bf16.mxu1 %v22115_v33 }
 0xd7f   : > { %13201 = vmatmul.mubr.bf16.gmra.mrb[100].mxu0 %v28269_v22 }
 0xd80   : > { %13376 = vmatpush1.bf16.msra.mxu0 %v22110_v61  ;;  %13055 = vmatmul.mubr.bf16.gmra.mrb[244].mxu1 %v28269_v22  ;;  %v22139_v61 = vld [vmem:[%s30452_s23 + $0x31c] ss:$48 sps:$4 sm:$0xff]  }
 0xd81   : > { %13230 = vmatpush1.bf16.msra.mxu1 %v22113_v44  ;;  %13377 = vmatprep.subr.bf16.mxu0 %v22118_v48 }
 0xd82   : > { %13231 = vmatprep.subr.bf16.mxu1 %v22121_v39  ;;  %13210 = vmatprep.mubr.bf16.mxu0 %v30461_v18  ;;  %v22134_v39 = vld [vmem:[%s30452_s23 + $0x320] ss:$48 sps:$4 sm:$0xff]  }
 0xd83   : > { %13064 = vmatprep.mubr.bf16.mxu1 %v30461_v18 }
 0xd84   : > { %13378 = vmatpush1.bf16.msra.mxu0 %v22116_v45  ;;  %v22137_v45 = vld [vmem:[%s30452_s23 + $0x318] ss:$48 sps:$4 sm:$0xff]  }
 0xd85   : > { %13232 = vmatpush1.bf16.msra.mxu1 %v22119_v60  ;;  %v12890_v43 = vpop.f32.mrb[76].mxu0  ;;  %13379 = vmatprep.subr.bf16.mxu0 %v22124_v34 }
 0xd86   : > { %v12817_v1 = vpop.f32.mrb[220].mxu1  ;;  %v12892_v31 = vpop.f32.mrb[77].mxu0  ;;  %13233 = vmatprep.subr.bf16.mxu1 %v22127_v3  ;;  %v22142_v3 = vld [vmem:[%s30452_s23 + $0x384] ss:$48 sps:$4 sm:$0xff]  }
 0xd87   : > { %v12818_v29 = vadd.f32 %v12817_v1, %v28499_v40  ;;  %13211 = vmatmul.mubr.bf16.gmra.mrb[104].mxu0 %v28294_v36  ;;  %v12819_v51 = vpop.f32.mrb[221].mxu1  ;;  %v12894_v10 = vpop.f32.mrb[78].mxu0 }
 0xd88   : > { %13380 = vmatpush1.bf16.msra.mxu0 %v22122_v14  ;;  %v12820_v25 = vadd.f32 %v12819_v51, %v28506_v6  ;;  %13065 = vmatmul.mubr.bf16.gmra.mrb[248].mxu1 %v28294_v36  ;;  %v12821_v24 = vpop.f32.mrb[222].mxu1  ;;  %v12896_v12 = vpop.f32.mrb[79].mxu0 }
 0xd89   : > { %v12891_v27 = vadd.f32 %v12890_v43, %v12818_v29  ;;  %13234 = vmatpush1.bf16.msra.mxu1 %v22125_v15  ;;  %13399 = vmatprep.mubr.bf16.mxu0 %v28024_v26  ;;  %v12822_v53 = vadd.f32 %v12821_v24, %v28499_v40  ;;  %v12823_v13 = vpop.f32.mrb[223].mxu1 }
 0xd8a   : > { %v12893_v37 = vadd.f32 %v12892_v31, %v12820_v25  ;;  %13253 = vmatprep.mubr.bf16.mxu1 %v28024_v26  ;;  %v12824_v33 = vadd.f32 %v12823_v13, %v28506_v6  ;;  %13381 = vmatprep.subr.bf16.mxu0 %v22130_v47  ;;  %v22145_v31 = vld [vmem:[%s30452_s23 + $0x37c] ss:$48 sps:$4 sm:$0xff]  }
 0xd8b   : > { %v12895_v44 = vadd.f32 %v12894_v10, %v12822_v53  ;;  %13235 = vmatprep.subr.bf16.mxu1 %v22133_v20  ;;  %v13659_v56 = vmax.f32 %v12891_v27, 0.0 }
 0xd8c   : > { %v12897_v48 = vadd.f32 %v12896_v12, %v12824_v33  ;;  %13382 = vmatpush1.bf16.msra.mxu0 %v22128_v4  ;;  %v13660_v14 = vmax.f32 %v12893_v37, 0.0  ;;  %v22140_v12 = vld [vmem:[%s30452_s23 + $0x380] ss:$48 sps:$4 sm:$0xff]  }
 0xd8d   : > { %v13671_v60 = vmax.f32 %v12895_v44, 0.0  ;;  %13236 = vmatpush1.bf16.msra.mxu1 %v22131_v63  ;;  %v12900_v34 = vpop.f32.mrb[80].mxu0  ;;  %13383 = vmatprep.subr.bf16.mxu0 %v22136_v7  ;;  %v22143_v63 = vld [vmem:[%s30452_s23 + $0x378] ss:$48 sps:$4 sm:$0xff]   ;;  %v22148_v7 = vld [vmem:[%s30452_s23 + $0x3e4] ss:$48 sps:$4 sm:$0xff]  }
 0xd8e   : > { %v13672_v43 = vmax.f32 %v12897_v48, 0.0  ;;  %v12827_v15 = vpop.f32.mrb[224].mxu1  ;;  %v12902_v1 = vpop.f32.mrb[81].mxu0  ;;  %13237 = vmatprep.subr.bf16.mxu1 %v22139_v61  ;;  %v22151_v61 = vld [vmem:[%s30452_s23 + $0x3dc] ss:$48 sps:$4 sm:$0xff]  }
 0xd8f   : > { %v28549_v47 = vpack.c.bf16 %v13671_v60, %v13659_v56  ;;  %v12828_v29 = vadd.f32 %v12827_v15, %v28499_v40  ;;  %v12829_v51 = vpop.f32.mrb[225].mxu1  ;;  %v12904_v10 = vpop.f32.mrb[82].mxu0  ;;  %v22149_v60 = vld [vmem:[%s30452_s23 + $0x3d8] ss:$48 sps:$4 sm:$0xff]  }
 0xd90   : > { %13384 = vmatpush1.bf16.msra.mxu0 %v22134_v39  ;;  %v12830_v20 = vadd.f32 %v12829_v51, %v28506_v6  ;;  %v12831_v25 = vpop.f32.mrb[226].mxu1  ;;  %v12906_v24 = vpop.f32.mrb[83].mxu0  ;;  %v28556_v4 = vpack.c.bf16 %v13672_v43, %v13660_v14  ;;  %v22146_v39 = vld [vmem:[%s30452_s23 + $0x3e0] ss:$48 sps:$4 sm:$0xff]   ;;  %v22157_v43 = vld [vmem:[%s30452_s23 + $0x43c] ss:$48 sps:$4 sm:$0xff]  }
 0xd91   : > { %v12901_v27 = vadd.f32 %v12900_v34, %v12828_v29  ;;  %13238 = vmatpush1.bf16.msra.mxu1 %v22137_v45  ;;  %v12832_v53 = vadd.f32 %v12831_v25, %v28499_v40  ;;  %v12833_v13 = vpop.f32.mrb[227].mxu1  ;;  %13385 = vmatprep.subr.bf16.mxu0 %v22142_v3  ;;  %v22154_v34 = vld [vmem:[%s30452_s23 + $0x444] ss:$48 sps:$4 sm:$0xff]   ;;  %v22155_v29 = vld [vmem:[%s30452_s23 + $0x438] ss:$48 sps:$4 sm:$0xff]  }
 0xd92   : > { %v12903_v37 = vadd.f32 %v12902_v1, %v12830_v20  ;;  %v12834_v33 = vadd.f32 %v12833_v13, %v28506_v6  ;;  %13239 = vmatprep.subr.bf16.mxu1 %v22145_v31  ;;  %v22152_v1 = vld [vmem:[%s30452_s23 + $0x440] ss:$48 sps:$4 sm:$0xff]   ;;  %v22160_v51 = vld [vmem:[%s30452_s23 + $0x4a4] ss:$48 sps:$4 sm:$0xff]   ;;  %v22161_v25 = vld [vmem:[%s30452_s23 + $0x498] ss:$48 sps:$4 sm:$0xff]  }
 0xd93   : > { %v12905_v44 = vadd.f32 %v12904_v10, %v12832_v53  ;;  %v13683_v45 = vmax.f32 %v12901_v27, 0.0  ;;  %v22163_v10 = vld [vmem:[%s30452_s23 + $0x49c] ss:$48 sps:$4 sm:$0xff]   ;;  %v22158_v20 = vld [vmem:[%s30452_s23 + $0x4a0] ss:$48 sps:$4 sm:$0xff]  }
 0xd94   : > { %v12907_v48 = vadd.f32 %v12906_v24, %v12834_v33  ;;  %13386 = vmatpush1.bf16.msra.mxu0 %v22140_v12  ;;  %v13684_v3 = vmax.f32 %v12903_v37, 0.0  ;;  %v22166_v24 = vld [vmem:[%s30452_s23 + $0x504] ss:$48 sps:$4 sm:$0xff]   ;;  %v22169_v12 = vld [vmem:[%s30452_s23 + $0x4fc] ss:$48 sps:$4 sm:$0xff]  }
 0xd95   : > { %v13695_v56 = vmax.f32 %v12905_v44, 0.0  ;;  %13240 = vmatpush1.bf16.msra.mxu1 %v22143_v63  ;;  %13387 = vmatprep.subr.bf16.mxu0 %v22148_v7  ;;  %v22164_v27 = vld [vmem:[%s30452_s23 + $0x500] ss:$48 sps:$4 sm:$0xff]   ;;  %v22167_v53 = vld [vmem:[%s30452_s23 + $0x4f8] ss:$48 sps:$4 sm:$0xff]  }
 0xd96   : > { %v13696_v14 = vmax.f32 %v12907_v48, 0.0  ;;  %13241 = vmatprep.subr.bf16.mxu1 %v22151_v61  ;;  %v22172_v13 = vld [vmem:[%s30452_s23 + $0x564] ss:$48 sps:$4 sm:$0xff]   ;;  %v22175_v63 = vld [vmem:[%s30452_s23 + $0x55c] ss:$48 sps:$4 sm:$0xff]  }
 0xd97   : > { %v28581_v15 = vpack.c.bf16 %v13695_v56, %v13683_v45  ;;  %v22170_v7 = vld [vmem:[%s30452_s23 + $0x560] ss:$48 sps:$4 sm:$0xff]   ;;  %v22173_v37 = vld [vmem:[%s30452_s23 + $0x558] ss:$48 sps:$4 sm:$0xff]   ;;  %v22178_v33 = vld [vmem:[%s30452_s23 + $0x5c4] ss:$48 sps:$4 sm:$0xff]  }
 0xd98   : > { %13388 = vmatpush1.bf16.msra.mxu0 %v22146_v39  ;;  %v28586_v31 = vpack.c.bf16 %v13696_v14, %v13684_v3  ;;  %v22181_v61 = vld [vmem:[%s30452_s23 + $0x5bc] ss:$48 sps:$4 sm:$0xff]   ;;  %v22176_v44 = vld [vmem:[%s30452_s23 + $0x5c0] ss:$48 sps:$4 sm:$0xff]   ;;  %v22179_v48 = vld [vmem:[%s30452_s23 + $0x5b8] ss:$48 sps:$4 sm:$0xff]  }
 0xd99   : > { %13242 = vmatpush1.bf16.msra.mxu1 %v22149_v60  ;;  %13389 = vmatprep.subr.bf16.mxu0 %v22154_v34  ;;  %v22184_v39 = vld [vmem:[%s30452_s23 + $0x624] ss:$48 sps:$4 sm:$0xff]   ;;  %v22187_v45 = vld [vmem:[%s30452_s23 + $0x61c] ss:$48 sps:$4 sm:$0xff]   ;;  %v22182_v56 = vld [vmem:[%s30452_s23 + $0x620] ss:$48 sps:$4 sm:$0xff]  }
 0xd9a   : > { %13243 = vmatprep.subr.bf16.mxu1 %v22157_v43  ;;  %v22185_v60 = vld [vmem:[%s30452_s23 + $0x618] ss:$48 sps:$4 sm:$0xff]   ;;  %v22190_v34 = vld [vmem:[%s30452_s23 + $0x684] ss:$48 sps:$4 sm:$0xff]   ;;  %v22193_v3 = vld [vmem:[%s30452_s23 + $0x67c] ss:$48 sps:$4 sm:$0xff]  }
 0xd9b   : > { %v22188_v14 = vld [vmem:[%s30452_s23 + $0x680] ss:$48 sps:$4 sm:$0xff]   ;;  %v22191_v43 = vld [vmem:[%s30452_s23 + $0x678] ss:$48 sps:$4 sm:$0xff]  }
 0xd9c   : > { %13390 = vmatpush1.bf16.msra.mxu0 %v22152_v1  ;;  %v22196_v1 = vld [vmem:[%s30452_s23 + $0x6e4] ss:$48 sps:$4 sm:$0xff]  }
 0xd9d   : > { %13244 = vmatpush1.bf16.msra.mxu1 %v22155_v29  ;;  %13391 = vmatprep.subr.bf16.mxu0 %v22160_v51  ;;  %v22199_v29 = vld [vmem:[%s30452_s23 + $0x6dc] ss:$48 sps:$4 sm:$0xff]   ;;  %v22194_v51 = vld [vmem:[%s30452_s23 + $0x6e0] ss:$48 sps:$4 sm:$0xff]  }
 0xd9e   : > { %13245 = vmatprep.subr.bf16.mxu1 %v22163_v10  ;;  %v22197_v10 = vld [vmem:[%s30452_s23 + $0x6d8] ss:$48 sps:$4 sm:$0xff]  }
 0xda0   : > { %13392 = vmatpush1.bf16.msra.mxu0 %v22158_v20  ;;  %v22202_v20 = vld [vmem:[%s30452_s23 + $0x744] ss:$48 sps:$4 sm:$0xff]  }
 0xda1   : > { %13246 = vmatpush1.bf16.msra.mxu1 %v22161_v25  ;;  %13393 = vmatprep.subr.bf16.mxu0 %v22166_v24  ;;  %v22205_v25 = vld [vmem:[%s30452_s23 + $0x73c] ss:$48 sps:$4 sm:$0xff]   ;;  %v22200_v24 = vld [vmem:[%s30452_s23 + $0x740] ss:$48 sps:$4 sm:$0xff]  }
 0xda2   : > { %13247 = vmatprep.subr.bf16.mxu1 %v22169_v12  ;;  %v22203_v12 = vld [vmem:[%s30452_s23 + $0x738] ss:$48 sps:$4 sm:$0xff]  }
 0xda4   : > { %13394 = vmatpush1.bf16.msra.mxu0 %v22164_v27  ;;  %v22208_v27 = vld [vmem:[%s30452_s23 + $0x7a4] ss:$48 sps:$4 sm:$0xff]  }
 0xda5   : > { %13248 = vmatpush1.bf16.msra.mxu1 %v22167_v53  ;;  %13395 = vmatprep.subr.bf16.mxu0 %v22172_v13  ;;  %v22211_v53 = vld [vmem:[%s30452_s23 + $0x79c] ss:$48 sps:$4 sm:$0xff]   ;;  %v22206_v13 = vld [vmem:[%s30452_s23 + $0x7a0] ss:$48 sps:$4 sm:$0xff]  }
 0xda6   : > { %13249 = vmatprep.subr.bf16.mxu1 %v22175_v63  ;;  %v22209_v63 = vld [vmem:[%s30452_s23 + $0x798] ss:$48 sps:$4 sm:$0xff]  }
 0xda8   : > { %13396 = vmatpush1.bf16.msra.mxu0 %v22170_v7  ;;  %v22214_v7 = vld [vmem:[%s30452_s23 + $0x804] ss:$48 sps:$4 sm:$0xff]  }
 0xda9   : > { %13250 = vmatpush1.bf16.msra.mxu1 %v22173_v37  ;;  %13397 = vmatprep.subr.bf16.mxu0 %v22178_v33  ;;  %v22217_v37 = vld [vmem:[%s30452_s23 + $0x7fc] ss:$48 sps:$4 sm:$0xff]   ;;  %v22212_v33 = vld [vmem:[%s30452_s23 + $0x800] ss:$48 sps:$4 sm:$0xff]  }
 0xdaa   : > { %13251 = vmatprep.subr.bf16.mxu1 %v22181_v61  ;;  %v22215_v61 = vld [vmem:[%s30452_s23 + $0x7f8] ss:$48 sps:$4 sm:$0xff]  }
 0xdac   : > { %13398 = vmatpush1.bf16.msra.mxu0 %v22176_v44  ;;  %v22220_v44 = vld [vmem:[%s30452_s23 + $0x864] ss:$48 sps:$4 sm:$0xff]  }
 0xdad   : > { %13252 = vmatpush1.bf16.msra.mxu1 %v22179_v48  ;;  %13440 = vmatprep.subr.bf16.mxu0 %v22184_v39  ;;  %v22223_v48 = vld [vmem:[%s30452_s23 + $0x85c] ss:$48 sps:$4 sm:$0xff]   ;;  %v22218_v39 = vld [vmem:[%s30452_s23 + $0x860] ss:$48 sps:$4 sm:$0xff]  }
 0xdae   : > { %13294 = vmatprep.subr.bf16.mxu1 %v22187_v45  ;;  %v22221_v45 = vld [vmem:[%s30452_s23 + $0x858] ss:$48 sps:$4 sm:$0xff]  }
 0xdaf   : > { %13400 = vmatmul.mubr.bf16.vlgmr.msra.gmra.mrb[108].mxu0 %v28026_v38 }
 0xdb0   : > { %13254 = vmatmul.mubr.bf16.vlgmr.msra.gmra.mrb[252].mxu1 %v28026_v38  ;;  %13409 = vmatprep.mubr.bf16.mxu0 %v28059_v9 }
 0xdb1   : > { %13441 = vmatpush1.bf16.msra.mxu0 %v22182_v56  ;;  %13263 = vmatprep.mubr.bf16.mxu1 %v28059_v9  ;;  %v22226_v56 = vld [vmem:[%s30452_s23 + $0x8c4] ss:$48 sps:$4 sm:$0xff]  }
 0xdb2   : > { %13295 = vmatpush1.bf16.msra.mxu1 %v22185_v60  ;;  %13442 = vmatprep.subr.bf16.mxu0 %v22190_v34  ;;  %v22229_v60 = vld [vmem:[%s30452_s23 + $0x8bc] ss:$48 sps:$4 sm:$0xff]   ;;  %v22224_v34 = vld [vmem:[%s30452_s23 + $0x8c0] ss:$48 sps:$4 sm:$0xff]  }
 0xdb3   : > { %13296 = vmatprep.subr.bf16.mxu1 %v22193_v3  ;;  %v22227_v3 = vld [vmem:[%s30452_s23 + $0x8b8] ss:$48 sps:$4 sm:$0xff]  }
 0xdb5   : > { %13443 = vmatpush1.bf16.msra.mxu0 %v22188_v14  ;;  %v22232_v14 = vld [vmem:[%s30462_s21 + $0x4] ss:$12 sps:$4 sm:$0xff]  }
 0xdb6   : > { %13297 = vmatpush1.bf16.msra.mxu1 %v22191_v43  ;;  %13444 = vmatprep.subr.bf16.mxu0 %v22196_v1  ;;  %v22235_v43 = vld [vmem:[%s30452_s23 + $0x2c] ss:$48 sps:$4 sm:$0xff]  }
 0xdb7   : > { %13410 = vmatmul.mubr.bf16.gmra.mrb[112].mxu0 %v28079_v30  ;;  %13298 = vmatprep.subr.bf16.mxu1 %v22199_v29  ;;  %v22230_v1 = vld [vmem:[%s30462_s21] ss:$12 sps:$4 sm:$0xff]   ;;  %v22233_v29 = vld [vmem:[%s30452_s23 + $0x28] ss:$48 sps:$4 sm:$0xff]  }
 0xdb8   : > { %13264 = vmatmul.mubr.bf16.gmra.mrb[0].mxu1 %v28079_v30  ;;  %13419 = vmatprep.mubr.bf16.mxu0 %v28267_v16 }
 0xdb9   : > { %13445 = vmatpush1.bf16.msra.mxu0 %v22194_v51  ;;  %13273 = vmatprep.mubr.bf16.mxu1 %v28267_v16  ;;  %v22238_v51 = vld [vmem:[%s30462_s21 + $0x1c] ss:$12 sps:$4 sm:$0xff]  }
 0xdba   : > { %13299 = vmatpush1.bf16.msra.mxu1 %v22197_v10  ;;  %13446 = vmatprep.subr.bf16.mxu0 %v22202_v20  ;;  %v22241_v10 = vld [vmem:[%s30452_s23 + $0x8c] ss:$48 sps:$4 sm:$0xff]   ;;  %v22236_v20 = vld [vmem:[%s30462_s21 + $0x18] ss:$12 sps:$4 sm:$0xff]  }
 0xdbb   : > { %13300 = vmatprep.subr.bf16.mxu1 %v22205_v25  ;;  %v22239_v25 = vld [vmem:[%s30452_s23 + $0x88] ss:$48 sps:$4 sm:$0xff]  }
 0xdbd   : > { %13447 = vmatpush1.bf16.msra.mxu0 %v22200_v24  ;;  %v22244_v24 = vld [vmem:[%s30462_s21 + $0x34] ss:$12 sps:$4 sm:$0xff]  }
 0xdbe   : > { %13301 = vmatpush1.bf16.msra.mxu1 %v22203_v12  ;;  %13448 = vmatprep.subr.bf16.mxu0 %v22208_v27  ;;  %v22247_v12 = vld [vmem:[%s30452_s23 + $0xec] ss:$48 sps:$4 sm:$0xff]  }
 0xdbf   : > { %13420 = vmatmul.mubr.bf16.gmra.mrb[116].mxu0 %v28271_v0  ;;  %13302 = vmatprep.subr.bf16.mxu1 %v22211_v53  ;;  %v22242_v27 = vld [vmem:[%s30462_s21 + $0x30] ss:$12 sps:$4 sm:$0xff]   ;;  %v22245_v53 = vld [vmem:[%s30452_s23 + $0xe8] ss:$48 sps:$4 sm:$0xff]  }
 0xdc0   : > { %13274 = vmatmul.mubr.bf16.gmra.mrb[4].mxu1 %v28271_v0  ;;  %13429 = vmatprep.mubr.bf16.mxu0 %v28292_v54 }
 0xdc1   : > { %13449 = vmatpush1.bf16.msra.mxu0 %v22206_v13  ;;  %13283 = vmatprep.mubr.bf16.mxu1 %v28292_v54  ;;  %v22250_v13 = vld [vmem:[%s30462_s21 + $0x4c] ss:$12 sps:$4 sm:$0xff]  }
 0xdc2   : > { %13303 = vmatpush1.bf16.msra.mxu1 %v22209_v63  ;;  %13450 = vmatprep.subr.bf16.mxu0 %v22214_v7  ;;  %v22253_v63 = vld [vmem:[%s30452_s23 + $0x14c] ss:$48 sps:$4 sm:$0xff]   ;;  %v22248_v7 = vld [vmem:[%s30462_s21 + $0x48] ss:$12 sps:$4 sm:$0xff]  }
 0xdc3   : > { %13304 = vmatprep.subr.bf16.mxu1 %v22217_v37  ;;  %v22251_v37 = vld [vmem:[%s30452_s23 + $0x148] ss:$48 sps:$4 sm:$0xff]  }
 0xdc5   : > { %13451 = vmatpush1.bf16.msra.mxu0 %v22212_v33  ;;  %v22256_v33 = vld [vmem:[%s30462_s21 + $0x64] ss:$12 sps:$4 sm:$0xff]  }
 0xdc6   : > { %13305 = vmatpush1.bf16.msra.mxu1 %v22215_v61  ;;  %13452 = vmatprep.subr.bf16.mxu0 %v22220_v44  ;;  %v22259_v61 = vld [vmem:[%s30452_s23 + $0x1ac] ss:$48 sps:$4 sm:$0xff]  }
 0xdc7   : > { %13430 = vmatmul.mubr.bf16.gmra.mrb[120].mxu0 %v28296_v32  ;;  %13306 = vmatprep.subr.bf16.mxu1 %v22223_v48  ;;  %v22254_v44 = vld [vmem:[%s30462_s21 + $0x60] ss:$12 sps:$4 sm:$0xff]   ;;  %v22257_v48 = vld [vmem:[%s30452_s23 + $0x1a8] ss:$48 sps:$4 sm:$0xff]  }
 0xdc8   : > { %13284 = vmatmul.mubr.bf16.gmra.mrb[8].mxu1 %v28296_v32  ;;  %13472 = vmatprep.mubr.bf16.mxu0 %v30461_v18 }
 0xdc9   : > { %13453 = vmatpush1.bf16.msra.mxu0 %v22218_v39  ;;  %13326 = vmatprep.mubr.bf16.mxu1 %v30461_v18  ;;  %v22262_v39 = vld [vmem:[%s30462_s21 + $0x7c] ss:$12 sps:$4 sm:$0xff]  }
 0xdca   : > { %13307 = vmatpush1.bf16.msra.mxu1 %v22221_v45  ;;  %13454 = vmatprep.subr.bf16.mxu0 %v22226_v56  ;;  %v22265_v45 = vld [vmem:[%s30452_s23 + $0x20c] ss:$48 sps:$4 sm:$0xff]   ;;  %v22260_v56 = vld [vmem:[%s30462_s21 + $0x78] ss:$12 sps:$4 sm:$0xff]  }
 0xdcb   : > { %13308 = vmatprep.subr.bf16.mxu1 %v22229_v60  ;;  %v22263_v60 = vld [vmem:[%s30452_s23 + $0x208] ss:$48 sps:$4 sm:$0xff]  }
 0xdcd   : > { %13455 = vmatpush1.bf16.msra.mxu0 %v22224_v34  ;;  %v22268_v34 = vld [vmem:[%s30462_s21 + $0x94] ss:$12 sps:$4 sm:$0xff]  }
 0xdce   : > { %13309 = vmatpush1.bf16.msra.mxu1 %v22227_v3  ;;  %15740 = vmatprep.subr.bf16.mxu0 %v22232_v14  ;;  %v22271_v3 = vld [vmem:[%s30452_s23 + $0x26c] ss:$48 sps:$4 sm:$0xff]  }
 0xdcf   : > { %13513 = vmatprep.subr.bf16.mxu1 %v22235_v43  ;;  %v22266_v14 = vld [vmem:[%s30462_s21 + $0x90] ss:$12 sps:$4 sm:$0xff]   ;;  %v22269_v43 = vld [vmem:[%s30452_s23 + $0x268] ss:$48 sps:$4 sm:$0xff]  }
 0xdd0   : > { %13473 = vmatmul.mubr.bf16.vlgmr.msra.gmra.mrb[108].mxu0 %v28022_v62 }
 0xdd1   : > { %13327 = vmatmul.mubr.bf16.vlgmr.msra.gmra.mrb[252].mxu1 %v28022_v62  ;;  %15741 = vmatpush1.bf16.msra.mxu0 %v22230_v1  ;;  %v22274_v1 = vld [vmem:[%s30462_s21 + $0xac] ss:$12 sps:$4 sm:$0xff]  }
 0xdd2   : > { %13514 = vmatpush1.bf16.msra.mxu1 %v22233_v29  ;;  %15742 = vmatprep.subr.bf16.mxu0 %v22238_v51  ;;  %v22277_v29 = vld [vmem:[%s30452_s23 + $0x2cc] ss:$48 sps:$4 sm:$0xff]   ;;  %v22272_v51 = vld [vmem:[%s30462_s21 + $0xa8] ss:$12 sps:$4 sm:$0xff]  }
 0xdd3   : > { %13515 = vmatprep.subr.bf16.mxu1 %v22241_v10  ;;  %13482 = vmatprep.mubr.bf16.mxu0 %v30461_v18  ;;  %v22275_v10 = vld [vmem:[%s30452_s23 + $0x2c8] ss:$48 sps:$4 sm:$0xff]  }
 0xdd4   : > { %13336 = vmatprep.mubr.bf16.mxu1 %v30461_v18 }
 0xdd5   : > { %15743 = vmatpush1.bf16.msra.mxu0 %v22236_v20  ;;  %v22280_v20 = vld [vmem:[%s30462_s21 + $0xc4] ss:$12 sps:$4 sm:$0xff]  }
 0xdd6   : > { %13516 = vmatpush1.bf16.msra.mxu1 %v22239_v25  ;;  %15744 = vmatprep.subr.bf16.mxu0 %v22244_v24  ;;  %v22283_v25 = vld [vmem:[%s30452_s23 + $0x32c] ss:$48 sps:$4 sm:$0xff]  }
 0xdd7   : > { %13517 = vmatprep.subr.bf16.mxu1 %v22247_v12  ;;  %v22278_v24 = vld [vmem:[%s30462_s21 + $0xc0] ss:$12 sps:$4 sm:$0xff]   ;;  %v22281_v12 = vld [vmem:[%s30452_s23 + $0x328] ss:$48 sps:$4 sm:$0xff]  }
 0xdd8   : > { %13483 = vmatmul.mubr.bf16.gmra.mrb[112].mxu0 %v28071_v58 }
 0xdd9   : > { %13337 = vmatmul.mubr.bf16.gmra.mrb[0].mxu1 %v28071_v58  ;;  %15745 = vmatpush1.bf16.msra.mxu0 %v22242_v27  ;;  %v22289_v27 = vld [vmem:[%s30452_s23 + $0x38c] ss:$48 sps:$4 sm:$0xff]  }
 0xdda   : > { %13518 = vmatpush1.bf16.msra.mxu1 %v22245_v53  ;;  %15746 = vmatprep.subr.bf16.mxu0 %v22250_v13  ;;  %v22284_v53 = vld [vmem:[%s30462_s21 + $0xd8] ss:$12 sps:$4 sm:$0xff]  }
 0xddb   : > { %13519 = vmatprep.subr.bf16.mxu1 %v22253_v63  ;;  %13492 = vmatprep.mubr.bf16.mxu0 %v30461_v18  ;;  %v22287_v13 = vld [vmem:[%s30452_s23 + $0x388] ss:$48 sps:$4 sm:$0xff]   ;;  %v22292_v63 = vld [vmem:[%s30462_s21 + $0xf4] ss:$12 sps:$4 sm:$0xff]  }
 0xddc   : > { %13346 = vmatprep.mubr.bf16.mxu1 %v30461_v18 }
 0xddd   : > { %15747 = vmatpush1.bf16.msra.mxu0 %v22248_v7  ;;  %v22295_v7 = vld [vmem:[%s30452_s23 + $0x3ec] ss:$48 sps:$4 sm:$0xff]  }
 0xdde   : > { %13520 = vmatpush1.bf16.msra.mxu1 %v22251_v37  ;;  %15748 = vmatprep.subr.bf16.mxu0 %v22256_v33  ;;  %v22290_v37 = vld [vmem:[%s30462_s21 + $0xf0] ss:$12 sps:$4 sm:$0xff]   ;;  %v22293_v33 = vld [vmem:[%s30452_s23 + $0x3e8] ss:$48 sps:$4 sm:$0xff]  }
 0xddf   : > { %13521 = vmatprep.subr.bf16.mxu1 %v22259_v61  ;;  %v22298_v61 = vld [vmem:[%s30462_s21 + $0x10c] ss:$12 sps:$4 sm:$0xff]  }
 0xde0   : > { %13493 = vmatmul.mubr.bf16.gmra.mrb[116].mxu0 %v28269_v22 }
 0xde1   : > { %13347 = vmatmul.mubr.bf16.gmra.mrb[4].mxu1 %v28269_v22  ;;  %15749 = vmatpush1.bf16.msra.mxu0 %v22254_v44  ;;  %v22301_v44 = vld [vmem:[%s30452_s23 + $0x44c] ss:$48 sps:$4 sm:$0xff]  }
 0xde2   : > { %13522 = vmatpush1.bf16.msra.mxu1 %v22257_v48  ;;  %15750 = vmatprep.subr.bf16.mxu0 %v22262_v39  ;;  %v22296_v48 = vld [vmem:[%s30462_s21 + $0x108] ss:$12 sps:$4 sm:$0xff]  }
 0xde3   : > { %13523 = vmatprep.subr.bf16.mxu1 %v22265_v45  ;;  %13502 = vmatprep.mubr.bf16.mxu0 %v30461_v18  ;;  %v22299_v39 = vld [vmem:[%s30452_s23 + $0x448] ss:$48 sps:$4 sm:$0xff]   ;;  %v22304_v45 = vld [vmem:[%s30462_s21 + $0x124] ss:$12 sps:$4 sm:$0xff]  }
 0xde4   : > { %13356 = vmatprep.mubr.bf16.mxu1 %v30461_v18 }
 0xde5   : > { %15751 = vmatpush1.bf16.msra.mxu0 %v22260_v56  ;;  %v22307_v56 = vld [vmem:[%s30452_s23 + $0x4ac] ss:$48 sps:$4 sm:$0xff]  }
 0xde6   : > { %13524 = vmatpush1.bf16.msra.mxu1 %v22263_v60  ;;  %15752 = vmatprep.subr.bf16.mxu0 %v22268_v34  ;;  %v22302_v60 = vld [vmem:[%s30462_s21 + $0x120] ss:$12 sps:$4 sm:$0xff]   ;;  %v22305_v34 = vld [vmem:[%s30452_s23 + $0x4a8] ss:$48 sps:$4 sm:$0xff]  }
 0xde7   : > { %13525 = vmatprep.subr.bf16.mxu1 %v22271_v3  ;;  %v22310_v3 = vld [vmem:[%s30462_s21 + $0x13c] ss:$12 sps:$4 sm:$0xff]  }
 0xde8   : > { %13503 = vmatmul.mubr.bf16.gmra.mrb[120].mxu0 %v28294_v36 }
 0xde9   : > { %13357 = vmatmul.mubr.bf16.gmra.mrb[8].mxu1 %v28294_v36  ;;  %15753 = vmatpush1.bf16.msra.mxu0 %v22266_v14  ;;  %v22313_v14 = vld [vmem:[%s30452_s23 + $0x50c] ss:$48 sps:$4 sm:$0xff]  }
 0xdea   : > { %15772 = vmatprep.mubr.bf16.mxu0 %v28556_v4  ;;  %13526 = vmatpush1.bf16.msra.mxu1 %v22269_v43  ;;  %v22308_v43 = vld [vmem:[%s30462_s21 + $0x138] ss:$12 sps:$4 sm:$0xff]  }
 0xdeb   : > { %13545 = vmatprep.mubr.bf16.mxu1 %v28024_v26  ;;  %15754 = vmatprep.subr.bf16.mxu0 %v22274_v1  ;;  %v22286_v26 = vld [vmem:[%s30462_s21 + $0xdc] ss:$12 sps:$4 sm:$0xff]  }
 0xdec   : > { %13527 = vmatprep.subr.bf16.mxu1 %v22277_v29  ;;  %v22311_v1 = vld [vmem:[%s30452_s23 + $0x508] ss:$48 sps:$4 sm:$0xff]   ;;  %v22316_v29 = vld [vmem:[%s30462_s21 + $0x154] ss:$12 sps:$4 sm:$0xff]  }
 0xded   : > { %15755 = vmatpush1.bf16.msra.mxu0 %v22272_v51  ;;  %v22319_v51 = vld [vmem:[%s30452_s23 + $0x56c] ss:$48 sps:$4 sm:$0xff]  }
 0xdee   : > { %13528 = vmatpush1.bf16.msra.mxu1 %v22275_v10  ;;  %15756 = vmatprep.subr.bf16.mxu0 %v22280_v20  ;;  %v22314_v10 = vld [vmem:[%s30462_s21 + $0x150] ss:$12 sps:$4 sm:$0xff]   ;;  %v22317_v20 = vld [vmem:[%s30452_s23 + $0x568] ss:$48 sps:$4 sm:$0xff]  }
 0xdef   : > { %13529 = vmatprep.subr.bf16.mxu1 %v22283_v25  ;;  %v22322_v25 = vld [vmem:[%s30462_s21 + $0x16c] ss:$12 sps:$4 sm:$0xff]  }
 0xdf1   : > { %15757 = vmatpush1.bf16.msra.mxu0 %v22278_v24  ;;  %v22325_v24 = vld [vmem:[%s30452_s23 + $0x5cc] ss:$48 sps:$4 sm:$0xff]  }
 0xdf2   : > { %13530 = vmatpush1.bf16.msra.mxu1 %v22281_v12  ;;  %15758 = vmatprep.subr.bf16.mxu0 %v22286_v26  ;;  %v22320_v12 = vld [vmem:[%s30462_s21 + $0x168] ss:$12 sps:$4 sm:$0xff]  }
 0xdf3   : > { %13531 = vmatprep.subr.bf16.mxu1 %v22289_v27  ;;  %v22323_v26 = vld [vmem:[%s30452_s23 + $0x5c8] ss:$48 sps:$4 sm:$0xff]   ;;  %v22328_v27 = vld [vmem:[%s30462_s21 + $0x184] ss:$12 sps:$4 sm:$0xff]  }
 0xdf5   : > { %15759 = vmatpush1.bf16.msra.mxu0 %v22284_v53  ;;  %v22331_v53 = vld [vmem:[%s30452_s23 + $0x62c] ss:$48 sps:$4 sm:$0xff]  }
 0xdf6   : > { %13532 = vmatpush1.bf16.msra.mxu1 %v22287_v13  ;;  %15760 = vmatprep.subr.bf16.mxu0 %v22292_v63  ;;  %v22326_v13 = vld [vmem:[%s30462_s21 + $0x180] ss:$12 sps:$4 sm:$0xff]   ;;  %v22329_v63 = vld [vmem:[%s30452_s23 + $0x628] ss:$48 sps:$4 sm:$0xff]  }
 0xdf7   : > { %13533 = vmatprep.subr.bf16.mxu1 %v22295_v7  ;;  %v22334_v7 = vld [vmem:[%s30462_s21 + $0x19c] ss:$12 sps:$4 sm:$0xff]  }
 0xdf9   : > { %15761 = vmatpush1.bf16.msra.mxu0 %v22290_v37  ;;  %v22337_v37 = vld [vmem:[%s30452_s23 + $0x68c] ss:$48 sps:$4 sm:$0xff]  }
 0xdfa   : > { %13534 = vmatpush1.bf16.msra.mxu1 %v22293_v33  ;;  %15762 = vmatprep.subr.bf16.mxu0 %v22298_v61  ;;  %v22332_v61 = vld [vmem:[%s30462_s21 + $0x198] ss:$12 sps:$4 sm:$0xff]  }
 0xdfb   : > { %13535 = vmatprep.subr.bf16.mxu1 %v22301_v44 }
 0xdfd   : > { %15763 = vmatpush1.bf16.msra.mxu0 %v22296_v48 }
 0xdfe   : > { %13536 = vmatpush1.bf16.msra.mxu1 %v22299_v39  ;;  %15764 = vmatprep.subr.bf16.mxu0 %v22304_v45  ;;  %v22335_v39 = vld [vmem:[%s30452_s23 + $0x688] ss:$48 sps:$4 sm:$0xff]  }
 0xdff   : > { %13537 = vmatprep.subr.bf16.mxu1 %v22307_v56 }
 0xe01   : > { %15765 = vmatpush1.bf16.msra.mxu0 %v22302_v60  ;;  %v22343_v60 = vld [vmem:[%s30452_s23 + $0x6ec] ss:$48 sps:$4 sm:$0xff]  }
 0xe02   : > { %13538 = vmatpush1.bf16.msra.mxu1 %v22305_v34  ;;  %15766 = vmatprep.subr.bf16.mxu0 %v22310_v3 }
 0xe03   : > { %13539 = vmatprep.subr.bf16.mxu1 %v22313_v14 }
 0xe05   : > { %15767 = vmatpush1.bf16.msra.mxu0 %v22308_v43 }
 0xe06   : > { %13540 = vmatpush1.bf16.msra.mxu1 %v22311_v1  ;;  %15768 = vmatprep.subr.bf16.mxu0 %v22316_v29 }
 0xe07   : > { %13541 = vmatprep.subr.bf16.mxu1 %v22319_v51  ;;  %v22338_v51 = vld [vmem:[%s30462_s21 + $0x1b0] ss:$12 sps:$4 sm:$0xff]  }
 0xe09   : > { %15769 = vmatpush1.bf16.msra.mxu0 %v22314_v10 }
 0xe0a   : > { %13542 = vmatpush1.bf16.msra.mxu1 %v22317_v20  ;;  %15770 = vmatprep.subr.bf16.mxu0 %v22322_v25  ;;  %v22341_v25 = vld [vmem:[%s30452_s23 + $0x6e8] ss:$48 sps:$4 sm:$0xff]  }
 0xe0b   : > { %13543 = vmatprep.subr.bf16.mxu1 %v22325_v24  ;;  %v22346_v24 = vld [vmem:[%s30462_s21 + $0x1cc] ss:$12 sps:$4 sm:$0xff]  }
 0xe0d   : > { %15771 = vmatpush1.bf16.msra.mxu0 %v22320_v12 }
 0xe0e   : > { %13544 = vmatpush1.bf16.msra.mxu1 %v22323_v26  ;;  %15813 = vmatprep.subr.bf16.mxu0 %v22328_v27  ;;  %v22349_v26 = vld [vmem:[%s30452_s23 + $0x74c] ss:$48 sps:$4 sm:$0xff]  }
 0xe0f   : > { %13586 = vmatprep.subr.bf16.mxu1 %v22331_v53  ;;  %v22344_v53 = vld [vmem:[%s30462_s21 + $0x1c8] ss:$12 sps:$4 sm:$0xff]  }
 0xe10   : > { %15773 = vmatmul.mubr.bf16.vlgmr.msra.gmra.mrb[124].mxu0 %v28549_v47 }
 0xe11   : > { %13546 = vmatmul.mubr.bf16.vlgmr.msra.gmra.mrb[12].mxu1 %v28026_v38  ;;  %15782 = vmatprep.mubr.bf16.mxu0 %v28586_v31  ;;  %v22340_v38 = vld [vmem:[%s30462_s21 + $0x1b4] ss:$12 sps:$4 sm:$0xff]  }
 0xe12   : > { %15814 = vmatpush1.bf16.msra.mxu0 %v22326_v13  ;;  %13555 = vmatprep.mubr.bf16.mxu1 %v28059_v9  ;;  %v12910_v33 = vpop.f32.mrb[84].mxu0 }
 0xe13   : > { %13587 = vmatpush1.bf16.msra.mxu1 %v22329_v63  ;;  %15815 = vmatprep.subr.bf16.mxu0 %v22334_v7  ;;  %v12837_v44 = vpop.f32.mrb[228].mxu1  ;;  %v12912_v48 = vpop.f32.mrb[85].mxu0 }
 0xe14   : > { %v12838_v45 = vadd.f32 %v12837_v44, %v28499_v40  ;;  %13588 = vmatprep.subr.bf16.mxu1 %v22337_v37  ;;  %v12839_v9 = vpop.f32.mrb[229].mxu1  ;;  %v12914_v56 = vpop.f32.mrb[86].mxu0  ;;  %v22347_v37 = vld [vmem:[%s30452_s23 + $0x748] ss:$48 sps:$4 sm:$0xff]  }
 0xe15   : > { %v12840_v34 = vadd.f32 %v12839_v9, %v28506_v6  ;;  %v12841_v3 = vpop.f32.mrb[230].mxu1  ;;  %v12916_v14 = vpop.f32.mrb[87].mxu0  ;;  %v22355_v9 = vld [vmem:[%s30452_s23 + $0x7ac] ss:$48 sps:$4 sm:$0xff]  }
 0xe16   : > { %v12911_v43 = vadd.f32 %v12910_v33, %v12838_v45  ;;  %15816 = vmatpush1.bf16.msra.mxu0 %v22332_v61  ;;  %v12842_v1 = vadd.f32 %v12841_v3, %v28499_v40  ;;  %v12843_v29 = vpop.f32.mrb[231].mxu1 }
 0xe17   : > { %v12913_v10 = vadd.f32 %v12912_v48, %v12840_v34  ;;  %13589 = vmatpush1.bf16.msra.mxu1 %v22335_v39  ;;  %v12844_v20 = vadd.f32 %v12843_v29, %v28506_v6  ;;  %15817 = vmatprep.subr.bf16.mxu0 %v22340_v38  ;;  %v22352_v48 = vld [vmem:[%s30462_s21 + $0x1e4] ss:$12 sps:$4 sm:$0xff]   ;;  %v22350_v29 = vld [vmem:[%s30462_s21 + $0x1e0] ss:$12 sps:$4 sm:$0xff]  }
 0xe18   : > { %v12915_v12 = vadd.f32 %v12914_v56, %v12842_v1  ;;  %15783 = vmatmul.mubr.bf16.gmra.mrb[128].mxu0 %v28581_v15  ;;  %13590 = vmatprep.subr.bf16.mxu1 %v22343_v60  ;;  %v13707_v13 = vmax.f32 %v12911_v43, 0.0 }
 0xe19   : > { %v12917_v27 = vadd.f32 %v12916_v14, %v12844_v20  ;;  %13556 = vmatmul.mubr.bf16.gmra.mrb[16].mxu1 %v28079_v30  ;;  %v13708_v33 = vmax.f32 %v12913_v10, 0.0  ;;  %v22353_v20 = vld [vmem:[%s30452_s23 + $0x7a8] ss:$48 sps:$4 sm:$0xff]  }
 0xe1a   : > { %v13719_v63 = vmax.f32 %v12915_v12, 0.0  ;;  %15818 = vmatpush1.bf16.msra.mxu0 %v22338_v51  ;;  %13565 = vmatprep.mubr.bf16.mxu1 %v28267_v16  ;;  %v12920_v7 = vpop.f32.mrb[88].mxu0 }
 0xe1b   : > { %v13720_v61 = vmax.f32 %v12917_v27, 0.0  ;;  %13591 = vmatpush1.bf16.msra.mxu1 %v22341_v25  ;;  %15819 = vmatprep.subr.bf16.mxu0 %v22346_v24  ;;  %v12847_v44 = vpop.f32.mrb[232].mxu1  ;;  %v12922_v30 = vpop.f32.mrb[89].mxu0  ;;  %v22358_v25 = vld [vmem:[%s30462_s21 + $0x1fc] ss:$12 sps:$4 sm:$0xff]  }
 0xe1c   : > { %v29021_v39 = vpack.c.bf16 %v13719_v63, %v13707_v13  ;;  %v12848_v38 = vadd.f32 %v12847_v44, %v28499_v40  ;;  %13592 = vmatprep.subr.bf16.mxu1 %v22349_v26  ;;  %v12849_v16 = vpop.f32.mrb[233].mxu1  ;;  %v12924_v45 = vpop.f32.mrb[90].mxu0  ;;  %v22356_v27 = vld [vmem:[%s30462_s21 + $0x1f8] ss:$12 sps:$4 sm:$0xff]  }
 0xe1d   : > { %v12850_v56 = vadd.f32 %v12849_v16, %v28506_v6  ;;  %v12851_v60 = vpop.f32.mrb[234].mxu1  ;;  %v12926_v34 = vpop.f32.mrb[91].mxu0  ;;  %v29028_v3 = vpack.c.bf16 %v13720_v61, %v13708_v33  ;;  %v22359_v63 = vld [vmem:[%s30452_s23 + $0x808] ss:$48 sps:$4 sm:$0xff]   ;;  %v22362_v33 = vld [vmem:[%s30462_s21 + $0x210] ss:$12 sps:$4 sm:$0xff]  }
 0xe1e   : > { %v12921_v14 = vadd.f32 %v12920_v7, %v12848_v38  ;;  %15820 = vmatpush1.bf16.msra.mxu0 %v22344_v53  ;;  %v12852_v43 = vadd.f32 %v12851_v60, %v28499_v40  ;;  %v12853_v1 = vpop.f32.mrb[235].mxu1  ;;  %v22361_v40 = vld [vmem:[%s30452_s23 + $0x80c] ss:$48 sps:$4 sm:$0xff]   ;;  %v22365_v61 = vld [vmem:[%s30452_s23 + $0x868] ss:$48 sps:$4 sm:$0xff]  }
 0xe1f   : > { %v12923_v51 = vadd.f32 %v12922_v30, %v12850_v56  ;;  %13593 = vmatpush1.bf16.msra.mxu1 %v22347_v37  ;;  %v12854_v10 = vadd.f32 %v12853_v1, %v28506_v6  ;;  %15821 = vmatprep.subr.bf16.mxu0 %v22352_v48  ;;  %v22370_v44 = vld [vmem:[%s30462_s21 + $0x22c] ss:$12 sps:$4 sm:$0xff]   ;;  %v22368_v48 = vld [vmem:[%s30462_s21 + $0x228] ss:$12 sps:$4 sm:$0xff]   ;;  %v22376_v16 = vld [vmem:[%s30462_s21 + $0x244] ss:$12 sps:$4 sm:$0xff]  }
 0xe20   : > { %v12925_v24 = vadd.f32 %v12924_v45, %v12852_v43  ;;  %13594 = vmatprep.subr.bf16.mxu1 %v22355_v9  ;;  %15792 = vmatprep.mubr.bf16.mxu0 %v29028_v3  ;;  %v13731_v6 = vmax.f32 %v12921_v14, 0.0  ;;  %v22373_v30 = vld [vmem:[%s30452_s23 + $0x8cc] ss:$48 sps:$4 sm:$0xff]   ;;  %v22371_v38 = vld [vmem:[%s30452_s23 + $0x8c8] ss:$48 sps:$4 sm:$0xff]  }
 0xe21   : > { %v12927_v12 = vadd.f32 %v12926_v34, %v12854_v10  ;;  %13566 = vmatmul.mubr.bf16.gmra.mrb[20].mxu1 %v28271_v0  ;;  %15793 = vmatmul.mubr.bf16.gmra.mrb[132].mxu0 %v29021_v39  ;;  %v13732_v53 = vmax.f32 %v12923_v51, 0.0  ;;  %v22364_v0 = vld [vmem:[%s30462_s21 + $0x214] ss:$12 sps:$4 sm:$0xff]   ;;  %v22381_v56 = vld [vmem:[%s30462_s21 + $0x25c] ss:$12 sps:$4 sm:$0xff]  }
 0xe22   : > { %v13743_v26 = vmax.f32 %v12925_v24, 0.0  ;;  %15822 = vmatpush1.bf16.msra.mxu0 %v22350_v29  ;;  %13575 = vmatprep.mubr.bf16.mxu1 %v28292_v54  ;;  %v22367_v54 = vld [vmem:[%s30452_s23 + $0x86c] ss:$48 sps:$4 sm:$0xff]   ;;  %v22378_v9 = vld [vmem:[%s30462_s21 + $0x8] ss:$12 sps:$4 sm:$0xff]  }
 0xe23   : > { %v13744_v13 = vmax.f32 %v12927_v12, 0.0  ;;  %13595 = vmatpush1.bf16.msra.mxu1 %v22353_v20  ;;  %15823 = vmatprep.subr.bf16.mxu0 %v22358_v25  ;;  %v22374_v45 = vld [vmem:[%s30462_s21 + $0x240] ss:$12 sps:$4 sm:$0xff]   ;;  %v22379_v34 = vld [vmem:[%s30462_s21 + $0x258] ss:$12 sps:$4 sm:$0xff]  }
 0xe24   : > { %v29057_v7 = vpack.c.bf16 %v13743_v26, %v13731_v6  ;;  %13596 = vmatprep.subr.bf16.mxu1 %v22361_v40  ;;  %v22382_v60 = vld [vmem:[%s30462_s21 + $0xe0] ss:$12 sps:$4 sm:$0xff]   ;;  %v22384_v1 = vld [vmem:[%s30462_s21 + $0x270] ss:$12 sps:$4 sm:$0xff]   ;;  %v22388_v29 = vld [vmem:[%s30462_s21 + $0x38] ss:$12 sps:$4 sm:$0xff]  }
 0xe25   : > { %v29062_v37 = vpack.c.bf16 %v13744_v13, %v13732_v53  ;;  %v22383_v14 = vld [vmem:[%s30462_s21 + $0x20] ss:$12 sps:$4 sm:$0xff]   ;;  %v22392_v10 = vld [vmem:[%s30462_s21 + $0x110] ss:$12 sps:$4 sm:$0xff]   ;;  %v22389_v20 = vld [vmem:[%s30462_s21 + $0x288] ss:$12 sps:$4 sm:$0xff]  }
 0xe26   : > { %15824 = vmatpush1.bf16.msra.mxu0 %v22356_v27  ;;  %v22386_v43 = vld [vmem:[%s30462_s21 + $0x274] ss:$12 sps:$4 sm:$0xff]   ;;  %v22391_v51 = vld [vmem:[%s30462_s21 + $0x28c] ss:$12 sps:$4 sm:$0xff]   ;;  %v22393_v25 = vld [vmem:[%s30462_s21 + $0x50] ss:$12 sps:$4 sm:$0xff]  }
 0xe27   : > { %13597 = vmatpush1.bf16.msra.mxu1 %v22359_v63  ;;  %15825 = vmatprep.subr.bf16.mxu0 %v22364_v0  ;;  %v22396_v24 = vld [vmem:[%s30462_s21 + $0x2a4] ss:$12 sps:$4 sm:$0xff]   ;;  %v22394_v27 = vld [vmem:[%s30462_s21 + $0x2a0] ss:$12 sps:$4 sm:$0xff]   ;;  %v22398_v53 = vld [vmem:[%s30462_s21 + $0x68] ss:$12 sps:$4 sm:$0xff]  }
 0xe28   : > { %13598 = vmatprep.subr.bf16.mxu1 %v22367_v54  ;;  %15802 = vmatprep.mubr.bf16.mxu0 %v29062_v37  ;;  %v30463_v40 = vld [vmem:[#allocation20_spill] sm:$0xff]  ;;  %v29153_v13 = vld [vmem:[#allocation11] sm:$0xff]  ;;  %v22401_v0 = vld [vmem:[%s30462_s21 + $0x2bc] ss:$12 sps:$4 sm:$0xff]  }
 0xe29   : > { %13576 = vmatmul.mubr.bf16.gmra.mrb[24].mxu1 %v28296_v32  ;;  %15803 = vmatmul.mubr.bf16.gmra.mrb[136].mxu0 %v29057_v7  ;;  %v22377_v32 = vld [vmem:[%s30462_s21 + $0xc8] ss:$12 sps:$4 sm:$0xff]   ;;  %v11301_v12 = vsub.s32 4, %v30463_v40  ;;  %v11305_v6 = vsub.s32 5, %v30463_v40  ;;  %v11297_v26 = vsub.s32 3, %v30463_v40  ;;  %v29163_v54 = vrot.slane %v29153_v13, %v30445_v46 }
 0xe2a   : > { %15826 = vmatpush1.bf16.msra.mxu0 %v22362_v33  ;;  %13618 = vmatprep.mubr.bf16.mxu1 %v30461_v18 }
 0xe2b   : > { %13599 = vmatpush1.bf16.msra.mxu1 %v22365_v61  ;;  %15827 = vmatprep.subr.bf16.mxu0 %v22370_v44  ;;  %v29156_v63 = vrot.slane %v29153_v13, %v11301_v12  ;;  %v29166_v33 = vrot.slane %v29153_v13, %v11305_v6  ;;  %v22402_v61 = vld [vmem:[%s30462_s21 + $0x140] ss:$12 sps:$4 sm:$0xff]   ;;  %v29174_v44 = vrot.slane %v29153_v13, %v11297_v26 }
 0xe2c   : > { %13600 = vmatprep.subr.bf16.mxu1 %v22373_v30  ;;  %v22411_v6 = vld [vmem:[%s30462_s21 + $0x2ec] ss:$12 sps:$4 sm:$0xff]  }
 0xe2e   : > { %15828 = vmatpush1.bf16.msra.mxu0 %v22368_v48  ;;  %v22399_v48 = vld [vmem:[%s30462_s21 + $0x2b8] ss:$12 sps:$4 sm:$0xff]  }
 0xe2f   : > { %13601 = vmatpush1.bf16.msra.mxu1 %v22371_v38  ;;  %15829 = vmatprep.subr.bf16.mxu0 %v22376_v16 }
 0xe30   : > { %19785 = vmatprep.subr.bf16.mxu1 %v22377_v32 }
 0xe32   : > { %13619 = vmatmul.mubr.bf16.vlgmr.msra.gmra.mrb[12].mxu1 %v28022_v62  ;;  %15830 = vmatpush1.bf16.msra.mxu0 %v22374_v45  ;;  %v22387_v62 = vld [vmem:[%s30462_s21 + $0xf8] ss:$12 sps:$4 sm:$0xff]   ;;  %v22403_v45 = vld [vmem:[%s30462_s21 + $0x80] ss:$12 sps:$4 sm:$0xff]  }
 0xe33   : > { %19786 = vmatpush3.bf16.msra.mxu1 %v22378_v9  ;;  %15831 = vmatprep.subr.bf16.mxu0 %v22381_v56 }
 0xe34   : > { %19787 = vmatprep.subr.bf16.mxu1 %v22382_v60  ;;  %13628 = vmatprep.mubr.bf16.mxu1 %v30461_v18 }
 0xe36   : > { %15832 = vmatpush1.bf16.msra.mxu0 %v22379_v34 }
 0xe37   : > { %19788 = vmatpush3.bf16.msra.mxu1 %v22383_v14  ;;  %15833 = vmatprep.subr.bf16.mxu0 %v22386_v43  ;;  %v22407_v14 = vld [vmem:[%s30462_s21 + $0x158] ss:$12 sps:$4 sm:$0xff]  }
 0xe38   : > { %19789 = vmatprep.subr.bf16.mxu1 %v22387_v62 }
 0xe3a   : > { %13629 = vmatmul.mubr.bf16.gmra.mrb[16].mxu1 %v28071_v58  ;;  %15834 = vmatpush1.bf16.msra.mxu0 %v22384_v1  ;;  %v22397_v58 = vld [vmem:[%s30462_s21 + $0x128] ss:$12 sps:$4 sm:$0xff]  }
 0xe3b   : > { %19790 = vmatpush3.bf16.msra.mxu1 %v22388_v29  ;;  %15835 = vmatprep.subr.bf16.mxu0 %v22391_v51 }
 0xe3c   : > { %19791 = vmatprep.subr.bf16.mxu1 %v22392_v10  ;;  %13638 = vmatprep.mubr.bf16.mxu1 %v30461_v18 }
 0xe3e   : > { %15836 = vmatpush1.bf16.msra.mxu0 %v22389_v20 }
 0xe3f   : > { %19792 = vmatpush3.bf16.msra.mxu1 %v22393_v25  ;;  %15837 = vmatprep.subr.bf16.mxu0 %v22396_v24 }
 0xe40   : > { %19793 = vmatprep.subr.bf16.mxu1 %v22397_v58  ;;  %v22408_v58 = vld [vmem:[%s30462_s21 + $0x98] ss:$12 sps:$4 sm:$0xff]  }
 0xe42   : > { %13639 = vmatmul.mubr.bf16.gmra.mrb[20].mxu1 %v28269_v22  ;;  %15838 = vmatpush1.bf16.msra.mxu0 %v22394_v27  ;;  %v13182_v30 = vpop.f32.mrb[92].mxu0  ;;  %v22406_v22 = vld [vmem:[%s30462_s21 + $0x2d4] ss:$12 sps:$4 sm:$0xff]  }
 0xe43   : > { %19794 = vmatpush3.bf16.msra.mxu1 %v22398_v53  ;;  %v20841_v38 = vadd.f32 %v13182_v30, %v29156_v63  ;;  %15839 = vmatprep.subr.bf16.mxu0 %v22401_v0  ;;  %v13036_v16 = vpop.f32.mrb[236].mxu1  ;;  %v13184_v32 = vpop.f32.mrb[93].mxu0  ;;  %v22412_v30 = vld [vmem:[%s30462_s21 + $0x170] ss:$12 sps:$4 sm:$0xff]  }
 0xe44   : > { %v20825_v9 = vadd.f32 %v13036_v16, %v29163_v54  ;;  %v20842_v56 = vadd.f32 %v13184_v32, %v29166_v33  ;;  %19795 = vmatprep.subr.bf16.mxu1 %v22402_v61  ;;  %v13038_v60 = vpop.f32.mrb[237].mxu1  ;;  %v13186_v34 = vpop.f32.mrb[94].mxu0  ;;  %13648 = vmatprep.mubr.bf16.mxu1 %v30461_v18  ;;  %v22404_v18 = vld [vmem:[%s30462_s21 + $0x2d0] ss:$12 sps:$4 sm:$0xff]  }
 0xe45   : > { %v20826_v43 = vadd.f32 %v13038_v60, %v29174_v44  ;;  %v20843_v62 = vadd.f32 %v13186_v34, %v29156_v63  ;;  %v13040_v1 = vpop.f32.mrb[238].mxu1  ;;  %v13188_v29 = vpop.f32.mrb[95].mxu0  ;;  %v13663_v25 = vmax.f32 %v20841_v38, 0.0 }
 0xe46   : > { %15840 = vmatpush1.bf16.msra.mxu0 %v22399_v48  ;;  %v20827_v51 = vadd.f32 %v13040_v1, %v29163_v54  ;;  %v20844_v10 = vadd.f32 %v13188_v29, %v29166_v33  ;;  %v13042_v20 = vpop.f32.mrb[239].mxu1  ;;  %v13661_v27 = vmax.f32 %v20825_v9, 0.0  ;;  %v13664_v53 = vmax.f32 %v20842_v56, 0.0  ;;  %v22409_v9 = vld [vmem:[%s30462_s21 + $0x2e8] ss:$12 sps:$4 sm:$0xff]  }
 0xe47   : > { %v13675_v24 = vmax.f32 %v20843_v62, 0.0  ;;  %19796 = vmatpush3.bf16.msra.mxu1 %v22403_v45  ;;  %v20828_v12 = vadd.f32 %v13042_v20, %v29174_v44  ;;  %15841 = vmatprep.subr.bf16.mxu0 %v22406_v22  ;;  %v13662_v48 = vmax.f32 %v20826_v43, 0.0  ;;  %v22413_v43 = vld [vmem:[%s30462_s21 + $0xb0] ss:$12 sps:$4 sm:$0xff]  }
 0xe48   : > { %v13673_v0 = vmax.f32 %v20827_v51, 0.0  ;;  %v13676_v61 = vmax.f32 %v20844_v10, 0.0  ;;  %19797 = vmatprep.subr.bf16.mxu1 %v22407_v14  ;;  %v22417_v51 = vld [vmem:[%s30462_s21 + $0x248] ss:$12 sps:$4 sm:$0xff]  }
 0xe49   : > { %v29210_v38 = vpack.c.bf16 %v13675_v24, %v13663_v25  ;;  %v13674_v16 = vmax.f32 %v20828_v12, 0.0 }
 0xe4a   : > { %v29212_v32 = vpack.c.bf16 %v13673_v0, %v13661_v27  ;;  %v29214_v45 = vpack.c.bf16 %v13676_v61, %v13664_v53  ;;  %13649 = vmatmul.mubr.bf16.gmra.mrb[24].mxu1 %v28294_v36  ;;  %15842 = vmatpush1.bf16.msra.mxu0 %v22404_v18  ;;  %v13192_v22 = vpop.f32.mrb[96].mxu0  ;;  %v22416_v36 = vld [vmem:[%s30462_s21 + $0x304] ss:$12 sps:$4 sm:$0xff]   ;;  %v22418_v61 = vld [vmem:[%s30462_s21 + $0x188] ss:$12 sps:$4 sm:$0xff]  }
 0xe4b   : > { %v29220_v56 = vpack.c.bf16 %v13674_v16, %v13662_v48  ;;  %19798 = vmatpush3.bf16.msra.mxu1 %v22408_v58  ;;  %16210 = vmatprep.mubr.bf16.mxu1 %v28556_v4  ;;  %v20845_v60 = vadd.f32 %v13192_v22, %v29156_v63  ;;  %v13046_v34 = vpop.f32.mrb[240].mxu1  ;;  %v13194_v14 = vpop.f32.mrb[97].mxu0 }
 0xe4c   : > { %15843 = vmatprep.subr.bf16.mxu0 %v22411_v6  ;;  %v20829_v62 = vadd.f32 %v13046_v34, %v29163_v54  ;;  %v20846_v1 = vadd.f32 %v13194_v14, %v29166_v33  ;;  %19799 = vmatprep.subr.bf16.mxu1 %v22412_v30  ;;  %v13048_v29 = vpop.f32.mrb[241].mxu1  ;;  %v13196_v4 = vpop.f32.mrb[98].mxu0  ;;  %v22414_v6 = vld [vmem:[%s30462_s21 + $0x300] ss:$12 sps:$4 sm:$0xff]   ;;  %v22421_v30 = vld [vmem:[%s30462_s21 + $0x31c] ss:$12 sps:$4 sm:$0xff]  }
 0xe4d   : > { %v20830_v10 = vadd.f32 %v13048_v29, %v29174_v44  ;;  %v20847_v20 = vadd.f32 %v13196_v4, %v29156_v63  ;;  %v13050_v18 = vpop.f32.mrb[242].mxu1  ;;  %v13198_v25 = vpop.f32.mrb[99].mxu0  ;;  %15845 = vmatprep.mubr.bf16.mxu0 %v29220_v56  ;;  %v13687_v27 = vmax.f32 %v20845_v60, 0.0  ;;  %v22422_v60 = vld [vmem:[%s30462_s21 + $0x260] ss:$12 sps:$4 sm:$0xff]  }
 0xe4e   : > { %15844 = vmatpush1.bf16.msra.mxu0 %v22409_v9  ;;  %v20831_v24 = vadd.f32 %v13050_v18, %v29163_v54  ;;  %v20848_v12 = vadd.f32 %v13198_v25, %v29166_v33  ;;  %v13052_v58 = vpop.f32.mrb[243].mxu1  ;;  %v13685_v48 = vmax.f32 %v20829_v62, 0.0  ;;  %v13688_v16 = vmax.f32 %v20846_v1, 0.0  ;;  %v22419_v1 = vld [vmem:[%s30462_s21 + $0x318] ss:$12 sps:$4 sm:$0xff]  }
 0xe4f   : > { %v13699_v53 = vmax.f32 %v20847_v20, 0.0  ;;  %19800 = vmatpush3.bf16.msra.mxu1 %v22413_v43  ;;  %v20832_v0 = vadd.f32 %v13052_v58, %v29174_v44  ;;  %15886 = vmatprep.subr.bf16.mxu0 %v22416_v36  ;;  %v13686_v34 = vmax.f32 %v20830_v10, 0.0  ;;  %v22423_v18 = vld [vmem:[%s30462_s21 + $0x1a0] ss:$12 sps:$4 sm:$0xff]   ;;  %v22427_v58 = vld [vmem:[%s30462_s21 + $0x278] ss:$12 sps:$4 sm:$0xff]  }
 0xe50   : > { %v13697_v22 = vmax.f32 %v20831_v24, 0.0  ;;  %v13700_v9 = vmax.f32 %v20848_v12, 0.0  ;;  %19825 = vmatprep.subr.bf16.mxu1 %v22417_v51 }
 0xe51   : > { %v29253_v14 = vpack.c.bf16 %v13699_v53, %v13687_v27  ;;  %v13698_v43 = vmax.f32 %v20832_v0, 0.0  ;;  %15846 = vmatmul.mubr.bf16.vlgmr.msra.gmra.mrb[124].mxu0 %v29212_v32 }
 0xe52   : > { %v29256_v36 = vpack.c.bf16 %v13697_v22, %v13685_v48  ;;  %v29258_v29 = vpack.c.bf16 %v13700_v9, %v13688_v16  ;;  %15887 = vmatpush1.bf16.msra.mxu0 %v22414_v6  ;;  %16211 = vmatmul.mubr.bf16.vlgmr.msra.gmra.mrb[28].mxu1 %v28549_v47  ;;  %v13202_v62 = vpop.f32.mrb[100].mxu0  ;;  %v22426_v47 = vld [vmem:[%s30462_s21 + $0x334] ss:$12 sps:$4 sm:$0xff]   ;;  %v22424_v16 = vld [vmem:[%s30462_s21 + $0x330] ss:$12 sps:$4 sm:$0xff]  }
 0xe53   : > { %v29264_v4 = vpack.c.bf16 %v13698_v43, %v13686_v34  ;;  %16218 = vmatprep.mubr.bf16.mxu1 %v28586_v31  ;;  %19826 = vmatpush3.bf16.msra.mxu1 %v22418_v61  ;;  %v20849_v51 = vadd.f32 %v13202_v62, %v29156_v63  ;;  %v13056_v10 = vpop.f32.mrb[244].mxu1  ;;  %v13204_v20 = vpop.f32.mrb[101].mxu0  ;;  %v22428_v34 = vld [vmem:[%s30462_s21 + $0x1b8] ss:$12 sps:$4 sm:$0xff]  }
 0xe54   : > { %15888 = vmatprep.subr.bf16.mxu0 %v22421_v30  ;;  %v20833_v25 = vadd.f32 %v13056_v10, %v29163_v54  ;;  %v20850_v24 = vadd.f32 %v13204_v20, %v29166_v33  ;;  %19827 = vmatprep.subr.bf16.mxu1 %v22422_v60  ;;  %v13058_v31 = vpop.f32.mrb[245].mxu1  ;;  %v13206_v12 = vpop.f32.mrb[102].mxu0  ;;  %v22431_v43 = vld [vmem:[%s30462_s21 + $0x34c] ss:$12 sps:$4 sm:$0xff]  }
 0xe55   : > { %v20834_v6 = vadd.f32 %v13058_v31, %v29174_v44  ;;  %v20851_v27 = vadd.f32 %v13206_v12, %v29156_v63  ;;  %v13060_v53 = vpop.f32.mrb[246].mxu1  ;;  %v13208_v0 = vpop.f32.mrb[103].mxu0  ;;  %15855 = vmatprep.mubr.bf16.mxu0 %v29264_v4  ;;  %v13711_v22 = vmax.f32 %v20849_v51, 0.0  ;;  %v22432_v51 = vld [vmem:[%s30462_s21 + $0x290] ss:$12 sps:$4 sm:$0xff]  }
 0xe56   : > { %15889 = vmatpush1.bf16.msra.mxu0 %v22419_v1  ;;  %v20835_v61 = vadd.f32 %v13060_v53, %v29163_v54  ;;  %v20852_v30 = vadd.f32 %v13208_v0, %v29166_v33  ;;  %v13062_v48 = vpop.f32.mrb[247].mxu1  ;;  %v13709_v62 = vmax.f32 %v20833_v25, 0.0  ;;  %v13712_v1 = vmax.f32 %v20850_v24, 0.0  ;;  %v22429_v24 = vld [vmem:[%s30462_s21 + $0x348] ss:$12 sps:$4 sm:$0xff]  }
 0xe57   : > { %v13723_v9 = vmax.f32 %v20851_v27, 0.0  ;;  %19828 = vmatpush3.bf16.msra.mxu1 %v22423_v18  ;;  %v20836_v60 = vadd.f32 %v13062_v48, %v29174_v44  ;;  %15890 = vmatprep.subr.bf16.mxu0 %v22426_v47  ;;  %v13710_v18 = vmax.f32 %v20834_v6, 0.0 }
 0xe58   : > { %v13721_v10 = vmax.f32 %v20835_v61, 0.0  ;;  %v13724_v20 = vmax.f32 %v20852_v30, 0.0  ;;  %19829 = vmatprep.subr.bf16.mxu1 %v22427_v58  ;;  %v22433_v61 = vld [vmem:[%s30462_s21 + $0x1d0] ss:$12 sps:$4 sm:$0xff]  }
 0xe59   : > { %v29297_v31 = vpack.c.bf16 %v13723_v9, %v13711_v22  ;;  %v13722_v47 = vmax.f32 %v20836_v60, 0.0  ;;  %15856 = vmatmul.mubr.bf16.gmra.mrb[128].mxu0 %v29256_v36  ;;  %v22437_v22 = vld [vmem:[%s30462_s21 + $0x2a8] ss:$12 sps:$4 sm:$0xff]  }
 0xe5a   : > { %v29300_v12 = vpack.c.bf16 %v13721_v10, %v13709_v62  ;;  %v29302_v27 = vpack.c.bf16 %v13724_v20, %v13712_v1  ;;  %15891 = vmatpush1.bf16.msra.mxu0 %v22424_v16  ;;  %16219 = vmatmul.mubr.bf16.gmra.mrb[32].mxu1 %v28581_v15  ;;  %v13212_v25 = vpop.f32.mrb[104].mxu0  ;;  %v22436_v15 = vld [vmem:[%s30462_s21 + $0x364] ss:$12 sps:$4 sm:$0xff]   ;;  %v22434_v20 = vld [vmem:[%s30462_s21 + $0x360] ss:$12 sps:$4 sm:$0xff]  }
 0xe5b   : > { %v29308_v58 = vpack.c.bf16 %v13722_v47, %v13710_v18  ;;  %16226 = vmatprep.mubr.bf16.mxu1 %v29028_v3  ;;  %19830 = vmatpush3.bf16.msra.mxu1 %v22428_v34  ;;  %v20853_v6 = vadd.f32 %v13212_v25, %v29156_v63  ;;  %v13066_v53 = vpop.f32.mrb[248].mxu1  ;;  %v13214_v0 = vpop.f32.mrb[105].mxu0 }
 0xe5c   : > { %15892 = vmatprep.subr.bf16.mxu0 %v22431_v43  ;;  %v20837_v30 = vadd.f32 %v13066_v53, %v29163_v54  ;;  %v20854_v48 = vadd.f32 %v13214_v0, %v29166_v33  ;;  %19831 = vmatprep.subr.bf16.mxu1 %v22432_v51  ;;  %v13068_v3 = vpop.f32.mrb[249].mxu1  ;;  %v13216_v16 = vpop.f32.mrb[106].mxu0 }
 0xe5d   : > { %v20838_v9 = vadd.f32 %v13068_v3, %v29174_v44  ;;  %v20855_v60 = vadd.f32 %v13216_v16, %v29156_v63  ;;  %v13070_v34 = vpop.f32.mrb[250].mxu1  ;;  %v13218_v62 = vpop.f32.mrb[107].mxu0  ;;  %15865 = vmatprep.mubr.bf16.mxu0 %v29308_v58  ;;  %v13735_v51 = vmax.f32 %v20853_v6, 0.0  ;;  %v22438_v63 = vld [vmem:[%s30462_s21 + $0x1e8] ss:$12 sps:$4 sm:$0xff]  }
 0xe5e   : > { %15893 = vmatpush1.bf16.msra.mxu0 %v22429_v24  ;;  %v20839_v43 = vadd.f32 %v13070_v34, %v29163_v54  ;;  %v20856_v1 = vadd.f32 %v13218_v62, %v29166_v33  ;;  %v13072_v10 = vpop.f32.mrb[251].mxu1  ;;  %v22441_v54 = vld [vmem:[%s30462_s21 + $0x37c] ss:$12 sps:$4 sm:$0xff]   ;;  %v13733_v33 = vmax.f32 %v20837_v30, 0.0  ;;  %v13736_v25 = vmax.f32 %v20854_v48, 0.0 }
 0xe5f   : > { %v13747_v18 = vmax.f32 %v20855_v60, 0.0  ;;  %19832 = vmatpush3.bf16.msra.mxu1 %v22433_v61  ;;  %v20840_v47 = vadd.f32 %v13072_v10, %v29174_v44  ;;  %15894 = vmatprep.subr.bf16.mxu0 %v22436_v15  ;;  %v22442_v6 = vld [vmem:[%s30462_s21 + $0x2c0] ss:$12 sps:$4 sm:$0xff]   ;;  %v13734_v0 = vmax.f32 %v20838_v9, 0.0  ;;  %v22439_v30 = vld [vmem:[%s30462_s21 + $0x378] ss:$12 sps:$4 sm:$0xff]  }
 0xe60   : > { %v13745_v24 = vmax.f32 %v20839_v43, 0.0  ;;  %v13748_v53 = vmax.f32 %v20856_v1, 0.0  ;;  %19833 = vmatprep.subr.bf16.mxu1 %v22437_v22  ;;  %v22443_v16 = vld [vmem:[%s30462_s21 + $0x200] ss:$12 sps:$4 sm:$0xff]   ;;  %v22448_v60 = vld [vmem:[%s30462_s21 + $0x218] ss:$12 sps:$4 sm:$0xff]  }
 0xe61   : > { %v29341_v44 = vpack.c.bf16 %v13747_v18, %v13735_v51  ;;  %v13746_v61 = vmax.f32 %v20840_v47, 0.0  ;;  %15866 = vmatmul.mubr.bf16.gmra.mrb[132].mxu0 %v29300_v12  ;;  %v22446_v22 = vld [vmem:[%s30462_s21 + $0x394] ss:$12 sps:$4 sm:$0xff]   ;;  %v22451_v9 = vld [vmem:[%s30462_s21 + $0x3ac] ss:$12 sps:$4 sm:$0xff]  }
 0xe62   : > { %v29344_v15 = vpack.c.bf16 %v13745_v24, %v13733_v33  ;;  %v29346_v3 = vpack.c.bf16 %v13748_v53, %v13736_v25  ;;  %15895 = vmatpush1.bf16.msra.mxu0 %v22434_v20  ;;  %16227 = vmatmul.mubr.bf16.gmra.mrb[36].mxu1 %v29021_v39  ;;  %v22447_v39 = vld [vmem:[%s30462_s21 + $0x2d8] ss:$12 sps:$4 sm:$0xff]   ;;  %v22452_v34 = vld [vmem:[%s30462_s21 + $0x2f0] ss:$12 sps:$4 sm:$0xff]   ;;  %v22449_v62 = vld [vmem:[%s30462_s21 + $0x3a8] ss:$12 sps:$4 sm:$0xff]  }
 0xe63   : > { %v29352_v48 = vpack.c.bf16 %v13746_v61, %v13734_v0  ;;  %16234 = vmatprep.mubr.bf16.mxu1 %v29062_v37  ;;  %19834 = vmatpush3.bf16.msra.mxu1 %v22438_v63  ;;  %v22444_v37 = vld [vmem:[%s30462_s21 + $0x390] ss:$12 sps:$4 sm:$0xff]   ;;  %v22457_v10 = vld [vmem:[%s30462_s21 + $0x3c8] ss:$12 sps:$4 sm:$0xff]   ;;  %v22462_v51 = vld [vmem:[%s30462_s21 + $0x3e0] ss:$12 sps:$4 sm:$0xff]  }
 0xe64   : > { %15896 = vmatprep.subr.bf16.mxu0 %v22441_v54  ;;  %19835 = vmatprep.subr.bf16.mxu1 %v22442_v6  ;;  %v22456_v43 = vld [vmem:[%s30462_s21 + $0x3c4] ss:$12 sps:$4 sm:$0xff]   ;;  %v22461_v20 = vld [vmem:[%s30462_s21 + $0x3dc] ss:$12 sps:$4 sm:$0xff]   ;;  %v22466_v47 = vld [vmem:[%s30462_s21 + $0x3f4] ss:$12 sps:$4 sm:$0xff]  }
 0xe65   : > { %15875 = vmatprep.mubr.bf16.mxu0 %v29352_v48  ;;  %v22453_v1 = vld [vmem:[%s30462_s21 + $0x230] ss:$12 sps:$4 sm:$0xff]   ;;  %v22459_v18 = vld [vmem:[%s30462_s21 + $0x3d8] ss:$12 sps:$4 sm:$0xff]   ;;  %v22463_v63 = vld [vmem:[%s30462_s21 + $0x320] ss:$12 sps:$4 sm:$0xff]  }
 0xe66   : > { %15897 = vmatpush1.bf16.msra.mxu0 %v22439_v30  ;;  %v22467_v54 = vld [vmem:[%s30462_s21 + $0x3f8] ss:$12 sps:$4 sm:$0xff]   ;;  %v22472_v25 = vld [vmem:[%s30462_s21 + $0x410] ss:$12 sps:$4 sm:$0xff]   ;;  %v22469_v24 = vld [vmem:[%s30462_s21 + $0x408] ss:$12 sps:$4 sm:$0xff]  }
 0xe67   : > { %19836 = vmatpush3.bf16.msra.mxu1 %v22443_v16  ;;  %15898 = vmatprep.subr.bf16.mxu0 %v22446_v22  ;;  %v22468_v33 = vld [vmem:[%s30462_s21 + $0x338] ss:$12 sps:$4 sm:$0xff]   ;;  %v22473_v6 = vld [vmem:[%s30462_s21 + $0x350] ss:$12 sps:$4 sm:$0xff]   ;;  %v22477_v0 = vld [vmem:[%s30462_s21 + $0x428] ss:$12 sps:$4 sm:$0xff]  }
 0xe68   : > { %19837 = vmatprep.subr.bf16.mxu1 %v22447_v39  ;;  %v22476_v53 = vld [vmem:[%s30462_s21 + $0x424] ss:$12 sps:$4 sm:$0xff]   ;;  %v22478_v61 = vld [vmem:[%s30462_s21 + $0x368] ss:$12 sps:$4 sm:$0xff]   ;;  %v22482_v30 = vld [vmem:[%s30462_s21 + $0x440] ss:$12 sps:$4 sm:$0xff]  }
 0xe69   : > { %15876 = vmatmul.mubr.bf16.gmra.mrb[136].mxu0 %v29344_v15  ;;  %v22479_v16 = vld [vmem:[%s30462_s21 + $0x438] ss:$12 sps:$4 sm:$0xff]   ;;  %v22486_v22 = vld [vmem:[%s30462_s21 + $0x454] ss:$12 sps:$4 sm:$0xff]  }
 0xe6a   : > { %15899 = vmatpush1.bf16.msra.mxu0 %v22444_v37  ;;  %15918 = vmatprep.mubr.bf16.mxu0 %v29214_v45  ;;  %v22483_v39 = vld [vmem:[%s30462_s21 + $0x380] ss:$12 sps:$4 sm:$0xff]   ;;  %v22487_v37 = vld [vmem:[%s30462_s21 + $0x458] ss:$12 sps:$4 sm:$0xff]  }
 0xe6b   : > { %16235 = vmatmul.mubr.bf16.gmra.mrb[40].mxu1 %v29057_v7  ;;  %15900 = vmatprep.subr.bf16.mxu0 %v22451_v9  ;;  %v22454_v7 = vld [vmem:[%s30462_s21 + $0x3c0] ss:$12 sps:$4 sm:$0xff]   ;;  %v22488_v9 = vld [vmem:[%s30462_s21 + $0x398] ss:$12 sps:$4 sm:$0xff]  }
 0xe6c   : > { %19838 = vmatpush3.bf16.msra.mxu1 %v22448_v60  ;;  %16275 = vmatprep.mubr.bf16.mxu1 %v29220_v56  ;;  %v22458_v56 = vld [vmem:[%s30462_s21 + $0x308] ss:$12 sps:$4 sm:$0xff]   ;;  %v22492_v60 = vld [vmem:[%s30462_s21 + $0x470] ss:$12 sps:$4 sm:$0xff]  }
 0xe6d   : > { %19839 = vmatprep.subr.bf16.mxu1 %v22452_v34  ;;  %v22489_v34 = vld [vmem:[%s30462_s21 + $0x468] ss:$12 sps:$4 sm:$0xff]  }
 0xe6e   : > { %15901 = vmatpush1.bf16.msra.mxu0 %v22449_v62  ;;  %v22496_v62 = vld [vmem:[%s30462_s21 + $0x484] ss:$12 sps:$4 sm:$0xff]  }
 0xe6f   : > { %15902 = vmatprep.subr.bf16.mxu0 %v22456_v43  ;;  %v22493_v43 = vld [vmem:[%s30462_s21 + $0x3b0] ss:$12 sps:$4 sm:$0xff]  }
 0xe70   : > { %19840 = vmatpush3.bf16.msra.mxu1 %v22453_v1  ;;  %v22497_v1 = vld [vmem:[%s30462_s21 + $0x548] ss:$12 sps:$4 sm:$0xff]  }
 0xe71   : > { %19865 = vmatprep.subr.bf16.mxu1 %v22457_v10  ;;  %v22501_v10 = vld [vmem:[%s30462_s21 + $0x49c] ss:$12 sps:$4 sm:$0xff]  }
 0xe72   : > { %15903 = vmatpush1.bf16.msra.mxu0 %v22454_v7  ;;  %v22502_v7 = vld [vmem:[%s30462_s21 + $0x560] ss:$12 sps:$4 sm:$0xff]  }
 0xe73   : > { %16276 = vmatmul.mubr.bf16.vlgmr.msra.gmra.mrb[44].mxu1 %v29212_v32  ;;  %15904 = vmatprep.subr.bf16.mxu0 %v22461_v20  ;;  %v22464_v32 = vld [vmem:[%s30462_s21 + $0x3f0] ss:$12 sps:$4 sm:$0xff]   ;;  %v22499_v20 = vld [vmem:[%s30462_s21 + $0x498] ss:$12 sps:$4 sm:$0xff]  }
 0xe74   : > { %16283 = vmatprep.mubr.bf16.mxu1 %v29264_v4  ;;  %19866 = vmatpush3.bf16.msra.mxu1 %v22458_v56  ;;  %v22471_v4 = vld [vmem:[%s30462_s21 + $0x40c] ss:$12 sps:$4 sm:$0xff]   ;;  %v22506_v56 = vld [vmem:[%s30462_s21 + $0x4b4] ss:$12 sps:$4 sm:$0xff]  }
 0xe75   : > { %19867 = vmatprep.subr.bf16.mxu1 %v22462_v51  ;;  %v22503_v51 = vld [vmem:[%s30462_s21 + $0x4a0] ss:$12 sps:$4 sm:$0xff]  }
 0xe76   : > { %15905 = vmatpush1.bf16.msra.mxu0 %v22459_v18  ;;  %v22507_v18 = vld [vmem:[%s30462_s21 + $0x578] ss:$12 sps:$4 sm:$0xff]  }
 0xe77   : > { %15906 = vmatprep.subr.bf16.mxu0 %v22466_v47  ;;  %v22508_v47 = vld [vmem:[%s30462_s21 + $0x4b8] ss:$12 sps:$4 sm:$0xff]  }
 0xe78   : > { %19868 = vmatpush3.bf16.msra.mxu1 %v22463_v63  ;;  %v22512_v63 = vld [vmem:[%s30462_s21 + $0x590] ss:$12 sps:$4 sm:$0xff]  }
 0xe79   : > { %19869 = vmatprep.subr.bf16.mxu1 %v22467_v54  ;;  %v22509_v54 = vld [vmem:[%s30462_s21 + $0x4c8] ss:$12 sps:$4 sm:$0xff]  }
 0xe7a   : > { %15907 = vmatpush1.bf16.msra.mxu0 %v22464_v32  ;;  %v22516_v32 = vld [vmem:[%s30462_s21 + $0x4e4] ss:$12 sps:$4 sm:$0xff]  }
 0xe7b   : > { %16284 = vmatmul.mubr.bf16.gmra.mrb[48].mxu1 %v29256_v36  ;;  %15908 = vmatprep.subr.bf16.mxu0 %v22471_v4  ;;  %v22474_v36 = vld [vmem:[%s30462_s21 + $0x420] ss:$12 sps:$4 sm:$0xff]   ;;  %v22513_v4 = vld [vmem:[%s30462_s21 + $0x4d0] ss:$12 sps:$4 sm:$0xff]  }
 0xe7c   : > { %16291 = vmatprep.mubr.bf16.mxu1 %v29308_v58  ;;  %19870 = vmatpush3.bf16.msra.mxu1 %v22468_v33  ;;  %v22481_v58 = vld [vmem:[%s30462_s21 + $0x43c] ss:$12 sps:$4 sm:$0xff]  }
 0xe7d   : > { %19871 = vmatprep.subr.bf16.mxu1 %v22472_v25  ;;  %v22517_v33 = vld [vmem:[%s30462_s21 + $0x5a8] ss:$12 sps:$4 sm:$0xff]   ;;  %v29553_v25 = vld [vmem:[#allocation11 + $0x8] sm:$0xf] }
 0xe7e   : > { %15909 = vmatpush1.bf16.msra.mxu0 %v22469_v24  ;;  %v22514_v24 = vld [vmem:[%s30462_s21 + $0x4e0] ss:$12 sps:$4 sm:$0xff]  }
 0xe7f   : > { %15910 = vmatprep.subr.bf16.mxu0 %v22476_v53  ;;  %v22521_v53 = vld [vmem:[%s30462_s21 + $0x4fc] ss:$12 sps:$4 sm:$0xff]  }
 0xe80   : > { %19872 = vmatpush3.bf16.msra.mxu1 %v22473_v6  ;;  %v22518_v6 = vld [vmem:[%s30462_s21 + $0x4e8] ss:$12 sps:$4 sm:$0xff]  }
 0xe81   : > { %19873 = vmatprep.subr.bf16.mxu1 %v22477_v0  ;;  %v29568_v0 = vrot.slane %v29553_v25, %v30443_v21 }
 0xe82   : > { %15911 = vmatpush1.bf16.msra.mxu0 %v22474_v36 }
 0xe83   : > { %16292 = vmatmul.mubr.bf16.gmra.mrb[52].mxu1 %v29300_v12  ;;  %15912 = vmatprep.subr.bf16.mxu0 %v22481_v58  ;;  %v22484_v12 = vld [vmem:[%s30462_s21 + $0x450] ss:$12 sps:$4 sm:$0xff]   ;;  %v29576_v58 = vrot.slane %v29553_v25, %v30444_v49 }
 0xe84   : > { %16299 = vmatprep.mubr.bf16.mxu1 %v29352_v48  ;;  %19874 = vmatpush3.bf16.msra.mxu1 %v22478_v61  ;;  %v22491_v48 = vld [vmem:[%s30462_s21 + $0x46c] ss:$12 sps:$4 sm:$0xff]  }
 0xe85   : > { %19875 = vmatprep.subr.bf16.mxu1 %v22482_v30  ;;  %v22522_v61 = vld [vmem:[%s30462_s21 + $0x5c0] ss:$12 sps:$4 sm:$0xff]   ;;  %v22519_v30 = vld [vmem:[%s30462_s21 + $0x4f8] ss:$12 sps:$4 sm:$0xff]  }
 0xe86   : > { %15913 = vmatpush1.bf16.msra.mxu0 %v22479_v16 }
 0xe87   : > { %15914 = vmatprep.subr.bf16.mxu0 %v22486_v22 }
 0xe88   : > { %19876 = vmatpush3.bf16.msra.mxu1 %v22483_v39  ;;  %v22526_v39 = vld [vmem:[%s30462_s21 + $0x514] ss:$12 sps:$4 sm:$0xff]  }
 0xe89   : > { %19877 = vmatprep.subr.bf16.mxu1 %v22487_v37 }
 0xe8a   : > { %15915 = vmatpush1.bf16.msra.mxu0 %v22484_v12 }
 0xe8b   : > { %16300 = vmatmul.mubr.bf16.gmra.mrb[56].mxu1 %v29344_v15  ;;  %15916 = vmatprep.subr.bf16.mxu0 %v22491_v48  ;;  %v22494_v15 = vld [vmem:[%s30462_s21 + $0x480] ss:$12 sps:$4 sm:$0xff]  }
 0xe8c   : > { %19878 = vmatpush3.bf16.msra.mxu1 %v22488_v9  ;;  %16340 = vmatprep.mubr.bf16.mxu1 %v29214_v45  ;;  %v22498_v45 = vld [vmem:[%s30462_s21 + $0x488] ss:$12 sps:$4 sm:$0xff]  }
 0xe8d   : > { %19879 = vmatprep.subr.bf16.mxu1 %v22492_v60 }
 0xe8e   : > { %15917 = vmatpush1.bf16.msra.mxu0 %v22489_v34 }
 0xe8f   : > { %15959 = vmatprep.subr.bf16.mxu0 %v22496_v62 }
 0xe90   : > { %19880 = vmatpush3.bf16.msra.mxu1 %v22493_v43 }
 0xe91   : > { %15919 = vmatmul.mubr.bf16.vlgmr.msra.gmra.mrb[124].mxu0 %v29210_v38  ;;  %19905 = vmatprep.subr.bf16.mxu1 %v22497_v1 }
 0xe92   : > { %15928 = vmatprep.mubr.bf16.mxu0 %v29258_v29  ;;  %15960 = vmatpush1.bf16.msra.mxu0 %v22494_v15 }
 0xe93   : > { %16341 = vmatmul.mubr.bf16.vlgmr.msra.gmra.mrb[60].mxu1 %v29210_v38  ;;  %15961 = vmatprep.subr.bf16.mxu0 %v22501_v10  ;;  %v22504_v38 = vld [vmem:[%s30462_s21 + $0x4b0] ss:$12 sps:$4 sm:$0xff]  }
 0xe94   : > { %16348 = vmatprep.mubr.bf16.mxu1 %v29258_v29  ;;  %19906 = vmatpush3.bf16.msra.mxu1 %v22498_v45  ;;  %v22511_v29 = vld [vmem:[%s30462_s21 + $0x4cc] ss:$12 sps:$4 sm:$0xff]   ;;  %v22524_v10 = vld [vmem:[%s30462_s21 + $0x510] ss:$12 sps:$4 sm:$0xff]  }
 0xe95   : > { %19907 = vmatprep.subr.bf16.mxu1 %v22502_v7 }
 0xe96   : > { %15962 = vmatpush1.bf16.msra.mxu0 %v22499_v20 }
 0xe97   : > { %15963 = vmatprep.subr.bf16.mxu0 %v22506_v56  ;;  %v22531_v56 = vld [vmem:[%s30462_s21 + $0x52c] ss:$12 sps:$4 sm:$0xff]  }
 0xe98   : > { %19908 = vmatpush3.bf16.msra.mxu1 %v22503_v51 }
 0xe99   : > { %15929 = vmatmul.mubr.bf16.gmra.mrb[128].mxu0 %v29253_v14  ;;  %19909 = vmatprep.subr.bf16.mxu1 %v22507_v18 }
 0xe9a   : > { %15938 = vmatprep.mubr.bf16.mxu0 %v29302_v27  ;;  %15964 = vmatpush1.bf16.msra.mxu0 %v22504_v38 }
 0xe9b   : > { %16349 = vmatmul.mubr.bf16.gmra.mrb[64].mxu1 %v29253_v14  ;;  %15965 = vmatprep.subr.bf16.mxu0 %v22511_v29  ;;  %v11309_v14 = vsub.s32 6, %v30463_v40  ;;  %v22528_v29 = vld [vmem:[%s30462_s21 + $0x518] ss:$12 sps:$4 sm:$0xff]  }
 0xe9c   : > { %16356 = vmatprep.mubr.bf16.mxu1 %v29302_v27  ;;  %19910 = vmatpush3.bf16.msra.mxu1 %v22508_v47  ;;  %v11313_v27 = vsub.s32 7, %v30463_v40  ;;  %v22636_v40 = vld [vmem:[%s30462_s21 + $0x76c] ss:$12 sps:$4 sm:$0xff]  }
 0xe9d   : > { %19911 = vmatprep.subr.bf16.mxu1 %v22512_v63  ;;  %v29572_v36 = vrot.slane %v29153_v13, %v11309_v14 }
 0xe9e   : > { %15966 = vmatpush1.bf16.msra.mxu0 %v22509_v54  ;;  %v29586_v16 = vrot.slane %v29153_v13, %v11313_v27  ;;  %v22523_v13 = vld [vmem:[%s30462_s21 + $0x500] ss:$12 sps:$4 sm:$0xff]   ;;  %v22529_v27 = vld [vmem:[%s30462_s21 + $0x528] ss:$12 sps:$4 sm:$0xff]  }
 0xe9f   : > { %15967 = vmatprep.subr.bf16.mxu0 %v22516_v32 }
 0xea0   : > { %19912 = vmatpush3.bf16.msra.mxu1 %v22513_v4  ;;  %v22532_v4 = vld [vmem:[%s30462_s21 + $0x5f0] ss:$12 sps:$4 sm:$0xff]  }
 0xea1   : > { %15939 = vmatmul.mubr.bf16.gmra.mrb[132].mxu0 %v29297_v31  ;;  %19913 = vmatprep.subr.bf16.mxu1 %v22517_v33 }
 0xea2   : > { %15948 = vmatprep.mubr.bf16.mxu0 %v29346_v3  ;;  %15968 = vmatpush1.bf16.msra.mxu0 %v22514_v24 }
 0xea3   : > { %16357 = vmatmul.mubr.bf16.gmra.mrb[68].mxu1 %v29297_v31  ;;  %v13474_v22 = vpop.f32.mrb[108].mxu0  ;;  %15969 = vmatprep.subr.bf16.mxu0 %v22521_v53 }
 0xea4   : > { %16364 = vmatprep.mubr.bf16.mxu1 %v29346_v3  ;;  %19914 = vmatpush3.bf16.msra.mxu1 %v22518_v6  ;;  %v20873_v37 = vadd.f32 %v13474_v22, %v29568_v0  ;;  %v13328_v12 = vpop.f32.mrb[252].mxu1  ;;  %v13476_v48 = vpop.f32.mrb[109].mxu0  ;;  %v22527_v3 = vld [vmem:[%s30462_s21 + $0x5d8] ss:$12 sps:$4 sm:$0xff]  }
 0xea5   : > { %v20857_v9 = vadd.f32 %v13328_v12, %v29572_v36  ;;  %v20874_v31 = vadd.f32 %v13476_v48, %v29576_v58  ;;  %v13330_v60 = vpop.f32.mrb[253].mxu1  ;;  %v13478_v34 = vpop.f32.mrb[110].mxu0  ;;  %19915 = vmatprep.subr.bf16.mxu1 %v22522_v61  ;;  %v22533_v48 = vld [vmem:[%s30462_s21 + $0x530] ss:$12 sps:$4 sm:$0xff]  }
 0xea6   : > { %v20858_v62 = vadd.f32 %v13330_v60, %v29586_v16  ;;  %v20875_v43 = vadd.f32 %v13478_v34, %v29568_v0  ;;  %15970 = vmatpush1.bf16.msra.mxu0 %v22519_v30  ;;  %v13332_v1 = vpop.f32.mrb[254].mxu1  ;;  %v13480_v15 = vpop.f32.mrb[111].mxu0  ;;  %v13667_v51 = vmax.f32 %v20873_v37, 0.0  ;;  %v22536_v30 = vld [vmem:[%s30462_s21 + $0x544] ss:$12 sps:$4 sm:$0xff]  }
 0xea7   : > { %v20859_v45 = vadd.f32 %v13332_v1, %v29572_v36  ;;  %v20876_v7 = vadd.f32 %v13480_v15, %v29576_v58  ;;  %v13334_v20 = vpop.f32.mrb[255].mxu1  ;;  %15971 = vmatprep.subr.bf16.mxu0 %v22526_v39  ;;  %v13665_v47 = vmax.f32 %v20857_v9, 0.0  ;;  %v13668_v63 = vmax.f32 %v20874_v31, 0.0  ;;  %v22537_v60 = vld [vmem:[%s30462_s21 + $0x6c8] ss:$12 sps:$4 sm:$0xff]  }
 0xea8   : > { %v13679_v18 = vmax.f32 %v20875_v43, 0.0  ;;  %19916 = vmatpush3.bf16.msra.mxu1 %v22523_v13  ;;  %v20860_v38 = vadd.f32 %v13334_v20, %v29586_v16  ;;  %v13666_v33 = vmax.f32 %v20858_v62, 0.0  ;;  %v22534_v1 = vld [vmem:[%s30462_s21 + $0x540] ss:$12 sps:$4 sm:$0xff]  }
 0xea9   : > { %v13677_v54 = vmax.f32 %v20859_v45, 0.0  ;;  %v13680_v32 = vmax.f32 %v20876_v7, 0.0  ;;  %15949 = vmatmul.mubr.bf16.gmra.mrb[136].mxu0 %v29341_v44  ;;  %19917 = vmatprep.subr.bf16.mxu1 %v22527_v3  ;;  %v22541_v7 = vld [vmem:[%s30462_s21 + $0x55c] ss:$12 sps:$4 sm:$0xff]  }
 0xeaa   : > { %v29620_v14 = vpack.c.bf16 %v13679_v18, %v13667_v51  ;;  %v13678_v24 = vmax.f32 %v20860_v38, 0.0  ;;  %15972 = vmatpush1.bf16.msra.mxu0 %v22524_v10  ;;  %v22538_v18 = vld [vmem:[%s30462_s21 + $0x608] ss:$12 sps:$4 sm:$0xff]  }
 0xeab   : > { %v29625_v53 = vpack.c.bf16 %v13677_v54, %v13665_v47  ;;  %v29627_v6 = vpack.c.bf16 %v13680_v32, %v13668_v63  ;;  %16365 = vmatmul.mubr.bf16.gmra.mrb[72].mxu1 %v29341_v44  ;;  %v13484_v61 = vpop.f32.mrb[112].mxu0  ;;  %15973 = vmatprep.subr.bf16.mxu0 %v22531_v56  ;;  %v22542_v54 = vld [vmem:[%s30462_s21 + $0x6e0] ss:$12 sps:$4 sm:$0xff]  }
 0xeac   : > { %v13762_v22 = vpack.c.bf16 %v13678_v24, %v13666_v33  ;;  %19918 = vmatpush3.bf16.msra.mxu1 %v22528_v29  ;;  %v20877_v39 = vadd.f32 %v13484_v61, %v29568_v0  ;;  %v13338_v37 = vpop.f32.mrb[0].mxu1  ;;  %v13486_v12 = vpop.f32.mrb[113].mxu0  ;;  %v22539_v24 = vld [vmem:[%s30462_s21 + $0x558] ss:$12 sps:$4 sm:$0xff]  }
 0xead   : > { %v20861_v13 = vadd.f32 %v13338_v37, %v29572_v36  ;;  %v20878_v44 = vadd.f32 %v13486_v12, %v29576_v58  ;;  %v13340_v9 = vpop.f32.mrb[1].mxu1  ;;  %v13488_v31 = vpop.f32.mrb[114].mxu0  ;;  %19919 = vmatprep.subr.bf16.mxu1 %v22532_v4 }
 0xeae   : > { %v20862_v34 = vadd.f32 %v13340_v9, %v29586_v16  ;;  %v20879_v3 = vadd.f32 %v13488_v31, %v29568_v0  ;;  %15974 = vmatpush1.bf16.msra.mxu0 %v22529_v27  ;;  %v13342_v62 = vpop.f32.mrb[2].mxu1  ;;  %v13490_v43 = vpop.f32.mrb[115].mxu0  ;;  %15991 = vmatprep.mubr.bf16.mxu0 %v13762_v22  ;;  %v13691_v20 = vmax.f32 %v20877_v39, 0.0 }
 0xeaf   : > { %v20863_v15 = vadd.f32 %v13342_v62, %v29572_v36  ;;  %v20880_v10 = vadd.f32 %v13490_v43, %v29576_v58  ;;  %16405 = vmatprep.mubr.bf16.mxu1 %v13762_v22  ;;  %v13344_v45 = vpop.f32.mrb[3].mxu1  ;;  %15975 = vmatprep.subr.bf16.mxu0 %v22536_v30  ;;  %v13689_v38 = vmax.f32 %v20861_v13, 0.0  ;;  %v13692_v29 = vmax.f32 %v20878_v44, 0.0  ;;  %v22546_v22 = vld [vmem:[%s30462_s21 + $0x574] ss:$12 sps:$4 sm:$0xff]  }
 0xeb0   : > { %v13703_v56 = vmax.f32 %v20879_v3, 0.0  ;;  %19920 = vmatpush3.bf16.msra.mxu1 %v22533_v48  ;;  %v20864_v51 = vadd.f32 %v13344_v45, %v29586_v16  ;;  %v13690_v32 = vmax.f32 %v20862_v34, 0.0  ;;  %v22543_v13 = vld [vmem:[%s30462_s21 + $0x620] ss:$12 sps:$4 sm:$0xff]   ;;  %v22547_v34 = vld [vmem:[%s30462_s21 + $0x6f8] ss:$12 sps:$4 sm:$0xff]  }
 0xeb1   : > { %v13701_v47 = vmax.f32 %v20863_v15, 0.0  ;;  %v13704_v63 = vmax.f32 %v20880_v10, 0.0  ;;  %19945 = vmatprep.subr.bf16.mxu1 %v22537_v60  ;;  %v22544_v15 = vld [vmem:[%s30462_s21 + $0x570] ss:$12 sps:$4 sm:$0xff]  }
 0xeb2   : > { %v29659_v4 = vpack.c.bf16 %v13703_v56, %v13691_v20  ;;  %v13702_v33 = vmax.f32 %v20864_v51, 0.0  ;;  %15976 = vmatpush1.bf16.msra.mxu0 %v22534_v1  ;;  %v22551_v20 = vld [vmem:[%s30462_s21 + $0x58c] ss:$12 sps:$4 sm:$0xff]  }
 0xeb3   : > { %v29664_v27 = vpack.c.bf16 %v13701_v47, %v13689_v38  ;;  %v29666_v61 = vpack.c.bf16 %v13704_v63, %v13692_v29  ;;  %16406 = vmatmul.mubr.bf16.vlgmr.msra.gmra.mrb[76].mxu1 %v29625_v53  ;;  %v13494_v30 = vpop.f32.mrb[116].mxu0  ;;  %15977 = vmatprep.subr.bf16.mxu0 %v22541_v7  ;;  %v22548_v38 = vld [vmem:[%s30462_s21 + $0x638] ss:$12 sps:$4 sm:$0xff]  }
 0xeb4   : > { %v29672_v39 = vpack.c.bf16 %v13702_v33, %v13690_v32  ;;  %19946 = vmatpush3.bf16.msra.mxu1 %v22538_v18  ;;  %v20881_v37 = vadd.f32 %v13494_v30, %v29568_v0  ;;  %v13348_v12 = vpop.f32.mrb[4].mxu1  ;;  %v13496_v48 = vpop.f32.mrb[117].mxu0  ;;  %v22552_v32 = vld [vmem:[%s30462_s21 + $0x710] ss:$12 sps:$4 sm:$0xff]  }
 0xeb5   : > { %v20865_v44 = vadd.f32 %v13348_v12, %v29572_v36  ;;  %v20882_v9 = vadd.f32 %v13496_v48, %v29576_v58  ;;  %v13350_v31 = vpop.f32.mrb[5].mxu1  ;;  %v13498_v60 = vpop.f32.mrb[118].mxu0  ;;  %19947 = vmatprep.subr.bf16.mxu1 %v22542_v54 }
 0xeb6   : > { %v20866_v3 = vadd.f32 %v13350_v31, %v29586_v16  ;;  %v20883_v62 = vadd.f32 %v13498_v60, %v29568_v0  ;;  %15978 = vmatpush1.bf16.msra.mxu0 %v22539_v24  ;;  %v13352_v43 = vpop.f32.mrb[6].mxu1  ;;  %v13500_v1 = vpop.f32.mrb[119].mxu0  ;;  %16413 = vmatprep.mubr.bf16.mxu1 %v29672_v39  ;;  %v13715_v56 = vmax.f32 %v20881_v37, 0.0 }
 0xeb7   : > { %v20867_v10 = vadd.f32 %v13352_v43, %v29572_v36  ;;  %v20884_v45 = vadd.f32 %v13500_v1, %v29576_v58  ;;  %v13354_v7 = vpop.f32.mrb[7].mxu1  ;;  %15979 = vmatprep.subr.bf16.mxu0 %v22546_v22  ;;  %v13713_v29 = vmax.f32 %v20865_v44, 0.0  ;;  %v13716_v47 = vmax.f32 %v20882_v9, 0.0  ;;  %v22549_v22 = vld [vmem:[%s30462_s21 + $0x588] ss:$12 sps:$4 sm:$0xff]  }
 0xeb8   : > { %v13727_v51 = vmax.f32 %v20883_v62, 0.0  ;;  %19948 = vmatpush3.bf16.msra.mxu1 %v22543_v13  ;;  %v20868_v18 = vadd.f32 %v13354_v7, %v29586_v16  ;;  %v13714_v33 = vmax.f32 %v20866_v3, 0.0  ;;  %v22556_v13 = vld [vmem:[%s30462_s21 + $0x5a4] ss:$12 sps:$4 sm:$0xff]  }
 0xeb9   : > { %v13725_v63 = vmax.f32 %v20867_v10, 0.0  ;;  %v13728_v54 = vmax.f32 %v20884_v45, 0.0  ;;  %19949 = vmatprep.subr.bf16.mxu1 %v22547_v34  ;;  %v22553_v34 = vld [vmem:[%s30462_s21 + $0x650] ss:$12 sps:$4 sm:$0xff]  }
 0xeba   : > { %v29701_v24 = vpack.c.bf16 %v13727_v51, %v13715_v56  ;;  %v13726_v30 = vmax.f32 %v20868_v18, 0.0  ;;  %15980 = vmatpush1.bf16.msra.mxu0 %v22544_v15  ;;  %v22557_v15 = vld [vmem:[%s30462_s21 + $0x728] ss:$12 sps:$4 sm:$0xff]   ;;  %v22554_v56 = vld [vmem:[%s30462_s21 + $0x5a0] ss:$12 sps:$4 sm:$0xff]  }
 0xebb   : > { %v29706_v37 = vpack.c.bf16 %v13725_v63, %v13713_v29  ;;  %v29708_v12 = vpack.c.bf16 %v13728_v54, %v13716_v47  ;;  %16414 = vmatmul.mubr.bf16.gmra.mrb[80].mxu1 %v29664_v27  ;;  %v13504_v48 = vpop.f32.mrb[120].mxu0  ;;  %15981 = vmatprep.subr.bf16.mxu0 %v22551_v20  ;;  %v22561_v29 = vld [vmem:[%s30462_s21 + $0x5bc] ss:$12 sps:$4 sm:$0xff]  }
 0xebc   : > { %v29714_v44 = vpack.c.bf16 %v13726_v30, %v13714_v33  ;;  %19950 = vmatpush3.bf16.msra.mxu1 %v22548_v38  ;;  %v20885_v9 = vadd.f32 %v13504_v48, %v29568_v0  ;;  %v13358_v31 = vpop.f32.mrb[8].mxu1  ;;  %v13506_v60 = vpop.f32.mrb[121].mxu0  ;;  %v22558_v54 = vld [vmem:[%s30462_s21 + $0x668] ss:$12 sps:$4 sm:$0xff]  }
 0xebd   : > { %v20869_v3 = vadd.f32 %v13358_v31, %v29572_v36  ;;  %v20886_v62 = vadd.f32 %v13506_v60, %v29576_v58  ;;  %v13360_v43 = vpop.f32.mrb[9].mxu1  ;;  %v13508_v1 = vpop.f32.mrb[122].mxu0  ;;  %19951 = vmatprep.subr.bf16.mxu1 %v22552_v32  ;;  %v22566_v60 = vld [vmem:[%s30462_s21 + $0x5d4] ss:$12 sps:$4 sm:$0xff]  }
 0xebe   : > { %v20870_v10 = vadd.f32 %v13360_v43, %v29586_v16  ;;  %v20887_v45 = vadd.f32 %v13508_v1, %v29568_v0  ;;  %15982 = vmatpush1.bf16.msra.mxu0 %v22549_v22  ;;  %v13362_v7 = vpop.f32.mrb[10].mxu1  ;;  %v13510_v20 = vpop.f32.mrb[123].mxu0  ;;  %16421 = vmatprep.mubr.bf16.mxu1 %v29714_v44  ;;  %v13739_v0 = vmax.f32 %v20885_v9, 0.0  ;;  %v22564_v43 = vld [vmem:[%s30462_s21 + $0x5d0] ss:$12 sps:$4 sm:$0xff]  }
 0xebf   : > { %v20871_v51 = vadd.f32 %v13362_v7, %v29572_v36  ;;  %v20888_v18 = vadd.f32 %v13510_v20, %v29576_v58  ;;  %v13364_v38 = vpop.f32.mrb[11].mxu1  ;;  %15983 = vmatprep.subr.bf16.mxu0 %v22556_v13  ;;  %v13737_v32 = vmax.f32 %v20869_v3, 0.0  ;;  %v13740_v33 = vmax.f32 %v20886_v62, 0.0  ;;  %v22562_v58 = vld [vmem:[%s30462_s21 + $0x740] ss:$12 sps:$4 sm:$0xff]  }
 0xec0   : > { %v13751_v47 = vmax.f32 %v20887_v45, 0.0  ;;  %19952 = vmatpush3.bf16.msra.mxu1 %v22553_v34  ;;  %v20872_v63 = vadd.f32 %v13364_v38, %v29586_v16  ;;  %v13738_v22 = vmax.f32 %v20870_v10, 0.0  ;;  %v22559_v16 = vld [vmem:[%s30462_s21 + $0x5b8] ss:$12 sps:$4 sm:$0xff]   ;;  %v22563_v3 = vld [vmem:[%s30462_s21 + $0x680] ss:$12 sps:$4 sm:$0xff]  }
 0xec1   : > { %v13749_v36 = vmax.f32 %v20871_v51, 0.0  ;;  %v13752_v30 = vmax.f32 %v20888_v18, 0.0  ;;  %19953 = vmatprep.subr.bf16.mxu1 %v22557_v15  ;;  %v22567_v62 = vld [vmem:[%s30462_s21 + $0x758] ss:$12 sps:$4 sm:$0xff]   ;;  %v22572_v10 = vld [vmem:[%s30462_s21 + $0x770] ss:$12 sps:$4 sm:$0xff]  }
 0xec2   : > { %v29743_v48 = vpack.c.bf16 %v13751_v47, %v13739_v0  ;;  %v13750_v13 = vmax.f32 %v20872_v63, 0.0  ;;  %15984 = vmatpush1.bf16.msra.mxu0 %v22554_v56  ;;  %v22571_v1 = vld [vmem:[%s30462_s21 + $0x5ec] ss:$12 sps:$4 sm:$0xff]   ;;  %v22569_v45 = vld [vmem:[%s30462_s21 + $0x5e8] ss:$12 sps:$4 sm:$0xff]  }
 0xec3   : > { %v29748_v9 = vpack.c.bf16 %v13749_v36, %v13737_v32  ;;  %v29750_v31 = vpack.c.bf16 %v13752_v30, %v13740_v33  ;;  %16422 = vmatmul.mubr.bf16.gmra.mrb[84].mxu1 %v29706_v37  ;;  %15985 = vmatprep.subr.bf16.mxu0 %v22561_v29  ;;  %v22568_v15 = vld [vmem:[%s30462_s21 + $0x698] ss:$12 sps:$4 sm:$0xff]   ;;  %v22573_v20 = vld [vmem:[%s30462_s21 + $0x6b0] ss:$12 sps:$4 sm:$0xff]   ;;  %v22598_v56 = vld [vmem:[%s30462_s21 + $0x848] ss:$12 sps:$4 sm:$0xff]  }
 0xec4   : > { %v29756_v34 = vpack.c.bf16 %v13750_v13, %v13738_v22  ;;  %19954 = vmatpush3.bf16.msra.mxu1 %v22558_v54  ;;  %v22576_v7 = vld [vmem:[%s30462_s21 + $0x604] ss:$12 sps:$4 sm:$0xff]   ;;  %v22574_v51 = vld [vmem:[%s30462_s21 + $0x600] ss:$12 sps:$4 sm:$0xff]   ;;  %v22579_v18 = vld [vmem:[%s30462_s21 + $0x61c] ss:$12 sps:$4 sm:$0xff]  }
 0xec5   : > { %19955 = vmatprep.subr.bf16.mxu1 %v22562_v58  ;;  %v22602_v38 = vld [vmem:[%s30462_s21 + $0x788] ss:$12 sps:$4 sm:$0xff]   ;;  %v22603_v29 = vld [vmem:[%s30462_s21 + $0x860] ss:$12 sps:$4 sm:$0xff]   ;;  %v22577_v0 = vld [vmem:[%s30462_s21 + $0x618] ss:$12 sps:$4 sm:$0xff]  }
 0xec6   : > { %15986 = vmatpush1.bf16.msra.mxu0 %v22559_v16  ;;  %16429 = vmatprep.mubr.bf16.mxu1 %v29756_v34  ;;  %v22582_v47 = vld [vmem:[%s30462_s21 + $0x634] ss:$12 sps:$4 sm:$0xff]   ;;  %v22580_v63 = vld [vmem:[%s30462_s21 + $0x630] ss:$12 sps:$4 sm:$0xff]   ;;  %v22585_v54 = vld [vmem:[%s30462_s21 + $0x64c] ss:$12 sps:$4 sm:$0xff]  }
 0xec7   : > { %15987 = vmatprep.subr.bf16.mxu0 %v22566_v60  ;;  %v22612_v32 = vld [vmem:[%s30462_s21 + $0x7b8] ss:$12 sps:$4 sm:$0xff]   ;;  %v22613_v33 = vld [vmem:[%s30462_s21 + $0x890] ss:$12 sps:$4 sm:$0xff]   ;;  %v22583_v36 = vld [vmem:[%s30462_s21 + $0x648] ss:$12 sps:$4 sm:$0xff]  }
 0xec8   : > { %19956 = vmatpush3.bf16.msra.mxu1 %v22563_v3  ;;  %v22588_v30 = vld [vmem:[%s30462_s21 + $0x664] ss:$12 sps:$4 sm:$0xff]   ;;  %v22586_v58 = vld [vmem:[%s30462_s21 + $0x660] ss:$12 sps:$4 sm:$0xff]   ;;  %v22591_v22 = vld [vmem:[%s30462_s21 + $0x67c] ss:$12 sps:$4 sm:$0xff]  }
 0xec9   : > { %19957 = vmatprep.subr.bf16.mxu1 %v22567_v62  ;;  %v22622_v13 = vld [vmem:[%s30462_s21 + $0x7e8] ss:$12 sps:$4 sm:$0xff]   ;;  %v22623_v16 = vld [vmem:[%s30462_s21 + $0x8c0] ss:$12 sps:$4 sm:$0xff]   ;;  %v22589_v60 = vld [vmem:[%s30462_s21 + $0x678] ss:$12 sps:$4 sm:$0xff]  }
 0xeca   : > { %15988 = vmatpush1.bf16.msra.mxu0 %v22564_v43  ;;  %v22594_v3 = vld [vmem:[%s30462_s21 + $0x694] ss:$12 sps:$4 sm:$0xff]   ;;  %v22592_v62 = vld [vmem:[%s30462_s21 + $0x690] ss:$12 sps:$4 sm:$0xff]   ;;  %v22597_v43 = vld [vmem:[%s30462_s21 + $0x6ac] ss:$12 sps:$4 sm:$0xff]  }
 0xecb   : > { %16430 = vmatmul.mubr.bf16.gmra.mrb[88].mxu1 %v29748_v9  ;;  %15989 = vmatprep.subr.bf16.mxu0 %v22571_v1  ;;  %v22632_v1 = vld [vmem:[%s30462_s21 + $0x818] ss:$12 sps:$4 sm:$0xff]  }
 0xecc   : > { %19958 = vmatpush3.bf16.msra.mxu1 %v22568_v15  ;;  %16470 = vmatprep.mubr.bf16.mxu1 %v29627_v6  ;;  %v22633_v15 = vld [vmem:[%s30462_s21 + $0x8f0] ss:$12 sps:$4 sm:$0xff]  }
 0xecd   : > { %19959 = vmatprep.subr.bf16.mxu1 %v22572_v10  ;;  %v22595_v10 = vld [vmem:[%s30462_s21 + $0x6a8] ss:$12 sps:$4 sm:$0xff]  }
 0xece   : > { %15990 = vmatpush1.bf16.msra.mxu0 %v22569_v45  ;;  %v22601_v45 = vld [vmem:[%s30462_s21 + $0x6c4] ss:$12 sps:$4 sm:$0xff]  }
 0xecf   : > { %16032 = vmatprep.subr.bf16.mxu0 %v22576_v7  ;;  %v22606_v7 = vld [vmem:[%s30462_s21 + $0x6dc] ss:$12 sps:$4 sm:$0xff]  }
 0xed0   : > { %19960 = vmatpush3.bf16.msra.mxu1 %v22573_v20  ;;  %v22604_v20 = vld [vmem:[%s30462_s21 + $0x6d8] ss:$12 sps:$4 sm:$0xff]  }
 0xed1   : > { %15992 = vmatmul.mubr.bf16.vlgmr.msra.gmra.mrb[124].mxu0 %v29625_v53  ;;  %19985 = vmatprep.subr.bf16.mxu1 %v22598_v56  ;;  %v22607_v53 = vld [vmem:[%s30462_s21 + $0x7a0] ss:$12 sps:$4 sm:$0xff]  }
 0xed2   : > { %16001 = vmatprep.mubr.bf16.mxu0 %v29672_v39  ;;  %16033 = vmatpush1.bf16.msra.mxu0 %v22574_v51  ;;  %v22608_v39 = vld [vmem:[%s30462_s21 + $0x878] ss:$12 sps:$4 sm:$0xff]   ;;  %v22611_v56 = vld [vmem:[%s30462_s21 + $0x6f4] ss:$12 sps:$4 sm:$0xff]   ;;  %v22609_v51 = vld [vmem:[%s30462_s21 + $0x6f0] ss:$12 sps:$4 sm:$0xff]  }
 0xed3   : > { %16471 = vmatmul.mubr.bf16.vlgmr.msra.gmra.mrb[92].mxu1 %v29620_v14  ;;  %16034 = vmatprep.subr.bf16.mxu0 %v22579_v18  ;;  %v22616_v18 = vld [vmem:[%s30462_s21 + $0x70c] ss:$12 sps:$4 sm:$0xff]  }
 0xed4   : > { %16478 = vmatprep.mubr.bf16.mxu1 %v29666_v61  ;;  %19986 = vmatpush3.bf16.msra.mxu1 %v22602_v38  ;;  %v22614_v38 = vld [vmem:[%s30462_s21 + $0x708] ss:$12 sps:$4 sm:$0xff]  }
 0xed5   : > { %19987 = vmatprep.subr.bf16.mxu1 %v22603_v29  ;;  %v22621_v29 = vld [vmem:[%s30462_s21 + $0x724] ss:$12 sps:$4 sm:$0xff]  }
 0xed6   : > { %16035 = vmatpush1.bf16.msra.mxu0 %v22577_v0  ;;  %v22619_v0 = vld [vmem:[%s30462_s21 + $0x720] ss:$12 sps:$4 sm:$0xff]  }
 0xed7   : > { %16036 = vmatprep.subr.bf16.mxu0 %v22582_v47  ;;  %v22626_v47 = vld [vmem:[%s30462_s21 + $0x73c] ss:$12 sps:$4 sm:$0xff]  }
 0xed8   : > { %19988 = vmatpush3.bf16.msra.mxu1 %v22607_v53  ;;  %v29931_v53 = vrot.slane %v29553_v25, %v30445_v46 }
 0xed9   : > { %16002 = vmatmul.mubr.bf16.gmra.mrb[128].mxu0 %v29664_v27  ;;  %19989 = vmatprep.subr.bf16.mxu1 %v22608_v39  ;;  %v22617_v27 = vld [vmem:[%s30462_s21 + $0x7d0] ss:$12 sps:$4 sm:$0xff]   ;;  %v22624_v39 = vld [vmem:[%s30462_s21 + $0x738] ss:$12 sps:$4 sm:$0xff]  }
 0xeda   : > { %16011 = vmatprep.mubr.bf16.mxu0 %v29714_v44  ;;  %16037 = vmatpush1.bf16.msra.mxu0 %v22580_v63  ;;  %v22618_v44 = vld [vmem:[%s30462_s21 + $0x8a8] ss:$12 sps:$4 sm:$0xff]   ;;  %v29939_v63 = vrot.slane %v29553_v25, %v11297_v26 }
 0xedb   : > { %16479 = vmatmul.mubr.bf16.gmra.mrb[96].mxu1 %v29659_v4  ;;  %16038 = vmatprep.subr.bf16.mxu0 %v22585_v54  ;;  %v22631_v54 = vld [vmem:[%s30462_s21 + $0x754] ss:$12 sps:$4 sm:$0xff]  }
 0xedc   : > { %16486 = vmatprep.mubr.bf16.mxu1 %v29708_v12  ;;  %19990 = vmatpush3.bf16.msra.mxu1 %v22612_v32 }
 0xedd   : > { %19991 = vmatprep.subr.bf16.mxu1 %v22613_v33 }
 0xede   : > { %16039 = vmatpush1.bf16.msra.mxu0 %v22583_v36 }
 0xedf   : > { %16040 = vmatprep.subr.bf16.mxu0 %v22588_v30  ;;  %v22629_v30 = vld [vmem:[%s30462_s21 + $0x750] ss:$12 sps:$4 sm:$0xff]  }
 0xee0   : > { %19992 = vmatpush3.bf16.msra.mxu1 %v22617_v27 }
 0xee1   : > { %16012 = vmatmul.mubr.bf16.gmra.mrb[132].mxu0 %v29706_v37  ;;  %19993 = vmatprep.subr.bf16.mxu1 %v22618_v44  ;;  %v22627_v37 = vld [vmem:[%s30462_s21 + $0x800] ss:$12 sps:$4 sm:$0xff]  }
 0xee2   : > { %16021 = vmatprep.mubr.bf16.mxu0 %v29756_v34  ;;  %16041 = vmatpush1.bf16.msra.mxu0 %v22586_v58  ;;  %v22628_v34 = vld [vmem:[%s30462_s21 + $0x8d8] ss:$12 sps:$4 sm:$0xff]  }
 0xee3   : > { %16487 = vmatmul.mubr.bf16.gmra.mrb[100].mxu1 %v29701_v24  ;;  %16042 = vmatprep.subr.bf16.mxu0 %v22591_v22 }
 0xee4   : > { %16494 = vmatprep.mubr.bf16.mxu1 %v29750_v31  ;;  %19994 = vmatpush3.bf16.msra.mxu1 %v22622_v13 }
 0xee5   : > { %19995 = vmatprep.subr.bf16.mxu1 %v22623_v16  ;;  %v22634_v16 = vld [vmem:[%s30462_s21 + $0x768] ss:$12 sps:$4 sm:$0xff]  }
 0xee6   : > { %16043 = vmatpush1.bf16.msra.mxu0 %v22589_v60 }
 0xee7   : > { %16044 = vmatprep.subr.bf16.mxu0 %v22594_v3 }
 0xee8   : > { %19996 = vmatpush3.bf16.msra.mxu1 %v22627_v37  ;;  %v22640_v37 = vld [vmem:[%s30462_s21 + $0x784] ss:$12 sps:$4 sm:$0xff]  }
 0xee9   : > { %16022 = vmatmul.mubr.bf16.gmra.mrb[136].mxu0 %v29748_v9  ;;  %19997 = vmatprep.subr.bf16.mxu1 %v22628_v34  ;;  %v22637_v9 = vld [vmem:[%s30462_s21 + $0x830] ss:$12 sps:$4 sm:$0xff]  }
 0xeea   : > { %16045 = vmatpush1.bf16.msra.mxu0 %v22592_v62  ;;  %16064 = vmatprep.mubr.bf16.mxu0 %v29627_v6  ;;  %v22599_v6 = vld [vmem:[%s30462_s21 + $0x6c0] ss:$12 sps:$4 sm:$0xff]  }
 0xeeb   : > { %16495 = vmatmul.mubr.bf16.gmra.mrb[104].mxu1 %v29743_v48  ;;  %16046 = vmatprep.subr.bf16.mxu0 %v22597_v43 }
 0xeec   : > { %19998 = vmatpush3.bf16.msra.mxu1 %v22632_v1 }
 0xeed   : > { %19999 = vmatprep.subr.bf16.mxu1 %v22633_v15 }
 0xeee   : > { %16047 = vmatpush1.bf16.msra.mxu0 %v22595_v10  ;;  %v22638_v10 = vld [vmem:[%s30462_s21 + $0x780] ss:$12 sps:$4 sm:$0xff]  }
 0xeef   : > { %16048 = vmatprep.subr.bf16.mxu0 %v22601_v45 }
 0xef0   : > { %20000 = vmatpush3.bf16.msra.mxu1 %v22637_v9 }
 0xef2   : > { %16049 = vmatpush1.bf16.msra.mxu0 %v22599_v6  ;;  %v22643_v6 = vld [vmem:[%s30462_s21 + $0x79c] ss:$12 sps:$4 sm:$0xff]  }
 0xef3   : > { %16050 = vmatprep.subr.bf16.mxu0 %v22606_v7 }
 0xef6   : > { %16051 = vmatpush1.bf16.msra.mxu0 %v22604_v20 }
 0xef7   : > { %16052 = vmatprep.subr.bf16.mxu0 %v22611_v56 }
 0xefa   : > { %16053 = vmatpush1.bf16.msra.mxu0 %v22609_v51 }
 0xefb   : > { %16054 = vmatprep.subr.bf16.mxu0 %v22616_v18 }
 0xefe   : > { %16055 = vmatpush1.bf16.msra.mxu0 %v22614_v38  ;;  %v22641_v38 = vld [vmem:[%s30462_s21 + $0x798] ss:$12 sps:$4 sm:$0xff]  }
 0xeff   : > { %16056 = vmatprep.subr.bf16.mxu0 %v22621_v29 }
 0xf02   : > { %16057 = vmatpush1.bf16.msra.mxu0 %v22619_v0 }
 0xf03   : > { %16058 = vmatprep.subr.bf16.mxu0 %v22626_v47  ;;  %v22646_v47 = vld [vmem:[%s30462_s21 + $0x7b4] ss:$12 sps:$4 sm:$0xff]  }
 0xf05   : > { %v13620_v32 = vpop.f32.mrb[12].mxu1 }
 0xf06   : > { %v20889_v33 = vadd.f32 %v13620_v32, %v29931_v53  ;;  %v13622_v36 = vpop.f32.mrb[13].mxu1  ;;  %16059 = vmatpush1.bf16.msra.mxu0 %v22624_v39 }
 0xf07   : > { %v20890_v27 = vadd.f32 %v13622_v36, %v29939_v63  ;;  %v13624_v44 = vpop.f32.mrb[14].mxu1  ;;  %16060 = vmatprep.subr.bf16.mxu0 %v22631_v54 }
 0xf08   : > { %v20891_v26 = vadd.f32 %v13624_v44, %v29931_v53  ;;  %v13626_v25 = vpop.f32.mrb[15].mxu1  ;;  %v13669_v22 = vmax.f32 %v20889_v33, 0.0  ;;  %v22644_v33 = vld [vmem:[%s30462_s21 + $0x7b0] ss:$12 sps:$4 sm:$0xff]  }
 0xf09   : > { %v20892_v58 = vadd.f32 %v13626_v25, %v29939_v63  ;;  %v13670_v60 = vmax.f32 %v20890_v27, 0.0  ;;  %v22649_v27 = vld [vmem:[%s30462_s21 + $0x7cc] ss:$12 sps:$4 sm:$0xff]  }
 0xf0a   : > { %v13681_v13 = vmax.f32 %v20891_v26, 0.0  ;;  %16061 = vmatpush1.bf16.msra.mxu0 %v22629_v30 }
 0xf0b   : > { %v13682_v3 = vmax.f32 %v20892_v58, 0.0  ;;  %16062 = vmatprep.subr.bf16.mxu0 %v22636_v40 }
 0xf0c   : > { %v29960_v34 = vpack.c.bf16 %v13681_v13, %v13669_v22  ;;  %v22647_v22 = vld [vmem:[%s30462_s21 + $0x7c8] ss:$12 sps:$4 sm:$0xff]  }
 0xf0d   : > { %v29962_v62 = vpack.c.bf16 %v13682_v3, %v13670_v60  ;;  %v13630_v43 = vpop.f32.mrb[16].mxu1  ;;  %v22652_v60 = vld [vmem:[%s30462_s21 + $0x7e4] ss:$12 sps:$4 sm:$0xff]  }
 0xf0e   : > { %v20893_v1 = vadd.f32 %v13630_v43, %v29931_v53  ;;  %v13632_v15 = vpop.f32.mrb[17].mxu1  ;;  %16063 = vmatpush1.bf16.msra.mxu0 %v22634_v16 }
 0xf0f   : > { %v20894_v45 = vadd.f32 %v13632_v15, %v29939_v63  ;;  %v13634_v9 = vpop.f32.mrb[18].mxu1  ;;  %16535 = vmatprep.mubr.bf16.mxu1 %v29962_v62  ;;  %16105 = vmatprep.subr.bf16.mxu0 %v22640_v37 }
 0xf10   : > { %v20895_v7 = vadd.f32 %v13634_v9, %v29931_v53  ;;  %v13636_v20 = vpop.f32.mrb[19].mxu1  ;;  %16536 = vmatmul.mubr.bf16.vlgmr.msra.gmra.mrb[108].mxu1 %v29960_v34  ;;  %v13693_v51 = vmax.f32 %v20893_v1, 0.0  ;;  %v22650_v1 = vld [vmem:[%s30462_s21 + $0x7e0] ss:$12 sps:$4 sm:$0xff]  }
 0xf11   : > { %v20896_v56 = vadd.f32 %v13636_v20, %v29939_v63  ;;  %16065 = vmatmul.mubr.bf16.vlgmr.msra.gmra.mrb[124].mxu0 %v29620_v14  ;;  %v13694_v29 = vmax.f32 %v20894_v45, 0.0  ;;  %v22655_v45 = vld [vmem:[%s30462_s21 + $0x7fc] ss:$12 sps:$4 sm:$0xff]  }
 0xf12   : > { %v13705_v18 = vmax.f32 %v20895_v7, 0.0  ;;  %16074 = vmatprep.mubr.bf16.mxu0 %v29666_v61  ;;  %16106 = vmatpush1.bf16.msra.mxu0 %v22638_v10 }
 0xf13   : > { %v13706_v0 = vmax.f32 %v20896_v56, 0.0  ;;  %16107 = vmatprep.subr.bf16.mxu0 %v22643_v6 }
 0xf14   : > { %v29984_v39 = vpack.c.bf16 %v13705_v18, %v13693_v51  ;;  %v22653_v51 = vld [vmem:[%s30462_s21 + $0x7f8] ss:$12 sps:$4 sm:$0xff]  }
 0xf15   : > { %v29986_v54 = vpack.c.bf16 %v13706_v0, %v13694_v29  ;;  %v13640_v14 = vpop.f32.mrb[20].mxu1 }
 0xf16   : > { %v20897_v32 = vadd.f32 %v13640_v14, %v29931_v53  ;;  %v13642_v61 = vpop.f32.mrb[21].mxu1  ;;  %16108 = vmatpush1.bf16.msra.mxu0 %v22641_v38 }
 0xf17   : > { %v20898_v36 = vadd.f32 %v13642_v61, %v29939_v63  ;;  %v13644_v30 = vpop.f32.mrb[22].mxu1  ;;  %16543 = vmatprep.mubr.bf16.mxu1 %v29986_v54  ;;  %16109 = vmatprep.subr.bf16.mxu0 %v22646_v47 }
 0xf18   : > { %v20899_v44 = vadd.f32 %v13644_v30, %v29931_v53  ;;  %v13646_v40 = vpop.f32.mrb[23].mxu1  ;;  %16544 = vmatmul.mubr.bf16.gmra.mrb[112].mxu1 %v29984_v39  ;;  %v13717_v25 = vmax.f32 %v20897_v32, 0.0  ;;  %v22661_v32 = vld [vmem:[%s30462_s21 + $0x82c] ss:$12 sps:$4 sm:$0xff]   ;;  %v22664_v30 = vld [vmem:[%s30462_s21 + $0x844] ss:$12 sps:$4 sm:$0xff]  }
 0xf19   : > { %v20900_v26 = vadd.f32 %v13646_v40, %v29939_v63  ;;  %16075 = vmatmul.mubr.bf16.gmra.mrb[128].mxu0 %v29659_v4  ;;  %v13718_v13 = vmax.f32 %v20898_v36, 0.0  ;;  %v22659_v36 = vld [vmem:[%s30462_s21 + $0x828] ss:$12 sps:$4 sm:$0xff]   ;;  %v22662_v40 = vld [vmem:[%s30462_s21 + $0x840] ss:$12 sps:$4 sm:$0xff]  }
 0xf1a   : > { %v13729_v58 = vmax.f32 %v20899_v44, 0.0  ;;  %16084 = vmatprep.mubr.bf16.mxu0 %v29708_v12  ;;  %16110 = vmatpush1.bf16.msra.mxu0 %v22644_v33 }
 0xf1b   : > { %v13730_v16 = vmax.f32 %v20900_v26, 0.0  ;;  %16111 = vmatprep.subr.bf16.mxu0 %v22649_v27 }
 0xf1c   : > { %v30008_v3 = vpack.c.bf16 %v13729_v58, %v13717_v25 }
 0xf1d   : > { %v30010_v37 = vpack.c.bf16 %v13730_v16, %v13718_v13  ;;  %v13650_v4 = vpop.f32.mrb[24].mxu1  ;;  %v22670_v13 = vld [vmem:[%s30462_s21 + $0x874] ss:$12 sps:$4 sm:$0xff]  }
 0xf1e   : > { %v20901_v43 = vadd.f32 %v13650_v4, %v29931_v53  ;;  %v13652_v12 = vpop.f32.mrb[25].mxu1  ;;  %16112 = vmatpush1.bf16.msra.mxu0 %v22647_v22  ;;  %v22665_v22 = vld [vmem:[%s30462_s21 + $0x858] ss:$12 sps:$4 sm:$0xff]   ;;  %v22668_v4 = vld [vmem:[%s30462_s21 + $0x870] ss:$12 sps:$4 sm:$0xff]  }
 0xf1f   : > { %v20902_v15 = vadd.f32 %v13652_v12, %v29939_v63  ;;  %v13654_v10 = vpop.f32.mrb[26].mxu1  ;;  %16551 = vmatprep.mubr.bf16.mxu1 %v30010_v37  ;;  %16113 = vmatprep.subr.bf16.mxu0 %v22652_v60 }
 0xf20   : > { %v20903_v9 = vadd.f32 %v13654_v10, %v29931_v53  ;;  %v13656_v6 = vpop.f32.mrb[27].mxu1  ;;  %16552 = vmatmul.mubr.bf16.gmra.mrb[116].mxu1 %v30008_v3  ;;  %v13741_v20 = vmax.f32 %v20901_v43, 0.0  ;;  %v22658_v53 = vld [vmem:[%s30462_s21 + $0x814] ss:$12 sps:$4 sm:$0xff]  }
 0xf21   : > { %v20904_v7 = vadd.f32 %v13656_v6, %v29939_v63  ;;  %16085 = vmatmul.mubr.bf16.gmra.mrb[132].mxu0 %v29701_v24  ;;  %v13742_v18 = vmax.f32 %v20902_v15, 0.0 }
 0xf22   : > { %v13753_v56 = vmax.f32 %v20903_v9, 0.0  ;;  %16094 = vmatprep.mubr.bf16.mxu0 %v29750_v31  ;;  %16114 = vmatpush1.bf16.msra.mxu0 %v22650_v1  ;;  %v22656_v31 = vld [vmem:[%s30462_s21 + $0x810] ss:$12 sps:$4 sm:$0xff]   ;;  %v22673_v1 = vld [vmem:[%s30462_s21 + $0x88c] ss:$12 sps:$4 sm:$0xff]  }
 0xf23   : > { %v13754_v38 = vmax.f32 %v20904_v7, 0.0  ;;  %16115 = vmatprep.subr.bf16.mxu0 %v22655_v45  ;;  %v22671_v45 = vld [vmem:[%s30462_s21 + $0x888] ss:$12 sps:$4 sm:$0xff]   ;;  %v22676_v9 = vld [vmem:[%s30462_s21 + $0x8a4] ss:$12 sps:$4 sm:$0xff]  }
 0xf24   : > { %v30032_v29 = vpack.c.bf16 %v13753_v56, %v13741_v20  ;;  %v22674_v7 = vld [vmem:[%s30462_s21 + $0x8a0] ss:$12 sps:$4 sm:$0xff]   ;;  %v22679_v56 = vld [vmem:[%s30462_s21 + $0x8bc] ss:$12 sps:$4 sm:$0xff]  }
 0xf25   : > { %v30034_v63 = vpack.c.bf16 %v13754_v38, %v13742_v18  ;;  %v19801_v24 = vpop.f32.mrb[28].mxu1  ;;  %v30084_v38 = vld [vmem:[#allocation13] sm:$0x7] }
 0xf26   : > { %16116 = vmatpush1.bf16.msra.mxu0 %v22653_v51  ;;  %v19802_v0 = vpop.f32.mrb[29].mxu1 }
 0xf27   : > { %v30039_v47 = vadd.f32 %v19802_v0, %v19801_v24  ;;  %v19804_v14 = vpop.f32.mrb[30].mxu1  ;;  %16559 = vmatprep.mubr.bf16.mxu1 %v30034_v63  ;;  %16117 = vmatprep.subr.bf16.mxu0 %v22658_v53  ;;  %v22677_v0 = vld [vmem:[%s30462_s21 + $0x8b8] ss:$12 sps:$4 sm:$0xff]  }
 0xf28   : > { %v19805_v61 = vpop.f32.mrb[31].mxu1  ;;  %16560 = vmatmul.mubr.bf16.gmra.mrb[120].mxu1 %v30032_v29 }
 0xf29   : > { %v19806_v33 = vadd.f32 %v19805_v61, %v19804_v14  ;;  %16095 = vmatmul.mubr.bf16.gmra.mrb[136].mxu0 %v29743_v48  ;;  %v14200_v14 = vrot.slane %v30084_v38, %v30445_v46  ;;  %v22680_v61 = vld [vmem:[%s30462_s21 + $0x8d0] ss:$12 sps:$4 sm:$0xff]  }
 0xf2a   : > { %16118 = vmatpush1.bf16.msra.mxu0 %v22656_v31  ;;  %16137 = vmatprep.mubr.bf16.mxu0 %v29962_v62  ;;  %v22667_v62 = vld [vmem:[%s30462_s21 + $0x85c] ss:$12 sps:$4 sm:$0xff]   ;;  %v22682_v31 = vld [vmem:[%s30462_s21 + $0x8d4] ss:$12 sps:$4 sm:$0xff]  }
 0xf2b   : > { %16119 = vmatprep.subr.bf16.mxu0 %v22661_v32 }
 0xf2d   : > { %v19807_v27 = vpop.f32.mrb[32].mxu1 }
 0xf2e   : > { %16120 = vmatpush1.bf16.msra.mxu0 %v22659_v36  ;;  %v19808_v44 = vpop.f32.mrb[33].mxu1 }
 0xf2f   : > { %v19809_v48 = vadd.f32 %v19808_v44, %v19807_v27  ;;  %v19810_v26 = vpop.f32.mrb[34].mxu1  ;;  %16121 = vmatprep.subr.bf16.mxu0 %v22664_v30  ;;  %v22685_v30 = vld [vmem:[%s30462_s21 + $0x8ec] ss:$12 sps:$4 sm:$0xff]   ;;  %v16213_v27 = vadd.f32 %v30039_v47, %v14200_v14 }
 0xf30   : > { %v19811_v25 = vpop.f32.mrb[35].mxu1 }
 0xf31   : > { %v19812_v58 = vadd.f32 %v19811_v25, %v19810_v26 }
 0xf32   : > { %16122 = vmatpush1.bf16.msra.mxu0 %v22662_v40 }
 0xf33   : > { %16123 = vmatprep.subr.bf16.mxu0 %v22667_v62  ;;  %v16216_v62 = vadd.f32 %v19806_v33, %v14200_v14 }
 0xf35   : > { %v19813_v16 = vpop.f32.mrb[36].mxu1 }
 0xf36   : > { %16124 = vmatpush1.bf16.msra.mxu0 %v22665_v22  ;;  %v19814_v60 = vpop.f32.mrb[37].mxu1  ;;  %v22683_v22 = vld [vmem:[%s30462_s21 + $0x8e8] ss:$12 sps:$4 sm:$0xff]  }
 0xf37   : > { %v19815_v43 = vadd.f32 %v19814_v60, %v19813_v16  ;;  %v19816_v12 = vpop.f32.mrb[38].mxu1  ;;  %16125 = vmatprep.subr.bf16.mxu0 %v22670_v13 }
 0xf38   : > { %v19817_v15 = vpop.f32.mrb[39].mxu1 }
 0xf39   : > { %v19818_v10 = vadd.f32 %v19817_v15, %v19816_v12  ;;  %v16224_v15 = vadd.f32 %v19812_v58, %v14200_v14 }
 0xf3a   : > { %16126 = vmatpush1.bf16.msra.mxu0 %v22668_v4  ;;  %v16221_v4 = vadd.f32 %v19809_v48, %v14200_v14 }
 0xf3b   : > { %16127 = vmatprep.subr.bf16.mxu0 %v22673_v1  ;;  %v16232_v48 = vadd.f32 %v19818_v10, %v14200_v14 }
 0xf3e   : > { %v19819_v6 = vpop.f32.mrb[40].mxu1  ;;  %16128 = vmatpush1.bf16.msra.mxu0 %v22671_v45 }
 0xf3f   : > { %v19820_v20 = vpop.f32.mrb[41].mxu1  ;;  %16129 = vmatprep.subr.bf16.mxu0 %v22676_v9 }
 0xf40   : > { %v19821_v51 = vadd.f32 %v19820_v20, %v19819_v6  ;;  %v19822_v18 = vpop.f32.mrb[42].mxu1  ;;  %v16229_v20 = vadd.f32 %v19815_v43, %v14200_v14 }
 0xf41   : > { %v19823_v53 = vpop.f32.mrb[43].mxu1 }
 0xf42   : > { %v19824_v24 = vadd.f32 %v19823_v53, %v19822_v18  ;;  %16130 = vmatpush1.bf16.msra.mxu0 %v22674_v7 }
 0xf43   : > { %16131 = vmatprep.subr.bf16.mxu0 %v22679_v56 }
 0xf44   : > { %v16240_v43 = vadd.f32 %v19824_v24, %v14200_v14 }
 0xf46   : > { %v19841_v32 = vpop.f32.mrb[44].mxu1  ;;  %16132 = vmatpush1.bf16.msra.mxu0 %v22677_v0 }
 0xf47   : > { %v19842_v36 = vpop.f32.mrb[45].mxu1  ;;  %16133 = vmatprep.subr.bf16.mxu0 %v22682_v31 }
 0xf48   : > { %v19843_v44 = vadd.f32 %v19842_v36, %v19841_v32  ;;  %v19844_v40 = vpop.f32.mrb[46].mxu1 }
 0xf49   : > { %v19845_v26 = vpop.f32.mrb[47].mxu1 }
 0xf4a   : > { %v16278_v25 = vadd.f32 %v19843_v44, %v16213_v27  ;;  %v19846_v46 = vadd.f32 %v19845_v26, %v19844_v40  ;;  %16134 = vmatpush1.bf16.msra.mxu0 %v22680_v61  ;;  %v16237_v61 = vadd.f32 %v19821_v51, %v14200_v14 }
 0xf4b   : > { %16135 = vmatprep.subr.bf16.mxu0 %v22685_v30 }
 0xf4c   : > { %v16281_v13 = vadd.f32 %v19846_v46, %v16216_v62 }
 0xf4e   : > { %v19847_v16 = vpop.f32.mrb[48].mxu1  ;;  %16136 = vmatpush1.bf16.msra.mxu0 %v22683_v22 }
 0xf4f   : > { %v19848_v60 = vpop.f32.mrb[49].mxu1 }
 0xf50   : > { %v19849_v12 = vadd.f32 %v19848_v60, %v19847_v16  ;;  %v19850_v1 = vpop.f32.mrb[50].mxu1 }
 0xf51   : > { %v19851_v47 = vpop.f32.mrb[51].mxu1  ;;  %16138 = vmatmul.mubr.bf16.vlgmr.msra.gmra.mrb[124].mxu0 %v29960_v34 }
 0xf52   : > { %v16286_v33 = vadd.f32 %v19849_v12, %v16221_v4  ;;  %v19852_v45 = vadd.f32 %v19851_v47, %v19850_v1  ;;  %16147 = vmatprep.mubr.bf16.mxu0 %v29986_v54 }
 0xf54   : > { %v16289_v9 = vadd.f32 %v19852_v45, %v16224_v15 }
 0xf56   : > { %v19853_v6 = vpop.f32.mrb[52].mxu1 }
 0xf57   : > { %v19854_v7 = vpop.f32.mrb[53].mxu1 }
 0xf58   : > { %v19855_v56 = vadd.f32 %v19854_v7, %v19853_v6  ;;  %v19856_v18 = vpop.f32.mrb[54].mxu1 }
 0xf59   : > { %v19857_v53 = vpop.f32.mrb[55].mxu1  ;;  %16148 = vmatmul.mubr.bf16.gmra.mrb[128].mxu0 %v29984_v39 }
 0xf5a   : > { %v16294_v0 = vadd.f32 %v19855_v56, %v16229_v20  ;;  %v19858_v31 = vadd.f32 %v19857_v53, %v19856_v18  ;;  %16157 = vmatprep.mubr.bf16.mxu0 %v30010_v37 }
 0xf5c   : > { %v16297_v34 = vadd.f32 %v19858_v31, %v16232_v48 }
 0xf5e   : > { %v19859_v58 = vpop.f32.mrb[56].mxu1 }
 0xf5f   : > { %v19860_v32 = vpop.f32.mrb[57].mxu1 }
 0xf60   : > { %v19861_v36 = vadd.f32 %v19860_v32, %v19859_v58  ;;  %v19862_v54 = vpop.f32.mrb[58].mxu1 }
 0xf61   : > { %v19863_v30 = vpop.f32.mrb[59].mxu1  ;;  %16158 = vmatmul.mubr.bf16.gmra.mrb[132].mxu0 %v30008_v3 }
 0xf62   : > { %v16302_v27 = vadd.f32 %v19861_v36, %v16237_v61  ;;  %v19864_v44 = vadd.f32 %v19863_v30, %v19862_v54  ;;  %16167 = vmatprep.mubr.bf16.mxu0 %v30034_v63 }
 0xf64   : > { %v16305_v39 = vadd.f32 %v19864_v44, %v16240_v43 }
 0xf66   : > { %v19881_v10 = vpop.f32.mrb[60].mxu1 }
 0xf67   : > { %v19882_v40 = vpop.f32.mrb[61].mxu1 }
 0xf68   : > { %v19883_v26 = vadd.f32 %v19882_v40, %v19881_v10  ;;  %v19884_v62 = vpop.f32.mrb[62].mxu1 }
 0xf69   : > { %v19885_v37 = vpop.f32.mrb[63].mxu1  ;;  %16168 = vmatmul.mubr.bf16.gmra.mrb[136].mxu0 %v30032_v29 }
 0xf6a   : > { %v16343_v46 = vadd.f32 %v19883_v26, %v16278_v25  ;;  %v19886_v51 = vadd.f32 %v19885_v37, %v19884_v62 }
 0xf6c   : > { %v16346_v22 = vadd.f32 %v19886_v51, %v16281_v13 }
 0xf6e   : > { %v19887_v16 = vpop.f32.mrb[64].mxu1 }
 0xf6f   : > { %v19888_v60 = vpop.f32.mrb[65].mxu1 }
 0xf70   : > { %v19889_v4 = vadd.f32 %v19888_v60, %v19887_v16  ;;  %v19890_v3 = vpop.f32.mrb[66].mxu1 }
 0xf71   : > { %v19891_v24 = vpop.f32.mrb[67].mxu1 }
 0xf72   : > { %v16351_v14 = vadd.f32 %v19889_v4, %v16286_v33  ;;  %v19892_v12 = vadd.f32 %v19891_v24, %v19890_v3 }
 0xf74   : > { %v16354_v1 = vadd.f32 %v19892_v12, %v16289_v9 }
 0xf76   : > { %v19893_v63 = vpop.f32.mrb[68].mxu1 }
 0xf77   : > { %v19894_v47 = vpop.f32.mrb[69].mxu1 }
 0xf78   : > { %v19895_v15 = vadd.f32 %v19894_v47, %v19893_v63  ;;  %v19896_v45 = vpop.f32.mrb[70].mxu1 }
 0xf79   : > { %v19897_v6 = vpop.f32.mrb[71].mxu1 }
 0xf7a   : > { %v16359_v7 = vadd.f32 %v19895_v15, %v16294_v0  ;;  %v19898_v20 = vadd.f32 %v19897_v6, %v19896_v45 }
 0xf7c   : > { %v16362_v56 = vadd.f32 %v19898_v20, %v16297_v34 }
 0xf7e   : > { %v19899_v29 = vpop.f32.mrb[72].mxu1 }
 0xf7f   : > { %v19900_v25 = vpop.f32.mrb[73].mxu1 }
 0xf80   : > { %v19901_v18 = vadd.f32 %v19900_v25, %v19899_v29  ;;  %v19902_v13 = vpop.f32.mrb[74].mxu1 }
 0xf81   : > { %v19903_v53 = vpop.f32.mrb[75].mxu1 }
 0xf82   : > { %v16367_v48 = vadd.f32 %v19901_v18, %v16302_v27  ;;  %v19904_v31 = vadd.f32 %v19903_v53, %v19902_v13 }
 0xf84   : > { %v16370_v58 = vadd.f32 %v19904_v31, %v16305_v39 }
 0xf86   : > { %v19921_v32 = vpop.f32.mrb[76].mxu1 }
 0xf87   : > { %v19922_v33 = vpop.f32.mrb[77].mxu1 }
 0xf88   : > { %v19923_v61 = vadd.f32 %v19922_v33, %v19921_v32  ;;  %v19924_v9 = vpop.f32.mrb[78].mxu1 }
 0xf89   : > { %v19925_v36 = vpop.f32.mrb[79].mxu1 }
 0xf8a   : > { %v16408_v54 = vadd.f32 %v19923_v61, %v16343_v46  ;;  %v19926_v30 = vadd.f32 %v19925_v36, %v19924_v9 }
 0xf8c   : > { %v16411_v43 = vadd.f32 %v19926_v30, %v16346_v22 }
 0xf8e   : > { %v19927_v44 = vpop.f32.mrb[80].mxu1 }
 0xf8f   : > { %v19928_v0 = vpop.f32.mrb[81].mxu1 }
 0xf90   : > { %v19929_v10 = vadd.f32 %v19928_v0, %v19927_v44  ;;  %v19930_v34 = vpop.f32.mrb[82].mxu1 }
 0xf91   : > { %v19931_v40 = vpop.f32.mrb[83].mxu1 }
 0xf92   : > { %v16416_v26 = vadd.f32 %v19929_v10, %v16351_v14  ;;  %v19932_v62 = vadd.f32 %v19931_v40, %v19930_v34 }
 0xf94   : > { %v16419_v37 = vadd.f32 %v19932_v62, %v16354_v1 }
 0xf96   : > { %v19933_v51 = vpop.f32.mrb[84].mxu1 }
 0xf97   : > { %v19934_v27 = vpop.f32.mrb[85].mxu1 }
 0xf98   : > { %v19935_v16 = vadd.f32 %v19934_v27, %v19933_v51  ;;  %v19936_v39 = vpop.f32.mrb[86].mxu1 }
 0xf99   : > { %v19937_v60 = vpop.f32.mrb[87].mxu1 }
 0xf9a   : > { %v16424_v4 = vadd.f32 %v19935_v16, %v16359_v7  ;;  %v19938_v3 = vadd.f32 %v19937_v60, %v19936_v39 }
 0xf9c   : > { %v16427_v24 = vadd.f32 %v19938_v3, %v16362_v56 }
 0xf9e   : > { %v19939_v12 = vpop.f32.mrb[88].mxu1 }
 0xf9f   : > { %v19940_v46 = vpop.f32.mrb[89].mxu1 }
 0xfa0   : > { %v19941_v63 = vadd.f32 %v19940_v46, %v19939_v12  ;;  %v19942_v22 = vpop.f32.mrb[90].mxu1 }
 0xfa1   : > { %v19943_v47 = vpop.f32.mrb[91].mxu1 }
 0xfa2   : > { %v16432_v15 = vadd.f32 %v19941_v63, %v16367_v48  ;;  %v19944_v45 = vadd.f32 %v19943_v47, %v19942_v22 }
 0xfa4   : > { %v16435_v6 = vadd.f32 %v19944_v45, %v16370_v58 }
 0xfa6   : > { %v19961_v20 = vpop.f32.mrb[92].mxu1 }
 0xfa7   : > { %v19962_v14 = vpop.f32.mrb[93].mxu1 }
 0xfa8   : > { %v19963_v29 = vadd.f32 %v19962_v14, %v19961_v20  ;;  %v19964_v1 = vpop.f32.mrb[94].mxu1 }
 0xfa9   : > { %v19965_v25 = vpop.f32.mrb[95].mxu1 }
 0xfaa   : > { %v16473_v18 = vadd.f32 %v19963_v29, %v16408_v54  ;;  %v19966_v13 = vadd.f32 %v19965_v25, %v19964_v1 }
 0xfac   : > { %v16476_v53 = vadd.f32 %v19966_v13, %v16411_v43 }
 0xfae   : > { %v19967_v31 = vpop.f32.mrb[96].mxu1 }
 0xfaf   : > { %v19968_v7 = vpop.f32.mrb[97].mxu1 }
 0xfb0   : > { %v19969_v32 = vadd.f32 %v19968_v7, %v19967_v31  ;;  %v19970_v56 = vpop.f32.mrb[98].mxu1 }
 0xfb1   : > { %v19971_v33 = vpop.f32.mrb[99].mxu1 }
 0xfb2   : > { %v16481_v61 = vadd.f32 %v19969_v32, %v16416_v26  ;;  %v19972_v9 = vadd.f32 %v19971_v33, %v19970_v56 }
 0xfb4   : > { %v16484_v36 = vadd.f32 %v19972_v9, %v16419_v37 }
 0xfb6   : > { %v19973_v30 = vpop.f32.mrb[100].mxu1 }
 0xfb7   : > { %v19974_v48 = vpop.f32.mrb[101].mxu1 }
 0xfb8   : > { %v19975_v44 = vadd.f32 %v19974_v48, %v19973_v30  ;;  %v19976_v58 = vpop.f32.mrb[102].mxu1 }
 0xfb9   : > { %v19977_v0 = vpop.f32.mrb[103].mxu1 }
 0xfba   : > { %v16489_v10 = vadd.f32 %v19975_v44, %v16424_v4  ;;  %v19978_v34 = vadd.f32 %v19977_v0, %v19976_v58 }
 0xfbc   : > { %v16492_v40 = vadd.f32 %v19978_v34, %v16427_v24  ;;  %v14196_v34 = vrot.slane %v30084_v38, %v30444_v49 }
 0xfbe   : > { %v19979_v62 = vpop.f32.mrb[104].mxu1 }
 0xfbf   : > { %v19980_v54 = vpop.f32.mrb[105].mxu1 }
 0xfc0   : > { %v19981_v43 = vadd.f32 %v19980_v54, %v19979_v62  ;;  %v19982_v51 = vpop.f32.mrb[106].mxu1 }
 0xfc1   : > { %v19983_v27 = vpop.f32.mrb[107].mxu1 }
 0xfc2   : > { %v16497_v16 = vadd.f32 %v19981_v43, %v16432_v15  ;;  %v19984_v39 = vadd.f32 %v19983_v27, %v19982_v51 }
 0xfc4   : > { %v16500_v60 = vadd.f32 %v19984_v39, %v16435_v6 }
 0xfe3   : > { %v20001_v26 = vpop.f32.mrb[108].mxu1 }
 0xfe4   : > { %v20002_v3 = vpop.f32.mrb[109].mxu1 }
 0xfe5   : > { %v20003_v37 = vadd.f32 %v20002_v3, %v20001_v26  ;;  %v20004_v12 = vpop.f32.mrb[110].mxu1 }
 0xfe6   : > { %v20005_v46 = vpop.f32.mrb[111].mxu1 }
 0xfe7   : > { %v16538_v63 = vadd.f32 %v20003_v37, %v16473_v18  ;;  %v20006_v22 = vadd.f32 %v20005_v46, %v20004_v12 }
 0xfe9   : > { %v16570_v4 = vadd.f32 %v16538_v63, %v27288_v50  ;;  %v16541_v47 = vadd.f32 %v20006_v22, %v16476_v53 }
 0xfeb   : > { %16594 = vst [vmem:[%s30114_s7 + $0x10] sm:$0xff] %v16570_v4  ;;  %v16573_v24 = vadd.f32 %v16541_v47, %v27303_v42  ;;  %v20007_v15 = vpop.f32.mrb[112].mxu1 }
 0xfec   : > { %v20008_v45 = vpop.f32.mrb[113].mxu1 }
 0xfed   : > { %16597 = vst [vmem:[%s30114_s7 + $0x28] sm:$0xff] %v16573_v24  ;;  %v20009_v6 = vadd.f32 %v20008_v45, %v20007_v15  ;;  %v20010_v20 = vpop.f32.mrb[114].mxu1 }
 0xfee   : > { %v20011_v14 = vpop.f32.mrb[115].mxu1 }
 0xfef   : > { %v16546_v29 = vadd.f32 %v20009_v6, %v16481_v61  ;;  %v20012_v50 = vadd.f32 %v20011_v14, %v20010_v20 }
 0xff1   : > { %v16576_v1 = vadd.f32 %v16546_v29, %v27309_v8  ;;  %v16549_v25 = vadd.f32 %v20012_v50, %v16484_v36  ;;  %v30468_v50 = vld [vmem:[#allocation29_spill] sm:$0xff] }
 0xff3   : > { %16600 = vst [vmem:[%s30114_s7 + $0x40] sm:$0xff] %v16576_v1  ;;  %v16579_v18 = vadd.f32 %v16549_v25, %v27315_v23  ;;  %v20013_v13 = vpop.f32.mrb[116].mxu1 }
 0xff4   : > { %v20014_v53 = vpop.f32.mrb[117].mxu1 }
 0xff5   : > { %16603 = vst [vmem:[%s30114_s7 + $0x58] sm:$0xff] %v16579_v18  ;;  %v20015_v42 = vadd.f32 %v20014_v53, %v20013_v13  ;;  %v20016_v31 = vpop.f32.mrb[118].mxu1 }
 0xff6   : > { %v20017_v7 = vpop.f32.mrb[119].mxu1 }
 0xff7   : > { %v16554_v32 = vadd.f32 %v20015_v42, %v16489_v10  ;;  %v20018_v56 = vadd.f32 %v20017_v7, %v20016_v31  ;;  %v30469_v31 = vld [vmem:[#allocation55_spill] sm:$0xff] }
 0xff9   : > { %v16582_v33 = vadd.f32 %v16554_v32, %v27711_v11  ;;  %v16557_v61 = vadd.f32 %v20018_v56, %v16492_v40 }
 0xffb   : > { %16606 = vst [vmem:[%s30114_s7 + $0x70] sm:$0xff] %v16582_v33  ;;  %v16585_v8 = vadd.f32 %v16557_v61, %v27725_v57  ;;  %v20019_v9 = vpop.f32.mrb[120].mxu1  ;;  %v14192_v57 = vrot.slane %v30084_v38, %v30443_v21  ;;  %v30470_v33 = vld [vmem:[#allocation57_spill] sm:$0xff] }
 0xffc   : > { %v20020_v36 = vpop.f32.mrb[121].mxu1 }
 0xffd   : > { %16609 = vst [vmem:[%s30114_s7 + $0x88] sm:$0xff] %v16585_v8  ;;  %v20021_v23 = vadd.f32 %v20020_v36, %v20019_v9  ;;  %v20022_v30 = vpop.f32.mrb[122].mxu1  ;;  %v30471_v9 = vld [vmem:[#allocation27_spill] sm:$0xff] }
 0xffe   : > { %v20023_v48 = vpop.f32.mrb[123].mxu1 }
 0xfff   : > { %v16562_v44 = vadd.f32 %v20021_v23, %v16497_v16  ;;  %v20024_v58 = vadd.f32 %v20023_v48, %v20022_v30  ;;  %v30473_v23 = vld [vmem:[#allocation25_spill] sm:$0xff] }
0x1001   : > { %v16588_v0 = vadd.f32 %v16562_v44, %v27773_v41  ;;  %v16565_v10 = vadd.f32 %v20024_v58, %v16500_v60 }
0x1003   : > { %16612 = vst [vmem:[%s30114_s7 + $0xa0] sm:$0xff] %v16588_v0  ;;  %v16591_v11 = vadd.f32 %v16565_v10, %v27788_v35 }
0x1005   : > { %16615 = vst [vmem:[%s30114_s7 + $0xb8] sm:$0xff] %v16591_v11 }
0x1024   : > { %v16139_v40 = vpop.f32.mrb[124].mxu0 }
0x1025   : > { %v20905_v62 = vadd.f32 %v16139_v40, %v14192_v57  ;;  %v16141_v54 = vpop.f32.mrb[125].mxu0 }
0x1026   : > { %v20906_v43 = vadd.f32 %v16141_v54, %v14196_v34  ;;  %v16143_v41 = vpop.f32.mrb[126].mxu0 }
0x1027   : > { %v16568_v51 = vadd.f32 %v20905_v62, %v27239_v17  ;;  %v20907_v27 = vadd.f32 %v16143_v41, %v14192_v57  ;;  %v16145_v16 = vpop.f32.mrb[127].mxu0 }
0x1028   : > { %v16569_v35 = vadd.f32 %v20906_v43, %v27242_v59  ;;  %v20908_v39 = vadd.f32 %v16145_v16, %v14196_v34 }
0x1029   : > { %16592 = vst [vmem:[%s30114_s7] sm:$0xff] %v16568_v51  ;;  %v16571_v21 = vadd.f32 %v20907_v27, %v27258_v55 }
0x102a   : > { %16593 = vst [vmem:[%s30114_s7 + $0x8] sm:$0xff] %v16569_v35  ;;  %v16572_v49 = vadd.f32 %v20908_v39, %v27261_v52 }
0x102b   : > { %16595 = vst [vmem:[%s30114_s7 + $0x18] sm:$0xff] %v16571_v21 }
0x102c   : > { %16596 = vst [vmem:[%s30114_s7 + $0x20] sm:$0xff] %v16572_v49  ;;  %v16149_v38 = vpop.f32.mrb[128].mxu0 }
0x102d   : > { %v20909_v60 = vadd.f32 %v16149_v38, %v14192_v57  ;;  %v16151_v17 = vpop.f32.mrb[129].mxu0 }
0x102e   : > { %v20910_v26 = vadd.f32 %v16151_v17, %v14196_v34  ;;  %v16153_v3 = vpop.f32.mrb[130].mxu0 }
0x102f   : > { %v16574_v59 = vadd.f32 %v20909_v60, %v27274_v2  ;;  %v20911_v37 = vadd.f32 %v16153_v3, %v14192_v57  ;;  %v16155_v12 = vpop.f32.mrb[131].mxu0 }
0x1030   : > { %v16575_v46 = vadd.f32 %v20910_v26, %v27277_v5  ;;  %v20912_v55 = vadd.f32 %v16155_v12, %v14196_v34  ;;  %v30465_v5 = vld [vmem:[#allocation56_spill] sm:$0xff] }
0x1031   : > { %16598 = vst [vmem:[%s30114_s7 + $0x30] sm:$0xff] %v16574_v59  ;;  %v16577_v52 = vadd.f32 %v20911_v37, %v27291_v28  ;;  %v30466_v28 = vld [vmem:[#allocation58_spill] sm:$0xff] }
0x1032   : > { %16599 = vst [vmem:[%s30114_s7 + $0x38] sm:$0xff] %v16575_v46  ;;  %v16578_v63 = vadd.f32 %v20912_v55, %v27294_v19  ;;  %v30467_v19 = vld [vmem:[#allocation31_spill] sm:$0xff] }
0x1033   : > { %16601 = vst [vmem:[%s30114_s7 + $0x48] sm:$0xff] %v16577_v52 }
0x1034   : > { %16602 = vst [vmem:[%s30114_s7 + $0x50] sm:$0xff] %v16578_v63  ;;  %v16159_v22 = vpop.f32.mrb[132].mxu0 }
0x1035   : > { %v20913_v4 = vadd.f32 %v16159_v22, %v14192_v57  ;;  %v16161_v2 = vpop.f32.mrb[133].mxu0 }
0x1036   : > { %v20914_v47 = vadd.f32 %v16161_v2, %v14196_v34  ;;  %v16163_v24 = vpop.f32.mrb[134].mxu0 }
0x1037   : > { %v16580_v15 = vadd.f32 %v20913_v4, %v30465_v5  ;;  %v20915_v45 = vadd.f32 %v16163_v24, %v14192_v57  ;;  %v16165_v6 = vpop.f32.mrb[135].mxu0 }
0x1038   : > { %v16581_v20 = vadd.f32 %v20914_v47, %v30466_v28  ;;  %v20916_v14 = vadd.f32 %v16165_v6, %v14196_v34 }
0x1039   : > { %16604 = vst [vmem:[%s30114_s7 + $0x60] sm:$0xff] %v16580_v15  ;;  %v16583_v29 = vadd.f32 %v20915_v45, %v30467_v19 }
0x103a   : > { %16605 = vst [vmem:[%s30114_s7 + $0x68] sm:$0xff] %v16581_v20  ;;  %v16584_v1 = vadd.f32 %v20916_v14, %v30468_v50 }
0x103b   : > { %16607 = vst [vmem:[%s30114_s7 + $0x78] sm:$0xff] %v16583_v29 }
0x103c   : > { %16608 = vst [vmem:[%s30114_s7 + $0x80] sm:$0xff] %v16584_v1  ;;  %v16169_v25 = vpop.f32.mrb[136].mxu0 }
0x103d   : > { %v20917_v18 = vadd.f32 %v16169_v25, %v14192_v57  ;;  %v16171_v13 = vpop.f32.mrb[137].mxu0 }
0x103e   : > { %v20918_v53 = vadd.f32 %v16171_v13, %v14196_v34  ;;  %v16173_v42 = vpop.f32.mrb[138].mxu0 }
0x103f   : > { %v16586_v7 = vadd.f32 %v20917_v18, %v30469_v31  ;;  %v20919_v32 = vadd.f32 %v16173_v42, %v14192_v57  ;;  %v16175_v56 = vpop.f32.mrb[139].mxu0 }
0x1040   : > { %v16587_v61 = vadd.f32 %v20918_v53, %v30470_v33  ;;  %v20920_v8 = vadd.f32 %v16175_v56, %v14196_v34 }
0x1041   : > { %16610 = vst [vmem:[%s30114_s7 + $0x90] sm:$0xff] %v16586_v7  ;;  %v16589_v36 = vadd.f32 %v20919_v32, %v30471_v9 }
0x1042   : > { %16611 = vst [vmem:[%s30114_s7 + $0x98] sm:$0xff] %v16587_v61  ;;  %v16590_v30 = vadd.f32 %v20920_v8, %v30473_v23 }
0x1043   : > { %16613 = vst [vmem:[%s30114_s7 + $0xa8] sm:$0xff] %v16589_v36 }
0x1044   : > { %16614 = vst [vmem:[%s30114_s7 + $0xb0] sm:$0xff] %v16590_v30 }
0x1045   : > { %23230 = shalt.err (!%p23227_p8)
}
0x1046   : > { %s23231_s7 = scalar_lea.hbm %s30168_s19, 3072  ;;  %s23235_s10 = scalar_lea.hbm %s30472_s6, 6144 }
0x1047   : > { %p23232_p10 = scmp.ne.s32.totalorder %s30168_s19, %s23231_s7  ;;  %p23236_p0 = scmp.lt.u32.totalorder %s30168_s19, %s30472_s6 }
0x1048   : > { %p23237_p6 = scmp.lt.u32.totalorder %s23235_s10, %s23231_s7  ;;  %p23239_p5 = scmp.lt.u32.totalorder %s23231_s7, %s30168_s19 }
0x1049   : > { %p23233_p11 = pnand %p23232_p10, %p30474_p9 }
0x104a   : > { %p23238_p7 = por %p23237_p6, %p23236_p0 }
0x104b   : > { %p23234_p12 = pneg %p23233_p11 }
0x104c   : > { %p23240_p4 = por %p23239_p5, %p23238_p7 }
0x104e   : > { %p23241_p13 = pnand %p23240_p4, %p23234_p12 }
0x1050   : > { %23244 = shalt.err (!%p23241_p13)
}
0x1051   : > { %s23309_s27 = smov 384   ;;  %s23310_s5 = smov 24  }
0x1052   : > { %s30475_s0 = scalar_lea.sflag [#allocation4], %s23640_s24 }
0x1053   : > { %21255 = dma.vmem_to_hbm [thread:$0]  (%p30474_p9), %s30170_s20, 3072, %s30168_s19, %s30475_s0, %s23309_s27, %s23309_s27, %s23310_s5  }
0x1054 PF: > { %s16646_s17 = sand.u32 1, %s23283_s29   ;;  %p30476_p1 = scmp.ne.s32.totalorder %s30323_s18, 0 }
0x1055   : > { %p30477_p3 = scmp.ge.s32.totalorder %s23295_s16, 2  ;;  %s16647_s7 = scalar_lea.sflag [#allocation4], %s16646_s17 }
0x1057   : > { %p21281_p2 = pnand %p30477_p3, %p30476_p1 }
0x1059   : > { %23278 = dma.done.wait (!%p21281_p2), %s16647_s7, 3072  }
0x105a   : > { %23280 = vsyncadd (!%p21281_p2), %s16647_s7, 4294964224  ;;  %p30_p8 = scmp.ge.s32.totalorder %s23567_s25, 4   ;;  %s30478_s29 = smov %s23287_s30 }
0x105b   : > { %s30479_s30 = smov %s23291_s15  ;;  %s30480_s15 = smov %s23578_s26 }
0x105c   : > { %s30481_s16 = smov %s23567_s25  ;;  %32 = sbr.rel (!%p30_p8) target bundleno = 18 (0x12), region = 160 }
0x1063   :  { %16652 = vsyncpa [#allocation3], 1 }
0x1064   :  { %16654 = vsyncpa [#allocation3 + $0x1], 1 }
0x1065   :  { %16655 = vsyncpa [#allocation6], 1 }
0x1066   :  { %16656 = vsyncpa [#allocation9], 1 }
0x1067   :  { %16657 = vsyncpa [#allocation12], 1 }
0x1068   :  { %16658 = vsyncpa [#allocation4], 1 }
0x1069   :  { %16660 = vsyncpa [#allocation4 + $0x1], 1 }

</bundles_post_ra>
